<compile_context>
chip_gen: v5e
topology: v5e:2x2
jax: 0.10.0
libtpu: 0.0.40
codegen_flags: <defaults>
</compile_context>

<pallas_src>
import functools

import jax
import jax.numpy as jnp
from jax.experimental import pallas as pl
from jax.experimental.pallas import tpu as pltpu

HIDDEN = 256       # hidden_size (matches the PyTorch script)
VOCAB = 64         # input_size (small synthetic vocabulary)
SEQ_LEN = 8        # tokens per sequence in the demo
BATCH = 16         # independent sequences in the batched demo (2 batch tiles)
BATCH_TILE = 8     # sublane-dense batch tile per grid step


def _gru_seq_kernel(seq_len, batch_tile,
                    toks_ref,     # SMEM (B_pad, S) int32 -- scalar-prefetch token ids
                    gi_tab_ref,   # VMEM (V, 3H) f32  -- emb @ W_ih^T + b_ih (folded)
                    whh_t_ref,    # VMEM (H, 3H) bf16 -- W_hh^T (gate order r, z, n)
                    bhh_ref,      # VMEM (1, 3H) f32
                    h0_ref,       # VMEM (BT, H) f32  -- initial hidden (this batch tile)
                    out_ref,      # VMEM (S, BT, H) f32 -- per-step outputs
                    hN_ref,       # VMEM (BT, H) f32  -- final hidden
                    gi_scr):      # VMEM (S*BT, 3H) f32 scratch -- pre-gathered gi rows
    H = HIDDEN
    base = pl.program_id(0) * batch_tile

    # --- Pre-gather all needed gi rows (embedding folded through W_ih) so the
    #     recurrence below only does static, dense loads on its critical path.
    for t in range(seq_len):
        for b in range(batch_tile):
            tok = jnp.clip(toks_ref[base + b, t], 0, VOCAB - 1)   # in-kernel OOB guard
            gi_scr[pl.ds(t * batch_tile + b, 1), :] = gi_tab_ref[pl.ds(tok, 1), :]

    # --- Sequential GRU recurrence, fully unrolled (seq_len is small & static).
    h = h0_ref[...]                                               # (BT, H) f32
    for t in range(seq_len):
        gi = gi_scr[pl.ds(t * batch_tile, batch_tile), :]         # (BT, 3H), static slice

        # Single MXU matmul per step: hidden projection for all three gates.
        gh = jnp.dot(h.astype(whh_t_ref.dtype), whh_t_ref[...],
                     preferred_element_type=jnp.float32) + bhh_ref[...]   # (BT, 3H) f32

        # PyTorch GRU gate math (gate order r, z, n); all elementwise in f32.
        r = jax.nn.sigmoid(gi[:, 0:H] + gh[:, 0:H])
        z = jax.nn.sigmoid(gi[:, H:2 * H] + gh[:, H:2 * H])
        n = jnp.tanh(gi[:, 2 * H:3 * H] + r * gh[:, 2 * H:3 * H])
        h = (1.0 - z) * n + z * h

        out_ref[t] = h.astype(out_ref.dtype)                      # dense (BT, H) store

    hN_ref[...] = h.astype(hN_ref.dtype)


def prepare_params(params):
    """One-time parameter prep: fold embedding through W_ih, pre-transpose W_hh."""
    gi_table = (params["embedding"] @ params["w_ih"].T
                + params["b_ih"]).astype(jnp.float32)             # (V, 3H) f32 (fold is exact)
    return {
        "gi_table": gi_table,
        "w_hh_t": params["w_hh"].T.astype(jnp.bfloat16),          # (H, 3H) bf16 MXU operand
        "b_hh": params["b_hh"].reshape(1, 3 * HIDDEN).astype(jnp.float32),
    }


def gru_encode_batch(tokens, hidden, prep):
    """Run B independent sequences through the encoder in ONE pallas_call.

    tokens : (B, S) int32 token ids
    hidden : (B, H) f32 initial hidden states
    returns (outputs, hidden_new) with outputs (S, B, H) and hidden_new (B, H)
    (PyTorch nn.GRU seq-major layout).
    """
    B, S = int(tokens.shape[0]), int(tokens.shape[1])
    B_pad = pl.cdiv(B, BATCH_TILE) * BATCH_TILE

    # Bounds check outside the kernel too (belt and braces).
    toks = jnp.clip(tokens.astype(jnp.int32), 0, VOCAB - 1)
    h0 = hidden.astype(jnp.float32)
    if B_pad != B:
        toks = jnp.zeros((B_pad, S), jnp.int32).at[:B].set(toks)
        h0 = jnp.zeros((B_pad, HIDDEN), jnp.float32).at[:B].set(h0)

    grid_spec = pltpu.PrefetchScalarGridSpec(
        num_scalar_prefetch=1,                 # token ids -> SMEM, readable in-kernel
        grid=(B_pad // BATCH_TILE,),           # batch tiles only; time loop is in-kernel
        in_specs=[
            # Constant index_maps -> weights/tables stay resident across batch tiles.
            pl.BlockSpec((VOCAB, 3 * HIDDEN), lambda bt, toks: (0, 0)),   # gi table
            pl.BlockSpec((HIDDEN, 3 * HIDDEN), lambda bt, toks: (0, 0)),  # W_hh^T
            pl.BlockSpec((1, 3 * HIDDEN), lambda bt, toks: (0, 0)),       # b_hh
            pl.BlockSpec((BATCH_TILE, HIDDEN), lambda bt, toks: (bt, 0)), # h0 tile
        ],
        out_specs=[
            pl.BlockSpec((S, BATCH_TILE, HIDDEN), lambda bt, toks: (0, bt, 0)),
            pl.BlockSpec((BATCH_TILE, HIDDEN), lambda bt, toks: (bt, 0)),
        ],
        scratch_shapes=[pltpu.VMEM((S * BATCH_TILE, 3 * HIDDEN), jnp.float32)],
    )

    outputs, hidden_new = pl.pallas_call(
        functools.partial(_gru_seq_kernel, S, BATCH_TILE),
        out_shape=(jax.ShapeDtypeStruct((S, B_pad, HIDDEN), jnp.float32),
                   jax.ShapeDtypeStruct((B_pad, HIDDEN), jnp.float32)),
        grid_spec=grid_spec,
        compiler_params=pltpu.CompilerParams(
            # Batch tiles are independent -> shard across TensorCores on v7x.
            dimension_semantics=("parallel",)),
    )(toks, prep["gi_table"], prep["w_hh_t"], prep["b_hh"], h0)

    if B_pad != B:
        outputs = outputs[:, :B, :]
        hidden_new = hidden_new[:B]
    return outputs, hidden_new


def encoder_rnn_forward(tokens, hidden, prep):
    """Module-exact sequence path: tokens (S,), hidden (1,1,H) ->
    (outputs (S,1,H), hidden (1,1,H)), i.e. nn.GRU(emb(tokens).view(S,1,H), hidden)."""
    S = int(tokens.shape[0])
    outputs, h_new = gru_encode_batch(tokens.reshape(1, S),
                                      hidden.reshape(1, HIDDEN), prep)
    return outputs, h_new.reshape(1, 1, HIDDEN)


def encoder_rnn_step(token, hidden, prep):
    """Exact EncoderRNN.forward(input, hidden): one token -> (output, hidden), both (1,1,H)."""
    outputs, h_new = encoder_rnn_forward(token.reshape(1), hidden, prep)
    return outputs.reshape(1, 1, HIDDEN), h_new


def _reference_forward(tokens, hidden, params, *, w_hh_dtype=jnp.float32):
    """Pure-JAX batched GRU reference.  w_hh_dtype=bf16 matches the kernel's
    arithmetic; w_hh_dtype=f32 is the true PyTorch f32 GRU."""
    H = HIDDEN
    gi_tab = params["embedding"] @ params["w_ih"].T + params["b_ih"]   # exact fold
    whh_t = params["w_hh"].T.astype(w_hh_dtype)
    bhh = params["b_hh"].reshape(1, 3 * H)
    h = hidden.astype(jnp.float32)
    B, S = tokens.shape
    outs = []
    for t in range(S):
        gi = gi_tab[tokens[:, t]]                                      # (B, 3H)
        gh = jnp.dot(h.astype(w_hh_dtype), whh_t,
                     preferred_element_type=jnp.float32) + bhh
        r = jax.nn.sigmoid(gi[:, 0:H] + gh[:, 0:H])
        z = jax.nn.sigmoid(gi[:, H:2 * H] + gh[:, H:2 * H])
        n = jnp.tanh(gi[:, 2 * H:] + r * gh[:, 2 * H:])
        h = (1.0 - z) * n + z * h
        outs.append(h)
    return jnp.stack(outs, axis=0), h                                  # (S,B,H), (B,H)


def init_params(key):
    """Deterministic synthetic parameters with the nn.Module's shapes (PyTorch layout)."""
    k_emb, k_wih, k_whh, k_bih, k_bhh = jax.random.split(key, 5)
    scale = 1.0 / jnp.sqrt(jnp.float32(HIDDEN))
    return {
        # nn.Embedding(input_size, hidden_size)
        "embedding": jax.random.normal(k_emb, (VOCAB, HIDDEN), jnp.float32),
        # nn.GRU(hidden_size, hidden_size): weight_ih_l0 / weight_hh_l0 are (3H, H)
        "w_ih": jax.random.uniform(k_wih, (3 * HIDDEN, HIDDEN), jnp.float32, -scale, scale),
        "w_hh": jax.random.uniform(k_whh, (3 * HIDDEN, HIDDEN), jnp.float32, -scale, scale),
        "b_ih": jax.random.uniform(k_bih, (3 * HIDDEN,), jnp.float32, -scale, scale),
        "b_hh": jax.random.uniform(k_bhh, (3 * HIDDEN,), jnp.float32, -scale, scale),
    }


if __name__ == "__main__":
    key = jax.random.PRNGKey(0)
    k_params, k_tok = jax.random.split(key, 2)
    params = init_params(k_params)
    prep = prepare_params(params)          # one-time: fold embedding, transpose, cast

    # ---- Batched throughput path: BATCH independent sequences, one pallas_call.
    tokens = jax.random.randint(k_tok, (BATCH, SEQ_LEN), 0, VOCAB, dtype=jnp.int32)
    hidden0 = jnp.zeros((BATCH, HIDDEN), dtype=jnp.float32)

    out, h_new = gru_encode_batch(tokens, hidden0, prep)
    out = jax.block_until_ready(out)
    h_new = jax.block_until_ready(h_new)
    assert out.shape == (SEQ_LEN, BATCH, HIDDEN) and h_new.shape == (BATCH, HIDDEN)

    # Same-arithmetic reference (fold + bf16 W_hh): tight tolerance.
    ref_out, ref_h = _reference_forward(tokens, hidden0, params, w_hh_dtype=jnp.bfloat16)
    assert jnp.allclose(out, ref_out, atol=1e-4), "batched output mismatch vs reference"
    assert jnp.allclose(h_new, ref_h, atol=1e-4), "batched hidden mismatch vs reference"

    # True f32 PyTorch-style GRU reference: looser tolerance (bf16 W_hh drift only).
    f32_out, f32_h = _reference_forward(tokens, hidden0, params, w_hh_dtype=jnp.float32)
    assert jnp.allclose(out, f32_out, atol=3e-2), "drift vs f32 GRU exceeds tolerance"
    assert jnp.allclose(h_new, f32_h, atol=3e-2), "hidden drift vs f32 GRU exceeds tolerance"

    # ---- Module-exact paths (batch 1; padded internally to a full sublane tile).
    h0 = jnp.zeros((1, 1, HIDDEN), dtype=jnp.float32)          # initHidden()
    seq_out, seq_h = encoder_rnn_forward(tokens[0], h0, prep)  # full sequence, B=1
    seq_out = jax.block_until_ready(seq_out)
    assert seq_out.shape == (SEQ_LEN, 1, HIDDEN) and seq_h.shape == (1, 1, HIDDEN)
    assert jnp.allclose(seq_out[:, 0, :], ref_out[:, 0, :], atol=1e-4)
    assert jnp.allclose(seq_h.reshape(HIDDEN), ref_h[0], atol=1e-4)

    # Single token step == original EncoderRNN.forward(input, hidden).
    o1, h1 = encoder_rnn_step(tokens[0, 0:1], h0, prep)
    o1 = jax.block_until_ready(o1)
    r1_out, r1_h = _reference_forward(tokens[0:1, 0:1], jnp.zeros((1, HIDDEN), jnp.float32),
                                      params, w_hh_dtype=jnp.bfloat16)
    assert jnp.allclose(o1.reshape(1, HIDDEN), r1_out[0], atol=1e-4), \
        "single-step output mismatch vs reference"
    assert jnp.allclose(h1.reshape(1, HIDDEN), r1_h, atol=1e-4), \
        "single-step hidden mismatch vs reference"
    assert jnp.allclose(o1, h1, atol=0.0), "output must equal new hidden for a GRU step"

    print("KERNEL_OK")
</pallas_src>

<mosaic_0001>
module attributes {stable_mosaic.version = 11 : i64} {
  func.func @_gru_seq_kernel(%arg0: i32, %arg1: memref<16x8xi32, #tpu.memory_space<smem>>, %arg2: memref<64x768xf32, #tpu.memory_space<vmem>>, %arg3: memref<256x768xbf16, #tpu.memory_space<vmem>>, %arg4: memref<1x768xf32, #tpu.memory_space<vmem>>, %arg5: memref<8x256xf32, #tpu.memory_space<vmem>>, %arg6: memref<8x8x256xf32, #tpu.memory_space<vmem>>, %arg7: memref<8x256xf32, #tpu.memory_space<vmem>>, %arg8: memref<64x768xf32, #tpu.memory_space<vmem>>) attributes {dimension_semantics = [#tpu.dimension_semantics<parallel>], iteration_bounds = array<i64: 2>, scalar_prefetch = 1 : i64, scratch_operands = 1 : i64, tpu.core_type = #tpu.core_type<tc>, window_params = [{pipeline_mode = #tpu.pipeline_mode<synchronous>, transform_indices = @transform_0, window_bounds = array<i64: 64, 768>}, {pipeline_mode = #tpu.pipeline_mode<synchronous>, transform_indices = @transform_1, window_bounds = array<i64: 256, 768>}, {pipeline_mode = #tpu.pipeline_mode<synchronous>, transform_indices = @transform_2, window_bounds = array<i64: 1, 768>}, {transform_indices = @transform_3, window_bounds = array<i64: 8, 256>}, {transform_indices = @transform_4, window_bounds = array<i64: 8, 8, 256>}, {transform_indices = @transform_5, window_bounds = array<i64: 8, 256>}]} {
    %c8_i32 = arith.constant 8 : i32
    %0 = arith.muli %arg0, %c8_i32 : i32
    %c0_i32 = arith.constant 0 : i32
    %1 = arith.addi %0, %c0_i32 : i32
    %2 = arith.index_cast %1 : i32 to index
    %c0 = arith.constant 0 : index
    %3 = memref.load %arg1[%2, %c0] : memref<16x8xi32, #tpu.memory_space<smem>>
    %c0_i32_0 = arith.constant 0 : i32
    %c63_i32 = arith.constant 63 : i32
    %4 = arith.maxsi %c0_i32_0, %3 : i32
    %5 = arith.minsi %c63_i32, %4 : i32
    %6 = arith.index_cast %5 : i32 to index
    %c0_1 = arith.constant 0 : index
    %7 = vector.load %arg2[%6, %c0_1] : memref<64x768xf32, #tpu.memory_space<vmem>>, vector<1x768xf32>
    %c0_2 = arith.constant 0 : index
    %c0_3 = arith.constant 0 : index
    %8 = vector.load %arg8[%c0_2, %c0_3] : memref<64x768xf32, #tpu.memory_space<vmem>>, vector<1x768xf32>
    tpu.vector_store %arg8[%c0_2, %c0_3], %7 {strides = array<i32>} : memref<64x768xf32, #tpu.memory_space<vmem>>, vector<1x768xf32>,
    %c1_i32 = arith.constant 1 : i32
    %9 = arith.addi %0, %c1_i32 : i32
    %10 = arith.index_cast %9 : i32 to index
    %c0_4 = arith.constant 0 : index
    %11 = memref.load %arg1[%10, %c0_4] : memref<16x8xi32, #tpu.memory_space<smem>>
    %c0_i32_5 = arith.constant 0 : i32
    %c63_i32_6 = arith.constant 63 : i32
    %12 = arith.maxsi %c0_i32_5, %11 : i32
    %13 = arith.minsi %c63_i32_6, %12 : i32
    %14 = arith.index_cast %13 : i32 to index
    %c0_7 = arith.constant 0 : index
    %15 = vector.load %arg2[%14, %c0_7] : memref<64x768xf32, #tpu.memory_space<vmem>>, vector<1x768xf32>
    %c1 = arith.constant 1 : index
    %c0_8 = arith.constant 0 : index
    %16 = vector.load %arg8[%c1, %c0_8] : memref<64x768xf32, #tpu.memory_space<vmem>>, vector<1x768xf32>
    tpu.vector_store %arg8[%c1, %c0_8], %15 {strides = array<i32>} : memref<64x768xf32, #tpu.memory_space<vmem>>, vector<1x768xf32>,
    %c2_i32 = arith.constant 2 : i32
    %17 = arith.addi %0, %c2_i32 : i32
    %18 = arith.index_cast %17 : i32 to index
    %c0_9 = arith.constant 0 : index
    %19 = memref.load %arg1[%18, %c0_9] : memref<16x8xi32, #tpu.memory_space<smem>>
    %c0_i32_10 = arith.constant 0 : i32
    %c63_i32_11 = arith.constant 63 : i32
    %20 = arith.maxsi %c0_i32_10, %19 : i32
    %21 = arith.minsi %c63_i32_11, %20 : i32
    %22 = arith.index_cast %21 : i32 to index
    %c0_12 = arith.constant 0 : index
    %23 = vector.load %arg2[%22, %c0_12] : memref<64x768xf32, #tpu.memory_space<vmem>>, vector<1x768xf32>
    %c2 = arith.constant 2 : index
    %c0_13 = arith.constant 0 : index
    %24 = vector.load %arg8[%c2, %c0_13] : memref<64x768xf32, #tpu.memory_space<vmem>>, vector<1x768xf32>
    tpu.vector_store %arg8[%c2, %c0_13], %23 {strides = array<i32>} : memref<64x768xf32, #tpu.memory_space<vmem>>, vector<1x768xf32>,
    %c3_i32 = arith.constant 3 : i32
    %25 = arith.addi %0, %c3_i32 : i32
    %26 = arith.index_cast %25 : i32 to index
    %c0_14 = arith.constant 0 : index
    %27 = memref.load %arg1[%26, %c0_14] : memref<16x8xi32, #tpu.memory_space<smem>>
    %c0_i32_15 = arith.constant 0 : i32
    %c63_i32_16 = arith.constant 63 : i32
    %28 = arith.maxsi %c0_i32_15, %27 : i32
    %29 = arith.minsi %c63_i32_16, %28 : i32
    %30 = arith.index_cast %29 : i32 to index
    %c0_17 = arith.constant 0 : index
    %31 = vector.load %arg2[%30, %c0_17] : memref<64x768xf32, #tpu.memory_space<vmem>>, vector<1x768xf32>
    %c3 = arith.constant 3 : index
    %c0_18 = arith.constant 0 : index
    %32 = vector.load %arg8[%c3, %c0_18] : memref<64x768xf32, #tpu.memory_space<vmem>>, vector<1x768xf32>
    tpu.vector_store %arg8[%c3, %c0_18], %31 {strides = array<i32>} : memref<64x768xf32, #tpu.memory_space<vmem>>, vector<1x768xf32>,
    %c4_i32 = arith.constant 4 : i32
    %33 = arith.addi %0, %c4_i32 : i32
    %34 = arith.index_cast %33 : i32 to index
    %c0_19 = arith.constant 0 : index
    %35 = memref.load %arg1[%34, %c0_19] : memref<16x8xi32, #tpu.memory_space<smem>>
    %c0_i32_20 = arith.constant 0 : i32
    %c63_i32_21 = arith.constant 63 : i32
    %36 = arith.maxsi %c0_i32_20, %35 : i32
    %37 = arith.minsi %c63_i32_21, %36 : i32
    %38 = arith.index_cast %37 : i32 to index
    %c0_22 = arith.constant 0 : index
    %39 = vector.load %arg2[%38, %c0_22] : memref<64x768xf32, #tpu.memory_space<vmem>>, vector<1x768xf32>
    %c4 = arith.constant 4 : index
    %c0_23 = arith.constant 0 : index
    %40 = vector.load %arg8[%c4, %c0_23] : memref<64x768xf32, #tpu.memory_space<vmem>>, vector<1x768xf32>
    tpu.vector_store %arg8[%c4, %c0_23], %39 {strides = array<i32>} : memref<64x768xf32, #tpu.memory_space<vmem>>, vector<1x768xf32>,
    %c5_i32 = arith.constant 5 : i32
    %41 = arith.addi %0, %c5_i32 : i32
    %42 = arith.index_cast %41 : i32 to index
    %c0_24 = arith.constant 0 : index
    %43 = memref.load %arg1[%42, %c0_24] : memref<16x8xi32, #tpu.memory_space<smem>>
    %c0_i32_25 = arith.constant 0 : i32
    %c63_i32_26 = arith.constant 63 : i32
    %44 = arith.maxsi %c0_i32_25, %43 : i32
    %45 = arith.minsi %c63_i32_26, %44 : i32
    %46 = arith.index_cast %45 : i32 to index
    %c0_27 = arith.constant 0 : index
    %47 = vector.load %arg2[%46, %c0_27] : memref<64x768xf32, #tpu.memory_space<vmem>>, vector<1x768xf32>
    %c5 = arith.constant 5 : index
    %c0_28 = arith.constant 0 : index
    %48 = vector.load %arg8[%c5, %c0_28] : memref<64x768xf32, #tpu.memory_space<vmem>>, vector<1x768xf32>
    tpu.vector_store %arg8[%c5, %c0_28], %47 {strides = array<i32>} : memref<64x768xf32, #tpu.memory_space<vmem>>, vector<1x768xf32>,
    %c6_i32 = arith.constant 6 : i32
    %49 = arith.addi %0, %c6_i32 : i32
    %50 = arith.index_cast %49 : i32 to index
    %c0_29 = arith.constant 0 : index
    %51 = memref.load %arg1[%50, %c0_29] : memref<16x8xi32, #tpu.memory_space<smem>>
    %c0_i32_30 = arith.constant 0 : i32
    %c63_i32_31 = arith.constant 63 : i32
    %52 = arith.maxsi %c0_i32_30, %51 : i32
    %53 = arith.minsi %c63_i32_31, %52 : i32
    %54 = arith.index_cast %53 : i32 to index
    %c0_32 = arith.constant 0 : index
    %55 = vector.load %arg2[%54, %c0_32] : memref<64x768xf32, #tpu.memory_space<vmem>>, vector<1x768xf32>
    %c6 = arith.constant 6 : index
    %c0_33 = arith.constant 0 : index
    %56 = vector.load %arg8[%c6, %c0_33] : memref<64x768xf32, #tpu.memory_space<vmem>>, vector<1x768xf32>
    tpu.vector_store %arg8[%c6, %c0_33], %55 {strides = array<i32>} : memref<64x768xf32, #tpu.memory_space<vmem>>, vector<1x768xf32>,
    %c7_i32 = arith.constant 7 : i32
    %57 = arith.addi %0, %c7_i32 : i32
    %58 = arith.index_cast %57 : i32 to index
    %c0_34 = arith.constant 0 : index
    %59 = memref.load %arg1[%58, %c0_34] : memref<16x8xi32, #tpu.memory_space<smem>>
    %c0_i32_35 = arith.constant 0 : i32
    %c63_i32_36 = arith.constant 63 : i32
    %60 = arith.maxsi %c0_i32_35, %59 : i32
    %61 = arith.minsi %c63_i32_36, %60 : i32
    %62 = arith.index_cast %61 : i32 to index
    %c0_37 = arith.constant 0 : index
    %63 = vector.load %arg2[%62, %c0_37] : memref<64x768xf32, #tpu.memory_space<vmem>>, vector<1x768xf32>
    %c7 = arith.constant 7 : index
    %c0_38 = arith.constant 0 : index
    %64 = vector.load %arg8[%c7, %c0_38] : memref<64x768xf32, #tpu.memory_space<vmem>>, vector<1x768xf32>
    tpu.vector_store %arg8[%c7, %c0_38], %63 {strides = array<i32>} : memref<64x768xf32, #tpu.memory_space<vmem>>, vector<1x768xf32>,
    %c0_i32_39 = arith.constant 0 : i32
    %65 = arith.addi %0, %c0_i32_39 : i32
    %66 = arith.index_cast %65 : i32 to index
    %c1_40 = arith.constant 1 : index
    %67 = memref.load %arg1[%66, %c1_40] : memref<16x8xi32, #tpu.memory_space<smem>>
    %c0_i32_41 = arith.constant 0 : i32
    %c63_i32_42 = arith.constant 63 : i32
    %68 = arith.maxsi %c0_i32_41, %67 : i32
    %69 = arith.minsi %c63_i32_42, %68 : i32
    %70 = arith.index_cast %69 : i32 to index
    %c0_43 = arith.constant 0 : index
    %71 = vector.load %arg2[%70, %c0_43] : memref<64x768xf32, #tpu.memory_space<vmem>>, vector<1x768xf32>
    %c8 = arith.constant 8 : index
    %c0_44 = arith.constant 0 : index
    %72 = vector.load %arg8[%c8, %c0_44] : memref<64x768xf32, #tpu.memory_space<vmem>>, vector<1x768xf32>
    tpu.vector_store %arg8[%c8, %c0_44], %71 {strides = array<i32>} : memref<64x768xf32, #tpu.memory_space<vmem>>, vector<1x768xf32>,
    %c1_i32_45 = arith.constant 1 : i32
    %73 = arith.addi %0, %c1_i32_45 : i32
    %74 = arith.index_cast %73 : i32 to index
    %c1_46 = arith.constant 1 : index
    %75 = memref.load %arg1[%74, %c1_46] : memref<16x8xi32, #tpu.memory_space<smem>>
    %c0_i32_47 = arith.constant 0 : i32
    %c63_i32_48 = arith.constant 63 : i32
    %76 = arith.maxsi %c0_i32_47, %75 : i32
    %77 = arith.minsi %c63_i32_48, %76 : i32
    %78 = arith.index_cast %77 : i32 to index
    %c0_49 = arith.constant 0 : index
    %79 = vector.load %arg2[%78, %c0_49] : memref<64x768xf32, #tpu.memory_space<vmem>>, vector<1x768xf32>
    %c9 = arith.constant 9 : index
    %c0_50 = arith.constant 0 : index
    %80 = vector.load %arg8[%c9, %c0_50] : memref<64x768xf32, #tpu.memory_space<vmem>>, vector<1x768xf32>
    tpu.vector_store %arg8[%c9, %c0_50], %79 {strides = array<i32>} : memref<64x768xf32, #tpu.memory_space<vmem>>, vector<1x768xf32>,
    %c2_i32_51 = arith.constant 2 : i32
    %81 = arith.addi %0, %c2_i32_51 : i32
    %82 = arith.index_cast %81 : i32 to index
    %c1_52 = arith.constant 1 : index
    %83 = memref.load %arg1[%82, %c1_52] : memref<16x8xi32, #tpu.memory_space<smem>>
    %c0_i32_53 = arith.constant 0 : i32
    %c63_i32_54 = arith.constant 63 : i32
    %84 = arith.maxsi %c0_i32_53, %83 : i32
    %85 = arith.minsi %c63_i32_54, %84 : i32
    %86 = arith.index_cast %85 : i32 to index
    %c0_55 = arith.constant 0 : index
    %87 = vector.load %arg2[%86, %c0_55] : memref<64x768xf32, #tpu.memory_space<vmem>>, vector<1x768xf32>
    %c10 = arith.constant 10 : index
    %c0_56 = arith.constant 0 : index
    %88 = vector.load %arg8[%c10, %c0_56] : memref<64x768xf32, #tpu.memory_space<vmem>>, vector<1x768xf32>
    tpu.vector_store %arg8[%c10, %c0_56], %87 {strides = array<i32>} : memref<64x768xf32, #tpu.memory_space<vmem>>, vector<1x768xf32>,
    %c3_i32_57 = arith.constant 3 : i32
    %89 = arith.addi %0, %c3_i32_57 : i32
    %90 = arith.index_cast %89 : i32 to index
    %c1_58 = arith.constant 1 : index
    %91 = memref.load %arg1[%90, %c1_58] : memref<16x8xi32, #tpu.memory_space<smem>>
    %c0_i32_59 = arith.constant 0 : i32
    %c63_i32_60 = arith.constant 63 : i32
    %92 = arith.maxsi %c0_i32_59, %91 : i32
    %93 = arith.minsi %c63_i32_60, %92 : i32
    %94 = arith.index_cast %93 : i32 to index
    %c0_61 = arith.constant 0 : index
    %95 = vector.load %arg2[%94, %c0_61] : memref<64x768xf32, #tpu.memory_space<vmem>>, vector<1x768xf32>
    %c11 = arith.constant 11 : index
    %c0_62 = arith.constant 0 : index
    %96 = vector.load %arg8[%c11, %c0_62] : memref<64x768xf32, #tpu.memory_space<vmem>>, vector<1x768xf32>
    tpu.vector_store %arg8[%c11, %c0_62], %95 {strides = array<i32>} : memref<64x768xf32, #tpu.memory_space<vmem>>, vector<1x768xf32>,
    %c4_i32_63 = arith.constant 4 : i32
    %97 = arith.addi %0, %c4_i32_63 : i32
    %98 = arith.index_cast %97 : i32 to index
    %c1_64 = arith.constant 1 : index
    %99 = memref.load %arg1[%98, %c1_64] : memref<16x8xi32, #tpu.memory_space<smem>>
    %c0_i32_65 = arith.constant 0 : i32
    %c63_i32_66 = arith.constant 63 : i32
    %100 = arith.maxsi %c0_i32_65, %99 : i32
    %101 = arith.minsi %c63_i32_66, %100 : i32
    %102 = arith.index_cast %101 : i32 to index
    %c0_67 = arith.constant 0 : index
    %103 = vector.load %arg2[%102, %c0_67] : memref<64x768xf32, #tpu.memory_space<vmem>>, vector<1x768xf32>
    %c12 = arith.constant 12 : index
    %c0_68 = arith.constant 0 : index
    %104 = vector.load %arg8[%c12, %c0_68] : memref<64x768xf32, #tpu.memory_space<vmem>>, vector<1x768xf32>
    tpu.vector_store %arg8[%c12, %c0_68], %103 {strides = array<i32>} : memref<64x768xf32, #tpu.memory_space<vmem>>, vector<1x768xf32>,
    %c5_i32_69 = arith.constant 5 : i32
    %105 = arith.addi %0, %c5_i32_69 : i32
    %106 = arith.index_cast %105 : i32 to index
    %c1_70 = arith.constant 1 : index
    %107 = memref.load %arg1[%106, %c1_70] : memref<16x8xi32, #tpu.memory_space<smem>>
    %c0_i32_71 = arith.constant 0 : i32
    %c63_i32_72 = arith.constant 63 : i32
    %108 = arith.maxsi %c0_i32_71, %107 : i32
    %109 = arith.minsi %c63_i32_72, %108 : i32
    %110 = arith.index_cast %109 : i32 to index
    %c0_73 = arith.constant 0 : index
    %111 = vector.load %arg2[%110, %c0_73] : memref<64x768xf32, #tpu.memory_space<vmem>>, vector<1x768xf32>
    %c13 = arith.constant 13 : index
    %c0_74 = arith.constant 0 : index
    %112 = vector.load %arg8[%c13, %c0_74] : memref<64x768xf32, #tpu.memory_space<vmem>>, vector<1x768xf32>
    tpu.vector_store %arg8[%c13, %c0_74], %111 {strides = array<i32>} : memref<64x768xf32, #tpu.memory_space<vmem>>, vector<1x768xf32>,
    %c6_i32_75 = arith.constant 6 : i32
    %113 = arith.addi %0, %c6_i32_75 : i32
    %114 = arith.index_cast %113 : i32 to index
    %c1_76 = arith.constant 1 : index
    %115 = memref.load %arg1[%114, %c1_76] : memref<16x8xi32, #tpu.memory_space<smem>>
    %c0_i32_77 = arith.constant 0 : i32
    %c63_i32_78 = arith.constant 63 : i32
    %116 = arith.maxsi %c0_i32_77, %115 : i32
    %117 = arith.minsi %c63_i32_78, %116 : i32
    %118 = arith.index_cast %117 : i32 to index
    %c0_79 = arith.constant 0 : index
    %119 = vector.load %arg2[%118, %c0_79] : memref<64x768xf32, #tpu.memory_space<vmem>>, vector<1x768xf32>
    %c14 = arith.constant 14 : index
    %c0_80 = arith.constant 0 : index
    %120 = vector.load %arg8[%c14, %c0_80] : memref<64x768xf32, #tpu.memory_space<vmem>>, vector<1x768xf32>
    tpu.vector_store %arg8[%c14, %c0_80], %119 {strides = array<i32>} : memref<64x768xf32, #tpu.memory_space<vmem>>, vector<1x768xf32>,
    %c7_i32_81 = arith.constant 7 : i32
    %121 = arith.addi %0, %c7_i32_81 : i32
    %122 = arith.index_cast %121 : i32 to index
    %c1_82 = arith.constant 1 : index
    %123 = memref.load %arg1[%122, %c1_82] : memref<16x8xi32, #tpu.memory_space<smem>>
    %c0_i32_83 = arith.constant 0 : i32
    %c63_i32_84 = arith.constant 63 : i32
    %124 = arith.maxsi %c0_i32_83, %123 : i32
    %125 = arith.minsi %c63_i32_84, %124 : i32
    %126 = arith.index_cast %125 : i32 to index
    %c0_85 = arith.constant 0 : index
    %127 = vector.load %arg2[%126, %c0_85] : memref<64x768xf32, #tpu.memory_space<vmem>>, vector<1x768xf32>
    %c15 = arith.constant 15 : index
    %c0_86 = arith.constant 0 : index
    %128 = vector.load %arg8[%c15, %c0_86] : memref<64x768xf32, #tpu.memory_space<vmem>>, vector<1x768xf32>
    tpu.vector_store %arg8[%c15, %c0_86], %127 {strides = array<i32>} : memref<64x768xf32, #tpu.memory_space<vmem>>, vector<1x768xf32>,
    %c0_i32_87 = arith.constant 0 : i32
    %129 = arith.addi %0, %c0_i32_87 : i32
    %130 = arith.index_cast %129 : i32 to index
    %c2_88 = arith.constant 2 : index
    %131 = memref.load %arg1[%130, %c2_88] : memref<16x8xi32, #tpu.memory_space<smem>>
    %c0_i32_89 = arith.constant 0 : i32
    %c63_i32_90 = arith.constant 63 : i32
    %132 = arith.maxsi %c0_i32_89, %131 : i32
    %133 = arith.minsi %c63_i32_90, %132 : i32
    %134 = arith.index_cast %133 : i32 to index
    %c0_91 = arith.constant 0 : index
    %135 = vector.load %arg2[%134, %c0_91] : memref<64x768xf32, #tpu.memory_space<vmem>>, vector<1x768xf32>
    %c16 = arith.constant 16 : index
    %c0_92 = arith.constant 0 : index
    %136 = vector.load %arg8[%c16, %c0_92] : memref<64x768xf32, #tpu.memory_space<vmem>>, vector<1x768xf32>
    tpu.vector_store %arg8[%c16, %c0_92], %135 {strides = array<i32>} : memref<64x768xf32, #tpu.memory_space<vmem>>, vector<1x768xf32>,
    %c1_i32_93 = arith.constant 1 : i32
    %137 = arith.addi %0, %c1_i32_93 : i32
    %138 = arith.index_cast %137 : i32 to index
    %c2_94 = arith.constant 2 : index
    %139 = memref.load %arg1[%138, %c2_94] : memref<16x8xi32, #tpu.memory_space<smem>>
    %c0_i32_95 = arith.constant 0 : i32
    %c63_i32_96 = arith.constant 63 : i32
    %140 = arith.maxsi %c0_i32_95, %139 : i32
    %141 = arith.minsi %c63_i32_96, %140 : i32
    %142 = arith.index_cast %141 : i32 to index
    %c0_97 = arith.constant 0 : index
    %143 = vector.load %arg2[%142, %c0_97] : memref<64x768xf32, #tpu.memory_space<vmem>>, vector<1x768xf32>
    %c17 = arith.constant 17 : index
    %c0_98 = arith.constant 0 : index
    %144 = vector.load %arg8[%c17, %c0_98] : memref<64x768xf32, #tpu.memory_space<vmem>>, vector<1x768xf32>
    tpu.vector_store %arg8[%c17, %c0_98], %143 {strides = array<i32>} : memref<64x768xf32, #tpu.memory_space<vmem>>, vector<1x768xf32>,
    %c2_i32_99 = arith.constant 2 : i32
    %145 = arith.addi %0, %c2_i32_99 : i32
    %146 = arith.index_cast %145 : i32 to index
    %c2_100 = arith.constant 2 : index
    %147 = memref.load %arg1[%146, %c2_100] : memref<16x8xi32, #tpu.memory_space<smem>>
    %c0_i32_101 = arith.constant 0 : i32
    %c63_i32_102 = arith.constant 63 : i32
    %148 = arith.maxsi %c0_i32_101, %147 : i32
    %149 = arith.minsi %c63_i32_102, %148 : i32
    %150 = arith.index_cast %149 : i32 to index
    %c0_103 = arith.constant 0 : index
    %151 = vector.load %arg2[%150, %c0_103] : memref<64x768xf32, #tpu.memory_space<vmem>>, vector<1x768xf32>
    %c18 = arith.constant 18 : index
    %c0_104 = arith.constant 0 : index
    %152 = vector.load %arg8[%c18, %c0_104] : memref<64x768xf32, #tpu.memory_space<vmem>>, vector<1x768xf32>
    tpu.vector_store %arg8[%c18, %c0_104], %151 {strides = array<i32>} : memref<64x768xf32, #tpu.memory_space<vmem>>, vector<1x768xf32>,
    %c3_i32_105 = arith.constant 3 : i32
    %153 = arith.addi %0, %c3_i32_105 : i32
    %154 = arith.index_cast %153 : i32 to index
    %c2_106 = arith.constant 2 : index
    %155 = memref.load %arg1[%154, %c2_106] : memref<16x8xi32, #tpu.memory_space<smem>>
    %c0_i32_107 = arith.constant 0 : i32
    %c63_i32_108 = arith.constant 63 : i32
    %156 = arith.maxsi %c0_i32_107, %155 : i32
    %157 = arith.minsi %c63_i32_108, %156 : i32
    %158 = arith.index_cast %157 : i32 to index
    %c0_109 = arith.constant 0 : index
    %159 = vector.load %arg2[%158, %c0_109] : memref<64x768xf32, #tpu.memory_space<vmem>>, vector<1x768xf32>
    %c19 = arith.constant 19 : index
    %c0_110 = arith.constant 0 : index
    %160 = vector.load %arg8[%c19, %c0_110] : memref<64x768xf32, #tpu.memory_space<vmem>>, vector<1x768xf32>
    tpu.vector_store %arg8[%c19, %c0_110], %159 {strides = array<i32>} : memref<64x768xf32, #tpu.memory_space<vmem>>, vector<1x768xf32>,
    %c4_i32_111 = arith.constant 4 : i32
    %161 = arith.addi %0, %c4_i32_111 : i32
    %162 = arith.index_cast %161 : i32 to index
    %c2_112 = arith.constant 2 : index
    %163 = memref.load %arg1[%162, %c2_112] : memref<16x8xi32, #tpu.memory_space<smem>>
    %c0_i32_113 = arith.constant 0 : i32
    %c63_i32_114 = arith.constant 63 : i32
    %164 = arith.maxsi %c0_i32_113, %163 : i32
    %165 = arith.minsi %c63_i32_114, %164 : i32
    %166 = arith.index_cast %165 : i32 to index
    %c0_115 = arith.constant 0 : index
    %167 = vector.load %arg2[%166, %c0_115] : memref<64x768xf32, #tpu.memory_space<vmem>>, vector<1x768xf32>
    %c20 = arith.constant 20 : index
    %c0_116 = arith.constant 0 : index
    %168 = vector.load %arg8[%c20, %c0_116] : memref<64x768xf32, #tpu.memory_space<vmem>>, vector<1x768xf32>
    tpu.vector_store %arg8[%c20, %c0_116], %167 {strides = array<i32>} : memref<64x768xf32, #tpu.memory_space<vmem>>, vector<1x768xf32>,
    %c5_i32_117 = arith.constant 5 : i32
    %169 = arith.addi %0, %c5_i32_117 : i32
    %170 = arith.index_cast %169 : i32 to index
    %c2_118 = arith.constant 2 : index
    %171 = memref.load %arg1[%170, %c2_118] : memref<16x8xi32, #tpu.memory_space<smem>>
    %c0_i32_119 = arith.constant 0 : i32
    %c63_i32_120 = arith.constant 63 : i32
    %172 = arith.maxsi %c0_i32_119, %171 : i32
    %173 = arith.minsi %c63_i32_120, %172 : i32
    %174 = arith.index_cast %173 : i32 to index
    %c0_121 = arith.constant 0 : index
    %175 = vector.load %arg2[%174, %c0_121] : memref<64x768xf32, #tpu.memory_space<vmem>>, vector<1x768xf32>
    %c21 = arith.constant 21 : index
    %c0_122 = arith.constant 0 : index
    %176 = vector.load %arg8[%c21, %c0_122] : memref<64x768xf32, #tpu.memory_space<vmem>>, vector<1x768xf32>
    tpu.vector_store %arg8[%c21, %c0_122], %175 {strides = array<i32>} : memref<64x768xf32, #tpu.memory_space<vmem>>, vector<1x768xf32>,
    %c6_i32_123 = arith.constant 6 : i32
    %177 = arith.addi %0, %c6_i32_123 : i32
    %178 = arith.index_cast %177 : i32 to index
    %c2_124 = arith.constant 2 : index
    %179 = memref.load %arg1[%178, %c2_124] : memref<16x8xi32, #tpu.memory_space<smem>>
    %c0_i32_125 = arith.constant 0 : i32
    %c63_i32_126 = arith.constant 63 : i32
    %180 = arith.maxsi %c0_i32_125, %179 : i32
    %181 = arith.minsi %c63_i32_126, %180 : i32
    %182 = arith.index_cast %181 : i32 to index
    %c0_127 = arith.constant 0 : index
    %183 = vector.load %arg2[%182, %c0_127] : memref<64x768xf32, #tpu.memory_space<vmem>>, vector<1x768xf32>
    %c22 = arith.constant 22 : index
    %c0_128 = arith.constant 0 : index
    %184 = vector.load %arg8[%c22, %c0_128] : memref<64x768xf32, #tpu.memory_space<vmem>>, vector<1x768xf32>
    tpu.vector_store %arg8[%c22, %c0_128], %183 {strides = array<i32>} : memref<64x768xf32, #tpu.memory_space<vmem>>, vector<1x768xf32>,
    %c7_i32_129 = arith.constant 7 : i32
    %185 = arith.addi %0, %c7_i32_129 : i32
    %186 = arith.index_cast %185 : i32 to index
    %c2_130 = arith.constant 2 : index
    %187 = memref.load %arg1[%186, %c2_130] : memref<16x8xi32, #tpu.memory_space<smem>>
    %c0_i32_131 = arith.constant 0 : i32
    %c63_i32_132 = arith.constant 63 : i32
    %188 = arith.maxsi %c0_i32_131, %187 : i32
    %189 = arith.minsi %c63_i32_132, %188 : i32
    %190 = arith.index_cast %189 : i32 to index
    %c0_133 = arith.constant 0 : index
    %191 = vector.load %arg2[%190, %c0_133] : memref<64x768xf32, #tpu.memory_space<vmem>>, vector<1x768xf32>
    %c23 = arith.constant 23 : index
    %c0_134 = arith.constant 0 : index
    %192 = vector.load %arg8[%c23, %c0_134] : memref<64x768xf32, #tpu.memory_space<vmem>>, vector<1x768xf32>
    tpu.vector_store %arg8[%c23, %c0_134], %191 {strides = array<i32>} : memref<64x768xf32, #tpu.memory_space<vmem>>, vector<1x768xf32>,
    %c0_i32_135 = arith.constant 0 : i32
    %193 = arith.addi %0, %c0_i32_135 : i32
    %194 = arith.index_cast %193 : i32 to index
    %c3_136 = arith.constant 3 : index
    %195 = memref.load %arg1[%194, %c3_136] : memref<16x8xi32, #tpu.memory_space<smem>>
    %c0_i32_137 = arith.constant 0 : i32
    %c63_i32_138 = arith.constant 63 : i32
    %196 = arith.maxsi %c0_i32_137, %195 : i32
    %197 = arith.minsi %c63_i32_138, %196 : i32
    %198 = arith.index_cast %197 : i32 to index
    %c0_139 = arith.constant 0 : index
    %199 = vector.load %arg2[%198, %c0_139] : memref<64x768xf32, #tpu.memory_space<vmem>>, vector<1x768xf32>
    %c24 = arith.constant 24 : index
    %c0_140 = arith.constant 0 : index
    %200 = vector.load %arg8[%c24, %c0_140] : memref<64x768xf32, #tpu.memory_space<vmem>>, vector<1x768xf32>
    tpu.vector_store %arg8[%c24, %c0_140], %199 {strides = array<i32>} : memref<64x768xf32, #tpu.memory_space<vmem>>, vector<1x768xf32>,
    %c1_i32_141 = arith.constant 1 : i32
    %201 = arith.addi %0, %c1_i32_141 : i32
    %202 = arith.index_cast %201 : i32 to index
    %c3_142 = arith.constant 3 : index
    %203 = memref.load %arg1[%202, %c3_142] : memref<16x8xi32, #tpu.memory_space<smem>>
    %c0_i32_143 = arith.constant 0 : i32
    %c63_i32_144 = arith.constant 63 : i32
    %204 = arith.maxsi %c0_i32_143, %203 : i32
    %205 = arith.minsi %c63_i32_144, %204 : i32
    %206 = arith.index_cast %205 : i32 to index
    %c0_145 = arith.constant 0 : index
    %207 = vector.load %arg2[%206, %c0_145] : memref<64x768xf32, #tpu.memory_space<vmem>>, vector<1x768xf32>
    %c25 = arith.constant 25 : index
    %c0_146 = arith.constant 0 : index
    %208 = vector.load %arg8[%c25, %c0_146] : memref<64x768xf32, #tpu.memory_space<vmem>>, vector<1x768xf32>
    tpu.vector_store %arg8[%c25, %c0_146], %207 {strides = array<i32>} : memref<64x768xf32, #tpu.memory_space<vmem>>, vector<1x768xf32>,
    %c2_i32_147 = arith.constant 2 : i32
    %209 = arith.addi %0, %c2_i32_147 : i32
    %210 = arith.index_cast %209 : i32 to index
    %c3_148 = arith.constant 3 : index
    %211 = memref.load %arg1[%210, %c3_148] : memref<16x8xi32, #tpu.memory_space<smem>>
    %c0_i32_149 = arith.constant 0 : i32
    %c63_i32_150 = arith.constant 63 : i32
    %212 = arith.maxsi %c0_i32_149, %211 : i32
    %213 = arith.minsi %c63_i32_150, %212 : i32
    %214 = arith.index_cast %213 : i32 to index
    %c0_151 = arith.constant 0 : index
    %215 = vector.load %arg2[%214, %c0_151] : memref<64x768xf32, #tpu.memory_space<vmem>>, vector<1x768xf32>
    %c26 = arith.constant 26 : index
    %c0_152 = arith.constant 0 : index
    %216 = vector.load %arg8[%c26, %c0_152] : memref<64x768xf32, #tpu.memory_space<vmem>>, vector<1x768xf32>
    tpu.vector_store %arg8[%c26, %c0_152], %215 {strides = array<i32>} : memref<64x768xf32, #tpu.memory_space<vmem>>, vector<1x768xf32>,
    %c3_i32_153 = arith.constant 3 : i32
    %217 = arith.addi %0, %c3_i32_153 : i32
    %218 = arith.index_cast %217 : i32 to index
    %c3_154 = arith.constant 3 : index
    %219 = memref.load %arg1[%218, %c3_154] : memref<16x8xi32, #tpu.memory_space<smem>>
    %c0_i32_155 = arith.constant 0 : i32
    %c63_i32_156 = arith.constant 63 : i32
    %220 = arith.maxsi %c0_i32_155, %219 : i32
    %221 = arith.minsi %c63_i32_156, %220 : i32
    %222 = arith.index_cast %221 : i32 to index
    %c0_157 = arith.constant 0 : index
    %223 = vector.load %arg2[%222, %c0_157] : memref<64x768xf32, #tpu.memory_space<vmem>>, vector<1x768xf32>
    %c27 = arith.constant 27 : index
    %c0_158 = arith.constant 0 : index
    %224 = vector.load %arg8[%c27, %c0_158] : memref<64x768xf32, #tpu.memory_space<vmem>>, vector<1x768xf32>
    tpu.vector_store %arg8[%c27, %c0_158], %223 {strides = array<i32>} : memref<64x768xf32, #tpu.memory_space<vmem>>, vector<1x768xf32>,
    %c4_i32_159 = arith.constant 4 : i32
    %225 = arith.addi %0, %c4_i32_159 : i32
    %226 = arith.index_cast %225 : i32 to index
    %c3_160 = arith.constant 3 : index
    %227 = memref.load %arg1[%226, %c3_160] : memref<16x8xi32, #tpu.memory_space<smem>>
    %c0_i32_161 = arith.constant 0 : i32
    %c63_i32_162 = arith.constant 63 : i32
    %228 = arith.maxsi %c0_i32_161, %227 : i32
    %229 = arith.minsi %c63_i32_162, %228 : i32
    %230 = arith.index_cast %229 : i32 to index
    %c0_163 = arith.constant 0 : index
    %231 = vector.load %arg2[%230, %c0_163] : memref<64x768xf32, #tpu.memory_space<vmem>>, vector<1x768xf32>
    %c28 = arith.constant 28 : index
    %c0_164 = arith.constant 0 : index
    %232 = vector.load %arg8[%c28, %c0_164] : memref<64x768xf32, #tpu.memory_space<vmem>>, vector<1x768xf32>
    tpu.vector_store %arg8[%c28, %c0_164], %231 {strides = array<i32>} : memref<64x768xf32, #tpu.memory_space<vmem>>, vector<1x768xf32>,
    %c5_i32_165 = arith.constant 5 : i32
    %233 = arith.addi %0, %c5_i32_165 : i32
    %234 = arith.index_cast %233 : i32 to index
    %c3_166 = arith.constant 3 : index
    %235 = memref.load %arg1[%234, %c3_166] : memref<16x8xi32, #tpu.memory_space<smem>>
    %c0_i32_167 = arith.constant 0 : i32
    %c63_i32_168 = arith.constant 63 : i32
    %236 = arith.maxsi %c0_i32_167, %235 : i32
    %237 = arith.minsi %c63_i32_168, %236 : i32
    %238 = arith.index_cast %237 : i32 to index
    %c0_169 = arith.constant 0 : index
    %239 = vector.load %arg2[%238, %c0_169] : memref<64x768xf32, #tpu.memory_space<vmem>>, vector<1x768xf32>
    %c29 = arith.constant 29 : index
    %c0_170 = arith.constant 0 : index
    %240 = vector.load %arg8[%c29, %c0_170] : memref<64x768xf32, #tpu.memory_space<vmem>>, vector<1x768xf32>
    tpu.vector_store %arg8[%c29, %c0_170], %239 {strides = array<i32>} : memref<64x768xf32, #tpu.memory_space<vmem>>, vector<1x768xf32>,
    %c6_i32_171 = arith.constant 6 : i32
    %241 = arith.addi %0, %c6_i32_171 : i32
    %242 = arith.index_cast %241 : i32 to index
    %c3_172 = arith.constant 3 : index
    %243 = memref.load %arg1[%242, %c3_172] : memref<16x8xi32, #tpu.memory_space<smem>>
    %c0_i32_173 = arith.constant 0 : i32
    %c63_i32_174 = arith.constant 63 : i32
    %244 = arith.maxsi %c0_i32_173, %243 : i32
    %245 = arith.minsi %c63_i32_174, %244 : i32
    %246 = arith.index_cast %245 : i32 to index
    %c0_175 = arith.constant 0 : index
    %247 = vector.load %arg2[%246, %c0_175] : memref<64x768xf32, #tpu.memory_space<vmem>>, vector<1x768xf32>
    %c30 = arith.constant 30 : index
    %c0_176 = arith.constant 0 : index
    %248 = vector.load %arg8[%c30, %c0_176] : memref<64x768xf32, #tpu.memory_space<vmem>>, vector<1x768xf32>
    tpu.vector_store %arg8[%c30, %c0_176], %247 {strides = array<i32>} : memref<64x768xf32, #tpu.memory_space<vmem>>, vector<1x768xf32>,
    %c7_i32_177 = arith.constant 7 : i32
    %249 = arith.addi %0, %c7_i32_177 : i32
    %250 = arith.index_cast %249 : i32 to index
    %c3_178 = arith.constant 3 : index
    %251 = memref.load %arg1[%250, %c3_178] : memref<16x8xi32, #tpu.memory_space<smem>>
    %c0_i32_179 = arith.constant 0 : i32
    %c63_i32_180 = arith.constant 63 : i32
    %252 = arith.maxsi %c0_i32_179, %251 : i32
    %253 = arith.minsi %c63_i32_180, %252 : i32
    %254 = arith.index_cast %253 : i32 to index
    %c0_181 = arith.constant 0 : index
    %255 = vector.load %arg2[%254, %c0_181] : memref<64x768xf32, #tpu.memory_space<vmem>>, vector<1x768xf32>
    %c31 = arith.constant 31 : index
    %c0_182 = arith.constant 0 : index
    %256 = vector.load %arg8[%c31, %c0_182] : memref<64x768xf32, #tpu.memory_space<vmem>>, vector<1x768xf32>
    tpu.vector_store %arg8[%c31, %c0_182], %255 {strides = array<i32>} : memref<64x768xf32, #tpu.memory_space<vmem>>, vector<1x768xf32>,
    %c0_i32_183 = arith.constant 0 : i32
    %257 = arith.addi %0, %c0_i32_183 : i32
    %258 = arith.index_cast %257 : i32 to index
    %c4_184 = arith.constant 4 : index
    %259 = memref.load %arg1[%258, %c4_184] : memref<16x8xi32, #tpu.memory_space<smem>>
    %c0_i32_185 = arith.constant 0 : i32
    %c63_i32_186 = arith.constant 63 : i32
    %260 = arith.maxsi %c0_i32_185, %259 : i32
    %261 = arith.minsi %c63_i32_186, %260 : i32
    %262 = arith.index_cast %261 : i32 to index
    %c0_187 = arith.constant 0 : index
    %263 = vector.load %arg2[%262, %c0_187] : memref<64x768xf32, #tpu.memory_space<vmem>>, vector<1x768xf32>
    %c32 = arith.constant 32 : index
    %c0_188 = arith.constant 0 : index
    %264 = vector.load %arg8[%c32, %c0_188] : memref<64x768xf32, #tpu.memory_space<vmem>>, vector<1x768xf32>
    tpu.vector_store %arg8[%c32, %c0_188], %263 {strides = array<i32>} : memref<64x768xf32, #tpu.memory_space<vmem>>, vector<1x768xf32>,
    %c1_i32_189 = arith.constant 1 : i32
    %265 = arith.addi %0, %c1_i32_189 : i32
    %266 = arith.index_cast %265 : i32 to index
    %c4_190 = arith.constant 4 : index
    %267 = memref.load %arg1[%266, %c4_190] : memref<16x8xi32, #tpu.memory_space<smem>>
    %c0_i32_191 = arith.constant 0 : i32
    %c63_i32_192 = arith.constant 63 : i32
    %268 = arith.maxsi %c0_i32_191, %267 : i32
    %269 = arith.minsi %c63_i32_192, %268 : i32
    %270 = arith.index_cast %269 : i32 to index
    %c0_193 = arith.constant 0 : index
    %271 = vector.load %arg2[%270, %c0_193] : memref<64x768xf32, #tpu.memory_space<vmem>>, vector<1x768xf32>
    %c33 = arith.constant 33 : index
    %c0_194 = arith.constant 0 : index
    %272 = vector.load %arg8[%c33, %c0_194] : memref<64x768xf32, #tpu.memory_space<vmem>>, vector<1x768xf32>
    tpu.vector_store %arg8[%c33, %c0_194], %271 {strides = array<i32>} : memref<64x768xf32, #tpu.memory_space<vmem>>, vector<1x768xf32>,
    %c2_i32_195 = arith.constant 2 : i32
    %273 = arith.addi %0, %c2_i32_195 : i32
    %274 = arith.index_cast %273 : i32 to index
    %c4_196 = arith.constant 4 : index
    %275 = memref.load %arg1[%274, %c4_196] : memref<16x8xi32, #tpu.memory_space<smem>>
    %c0_i32_197 = arith.constant 0 : i32
    %c63_i32_198 = arith.constant 63 : i32
    %276 = arith.maxsi %c0_i32_197, %275 : i32
    %277 = arith.minsi %c63_i32_198, %276 : i32
    %278 = arith.index_cast %277 : i32 to index
    %c0_199 = arith.constant 0 : index
    %279 = vector.load %arg2[%278, %c0_199] : memref<64x768xf32, #tpu.memory_space<vmem>>, vector<1x768xf32>
    %c34 = arith.constant 34 : index
    %c0_200 = arith.constant 0 : index
    %280 = vector.load %arg8[%c34, %c0_200] : memref<64x768xf32, #tpu.memory_space<vmem>>, vector<1x768xf32>
    tpu.vector_store %arg8[%c34, %c0_200], %279 {strides = array<i32>} : memref<64x768xf32, #tpu.memory_space<vmem>>, vector<1x768xf32>,
    %c3_i32_201 = arith.constant 3 : i32
    %281 = arith.addi %0, %c3_i32_201 : i32
    %282 = arith.index_cast %281 : i32 to index
    %c4_202 = arith.constant 4 : index
    %283 = memref.load %arg1[%282, %c4_202] : memref<16x8xi32, #tpu.memory_space<smem>>
    %c0_i32_203 = arith.constant 0 : i32
    %c63_i32_204 = arith.constant 63 : i32
    %284 = arith.maxsi %c0_i32_203, %283 : i32
    %285 = arith.minsi %c63_i32_204, %284 : i32
    %286 = arith.index_cast %285 : i32 to index
    %c0_205 = arith.constant 0 : index
    %287 = vector.load %arg2[%286, %c0_205] : memref<64x768xf32, #tpu.memory_space<vmem>>, vector<1x768xf32>
    %c35 = arith.constant 35 : index
    %c0_206 = arith.constant 0 : index
    %288 = vector.load %arg8[%c35, %c0_206] : memref<64x768xf32, #tpu.memory_space<vmem>>, vector<1x768xf32>
    tpu.vector_store %arg8[%c35, %c0_206], %287 {strides = array<i32>} : memref<64x768xf32, #tpu.memory_space<vmem>>, vector<1x768xf32>,
    %c4_i32_207 = arith.constant 4 : i32
    %289 = arith.addi %0, %c4_i32_207 : i32
    %290 = arith.index_cast %289 : i32 to index
    %c4_208 = arith.constant 4 : index
    %291 = memref.load %arg1[%290, %c4_208] : memref<16x8xi32, #tpu.memory_space<smem>>
    %c0_i32_209 = arith.constant 0 : i32
    %c63_i32_210 = arith.constant 63 : i32
    %292 = arith.maxsi %c0_i32_209, %291 : i32
    %293 = arith.minsi %c63_i32_210, %292 : i32
    %294 = arith.index_cast %293 : i32 to index
    %c0_211 = arith.constant 0 : index
    %295 = vector.load %arg2[%294, %c0_211] : memref<64x768xf32, #tpu.memory_space<vmem>>, vector<1x768xf32>
    %c36 = arith.constant 36 : index
    %c0_212 = arith.constant 0 : index
    %296 = vector.load %arg8[%c36, %c0_212] : memref<64x768xf32, #tpu.memory_space<vmem>>, vector<1x768xf32>
    tpu.vector_store %arg8[%c36, %c0_212], %295 {strides = array<i32>} : memref<64x768xf32, #tpu.memory_space<vmem>>, vector<1x768xf32>,
    %c5_i32_213 = arith.constant 5 : i32
    %297 = arith.addi %0, %c5_i32_213 : i32
    %298 = arith.index_cast %297 : i32 to index
    %c4_214 = arith.constant 4 : index
    %299 = memref.load %arg1[%298, %c4_214] : memref<16x8xi32, #tpu.memory_space<smem>>
    %c0_i32_215 = arith.constant 0 : i32
    %c63_i32_216 = arith.constant 63 : i32
    %300 = arith.maxsi %c0_i32_215, %299 : i32
    %301 = arith.minsi %c63_i32_216, %300 : i32
    %302 = arith.index_cast %301 : i32 to index
    %c0_217 = arith.constant 0 : index
    %303 = vector.load %arg2[%302, %c0_217] : memref<64x768xf32, #tpu.memory_space<vmem>>, vector<1x768xf32>
    %c37 = arith.constant 37 : index
    %c0_218 = arith.constant 0 : index
    %304 = vector.load %arg8[%c37, %c0_218] : memref<64x768xf32, #tpu.memory_space<vmem>>, vector<1x768xf32>
    tpu.vector_store %arg8[%c37, %c0_218], %303 {strides = array<i32>} : memref<64x768xf32, #tpu.memory_space<vmem>>, vector<1x768xf32>,
    %c6_i32_219 = arith.constant 6 : i32
    %305 = arith.addi %0, %c6_i32_219 : i32
    %306 = arith.index_cast %305 : i32 to index
    %c4_220 = arith.constant 4 : index
    %307 = memref.load %arg1[%306, %c4_220] : memref<16x8xi32, #tpu.memory_space<smem>>
    %c0_i32_221 = arith.constant 0 : i32
    %c63_i32_222 = arith.constant 63 : i32
    %308 = arith.maxsi %c0_i32_221, %307 : i32
    %309 = arith.minsi %c63_i32_222, %308 : i32
    %310 = arith.index_cast %309 : i32 to index
    %c0_223 = arith.constant 0 : index
    %311 = vector.load %arg2[%310, %c0_223] : memref<64x768xf32, #tpu.memory_space<vmem>>, vector<1x768xf32>
    %c38 = arith.constant 38 : index
    %c0_224 = arith.constant 0 : index
    %312 = vector.load %arg8[%c38, %c0_224] : memref<64x768xf32, #tpu.memory_space<vmem>>, vector<1x768xf32>
    tpu.vector_store %arg8[%c38, %c0_224], %311 {strides = array<i32>} : memref<64x768xf32, #tpu.memory_space<vmem>>, vector<1x768xf32>,
    %c7_i32_225 = arith.constant 7 : i32
    %313 = arith.addi %0, %c7_i32_225 : i32
    %314 = arith.index_cast %313 : i32 to index
    %c4_226 = arith.constant 4 : index
    %315 = memref.load %arg1[%314, %c4_226] : memref<16x8xi32, #tpu.memory_space<smem>>
    %c0_i32_227 = arith.constant 0 : i32
    %c63_i32_228 = arith.constant 63 : i32
    %316 = arith.maxsi %c0_i32_227, %315 : i32
    %317 = arith.minsi %c63_i32_228, %316 : i32
    %318 = arith.index_cast %317 : i32 to index
    %c0_229 = arith.constant 0 : index
    %319 = vector.load %arg2[%318, %c0_229] : memref<64x768xf32, #tpu.memory_space<vmem>>, vector<1x768xf32>
    %c39 = arith.constant 39 : index
    %c0_230 = arith.constant 0 : index
    %320 = vector.load %arg8[%c39, %c0_230] : memref<64x768xf32, #tpu.memory_space<vmem>>, vector<1x768xf32>
    tpu.vector_store %arg8[%c39, %c0_230], %319 {strides = array<i32>} : memref<64x768xf32, #tpu.memory_space<vmem>>, vector<1x768xf32>,
    %c0_i32_231 = arith.constant 0 : i32
    %321 = arith.addi %0, %c0_i32_231 : i32
    %322 = arith.index_cast %321 : i32 to index
    %c5_232 = arith.constant 5 : index
    %323 = memref.load %arg1[%322, %c5_232] : memref<16x8xi32, #tpu.memory_space<smem>>
    %c0_i32_233 = arith.constant 0 : i32
    %c63_i32_234 = arith.constant 63 : i32
    %324 = arith.maxsi %c0_i32_233, %323 : i32
    %325 = arith.minsi %c63_i32_234, %324 : i32
    %326 = arith.index_cast %325 : i32 to index
    %c0_235 = arith.constant 0 : index
    %327 = vector.load %arg2[%326, %c0_235] : memref<64x768xf32, #tpu.memory_space<vmem>>, vector<1x768xf32>
    %c40 = arith.constant 40 : index
    %c0_236 = arith.constant 0 : index
    %328 = vector.load %arg8[%c40, %c0_236] : memref<64x768xf32, #tpu.memory_space<vmem>>, vector<1x768xf32>
    tpu.vector_store %arg8[%c40, %c0_236], %327 {strides = array<i32>} : memref<64x768xf32, #tpu.memory_space<vmem>>, vector<1x768xf32>,
    %c1_i32_237 = arith.constant 1 : i32
    %329 = arith.addi %0, %c1_i32_237 : i32
    %330 = arith.index_cast %329 : i32 to index
    %c5_238 = arith.constant 5 : index
    %331 = memref.load %arg1[%330, %c5_238] : memref<16x8xi32, #tpu.memory_space<smem>>
    %c0_i32_239 = arith.constant 0 : i32
    %c63_i32_240 = arith.constant 63 : i32
    %332 = arith.maxsi %c0_i32_239, %331 : i32
    %333 = arith.minsi %c63_i32_240, %332 : i32
    %334 = arith.index_cast %333 : i32 to index
    %c0_241 = arith.constant 0 : index
    %335 = vector.load %arg2[%334, %c0_241] : memref<64x768xf32, #tpu.memory_space<vmem>>, vector<1x768xf32>
    %c41 = arith.constant 41 : index
    %c0_242 = arith.constant 0 : index
    %336 = vector.load %arg8[%c41, %c0_242] : memref<64x768xf32, #tpu.memory_space<vmem>>, vector<1x768xf32>
    tpu.vector_store %arg8[%c41, %c0_242], %335 {strides = array<i32>} : memref<64x768xf32, #tpu.memory_space<vmem>>, vector<1x768xf32>,
    %c2_i32_243 = arith.constant 2 : i32
    %337 = arith.addi %0, %c2_i32_243 : i32
    %338 = arith.index_cast %337 : i32 to index
    %c5_244 = arith.constant 5 : index
    %339 = memref.load %arg1[%338, %c5_244] : memref<16x8xi32, #tpu.memory_space<smem>>
    %c0_i32_245 = arith.constant 0 : i32
    %c63_i32_246 = arith.constant 63 : i32
    %340 = arith.maxsi %c0_i32_245, %339 : i32
    %341 = arith.minsi %c63_i32_246, %340 : i32
    %342 = arith.index_cast %341 : i32 to index
    %c0_247 = arith.constant 0 : index
    %343 = vector.load %arg2[%342, %c0_247] : memref<64x768xf32, #tpu.memory_space<vmem>>, vector<1x768xf32>
    %c42 = arith.constant 42 : index
    %c0_248 = arith.constant 0 : index
    %344 = vector.load %arg8[%c42, %c0_248] : memref<64x768xf32, #tpu.memory_space<vmem>>, vector<1x768xf32>
    tpu.vector_store %arg8[%c42, %c0_248], %343 {strides = array<i32>} : memref<64x768xf32, #tpu.memory_space<vmem>>, vector<1x768xf32>,
    %c3_i32_249 = arith.constant 3 : i32
    %345 = arith.addi %0, %c3_i32_249 : i32
    %346 = arith.index_cast %345 : i32 to index
    %c5_250 = arith.constant 5 : index
    %347 = memref.load %arg1[%346, %c5_250] : memref<16x8xi32, #tpu.memory_space<smem>>
    %c0_i32_251 = arith.constant 0 : i32
    %c63_i32_252 = arith.constant 63 : i32
    %348 = arith.maxsi %c0_i32_251, %347 : i32
    %349 = arith.minsi %c63_i32_252, %348 : i32
    %350 = arith.index_cast %349 : i32 to index
    %c0_253 = arith.constant 0 : index
    %351 = vector.load %arg2[%350, %c0_253] : memref<64x768xf32, #tpu.memory_space<vmem>>, vector<1x768xf32>
    %c43 = arith.constant 43 : index
    %c0_254 = arith.constant 0 : index
    %352 = vector.load %arg8[%c43, %c0_254] : memref<64x768xf32, #tpu.memory_space<vmem>>, vector<1x768xf32>
    tpu.vector_store %arg8[%c43, %c0_254], %351 {strides = array<i32>} : memref<64x768xf32, #tpu.memory_space<vmem>>, vector<1x768xf32>,
    %c4_i32_255 = arith.constant 4 : i32
    %353 = arith.addi %0, %c4_i32_255 : i32
    %354 = arith.index_cast %353 : i32 to index
    %c5_256 = arith.constant 5 : index
    %355 = memref.load %arg1[%354, %c5_256] : memref<16x8xi32, #tpu.memory_space<smem>>
    %c0_i32_257 = arith.constant 0 : i32
    %c63_i32_258 = arith.constant 63 : i32
    %356 = arith.maxsi %c0_i32_257, %355 : i32
    %357 = arith.minsi %c63_i32_258, %356 : i32
    %358 = arith.index_cast %357 : i32 to index
    %c0_259 = arith.constant 0 : index
    %359 = vector.load %arg2[%358, %c0_259] : memref<64x768xf32, #tpu.memory_space<vmem>>, vector<1x768xf32>
    %c44 = arith.constant 44 : index
    %c0_260 = arith.constant 0 : index
    %360 = vector.load %arg8[%c44, %c0_260] : memref<64x768xf32, #tpu.memory_space<vmem>>, vector<1x768xf32>
    tpu.vector_store %arg8[%c44, %c0_260], %359 {strides = array<i32>} : memref<64x768xf32, #tpu.memory_space<vmem>>, vector<1x768xf32>,
    %c5_i32_261 = arith.constant 5 : i32
    %361 = arith.addi %0, %c5_i32_261 : i32
    %362 = arith.index_cast %361 : i32 to index
    %c5_262 = arith.constant 5 : index
    %363 = memref.load %arg1[%362, %c5_262] : memref<16x8xi32, #tpu.memory_space<smem>>
    %c0_i32_263 = arith.constant 0 : i32
    %c63_i32_264 = arith.constant 63 : i32
    %364 = arith.maxsi %c0_i32_263, %363 : i32
    %365 = arith.minsi %c63_i32_264, %364 : i32
    %366 = arith.index_cast %365 : i32 to index
    %c0_265 = arith.constant 0 : index
    %367 = vector.load %arg2[%366, %c0_265] : memref<64x768xf32, #tpu.memory_space<vmem>>, vector<1x768xf32>
    %c45 = arith.constant 45 : index
    %c0_266 = arith.constant 0 : index
    %368 = vector.load %arg8[%c45, %c0_266] : memref<64x768xf32, #tpu.memory_space<vmem>>, vector<1x768xf32>
    tpu.vector_store %arg8[%c45, %c0_266], %367 {strides = array<i32>} : memref<64x768xf32, #tpu.memory_space<vmem>>, vector<1x768xf32>,
    %c6_i32_267 = arith.constant 6 : i32
    %369 = arith.addi %0, %c6_i32_267 : i32
    %370 = arith.index_cast %369 : i32 to index
    %c5_268 = arith.constant 5 : index
    %371 = memref.load %arg1[%370, %c5_268] : memref<16x8xi32, #tpu.memory_space<smem>>
    %c0_i32_269 = arith.constant 0 : i32
    %c63_i32_270 = arith.constant 63 : i32
    %372 = arith.maxsi %c0_i32_269, %371 : i32
    %373 = arith.minsi %c63_i32_270, %372 : i32
    %374 = arith.index_cast %373 : i32 to index
    %c0_271 = arith.constant 0 : index
    %375 = vector.load %arg2[%374, %c0_271] : memref<64x768xf32, #tpu.memory_space<vmem>>, vector<1x768xf32>
    %c46 = arith.constant 46 : index
    %c0_272 = arith.constant 0 : index
    %376 = vector.load %arg8[%c46, %c0_272] : memref<64x768xf32, #tpu.memory_space<vmem>>, vector<1x768xf32>
    tpu.vector_store %arg8[%c46, %c0_272], %375 {strides = array<i32>} : memref<64x768xf32, #tpu.memory_space<vmem>>, vector<1x768xf32>,
    %c7_i32_273 = arith.constant 7 : i32
    %377 = arith.addi %0, %c7_i32_273 : i32
    %378 = arith.index_cast %377 : i32 to index
    %c5_274 = arith.constant 5 : index
    %379 = memref.load %arg1[%378, %c5_274] : memref<16x8xi32, #tpu.memory_space<smem>>
    %c0_i32_275 = arith.constant 0 : i32
    %c63_i32_276 = arith.constant 63 : i32
    %380 = arith.maxsi %c0_i32_275, %379 : i32
    %381 = arith.minsi %c63_i32_276, %380 : i32
    %382 = arith.index_cast %381 : i32 to index
    %c0_277 = arith.constant 0 : index
    %383 = vector.load %arg2[%382, %c0_277] : memref<64x768xf32, #tpu.memory_space<vmem>>, vector<1x768xf32>
    %c47 = arith.constant 47 : index
    %c0_278 = arith.constant 0 : index
    %384 = vector.load %arg8[%c47, %c0_278] : memref<64x768xf32, #tpu.memory_space<vmem>>, vector<1x768xf32>
    tpu.vector_store %arg8[%c47, %c0_278], %383 {strides = array<i32>} : memref<64x768xf32, #tpu.memory_space<vmem>>, vector<1x768xf32>,
    %c0_i32_279 = arith.constant 0 : i32
    %385 = arith.addi %0, %c0_i32_279 : i32
    %386 = arith.index_cast %385 : i32 to index
    %c6_280 = arith.constant 6 : index
    %387 = memref.load %arg1[%386, %c6_280] : memref<16x8xi32, #tpu.memory_space<smem>>
    %c0_i32_281 = arith.constant 0 : i32
    %c63_i32_282 = arith.constant 63 : i32
    %388 = arith.maxsi %c0_i32_281, %387 : i32
    %389 = arith.minsi %c63_i32_282, %388 : i32
    %390 = arith.index_cast %389 : i32 to index
    %c0_283 = arith.constant 0 : index
    %391 = vector.load %arg2[%390, %c0_283] : memref<64x768xf32, #tpu.memory_space<vmem>>, vector<1x768xf32>
    %c48 = arith.constant 48 : index
    %c0_284 = arith.constant 0 : index
    %392 = vector.load %arg8[%c48, %c0_284] : memref<64x768xf32, #tpu.memory_space<vmem>>, vector<1x768xf32>
    tpu.vector_store %arg8[%c48, %c0_284], %391 {strides = array<i32>} : memref<64x768xf32, #tpu.memory_space<vmem>>, vector<1x768xf32>,
    %c1_i32_285 = arith.constant 1 : i32
    %393 = arith.addi %0, %c1_i32_285 : i32
    %394 = arith.index_cast %393 : i32 to index
    %c6_286 = arith.constant 6 : index
    %395 = memref.load %arg1[%394, %c6_286] : memref<16x8xi32, #tpu.memory_space<smem>>
    %c0_i32_287 = arith.constant 0 : i32
    %c63_i32_288 = arith.constant 63 : i32
    %396 = arith.maxsi %c0_i32_287, %395 : i32
    %397 = arith.minsi %c63_i32_288, %396 : i32
    %398 = arith.index_cast %397 : i32 to index
    %c0_289 = arith.constant 0 : index
    %399 = vector.load %arg2[%398, %c0_289] : memref<64x768xf32, #tpu.memory_space<vmem>>, vector<1x768xf32>
    %c49 = arith.constant 49 : index
    %c0_290 = arith.constant 0 : index
    %400 = vector.load %arg8[%c49, %c0_290] : memref<64x768xf32, #tpu.memory_space<vmem>>, vector<1x768xf32>
    tpu.vector_store %arg8[%c49, %c0_290], %399 {strides = array<i32>} : memref<64x768xf32, #tpu.memory_space<vmem>>, vector<1x768xf32>,
    %c2_i32_291 = arith.constant 2 : i32
    %401 = arith.addi %0, %c2_i32_291 : i32
    %402 = arith.index_cast %401 : i32 to index
    %c6_292 = arith.constant 6 : index
    %403 = memref.load %arg1[%402, %c6_292] : memref<16x8xi32, #tpu.memory_space<smem>>
    %c0_i32_293 = arith.constant 0 : i32
    %c63_i32_294 = arith.constant 63 : i32
    %404 = arith.maxsi %c0_i32_293, %403 : i32
    %405 = arith.minsi %c63_i32_294, %404 : i32
    %406 = arith.index_cast %405 : i32 to index
    %c0_295 = arith.constant 0 : index
    %407 = vector.load %arg2[%406, %c0_295] : memref<64x768xf32, #tpu.memory_space<vmem>>, vector<1x768xf32>
    %c50 = arith.constant 50 : index
    %c0_296 = arith.constant 0 : index
    %408 = vector.load %arg8[%c50, %c0_296] : memref<64x768xf32, #tpu.memory_space<vmem>>, vector<1x768xf32>
    tpu.vector_store %arg8[%c50, %c0_296], %407 {strides = array<i32>} : memref<64x768xf32, #tpu.memory_space<vmem>>, vector<1x768xf32>,
    %c3_i32_297 = arith.constant 3 : i32
    %409 = arith.addi %0, %c3_i32_297 : i32
    %410 = arith.index_cast %409 : i32 to index
    %c6_298 = arith.constant 6 : index
    %411 = memref.load %arg1[%410, %c6_298] : memref<16x8xi32, #tpu.memory_space<smem>>
    %c0_i32_299 = arith.constant 0 : i32
    %c63_i32_300 = arith.constant 63 : i32
    %412 = arith.maxsi %c0_i32_299, %411 : i32
    %413 = arith.minsi %c63_i32_300, %412 : i32
    %414 = arith.index_cast %413 : i32 to index
    %c0_301 = arith.constant 0 : index
    %415 = vector.load %arg2[%414, %c0_301] : memref<64x768xf32, #tpu.memory_space<vmem>>, vector<1x768xf32>
    %c51 = arith.constant 51 : index
    %c0_302 = arith.constant 0 : index
    %416 = vector.load %arg8[%c51, %c0_302] : memref<64x768xf32, #tpu.memory_space<vmem>>, vector<1x768xf32>
    tpu.vector_store %arg8[%c51, %c0_302], %415 {strides = array<i32>} : memref<64x768xf32, #tpu.memory_space<vmem>>, vector<1x768xf32>,
    %c4_i32_303 = arith.constant 4 : i32
    %417 = arith.addi %0, %c4_i32_303 : i32
    %418 = arith.index_cast %417 : i32 to index
    %c6_304 = arith.constant 6 : index
    %419 = memref.load %arg1[%418, %c6_304] : memref<16x8xi32, #tpu.memory_space<smem>>
    %c0_i32_305 = arith.constant 0 : i32
    %c63_i32_306 = arith.constant 63 : i32
    %420 = arith.maxsi %c0_i32_305, %419 : i32
    %421 = arith.minsi %c63_i32_306, %420 : i32
    %422 = arith.index_cast %421 : i32 to index
    %c0_307 = arith.constant 0 : index
    %423 = vector.load %arg2[%422, %c0_307] : memref<64x768xf32, #tpu.memory_space<vmem>>, vector<1x768xf32>
    %c52 = arith.constant 52 : index
    %c0_308 = arith.constant 0 : index
    %424 = vector.load %arg8[%c52, %c0_308] : memref<64x768xf32, #tpu.memory_space<vmem>>, vector<1x768xf32>
    tpu.vector_store %arg8[%c52, %c0_308], %423 {strides = array<i32>} : memref<64x768xf32, #tpu.memory_space<vmem>>, vector<1x768xf32>,
    %c5_i32_309 = arith.constant 5 : i32
    %425 = arith.addi %0, %c5_i32_309 : i32
    %426 = arith.index_cast %425 : i32 to index
    %c6_310 = arith.constant 6 : index
    %427 = memref.load %arg1[%426, %c6_310] : memref<16x8xi32, #tpu.memory_space<smem>>
    %c0_i32_311 = arith.constant 0 : i32
    %c63_i32_312 = arith.constant 63 : i32
    %428 = arith.maxsi %c0_i32_311, %427 : i32
    %429 = arith.minsi %c63_i32_312, %428 : i32
    %430 = arith.index_cast %429 : i32 to index
    %c0_313 = arith.constant 0 : index
    %431 = vector.load %arg2[%430, %c0_313] : memref<64x768xf32, #tpu.memory_space<vmem>>, vector<1x768xf32>
    %c53 = arith.constant 53 : index
    %c0_314 = arith.constant 0 : index
    %432 = vector.load %arg8[%c53, %c0_314] : memref<64x768xf32, #tpu.memory_space<vmem>>, vector<1x768xf32>
    tpu.vector_store %arg8[%c53, %c0_314], %431 {strides = array<i32>} : memref<64x768xf32, #tpu.memory_space<vmem>>, vector<1x768xf32>,
    %c6_i32_315 = arith.constant 6 : i32
    %433 = arith.addi %0, %c6_i32_315 : i32
    %434 = arith.index_cast %433 : i32 to index
    %c6_316 = arith.constant 6 : index
    %435 = memref.load %arg1[%434, %c6_316] : memref<16x8xi32, #tpu.memory_space<smem>>
    %c0_i32_317 = arith.constant 0 : i32
    %c63_i32_318 = arith.constant 63 : i32
    %436 = arith.maxsi %c0_i32_317, %435 : i32
    %437 = arith.minsi %c63_i32_318, %436 : i32
    %438 = arith.index_cast %437 : i32 to index
    %c0_319 = arith.constant 0 : index
    %439 = vector.load %arg2[%438, %c0_319] : memref<64x768xf32, #tpu.memory_space<vmem>>, vector<1x768xf32>
    %c54 = arith.constant 54 : index
    %c0_320 = arith.constant 0 : index
    %440 = vector.load %arg8[%c54, %c0_320] : memref<64x768xf32, #tpu.memory_space<vmem>>, vector<1x768xf32>
    tpu.vector_store %arg8[%c54, %c0_320], %439 {strides = array<i32>} : memref<64x768xf32, #tpu.memory_space<vmem>>, vector<1x768xf32>,
    %c7_i32_321 = arith.constant 7 : i32
    %441 = arith.addi %0, %c7_i32_321 : i32
    %442 = arith.index_cast %441 : i32 to index
    %c6_322 = arith.constant 6 : index
    %443 = memref.load %arg1[%442, %c6_322] : memref<16x8xi32, #tpu.memory_space<smem>>
    %c0_i32_323 = arith.constant 0 : i32
    %c63_i32_324 = arith.constant 63 : i32
    %444 = arith.maxsi %c0_i32_323, %443 : i32
    %445 = arith.minsi %c63_i32_324, %444 : i32
    %446 = arith.index_cast %445 : i32 to index
    %c0_325 = arith.constant 0 : index
    %447 = vector.load %arg2[%446, %c0_325] : memref<64x768xf32, #tpu.memory_space<vmem>>, vector<1x768xf32>
    %c55 = arith.constant 55 : index
    %c0_326 = arith.constant 0 : index
    %448 = vector.load %arg8[%c55, %c0_326] : memref<64x768xf32, #tpu.memory_space<vmem>>, vector<1x768xf32>
    tpu.vector_store %arg8[%c55, %c0_326], %447 {strides = array<i32>} : memref<64x768xf32, #tpu.memory_space<vmem>>, vector<1x768xf32>,
    %c0_i32_327 = arith.constant 0 : i32
    %449 = arith.addi %0, %c0_i32_327 : i32
    %450 = arith.index_cast %449 : i32 to index
    %c7_328 = arith.constant 7 : index
    %451 = memref.load %arg1[%450, %c7_328] : memref<16x8xi32, #tpu.memory_space<smem>>
    %c0_i32_329 = arith.constant 0 : i32
    %c63_i32_330 = arith.constant 63 : i32
    %452 = arith.maxsi %c0_i32_329, %451 : i32
    %453 = arith.minsi %c63_i32_330, %452 : i32
    %454 = arith.index_cast %453 : i32 to index
    %c0_331 = arith.constant 0 : index
    %455 = vector.load %arg2[%454, %c0_331] : memref<64x768xf32, #tpu.memory_space<vmem>>, vector<1x768xf32>
    %c56 = arith.constant 56 : index
    %c0_332 = arith.constant 0 : index
    %456 = vector.load %arg8[%c56, %c0_332] : memref<64x768xf32, #tpu.memory_space<vmem>>, vector<1x768xf32>
    tpu.vector_store %arg8[%c56, %c0_332], %455 {strides = array<i32>} : memref<64x768xf32, #tpu.memory_space<vmem>>, vector<1x768xf32>,
    %c1_i32_333 = arith.constant 1 : i32
    %457 = arith.addi %0, %c1_i32_333 : i32
    %458 = arith.index_cast %457 : i32 to index
    %c7_334 = arith.constant 7 : index
    %459 = memref.load %arg1[%458, %c7_334] : memref<16x8xi32, #tpu.memory_space<smem>>
    %c0_i32_335 = arith.constant 0 : i32
    %c63_i32_336 = arith.constant 63 : i32
    %460 = arith.maxsi %c0_i32_335, %459 : i32
    %461 = arith.minsi %c63_i32_336, %460 : i32
    %462 = arith.index_cast %461 : i32 to index
    %c0_337 = arith.constant 0 : index
    %463 = vector.load %arg2[%462, %c0_337] : memref<64x768xf32, #tpu.memory_space<vmem>>, vector<1x768xf32>
    %c57 = arith.constant 57 : index
    %c0_338 = arith.constant 0 : index
    %464 = vector.load %arg8[%c57, %c0_338] : memref<64x768xf32, #tpu.memory_space<vmem>>, vector<1x768xf32>
    tpu.vector_store %arg8[%c57, %c0_338], %463 {strides = array<i32>} : memref<64x768xf32, #tpu.memory_space<vmem>>, vector<1x768xf32>,
    %c2_i32_339 = arith.constant 2 : i32
    %465 = arith.addi %0, %c2_i32_339 : i32
    %466 = arith.index_cast %465 : i32 to index
    %c7_340 = arith.constant 7 : index
    %467 = memref.load %arg1[%466, %c7_340] : memref<16x8xi32, #tpu.memory_space<smem>>
    %c0_i32_341 = arith.constant 0 : i32
    %c63_i32_342 = arith.constant 63 : i32
    %468 = arith.maxsi %c0_i32_341, %467 : i32
    %469 = arith.minsi %c63_i32_342, %468 : i32
    %470 = arith.index_cast %469 : i32 to index
    %c0_343 = arith.constant 0 : index
    %471 = vector.load %arg2[%470, %c0_343] : memref<64x768xf32, #tpu.memory_space<vmem>>, vector<1x768xf32>
    %c58 = arith.constant 58 : index
    %c0_344 = arith.constant 0 : index
    %472 = vector.load %arg8[%c58, %c0_344] : memref<64x768xf32, #tpu.memory_space<vmem>>, vector<1x768xf32>
    tpu.vector_store %arg8[%c58, %c0_344], %471 {strides = array<i32>} : memref<64x768xf32, #tpu.memory_space<vmem>>, vector<1x768xf32>,
    %c3_i32_345 = arith.constant 3 : i32
    %473 = arith.addi %0, %c3_i32_345 : i32
    %474 = arith.index_cast %473 : i32 to index
    %c7_346 = arith.constant 7 : index
    %475 = memref.load %arg1[%474, %c7_346] : memref<16x8xi32, #tpu.memory_space<smem>>
    %c0_i32_347 = arith.constant 0 : i32
    %c63_i32_348 = arith.constant 63 : i32
    %476 = arith.maxsi %c0_i32_347, %475 : i32
    %477 = arith.minsi %c63_i32_348, %476 : i32
    %478 = arith.index_cast %477 : i32 to index
    %c0_349 = arith.constant 0 : index
    %479 = vector.load %arg2[%478, %c0_349] : memref<64x768xf32, #tpu.memory_space<vmem>>, vector<1x768xf32>
    %c59 = arith.constant 59 : index
    %c0_350 = arith.constant 0 : index
    %480 = vector.load %arg8[%c59, %c0_350] : memref<64x768xf32, #tpu.memory_space<vmem>>, vector<1x768xf32>
    tpu.vector_store %arg8[%c59, %c0_350], %479 {strides = array<i32>} : memref<64x768xf32, #tpu.memory_space<vmem>>, vector<1x768xf32>,
    %c4_i32_351 = arith.constant 4 : i32
    %481 = arith.addi %0, %c4_i32_351 : i32
    %482 = arith.index_cast %481 : i32 to index
    %c7_352 = arith.constant 7 : index
    %483 = memref.load %arg1[%482, %c7_352] : memref<16x8xi32, #tpu.memory_space<smem>>
    %c0_i32_353 = arith.constant 0 : i32
    %c63_i32_354 = arith.constant 63 : i32
    %484 = arith.maxsi %c0_i32_353, %483 : i32
    %485 = arith.minsi %c63_i32_354, %484 : i32
    %486 = arith.index_cast %485 : i32 to index
    %c0_355 = arith.constant 0 : index
    %487 = vector.load %arg2[%486, %c0_355] : memref<64x768xf32, #tpu.memory_space<vmem>>, vector<1x768xf32>
    %c60 = arith.constant 60 : index
    %c0_356 = arith.constant 0 : index
    %488 = vector.load %arg8[%c60, %c0_356] : memref<64x768xf32, #tpu.memory_space<vmem>>, vector<1x768xf32>
    tpu.vector_store %arg8[%c60, %c0_356], %487 {strides = array<i32>} : memref<64x768xf32, #tpu.memory_space<vmem>>, vector<1x768xf32>,
    %c5_i32_357 = arith.constant 5 : i32
    %489 = arith.addi %0, %c5_i32_357 : i32
    %490 = arith.index_cast %489 : i32 to index
    %c7_358 = arith.constant 7 : index
    %491 = memref.load %arg1[%490, %c7_358] : memref<16x8xi32, #tpu.memory_space<smem>>
    %c0_i32_359 = arith.constant 0 : i32
    %c63_i32_360 = arith.constant 63 : i32
    %492 = arith.maxsi %c0_i32_359, %491 : i32
    %493 = arith.minsi %c63_i32_360, %492 : i32
    %494 = arith.index_cast %493 : i32 to index
    %c0_361 = arith.constant 0 : index
    %495 = vector.load %arg2[%494, %c0_361] : memref<64x768xf32, #tpu.memory_space<vmem>>, vector<1x768xf32>
    %c61 = arith.constant 61 : index
    %c0_362 = arith.constant 0 : index
    %496 = vector.load %arg8[%c61, %c0_362] : memref<64x768xf32, #tpu.memory_space<vmem>>, vector<1x768xf32>
    tpu.vector_store %arg8[%c61, %c0_362], %495 {strides = array<i32>} : memref<64x768xf32, #tpu.memory_space<vmem>>, vector<1x768xf32>,
    %c6_i32_363 = arith.constant 6 : i32
    %497 = arith.addi %0, %c6_i32_363 : i32
    %498 = arith.index_cast %497 : i32 to index
    %c7_364 = arith.constant 7 : index
    %499 = memref.load %arg1[%498, %c7_364] : memref<16x8xi32, #tpu.memory_space<smem>>
    %c0_i32_365 = arith.constant 0 : i32
    %c63_i32_366 = arith.constant 63 : i32
    %500 = arith.maxsi %c0_i32_365, %499 : i32
    %501 = arith.minsi %c63_i32_366, %500 : i32
    %502 = arith.index_cast %501 : i32 to index
    %c0_367 = arith.constant 0 : index
    %503 = vector.load %arg2[%502, %c0_367] : memref<64x768xf32, #tpu.memory_space<vmem>>, vector<1x768xf32>
    %c62 = arith.constant 62 : index
    %c0_368 = arith.constant 0 : index
    %504 = vector.load %arg8[%c62, %c0_368] : memref<64x768xf32, #tpu.memory_space<vmem>>, vector<1x768xf32>
    tpu.vector_store %arg8[%c62, %c0_368], %503 {strides = array<i32>} : memref<64x768xf32, #tpu.memory_space<vmem>>, vector<1x768xf32>,
    %c7_i32_369 = arith.constant 7 : i32
    %505 = arith.addi %0, %c7_i32_369 : i32
    %506 = arith.index_cast %505 : i32 to index
    %c7_370 = arith.constant 7 : index
    %507 = memref.load %arg1[%506, %c7_370] : memref<16x8xi32, #tpu.memory_space<smem>>
    %c0_i32_371 = arith.constant 0 : i32
    %c63_i32_372 = arith.constant 63 : i32
    %508 = arith.maxsi %c0_i32_371, %507 : i32
    %509 = arith.minsi %c63_i32_372, %508 : i32
    %510 = arith.index_cast %509 : i32 to index
    %c0_373 = arith.constant 0 : index
    %511 = vector.load %arg2[%510, %c0_373] : memref<64x768xf32, #tpu.memory_space<vmem>>, vector<1x768xf32>
    %c63 = arith.constant 63 : index
    %c0_374 = arith.constant 0 : index
    %512 = vector.load %arg8[%c63, %c0_374] : memref<64x768xf32, #tpu.memory_space<vmem>>, vector<1x768xf32>
    tpu.vector_store %arg8[%c63, %c0_374], %511 {strides = array<i32>} : memref<64x768xf32, #tpu.memory_space<vmem>>, vector<1x768xf32>,
    %c0_375 = arith.constant 0 : index
    %c0_376 = arith.constant 0 : index
    %513 = vector.load %arg5[%c0_375, %c0_376] : memref<8x256xf32, #tpu.memory_space<vmem>>, vector<8x256xf32>
    %c0_377 = arith.constant 0 : index
    %c0_378 = arith.constant 0 : index
    %514 = vector.load %arg8[%c0_377, %c0_378] : memref<64x768xf32, #tpu.memory_space<vmem>>, vector<8x768xf32>
    %515 = arith.truncf %513 : vector<8x256xf32> to vector<8x256xbf16>
    %c0_379 = arith.constant 0 : index
    %c0_380 = arith.constant 0 : index
    %516 = vector.load %arg3[%c0_379, %c0_380] : memref<256x768xbf16, #tpu.memory_space<vmem>>, vector<256x768xbf16>
    %cst = arith.constant dense<0.000000e+00> : vector<8x768xf32>
    %517 = tpu.matmul %515, %516, %cst {dimension_numbers = #tpu.dot_dimension_numbers<[1], [0], [0], [1], [0, 0, 1, 1], [], []>} : vector<8x256xbf16>, vector<256x768xbf16>, vector<8x768xf32> -> vector<8x768xf32>
    %c0_381 = arith.constant 0 : index
    %c0_382 = arith.constant 0 : index
    %518 = vector.load %arg4[%c0_381, %c0_382] : memref<1x768xf32, #tpu.memory_space<vmem>>, vector<1x768xf32>
    %519 = vector.broadcast %518 : vector<1x768xf32> to vector<8x768xf32>
    %520 = arith.addf %517, %519 : vector<8x768xf32>
    %521 = vector.extract_strided_slice %514 {offsets = [0, 0], sizes = [8, 256], strides = [1, 1]} : vector<8x768xf32> to vector<8x256xf32>
    %522 = vector.extract_strided_slice %520 {offsets = [0, 0], sizes = [8, 256], strides = [1, 1]} : vector<8x768xf32> to vector<8x256xf32>
    %523 = arith.addf %521, %522 : vector<8x256xf32>
    %524 = arith.negf %523 : vector<8x256xf32>
    %525 = math.exp %524 : vector<8x256xf32>
    %cst_383 = arith.constant 1.000000e+00 : f32
    %526 = vector.broadcast %cst_383 : f32 to vector<8x256xf32>
    %527 = arith.addf %526, %525 : vector<8x256xf32>
    %528 = arith.divf %526, %527 : vector<8x256xf32>
    %529 = vector.extract_strided_slice %514 {offsets = [0, 256], sizes = [8, 256], strides = [1, 1]} : vector<8x768xf32> to vector<8x256xf32>
    %530 = vector.extract_strided_slice %520 {offsets = [0, 256], sizes = [8, 256], strides = [1, 1]} : vector<8x768xf32> to vector<8x256xf32>
    %531 = arith.addf %529, %530 : vector<8x256xf32>
    %532 = arith.negf %531 : vector<8x256xf32>
    %533 = math.exp %532 : vector<8x256xf32>
    %cst_384 = arith.constant 1.000000e+00 : f32
    %534 = vector.broadcast %cst_384 : f32 to vector<8x256xf32>
    %535 = arith.addf %534, %533 : vector<8x256xf32>
    %536 = arith.divf %534, %535 : vector<8x256xf32>
    %537 = vector.extract_strided_slice %514 {offsets = [0, 512], sizes = [8, 256], strides = [1, 1]} : vector<8x768xf32> to vector<8x256xf32>
    %538 = vector.extract_strided_slice %520 {offsets = [0, 512], sizes = [8, 256], strides = [1, 1]} : vector<8x768xf32> to vector<8x256xf32>
    %539 = arith.mulf %528, %538 : vector<8x256xf32>
    %540 = arith.addf %537, %539 : vector<8x256xf32>
    %541 = math.tanh %540 : vector<8x256xf32>
    %cst_385 = arith.constant 1.000000e+00 : f32
    %542 = vector.broadcast %cst_385 : f32 to vector<8x256xf32>
    %543 = arith.subf %542, %536 : vector<8x256xf32>
    %544 = arith.mulf %543, %541 : vector<8x256xf32>
    %545 = arith.mulf %536, %513 : vector<8x256xf32>
    %546 = arith.addf %544, %545 : vector<8x256xf32>
    %c0_386 = arith.constant 0 : index
    %c0_387 = arith.constant 0 : index
    %c0_388 = arith.constant 0 : index
    %547 = vector.load %arg6[%c0_386, %c0_387, %c0_388] : memref<8x8x256xf32, #tpu.memory_space<vmem>>, vector<1x8x256xf32>
    %548 = vector.shape_cast %547 : vector<1x8x256xf32> to vector<8x256xf32>
    %549 = vector.shape_cast %546 : vector<8x256xf32> to vector<1x8x256xf32>
    tpu.vector_store %arg6[%c0_386, %c0_387, %c0_388], %549 {strides = array<i32>} : memref<8x8x256xf32, #tpu.memory_space<vmem>>, vector<1x8x256xf32>,
    %c8_389 = arith.constant 8 : index
    %c0_390 = arith.constant 0 : index
    %550 = vector.load %arg8[%c8_389, %c0_390] : memref<64x768xf32, #tpu.memory_space<vmem>>, vector<8x768xf32>
    %551 = arith.truncf %546 : vector<8x256xf32> to vector<8x256xbf16>
    %c0_391 = arith.constant 0 : index
    %c0_392 = arith.constant 0 : index
    %552 = vector.load %arg3[%c0_391, %c0_392] : memref<256x768xbf16, #tpu.memory_space<vmem>>, vector<256x768xbf16>
    %cst_393 = arith.constant dense<0.000000e+00> : vector<8x768xf32>
    %553 = tpu.matmul %551, %552, %cst_393 {dimension_numbers = #tpu.dot_dimension_numbers<[1], [0], [0], [1], [0, 0, 1, 1], [], []>} : vector<8x256xbf16>, vector<256x768xbf16>, vector<8x768xf32> -> vector<8x768xf32>
    %c0_394 = arith.constant 0 : index
    %c0_395 = arith.constant 0 : index
    %554 = vector.load %arg4[%c0_394, %c0_395] : memref<1x768xf32, #tpu.memory_space<vmem>>, vector<1x768xf32>
    %555 = vector.broadcast %554 : vector<1x768xf32> to vector<8x768xf32>
    %556 = arith.addf %553, %555 : vector<8x768xf32>
    %557 = vector.extract_strided_slice %550 {offsets = [0, 0], sizes = [8, 256], strides = [1, 1]} : vector<8x768xf32> to vector<8x256xf32>
    %558 = vector.extract_strided_slice %556 {offsets = [0, 0], sizes = [8, 256], strides = [1, 1]} : vector<8x768xf32> to vector<8x256xf32>
    %559 = arith.addf %557, %558 : vector<8x256xf32>
    %560 = arith.negf %559 : vector<8x256xf32>
    %561 = math.exp %560 : vector<8x256xf32>
    %cst_396 = arith.constant 1.000000e+00 : f32
    %562 = vector.broadcast %cst_396 : f32 to vector<8x256xf32>
    %563 = arith.addf %562, %561 : vector<8x256xf32>
    %564 = arith.divf %562, %563 : vector<8x256xf32>
    %565 = vector.extract_strided_slice %550 {offsets = [0, 256], sizes = [8, 256], strides = [1, 1]} : vector<8x768xf32> to vector<8x256xf32>
    %566 = vector.extract_strided_slice %556 {offsets = [0, 256], sizes = [8, 256], strides = [1, 1]} : vector<8x768xf32> to vector<8x256xf32>
    %567 = arith.addf %565, %566 : vector<8x256xf32>
    %568 = arith.negf %567 : vector<8x256xf32>
    %569 = math.exp %568 : vector<8x256xf32>
    %cst_397 = arith.constant 1.000000e+00 : f32
    %570 = vector.broadcast %cst_397 : f32 to vector<8x256xf32>
    %571 = arith.addf %570, %569 : vector<8x256xf32>
    %572 = arith.divf %570, %571 : vector<8x256xf32>
    %573 = vector.extract_strided_slice %550 {offsets = [0, 512], sizes = [8, 256], strides = [1, 1]} : vector<8x768xf32> to vector<8x256xf32>
    %574 = vector.extract_strided_slice %556 {offsets = [0, 512], sizes = [8, 256], strides = [1, 1]} : vector<8x768xf32> to vector<8x256xf32>
    %575 = arith.mulf %564, %574 : vector<8x256xf32>
    %576 = arith.addf %573, %575 : vector<8x256xf32>
    %577 = math.tanh %576 : vector<8x256xf32>
    %cst_398 = arith.constant 1.000000e+00 : f32
    %578 = vector.broadcast %cst_398 : f32 to vector<8x256xf32>
    %579 = arith.subf %578, %572 : vector<8x256xf32>
    %580 = arith.mulf %579, %577 : vector<8x256xf32>
    %581 = arith.mulf %572, %546 : vector<8x256xf32>
    %582 = arith.addf %580, %581 : vector<8x256xf32>
    %c1_399 = arith.constant 1 : index
    %c0_400 = arith.constant 0 : index
    %c0_401 = arith.constant 0 : index
    %583 = vector.load %arg6[%c1_399, %c0_400, %c0_401] : memref<8x8x256xf32, #tpu.memory_space<vmem>>, vector<1x8x256xf32>
    %584 = vector.shape_cast %583 : vector<1x8x256xf32> to vector<8x256xf32>
    %585 = vector.shape_cast %582 : vector<8x256xf32> to vector<1x8x256xf32>
    tpu.vector_store %arg6[%c1_399, %c0_400, %c0_401], %585 {strides = array<i32>} : memref<8x8x256xf32, #tpu.memory_space<vmem>>, vector<1x8x256xf32>,
    %c16_402 = arith.constant 16 : index
    %c0_403 = arith.constant 0 : index
    %586 = vector.load %arg8[%c16_402, %c0_403] : memref<64x768xf32, #tpu.memory_space<vmem>>, vector<8x768xf32>
    %587 = arith.truncf %582 : vector<8x256xf32> to vector<8x256xbf16>
    %c0_404 = arith.constant 0 : index
    %c0_405 = arith.constant 0 : index
    %588 = vector.load %arg3[%c0_404, %c0_405] : memref<256x768xbf16, #tpu.memory_space<vmem>>, vector<256x768xbf16>
    %cst_406 = arith.constant dense<0.000000e+00> : vector<8x768xf32>
    %589 = tpu.matmul %587, %588, %cst_406 {dimension_numbers = #tpu.dot_dimension_numbers<[1], [0], [0], [1], [0, 0, 1, 1], [], []>} : vector<8x256xbf16>, vector<256x768xbf16>, vector<8x768xf32> -> vector<8x768xf32>
    %c0_407 = arith.constant 0 : index
    %c0_408 = arith.constant 0 : index
    %590 = vector.load %arg4[%c0_407, %c0_408] : memref<1x768xf32, #tpu.memory_space<vmem>>, vector<1x768xf32>
    %591 = vector.broadcast %590 : vector<1x768xf32> to vector<8x768xf32>
    %592 = arith.addf %589, %591 : vector<8x768xf32>
    %593 = vector.extract_strided_slice %586 {offsets = [0, 0], sizes = [8, 256], strides = [1, 1]} : vector<8x768xf32> to vector<8x256xf32>
    %594 = vector.extract_strided_slice %592 {offsets = [0, 0], sizes = [8, 256], strides = [1, 1]} : vector<8x768xf32> to vector<8x256xf32>
    %595 = arith.addf %593, %594 : vector<8x256xf32>
    %596 = arith.negf %595 : vector<8x256xf32>
    %597 = math.exp %596 : vector<8x256xf32>
    %cst_409 = arith.constant 1.000000e+00 : f32
    %598 = vector.broadcast %cst_409 : f32 to vector<8x256xf32>
    %599 = arith.addf %598, %597 : vector<8x256xf32>
    %600 = arith.divf %598, %599 : vector<8x256xf32>
    %601 = vector.extract_strided_slice %586 {offsets = [0, 256], sizes = [8, 256], strides = [1, 1]} : vector<8x768xf32> to vector<8x256xf32>
    %602 = vector.extract_strided_slice %592 {offsets = [0, 256], sizes = [8, 256], strides = [1, 1]} : vector<8x768xf32> to vector<8x256xf32>
    %603 = arith.addf %601, %602 : vector<8x256xf32>
    %604 = arith.negf %603 : vector<8x256xf32>
    %605 = math.exp %604 : vector<8x256xf32>
    %cst_410 = arith.constant 1.000000e+00 : f32
    %606 = vector.broadcast %cst_410 : f32 to vector<8x256xf32>
    %607 = arith.addf %606, %605 : vector<8x256xf32>
    %608 = arith.divf %606, %607 : vector<8x256xf32>
    %609 = vector.extract_strided_slice %586 {offsets = [0, 512], sizes = [8, 256], strides = [1, 1]} : vector<8x768xf32> to vector<8x256xf32>
    %610 = vector.extract_strided_slice %592 {offsets = [0, 512], sizes = [8, 256], strides = [1, 1]} : vector<8x768xf32> to vector<8x256xf32>
    %611 = arith.mulf %600, %610 : vector<8x256xf32>
    %612 = arith.addf %609, %611 : vector<8x256xf32>
    %613 = math.tanh %612 : vector<8x256xf32>
    %cst_411 = arith.constant 1.000000e+00 : f32
    %614 = vector.broadcast %cst_411 : f32 to vector<8x256xf32>
    %615 = arith.subf %614, %608 : vector<8x256xf32>
    %616 = arith.mulf %615, %613 : vector<8x256xf32>
    %617 = arith.mulf %608, %582 : vector<8x256xf32>
    %618 = arith.addf %616, %617 : vector<8x256xf32>
    %c2_412 = arith.constant 2 : index
    %c0_413 = arith.constant 0 : index
    %c0_414 = arith.constant 0 : index
    %619 = vector.load %arg6[%c2_412, %c0_413, %c0_414] : memref<8x8x256xf32, #tpu.memory_space<vmem>>, vector<1x8x256xf32>
    %620 = vector.shape_cast %619 : vector<1x8x256xf32> to vector<8x256xf32>
    %621 = vector.shape_cast %618 : vector<8x256xf32> to vector<1x8x256xf32>
    tpu.vector_store %arg6[%c2_412, %c0_413, %c0_414], %621 {strides = array<i32>} : memref<8x8x256xf32, #tpu.memory_space<vmem>>, vector<1x8x256xf32>,
    %c24_415 = arith.constant 24 : index
    %c0_416 = arith.constant 0 : index
    %622 = vector.load %arg8[%c24_415, %c0_416] : memref<64x768xf32, #tpu.memory_space<vmem>>, vector<8x768xf32>
    %623 = arith.truncf %618 : vector<8x256xf32> to vector<8x256xbf16>
    %c0_417 = arith.constant 0 : index
    %c0_418 = arith.constant 0 : index
    %624 = vector.load %arg3[%c0_417, %c0_418] : memref<256x768xbf16, #tpu.memory_space<vmem>>, vector<256x768xbf16>
    %cst_419 = arith.constant dense<0.000000e+00> : vector<8x768xf32>
    %625 = tpu.matmul %623, %624, %cst_419 {dimension_numbers = #tpu.dot_dimension_numbers<[1], [0], [0], [1], [0, 0, 1, 1], [], []>} : vector<8x256xbf16>, vector<256x768xbf16>, vector<8x768xf32> -> vector<8x768xf32>
    %c0_420 = arith.constant 0 : index
    %c0_421 = arith.constant 0 : index
    %626 = vector.load %arg4[%c0_420, %c0_421] : memref<1x768xf32, #tpu.memory_space<vmem>>, vector<1x768xf32>
    %627 = vector.broadcast %626 : vector<1x768xf32> to vector<8x768xf32>
    %628 = arith.addf %625, %627 : vector<8x768xf32>
    %629 = vector.extract_strided_slice %622 {offsets = [0, 0], sizes = [8, 256], strides = [1, 1]} : vector<8x768xf32> to vector<8x256xf32>
    %630 = vector.extract_strided_slice %628 {offsets = [0, 0], sizes = [8, 256], strides = [1, 1]} : vector<8x768xf32> to vector<8x256xf32>
    %631 = arith.addf %629, %630 : vector<8x256xf32>
    %632 = arith.negf %631 : vector<8x256xf32>
    %633 = math.exp %632 : vector<8x256xf32>
    %cst_422 = arith.constant 1.000000e+00 : f32
    %634 = vector.broadcast %cst_422 : f32 to vector<8x256xf32>
    %635 = arith.addf %634, %633 : vector<8x256xf32>
    %636 = arith.divf %634, %635 : vector<8x256xf32>
    %637 = vector.extract_strided_slice %622 {offsets = [0, 256], sizes = [8, 256], strides = [1, 1]} : vector<8x768xf32> to vector<8x256xf32>
    %638 = vector.extract_strided_slice %628 {offsets = [0, 256], sizes = [8, 256], strides = [1, 1]} : vector<8x768xf32> to vector<8x256xf32>
    %639 = arith.addf %637, %638 : vector<8x256xf32>
    %640 = arith.negf %639 : vector<8x256xf32>
    %641 = math.exp %640 : vector<8x256xf32>
    %cst_423 = arith.constant 1.000000e+00 : f32
    %642 = vector.broadcast %cst_423 : f32 to vector<8x256xf32>
    %643 = arith.addf %642, %641 : vector<8x256xf32>
    %644 = arith.divf %642, %643 : vector<8x256xf32>
    %645 = vector.extract_strided_slice %622 {offsets = [0, 512], sizes = [8, 256], strides = [1, 1]} : vector<8x768xf32> to vector<8x256xf32>
    %646 = vector.extract_strided_slice %628 {offsets = [0, 512], sizes = [8, 256], strides = [1, 1]} : vector<8x768xf32> to vector<8x256xf32>
    %647 = arith.mulf %636, %646 : vector<8x256xf32>
    %648 = arith.addf %645, %647 : vector<8x256xf32>
    %649 = math.tanh %648 : vector<8x256xf32>
    %cst_424 = arith.constant 1.000000e+00 : f32
    %650 = vector.broadcast %cst_424 : f32 to vector<8x256xf32>
    %651 = arith.subf %650, %644 : vector<8x256xf32>
    %652 = arith.mulf %651, %649 : vector<8x256xf32>
    %653 = arith.mulf %644, %618 : vector<8x256xf32>
    %654 = arith.addf %652, %653 : vector<8x256xf32>
    %c3_425 = arith.constant 3 : index
    %c0_426 = arith.constant 0 : index
    %c0_427 = arith.constant 0 : index
    %655 = vector.load %arg6[%c3_425, %c0_426, %c0_427] : memref<8x8x256xf32, #tpu.memory_space<vmem>>, vector<1x8x256xf32>
    %656 = vector.shape_cast %655 : vector<1x8x256xf32> to vector<8x256xf32>
    %657 = vector.shape_cast %654 : vector<8x256xf32> to vector<1x8x256xf32>
    tpu.vector_store %arg6[%c3_425, %c0_426, %c0_427], %657 {strides = array<i32>} : memref<8x8x256xf32, #tpu.memory_space<vmem>>, vector<1x8x256xf32>,
    %c32_428 = arith.constant 32 : index
    %c0_429 = arith.constant 0 : index
    %658 = vector.load %arg8[%c32_428, %c0_429] : memref<64x768xf32, #tpu.memory_space<vmem>>, vector<8x768xf32>
    %659 = arith.truncf %654 : vector<8x256xf32> to vector<8x256xbf16>
    %c0_430 = arith.constant 0 : index
    %c0_431 = arith.constant 0 : index
    %660 = vector.load %arg3[%c0_430, %c0_431] : memref<256x768xbf16, #tpu.memory_space<vmem>>, vector<256x768xbf16>
    %cst_432 = arith.constant dense<0.000000e+00> : vector<8x768xf32>
    %661 = tpu.matmul %659, %660, %cst_432 {dimension_numbers = #tpu.dot_dimension_numbers<[1], [0], [0], [1], [0, 0, 1, 1], [], []>} : vector<8x256xbf16>, vector<256x768xbf16>, vector<8x768xf32> -> vector<8x768xf32>
    %c0_433 = arith.constant 0 : index
    %c0_434 = arith.constant 0 : index
    %662 = vector.load %arg4[%c0_433, %c0_434] : memref<1x768xf32, #tpu.memory_space<vmem>>, vector<1x768xf32>
    %663 = vector.broadcast %662 : vector<1x768xf32> to vector<8x768xf32>
    %664 = arith.addf %661, %663 : vector<8x768xf32>
    %665 = vector.extract_strided_slice %658 {offsets = [0, 0], sizes = [8, 256], strides = [1, 1]} : vector<8x768xf32> to vector<8x256xf32>
    %666 = vector.extract_strided_slice %664 {offsets = [0, 0], sizes = [8, 256], strides = [1, 1]} : vector<8x768xf32> to vector<8x256xf32>
    %667 = arith.addf %665, %666 : vector<8x256xf32>
    %668 = arith.negf %667 : vector<8x256xf32>
    %669 = math.exp %668 : vector<8x256xf32>
    %cst_435 = arith.constant 1.000000e+00 : f32
    %670 = vector.broadcast %cst_435 : f32 to vector<8x256xf32>
    %671 = arith.addf %670, %669 : vector<8x256xf32>
    %672 = arith.divf %670, %671 : vector<8x256xf32>
    %673 = vector.extract_strided_slice %658 {offsets = [0, 256], sizes = [8, 256], strides = [1, 1]} : vector<8x768xf32> to vector<8x256xf32>
    %674 = vector.extract_strided_slice %664 {offsets = [0, 256], sizes = [8, 256], strides = [1, 1]} : vector<8x768xf32> to vector<8x256xf32>
    %675 = arith.addf %673, %674 : vector<8x256xf32>
    %676 = arith.negf %675 : vector<8x256xf32>
    %677 = math.exp %676 : vector<8x256xf32>
    %cst_436 = arith.constant 1.000000e+00 : f32
    %678 = vector.broadcast %cst_436 : f32 to vector<8x256xf32>
    %679 = arith.addf %678, %677 : vector<8x256xf32>
    %680 = arith.divf %678, %679 : vector<8x256xf32>
    %681 = vector.extract_strided_slice %658 {offsets = [0, 512], sizes = [8, 256], strides = [1, 1]} : vector<8x768xf32> to vector<8x256xf32>
    %682 = vector.extract_strided_slice %664 {offsets = [0, 512], sizes = [8, 256], strides = [1, 1]} : vector<8x768xf32> to vector<8x256xf32>
    %683 = arith.mulf %672, %682 : vector<8x256xf32>
    %684 = arith.addf %681, %683 : vector<8x256xf32>
    %685 = math.tanh %684 : vector<8x256xf32>
    %cst_437 = arith.constant 1.000000e+00 : f32
    %686 = vector.broadcast %cst_437 : f32 to vector<8x256xf32>
    %687 = arith.subf %686, %680 : vector<8x256xf32>
    %688 = arith.mulf %687, %685 : vector<8x256xf32>
    %689 = arith.mulf %680, %654 : vector<8x256xf32>
    %690 = arith.addf %688, %689 : vector<8x256xf32>
    %c4_438 = arith.constant 4 : index
    %c0_439 = arith.constant 0 : index
    %c0_440 = arith.constant 0 : index
    %691 = vector.load %arg6[%c4_438, %c0_439, %c0_440] : memref<8x8x256xf32, #tpu.memory_space<vmem>>, vector<1x8x256xf32>
    %692 = vector.shape_cast %691 : vector<1x8x256xf32> to vector<8x256xf32>
    %693 = vector.shape_cast %690 : vector<8x256xf32> to vector<1x8x256xf32>
    tpu.vector_store %arg6[%c4_438, %c0_439, %c0_440], %693 {strides = array<i32>} : memref<8x8x256xf32, #tpu.memory_space<vmem>>, vector<1x8x256xf32>,
    %c40_441 = arith.constant 40 : index
    %c0_442 = arith.constant 0 : index
    %694 = vector.load %arg8[%c40_441, %c0_442] : memref<64x768xf32, #tpu.memory_space<vmem>>, vector<8x768xf32>
    %695 = arith.truncf %690 : vector<8x256xf32> to vector<8x256xbf16>
    %c0_443 = arith.constant 0 : index
    %c0_444 = arith.constant 0 : index
    %696 = vector.load %arg3[%c0_443, %c0_444] : memref<256x768xbf16, #tpu.memory_space<vmem>>, vector<256x768xbf16>
    %cst_445 = arith.constant dense<0.000000e+00> : vector<8x768xf32>
    %697 = tpu.matmul %695, %696, %cst_445 {dimension_numbers = #tpu.dot_dimension_numbers<[1], [0], [0], [1], [0, 0, 1, 1], [], []>} : vector<8x256xbf16>, vector<256x768xbf16>, vector<8x768xf32> -> vector<8x768xf32>
    %c0_446 = arith.constant 0 : index
    %c0_447 = arith.constant 0 : index
    %698 = vector.load %arg4[%c0_446, %c0_447] : memref<1x768xf32, #tpu.memory_space<vmem>>, vector<1x768xf32>
    %699 = vector.broadcast %698 : vector<1x768xf32> to vector<8x768xf32>
    %700 = arith.addf %697, %699 : vector<8x768xf32>
    %701 = vector.extract_strided_slice %694 {offsets = [0, 0], sizes = [8, 256], strides = [1, 1]} : vector<8x768xf32> to vector<8x256xf32>
    %702 = vector.extract_strided_slice %700 {offsets = [0, 0], sizes = [8, 256], strides = [1, 1]} : vector<8x768xf32> to vector<8x256xf32>
    %703 = arith.addf %701, %702 : vector<8x256xf32>
    %704 = arith.negf %703 : vector<8x256xf32>
    %705 = math.exp %704 : vector<8x256xf32>
    %cst_448 = arith.constant 1.000000e+00 : f32
    %706 = vector.broadcast %cst_448 : f32 to vector<8x256xf32>
    %707 = arith.addf %706, %705 : vector<8x256xf32>
    %708 = arith.divf %706, %707 : vector<8x256xf32>
    %709 = vector.extract_strided_slice %694 {offsets = [0, 256], sizes = [8, 256], strides = [1, 1]} : vector<8x768xf32> to vector<8x256xf32>
    %710 = vector.extract_strided_slice %700 {offsets = [0, 256], sizes = [8, 256], strides = [1, 1]} : vector<8x768xf32> to vector<8x256xf32>
    %711 = arith.addf %709, %710 : vector<8x256xf32>
    %712 = arith.negf %711 : vector<8x256xf32>
    %713 = math.exp %712 : vector<8x256xf32>
    %cst_449 = arith.constant 1.000000e+00 : f32
    %714 = vector.broadcast %cst_449 : f32 to vector<8x256xf32>
    %715 = arith.addf %714, %713 : vector<8x256xf32>
    %716 = arith.divf %714, %715 : vector<8x256xf32>
    %717 = vector.extract_strided_slice %694 {offsets = [0, 512], sizes = [8, 256], strides = [1, 1]} : vector<8x768xf32> to vector<8x256xf32>
    %718 = vector.extract_strided_slice %700 {offsets = [0, 512], sizes = [8, 256], strides = [1, 1]} : vector<8x768xf32> to vector<8x256xf32>
    %719 = arith.mulf %708, %718 : vector<8x256xf32>
    %720 = arith.addf %717, %719 : vector<8x256xf32>
    %721 = math.tanh %720 : vector<8x256xf32>
    %cst_450 = arith.constant 1.000000e+00 : f32
    %722 = vector.broadcast %cst_450 : f32 to vector<8x256xf32>
    %723 = arith.subf %722, %716 : vector<8x256xf32>
    %724 = arith.mulf %723, %721 : vector<8x256xf32>
    %725 = arith.mulf %716, %690 : vector<8x256xf32>
    %726 = arith.addf %724, %725 : vector<8x256xf32>
    %c5_451 = arith.constant 5 : index
    %c0_452 = arith.constant 0 : index
    %c0_453 = arith.constant 0 : index
    %727 = vector.load %arg6[%c5_451, %c0_452, %c0_453] : memref<8x8x256xf32, #tpu.memory_space<vmem>>, vector<1x8x256xf32>
    %728 = vector.shape_cast %727 : vector<1x8x256xf32> to vector<8x256xf32>
    %729 = vector.shape_cast %726 : vector<8x256xf32> to vector<1x8x256xf32>
    tpu.vector_store %arg6[%c5_451, %c0_452, %c0_453], %729 {strides = array<i32>} : memref<8x8x256xf32, #tpu.memory_space<vmem>>, vector<1x8x256xf32>,
    %c48_454 = arith.constant 48 : index
    %c0_455 = arith.constant 0 : index
    %730 = vector.load %arg8[%c48_454, %c0_455] : memref<64x768xf32, #tpu.memory_space<vmem>>, vector<8x768xf32>
    %731 = arith.truncf %726 : vector<8x256xf32> to vector<8x256xbf16>
    %c0_456 = arith.constant 0 : index
    %c0_457 = arith.constant 0 : index
    %732 = vector.load %arg3[%c0_456, %c0_457] : memref<256x768xbf16, #tpu.memory_space<vmem>>, vector<256x768xbf16>
    %cst_458 = arith.constant dense<0.000000e+00> : vector<8x768xf32>
    %733 = tpu.matmul %731, %732, %cst_458 {dimension_numbers = #tpu.dot_dimension_numbers<[1], [0], [0], [1], [0, 0, 1, 1], [], []>} : vector<8x256xbf16>, vector<256x768xbf16>, vector<8x768xf32> -> vector<8x768xf32>
    %c0_459 = arith.constant 0 : index
    %c0_460 = arith.constant 0 : index
    %734 = vector.load %arg4[%c0_459, %c0_460] : memref<1x768xf32, #tpu.memory_space<vmem>>, vector<1x768xf32>
    %735 = vector.broadcast %734 : vector<1x768xf32> to vector<8x768xf32>
    %736 = arith.addf %733, %735 : vector<8x768xf32>
    %737 = vector.extract_strided_slice %730 {offsets = [0, 0], sizes = [8, 256], strides = [1, 1]} : vector<8x768xf32> to vector<8x256xf32>
    %738 = vector.extract_strided_slice %736 {offsets = [0, 0], sizes = [8, 256], strides = [1, 1]} : vector<8x768xf32> to vector<8x256xf32>
    %739 = arith.addf %737, %738 : vector<8x256xf32>
    %740 = arith.negf %739 : vector<8x256xf32>
    %741 = math.exp %740 : vector<8x256xf32>
    %cst_461 = arith.constant 1.000000e+00 : f32
    %742 = vector.broadcast %cst_461 : f32 to vector<8x256xf32>
    %743 = arith.addf %742, %741 : vector<8x256xf32>
    %744 = arith.divf %742, %743 : vector<8x256xf32>
    %745 = vector.extract_strided_slice %730 {offsets = [0, 256], sizes = [8, 256], strides = [1, 1]} : vector<8x768xf32> to vector<8x256xf32>
    %746 = vector.extract_strided_slice %736 {offsets = [0, 256], sizes = [8, 256], strides = [1, 1]} : vector<8x768xf32> to vector<8x256xf32>
    %747 = arith.addf %745, %746 : vector<8x256xf32>
    %748 = arith.negf %747 : vector<8x256xf32>
    %749 = math.exp %748 : vector<8x256xf32>
    %cst_462 = arith.constant 1.000000e+00 : f32
    %750 = vector.broadcast %cst_462 : f32 to vector<8x256xf32>
    %751 = arith.addf %750, %749 : vector<8x256xf32>
    %752 = arith.divf %750, %751 : vector<8x256xf32>
    %753 = vector.extract_strided_slice %730 {offsets = [0, 512], sizes = [8, 256], strides = [1, 1]} : vector<8x768xf32> to vector<8x256xf32>
    %754 = vector.extract_strided_slice %736 {offsets = [0, 512], sizes = [8, 256], strides = [1, 1]} : vector<8x768xf32> to vector<8x256xf32>
    %755 = arith.mulf %744, %754 : vector<8x256xf32>
    %756 = arith.addf %753, %755 : vector<8x256xf32>
    %757 = math.tanh %756 : vector<8x256xf32>
    %cst_463 = arith.constant 1.000000e+00 : f32
    %758 = vector.broadcast %cst_463 : f32 to vector<8x256xf32>
    %759 = arith.subf %758, %752 : vector<8x256xf32>
    %760 = arith.mulf %759, %757 : vector<8x256xf32>
    %761 = arith.mulf %752, %726 : vector<8x256xf32>
    %762 = arith.addf %760, %761 : vector<8x256xf32>
    %c6_464 = arith.constant 6 : index
    %c0_465 = arith.constant 0 : index
    %c0_466 = arith.constant 0 : index
    %763 = vector.load %arg6[%c6_464, %c0_465, %c0_466] : memref<8x8x256xf32, #tpu.memory_space<vmem>>, vector<1x8x256xf32>
    %764 = vector.shape_cast %763 : vector<1x8x256xf32> to vector<8x256xf32>
    %765 = vector.shape_cast %762 : vector<8x256xf32> to vector<1x8x256xf32>
    tpu.vector_store %arg6[%c6_464, %c0_465, %c0_466], %765 {strides = array<i32>} : memref<8x8x256xf32, #tpu.memory_space<vmem>>, vector<1x8x256xf32>,
    %c56_467 = arith.constant 56 : index
    %c0_468 = arith.constant 0 : index
    %766 = vector.load %arg8[%c56_467, %c0_468] : memref<64x768xf32, #tpu.memory_space<vmem>>, vector<8x768xf32>
    %767 = arith.truncf %762 : vector<8x256xf32> to vector<8x256xbf16>
    %c0_469 = arith.constant 0 : index
    %c0_470 = arith.constant 0 : index
    %768 = vector.load %arg3[%c0_469, %c0_470] : memref<256x768xbf16, #tpu.memory_space<vmem>>, vector<256x768xbf16>
    %cst_471 = arith.constant dense<0.000000e+00> : vector<8x768xf32>
    %769 = tpu.matmul %767, %768, %cst_471 {dimension_numbers = #tpu.dot_dimension_numbers<[1], [0], [0], [1], [0, 0, 1, 1], [], []>} : vector<8x256xbf16>, vector<256x768xbf16>, vector<8x768xf32> -> vector<8x768xf32>
    %c0_472 = arith.constant 0 : index
    %c0_473 = arith.constant 0 : index
    %770 = vector.load %arg4[%c0_472, %c0_473] : memref<1x768xf32, #tpu.memory_space<vmem>>, vector<1x768xf32>
    %771 = vector.broadcast %770 : vector<1x768xf32> to vector<8x768xf32>
    %772 = arith.addf %769, %771 : vector<8x768xf32>
    %773 = vector.extract_strided_slice %766 {offsets = [0, 0], sizes = [8, 256], strides = [1, 1]} : vector<8x768xf32> to vector<8x256xf32>
    %774 = vector.extract_strided_slice %772 {offsets = [0, 0], sizes = [8, 256], strides = [1, 1]} : vector<8x768xf32> to vector<8x256xf32>
    %775 = arith.addf %773, %774 : vector<8x256xf32>
    %776 = arith.negf %775 : vector<8x256xf32>
    %777 = math.exp %776 : vector<8x256xf32>
    %cst_474 = arith.constant 1.000000e+00 : f32
    %778 = vector.broadcast %cst_474 : f32 to vector<8x256xf32>
    %779 = arith.addf %778, %777 : vector<8x256xf32>
    %780 = arith.divf %778, %779 : vector<8x256xf32>
    %781 = vector.extract_strided_slice %766 {offsets = [0, 256], sizes = [8, 256], strides = [1, 1]} : vector<8x768xf32> to vector<8x256xf32>
    %782 = vector.extract_strided_slice %772 {offsets = [0, 256], sizes = [8, 256], strides = [1, 1]} : vector<8x768xf32> to vector<8x256xf32>
    %783 = arith.addf %781, %782 : vector<8x256xf32>
    %784 = arith.negf %783 : vector<8x256xf32>
    %785 = math.exp %784 : vector<8x256xf32>
    %cst_475 = arith.constant 1.000000e+00 : f32
    %786 = vector.broadcast %cst_475 : f32 to vector<8x256xf32>
    %787 = arith.addf %786, %785 : vector<8x256xf32>
    %788 = arith.divf %786, %787 : vector<8x256xf32>
    %789 = vector.extract_strided_slice %766 {offsets = [0, 512], sizes = [8, 256], strides = [1, 1]} : vector<8x768xf32> to vector<8x256xf32>
    %790 = vector.extract_strided_slice %772 {offsets = [0, 512], sizes = [8, 256], strides = [1, 1]} : vector<8x768xf32> to vector<8x256xf32>
    %791 = arith.mulf %780, %790 : vector<8x256xf32>
    %792 = arith.addf %789, %791 : vector<8x256xf32>
    %793 = math.tanh %792 : vector<8x256xf32>
    %cst_476 = arith.constant 1.000000e+00 : f32
    %794 = vector.broadcast %cst_476 : f32 to vector<8x256xf32>
    %795 = arith.subf %794, %788 : vector<8x256xf32>
    %796 = arith.mulf %795, %793 : vector<8x256xf32>
    %797 = arith.mulf %788, %762 : vector<8x256xf32>
    %798 = arith.addf %796, %797 : vector<8x256xf32>
    %c7_477 = arith.constant 7 : index
    %c0_478 = arith.constant 0 : index
    %c0_479 = arith.constant 0 : index
    %799 = vector.load %arg6[%c7_477, %c0_478, %c0_479] : memref<8x8x256xf32, #tpu.memory_space<vmem>>, vector<1x8x256xf32>
    %800 = vector.shape_cast %799 : vector<1x8x256xf32> to vector<8x256xf32>
    %801 = vector.shape_cast %798 : vector<8x256xf32> to vector<1x8x256xf32>
    tpu.vector_store %arg6[%c7_477, %c0_478, %c0_479], %801 {strides = array<i32>} : memref<8x8x256xf32, #tpu.memory_space<vmem>>, vector<1x8x256xf32>,
    %c0_480 = arith.constant 0 : index
    %c0_481 = arith.constant 0 : index
    %802 = vector.load %arg7[%c0_480, %c0_481] : memref<8x256xf32, #tpu.memory_space<vmem>>, vector<8x256xf32>
    tpu.vector_store %arg7[%c0_480, %c0_481], %798 {strides = array<i32>} : memref<8x256xf32, #tpu.memory_space<vmem>>, vector<8x256xf32>,
    return
  }
  func.func @transform_0(%arg0: i32, %arg1: memref<16x8xi32, #tpu.memory_space<smem>>) -> (i32, i32) {
    %c0_i32 = arith.constant 0 : i32
    %c0_i32_0 = arith.constant 0 : i32
    %c0_i32_1 = arith.constant 0 : i32
    return %c0_i32, %c0_i32_0 : i32, i32
  }
  func.func @transform_1(%arg0: i32, %arg1: memref<16x8xi32, #tpu.memory_space<smem>>) -> (i32, i32) {
    %c0_i32 = arith.constant 0 : i32
    %c0_i32_0 = arith.constant 0 : i32
    %c0_i32_1 = arith.constant 0 : i32
    return %c0_i32, %c0_i32_0 : i32, i32
  }
  func.func @transform_2(%arg0: i32, %arg1: memref<16x8xi32, #tpu.memory_space<smem>>) -> (i32, i32) {
    %c0_i32 = arith.constant 0 : i32
    %c0_i32_0 = arith.constant 0 : i32
    %c0_i32_1 = arith.constant 0 : i32
    return %c0_i32, %c0_i32_0 : i32, i32
  }
  func.func @transform_3(%arg0: i32, %arg1: memref<16x8xi32, #tpu.memory_space<smem>>) -> (i32, i32) {
    %c0_i32 = arith.constant 0 : i32
    %c0_i32_0 = arith.constant 0 : i32
    return %arg0, %c0_i32 : i32, i32
  }
  func.func @transform_4(%arg0: i32, %arg1: memref<16x8xi32, #tpu.memory_space<smem>>) -> (i32, i32, i32) {
    %c0_i32 = arith.constant 0 : i32
    %c0_i32_0 = arith.constant 0 : i32
    %c0_i32_1 = arith.constant 0 : i32
    return %c0_i32, %arg0, %c0_i32_0 : i32, i32, i32
  }
  func.func @transform_5(%arg0: i32, %arg1: memref<16x8xi32, #tpu.memory_space<smem>>) -> (i32, i32) {
    %c0_i32 = arith.constant 0 : i32
    %c0_i32_0 = arith.constant 0 : i32
    return %arg0, %c0_i32 : i32, i32
  }
}

</mosaic_0001>

<bundles_post_ra>
// kernel: tpu_custom_call.1
= control target key start
LH: loop header
LB: loop body
LE: loop exit
PB: predicated region body
PF: predicated region fallthrough
CT: control target
= control target key end

     0   :  { %s13669_s24 = smov [#allocation4]   ;;  %s15232_s0 = inlined_call_operand.vmem [shape: s32[16,8], index: 0, kind: input, shape index: {}]   ;;  %s15233_s1 = inlined_call_operand.hbm [shape: f32[64,768], index: 1, kind: input, shape index: {}]   ;;  %s15234_s2 = inlined_call_operand.hbm [shape: bf16[256,768], index: 2, kind: input, shape index: {}]   ;;  %s15235_s3 = inlined_call_operand.vmem [shape: f32[1,768], index: 3, kind: input, shape index: {}]   ;;  %s15236_s4 = inlined_call_operand.hbm [shape: f32[16,256], index: 4, kind: input, shape index: {}]   ;;  %s15237_s5 = inlined_call_operand.hbm [shape: f32[8,16,256], index: 5, kind: output, shape index: {0}]   ;;  %s15238_s6 = inlined_call_operand.hbm [shape: f32[16,256], index: 6, kind: output, shape index: {1}]  }
   0x1   :  { %15270 = sst [smem:[#allocation38_spill]] %s15233_s1  ;;  %s13_s23 = sshll.u32 %s15232_s0, 4  ;;  %s14_s23 = int_to_ptr.vmem [resolvable:$true] %s13_s23 }
   0x2   :  { %15271 = sst [smem:[#allocation39_spill]] %s15234_s2 }
   0x3   :  { %15272 = sst [smem:[#allocation40_spill]] %s15236_s4 }
   0x4   :  { %15273 = sst [smem:[#allocation41_spill]] %s15237_s5 }
   0x5   :  { %15274 = sst [smem:[#allocation42_spill]] %s15238_s6 }
   0x6   :  { %16 = dma.vmem_to_smem %s14_s23, 256, %s13669_s24, [#allocation3] }
   0x7   :  { %13631 = dma.done.wait [#allocation3], 256 }
   0x8   :  { %13632 = vsyncadd [#allocation3], 4294967040 }
   0x9   :  { %19 = sfence }
   0xa   :  { %20 = vsyncpa [#allocation6], 0 }
   0xb   :  { %21 = vsyncpa [#allocation9], 0 }
   0xc   :  { %22 = vsyncpa [#allocation7], 0 }
   0xd   :  { %24 = vsyncpa [#allocation7 + $0x1], 0 }
   0xe   :  { %25 = vsyncpa [#allocation13], 0 }
   0xf   :  { %27 = vsyncpa [#allocation13 + $0x1], 0  ;;  %s13717_s25 = smov 0   ;;  %s13719_s26 = smov 0  }
  0x10   :  { %s13721_s27 = smov 0   ;;  %s13723_s28 = smov 0  }
  0x11 LB: > { %15275 = sst [smem:[#allocation20_spill]] %s13655_s25  ;;  %s13741_s7 = sadd.s32 4294967295, %s13667_s28   ;;  %s13667_s28 = sphi %s13723_s28, %s15402_s28   ;;  %s13663_s27 = sphi %s13721_s27, %s15405_s27   ;;  %s13659_s26 = sphi %s13719_s26, %s15404_s26   ;;  %s13655_s25 = sphi %s13717_s25, %s15403_s25  }
  0x12   : > { %15276 = sst [smem:[#allocation21_spill]] %s13659_s26  ;;  %p8750_p0 = scmp.ge.s32.totalorder %s13667_s28, 1 }
  0x13   : > { %15277 = sst [smem:[#allocation22_spill]] %s13663_s27  ;;  %p117_p1 = scmp.eq.s32.totalorder %s13741_s7, 0 }
  0x14   : > { %15278 = sst [smem:[#allocation23_spill]] %s13667_s28  ;;  %p140_p2 = scmp.eq.s32.totalorder %s13741_s7, 1 }
  0x15   : > { %s15279_s1 = sld [smem:[#allocation38_spill]]  ;;  %p179_p3 = scmp.lt.s32.totalorder %s13667_s28, 3 }
  0x16   : > { %15280 = sst [smem:[#allocation24_spill]] %s13741_s7  ;;  %s13670_s9 = smov [#allocation5]  }
  0x17   : > { %p13747_p4 = pnand %p8750_p0, %p179_p3  ;;  %s192_s10 = sshll.u32 %s13670_s9, 4  ;;  %s193_s10 = int_to_ptr.vmem [resolvable:$true] %s192_s10 }
  0x18   : > { %s15282_s2 = sld [smem:[#allocation39_spill]]  ;;  %s13671_s14 = smov [#allocation8]  }
  0x19   : > { %p13217_p5 = pneg %p13747_p4  ;;  %s206_s15 = sshll.u32 %s13671_s14, 4  ;;  %s207_s15 = int_to_ptr.vmem [resolvable:$true] %s206_s15 }
  0x1a   : > { %s13672_s16 = smov 768   ;;  %s13673_s17 = smov 48  }
  0x1b   : > { %s190_s30 = sshll.u32 %s15279_s1, 4  ;;  %p13218_p7 = pnand %p13217_p5, %p117_p1  ;;  %s191_s30 = int_to_ptr.hbm [resolvable:$true] %s190_s30 }
  0x1c   : > { %s13674_s18 = smov 384   ;;  %s13675_s19 = smov 24  }
  0x1d   : > { %13220 = dma.hbm_to_vmem [thread:$0]  (!%p13218_p7), %s191_s30, 6144, %s193_s10, [#allocation6], %s13672_s16, %s13672_s16, %s13673_s17  }
  0x1e   : > { %s204_s13 = sshll.u32 %s15282_s2, 4  ;;  %s8749_s20 = sadd.s32 4294967294, %s13667_s28   ;;  %s205_s13 = int_to_ptr.hbm [resolvable:$true] %s204_s13 }
  0x1f   : > { %13223 = dma.hbm_to_vmem [thread:$0]  (!%p13218_p7), %s205_s13, 12288, %s207_s15, [#allocation9], %s13674_s18, %s13674_s18, %s13675_s19  }
  0x20   : > { %s13761_s21 = sadd.s32 1, %s13667_s28   ;;  %s103_s22 = sadd.s32 1, %s13663_s27 }
  0x21   : > { %15283 = sst [smem:[#allocation25_spill]] %s13761_s21  ;;  %s100_s23 = ssub.s32 %s13667_s28, %s13761_s21 }
  0x22   : > { %p110_p8 = scmp.ne.s32.totalorder %s13663_s27, %s13659_s26  ;;  %p101_p9 = scmp.eq.s32.totalorder %s100_s23, 0 }
  0x23   : > { %p111_p10 = scmp.eq.s32.totalorder %s13667_s28, 0  ;;  %p116_p11 = scmp.ne.s32.totalorder %s13659_s26, %s13655_s25 }
  0x24   : > { %p13773_p12 = por %p140_p2, %p110_p8  ;;  %p146_p3 = scmp.eq.s32.totalorder %s8749_s20, 1 }
  0x25   : > { %s13778_s0 = scalar_select %p101_p9, %s13663_s27, %s103_s22  }
  0x26   : > { %s15284_s24 = scalar_select %p13773_p12, 1, 0 }
  0x27   : > { %15286 = sst [smem:[#allocation27_spill]] %s13778_s0  ;;  %p13782_p13 = por %p117_p1, %p116_p11 }
  0x28   : > { %15285 = sst [smem:[#allocation26_spill]] %s15284_s24  ;;  %p13786_p0 = por %p111_p10, %p110_p8 }
  0x29   : > { %p13237_p5 = scmp.lt.s32.totalorder %s13667_s28, 2  ;;  %s225_s9 = sand.u32 1, %s13663_s27  }
  0x2a   : > { %p13792_p7 = por %p146_p3, %p116_p11  ;;  %s223_s11 = sand.u32 1, %s13667_s28  }
  0x2b   : > { %s8754_s12 = sshll.u32 %s225_s9, 4  ;;  %s12282_s13 = sshll.u32 %s13667_s28, 4 }
  0x2c   : > { %s15289_s10 = scalar_select %p13792_p7, 1, 0 }
  0x2d   : > { %s15291_s4 = sld [smem:[#allocation40_spill]]  ;;  %s227_s18 = scalar_lea.vmem [#allocation10], %s8754_s12 }
  0x2e   : > { %15290 = sst [smem:[#allocation28_spill]] %s15289_s10  ;;  %s236_s19 = sshll.u32 %s227_s18, 4  ;;  %s237_s19 = int_to_ptr.vmem [resolvable:$true] %s236_s19 }
  0x2f   : > { %p13803_p2 = pnand %p13237_p5, %p13786_p0  ;;  %s224_s22 = scalar_lea.sflag [#allocation6], %s223_s11 }
  0x31   : > { %p13533_p9 = pneg %p13803_p2 }
  0x33   : > { %s232_s16 = scalar_lea.hbm %s15291_s4, %s12282_s13  ;;  %s13536_s14 = scalar_lea.hbm %s15291_s4, 32 }
  0x34   : > { %s234_s17 = sshll.u32 %s232_s16, 4  ;;  %s235_s17 = int_to_ptr.hbm [resolvable:$true] %s234_s17 }
  0x35   : > { %s13529_s23 = sshra.s32 %s235_s17, 4  ;;  %s13530_s23 = int_to_ptr.hbm [resolvable:$true] %s13529_s23 }
  0x36   : > { %s13531_s9 = scalar_lea.hbm %s13530_s23, 16  ;;  %p13537_p0 = scmp.lt.s32.totalorder %s13530_s23, %s15291_s4 }
  0x37   : > { %p13532_p8 = scmp.ne.s32.totalorder %s13530_s23, %s13531_s9  ;;  %p13538_p3 = scmp.lt.s32.totalorder %s13536_s14, %s13531_s9 }
  0x39   : > { %p13534_p10 = pnand %p13533_p9, %p13532_p8  ;;  %p13539_p5 = por %p13538_p3, %p13537_p0 }
  0x3b   : > { %p13535_p11 = pneg %p13534_p10 }
  0x3d   : > { %p13540_p6 = pnand %p13539_p5, %p13535_p11 }
  0x3f   : > { %13543 = shalt.err (!%p13540_p6)
}
  0x40   : > { %13227 = dma.hbm_to_vmem [thread:$0]  (!%p13803_p2), %s235_s17, 256, %s237_s19, %s224_s22  }
  0x41   : > { %245 = sbr.rel (%p13747_p4) target bundleno = 1661 (0x67d), region = 36 }
  0x46   : > { %13634 = dma.done.wait (%p117_p1), [#allocation6], 6144  }
  0x47   : > { %13636 = vsyncadd (%p117_p1), [#allocation6], 4294961152 }
  0x48   : > { %13638 = dma.done.wait (%p117_p1), [#allocation9], 12288  }
  0x49   : > { %13640 = vsyncadd (%p117_p1), [#allocation9], 4294955008  ;;  %s257_s11 = sand.u32 1, %s13741_s7   ;;  %s13829_s16 = sand.u32 1, %s13659_s26  }
  0x4a   : > { %15293 = sst [smem:[#allocation29_spill]] %s13829_s16  ;;  %s15239_s8 = sshll.u32 %s13829_s16, 4 }
  0x4b   : > { %s258_s17 = scalar_lea.sflag [#allocation6], %s257_s11  ;;  %s13834_s18 = scalar_lea.vmem [#allocation10], %s15239_s8 }
  0x4c   : > { %13642 = dma.done.wait (%p13782_p13), %s258_s17, 256  }
  0x4d   : > { %13644 = vsyncadd (%p13782_p13), %s258_s17, 4294967040  ;;  %v9326_v0 = vld [vmem:[#allocation8 + $0x150] sm:$0xf]  ;;  %v12471_v1 = vld [vmem:[#allocation8 + $0x164] sm:$0xf0]  ;;  %s13855_s29 = sshll.u32 %s13741_s7, 10 }
  0x4e   : > { %v9518_v2 = vld [vmem:[#allocation8 + $0x2d0] sm:$0xf]  ;;  %v9327_v3 = vor.u32 %v12471_v1, %v9326_v0  ;;  %v12519_v4 = vld [vmem:[#allocation8 + $0x2e4] sm:$0xf0]  ;;  %v12468_v5 = vld [vmem:[#allocation8 + $0x154] sm:$0xf] }
  0x4f   : > { %v9328_v6 = vld [vmem:[#allocation8 + $0x168] sm:$0xf0]  ;;  %v9519_v7 = vor.u32 %v12519_v4, %v9518_v2  ;;  %v12516_v9 = vld [vmem:[#allocation8 + $0x2d4] sm:$0xf]  ;;  %v9302_v11 = vld [vmem:[#allocation8 + $0x120] sm:$0xf] }
  0x50   : > { %v9331_v8 = vor.u32 %v12468_v5, %v9328_v6  ;;  %v9520_v10 = vld [vmem:[#allocation8 + $0x2e8] sm:$0xf0]  ;;  %2185 = vmatpush.bf16.msra.mxu0 %v9327_v3  ;;  %v12465_v13 = vld [vmem:[#allocation8 + $0x134] sm:$0xf0]  ;;  %v9494_v14 = vld [vmem:[#allocation8 + $0x2a0] sm:$0xf] }
  0x51   : > { %v9523_v12 = vor.u32 %v12516_v9, %v9520_v10  ;;  %v12513_v15 = vld [vmem:[#allocation8 + $0x2b4] sm:$0xf0]  ;;  %2198 = vmatpush.bf16.msra.mxu1 %v9519_v7  ;;  %v9303_v16 = vor.u32 %v12465_v13, %v9302_v11  ;;  %v12462_v18 = vld [vmem:[#allocation8 + $0x124] sm:$0xf]  ;;  %v9304_v19 = vld [vmem:[#allocation8 + $0x138] sm:$0xf0] }
  0x52   : > { %2211 = vmatpush.bf16.msra.mxu2 %v9331_v8  ;;  %v9495_v17 = vor.u32 %v12513_v15, %v9494_v14  ;;  %v12510_v20 = vld [vmem:[#allocation8 + $0x2a4] sm:$0xf]  ;;  %v9307_v21 = vor.u32 %v12462_v18, %v9304_v19  ;;  %v9496_v22 = vld [vmem:[#allocation8 + $0x2b8] sm:$0xf0]  ;;  %v9278_v23 = vld [vmem:[#allocation8 + $0xf0] sm:$0xf] }
  0x53   : > { %2224 = vmatpush.bf16.msra.mxu3 %v9523_v12  ;;  %v12459_v24 = vld [vmem:[#allocation8 + $0x104] sm:$0xf0]  ;;  %v9499_v25 = vor.u32 %v12510_v20, %v9496_v22  ;;  %v9470_v26 = vld [vmem:[#allocation8 + $0x270] sm:$0xf]  ;;  %v12456_v28 = vld [vmem:[#allocation8 + $0xf4] sm:$0xf] }
  0x54   : > { %v12507_v27 = vld [vmem:[#allocation8 + $0x284] sm:$0xf0]  ;;  %2186 = vmatpush.bf16.msra.mxu0 %v9303_v16  ;;  %v9279_v29 = vor.u32 %v12459_v24, %v9278_v23  ;;  %v9280_v30 = vld [vmem:[#allocation8 + $0x108] sm:$0xf0]  ;;  %v12504_v31 = vld [vmem:[#allocation8 + $0x274] sm:$0xf] }
  0x55   : > { %v9472_v32 = vld [vmem:[#allocation8 + $0x288] sm:$0xf0]  ;;  %2199 = vmatpush.bf16.msra.mxu1 %v9495_v17  ;;  %v9471_v33 = vor.u32 %v12507_v27, %v9470_v26  ;;  %v9283_v34 = vor.u32 %v12456_v28, %v9280_v30  ;;  %v9254_v35 = vld [vmem:[#allocation8 + $0xc0] sm:$0xf]  ;;  %v12453_v36 = vld [vmem:[#allocation8 + $0xd4] sm:$0xf0] }
  0x56   : > { %2212 = vmatpush.bf16.msra.mxu2 %v9307_v21  ;;  %v9446_v37 = vld [vmem:[#allocation8 + $0x240] sm:$0xf]  ;;  %v9475_v38 = vor.u32 %v12504_v31, %v9472_v32  ;;  %v12501_v39 = vld [vmem:[#allocation8 + $0x254] sm:$0xf0]  ;;  %v12450_v40 = vld [vmem:[#allocation8 + $0xc4] sm:$0xf]  ;;  %v9255_v44 = vor.u32 %v12453_v36, %v9254_v35 }
  0x57   : > { %2225 = vmatpush.bf16.msra.mxu3 %v9499_v25  ;;  %v9256_v41 = vld [vmem:[#allocation8 + $0xd8] sm:$0xf0]  ;;  %v12498_v42 = vld [vmem:[#allocation8 + $0x244] sm:$0xf]  ;;  %v9447_v45 = vor.u32 %v12501_v39, %v9446_v37  ;;  %v9230_v47 = vld [vmem:[#allocation8 + $0x90] sm:$0xf] }
  0x58   : > { %v9448_v43 = vld [vmem:[#allocation8 + $0x258] sm:$0xf0]  ;;  %2187 = vmatpush.bf16.msra.mxu0 %v9279_v29  ;;  %v9259_v46 = vor.u32 %v12450_v40, %v9256_v41  ;;  %v12447_v48 = vld [vmem:[#allocation8 + $0xa4] sm:$0xf0]  ;;  %v9422_v49 = vld [vmem:[#allocation8 + $0x210] sm:$0xf] }
  0x59   : > { %2200 = vmatpush.bf16.msra.mxu1 %v9471_v33  ;;  %v9451_v50 = vor.u32 %v12498_v42, %v9448_v43  ;;  %v12495_v51 = vld [vmem:[#allocation8 + $0x224] sm:$0xf0]  ;;  %v12444_v52 = vld [vmem:[#allocation8 + $0x94] sm:$0xf]  ;;  %v9232_v53 = vld [vmem:[#allocation8 + $0xa8] sm:$0xf0]  ;;  %v9231_v56 = vor.u32 %v12447_v48, %v9230_v47 }
  0x5a   : > { %2213 = vmatpush.bf16.msra.mxu2 %v9283_v34  ;;  %v12492_v54 = vld [vmem:[#allocation8 + $0x214] sm:$0xf]  ;;  %v9424_v55 = vld [vmem:[#allocation8 + $0x228] sm:$0xf0]  ;;  %v9423_v57 = vor.u32 %v12495_v51, %v9422_v49  ;;  %v9235_v58 = vor.u32 %v12444_v52, %v9232_v53  ;;  %v9206_v59 = vld [vmem:[#allocation8 + $0x60] sm:$0xf] }
  0x5b   : > { %2226 = vmatpush.bf16.msra.mxu3 %v9475_v38  ;;  %v12441_v60 = vld [vmem:[#allocation8 + $0x74] sm:$0xf0]  ;;  %v9398_v61 = vld [vmem:[#allocation8 + $0x1e0] sm:$0xf]  ;;  %v9427_v62 = vor.u32 %v12492_v54, %v9424_v55  ;;  %v12438_v0 = vld [vmem:[#allocation8 + $0x64] sm:$0xf] }
  0x5c   : > { %2188 = vmatpush.bf16.msra.mxu0 %v9255_v44  ;;  %v12489_v63 = vld [vmem:[#allocation8 + $0x1f4] sm:$0xf0]  ;;  %v9208_v1 = vld [vmem:[#allocation8 + $0x78] sm:$0xf0]  ;;  %v12486_v2 = vld [vmem:[#allocation8 + $0x1e4] sm:$0xf]  ;;  %v9207_v4 = vor.u32 %v12441_v60, %v9206_v59 }
  0x5d   : > { %2201 = vmatpush.bf16.msra.mxu1 %v9447_v45  ;;  %v9400_v3 = vld [vmem:[#allocation8 + $0x1f8] sm:$0xf0]  ;;  %v9399_v5 = vor.u32 %v12489_v63, %v9398_v61  ;;  %v9211_v6 = vor.u32 %v12438_v0, %v9208_v1  ;;  %v9182_v7 = vld [vmem:[#allocation8 + $0x30] sm:$0xf]  ;;  %v12435_v8 = vld [vmem:[#allocation8 + $0x44] sm:$0xf0] }
  0x5e   : > { %2214 = vmatpush.bf16.msra.mxu2 %v9259_v46  ;;  %v9374_v9 = vld [vmem:[#allocation8 + $0x1b0] sm:$0xf]  ;;  %v9403_v10 = vor.u32 %v12486_v2, %v9400_v3  ;;  %v12483_v11 = vld [vmem:[#allocation8 + $0x1c4] sm:$0xf0]  ;;  %v12432_v12 = vld [vmem:[#allocation8 + $0x34] sm:$0xf]  ;;  %v9183_v16 = vor.u32 %v12435_v8, %v9182_v7 }
  0x5f   : > { %2227 = vmatpush.bf16.msra.mxu3 %v9451_v50  ;;  %v9184_v13 = vld [vmem:[#allocation8 + $0x48] sm:$0xf0]  ;;  %v12480_v14 = vld [vmem:[#allocation8 + $0x1b4] sm:$0xf]  ;;  %v9158_v17 = vld [vmem:[#allocation8] sm:$0xf]  ;;  %v9375_v19 = vor.u32 %v12483_v11, %v9374_v9 }
  0x60   : > { %2189 = vmatpush.bf16.msra.mxu0 %v9231_v56  ;;  %v9376_v15 = vld [vmem:[#allocation8 + $0x1c8] sm:$0xf0]  ;;  %v12429_v18 = vld [vmem:[#allocation8 + $0x14] sm:$0xf0]  ;;  %v9187_v20 = vor.u32 %v12432_v12, %v9184_v13  ;;  %v9350_v21 = vld [vmem:[#allocation8 + $0x180] sm:$0xf] }
  0x61   : > { %2202 = vmatpush.bf16.msra.mxu1 %v9423_v57  ;;  %v12477_v22 = vld [vmem:[#allocation8 + $0x194] sm:$0xf0]  ;;  %v12426_v23 = vld [vmem:[#allocation8 + $0x4] sm:$0xf]  ;;  %v9379_v24 = vor.u32 %v12480_v14, %v9376_v15  ;;  %v9160_v25 = vld [vmem:[#allocation8 + $0x18] sm:$0xf0]  ;;  %v9159_v31 = vor.u32 %v12429_v18, %v9158_v17 }
  0x62   : > { %2215 = vmatpush.bf16.msra.mxu2 %v9235_v58  ;;  %v12474_v26 = vld [vmem:[#allocation8 + $0x184] sm:$0xf]  ;;  %v9352_v27 = vld [vmem:[#allocation8 + $0x198] sm:$0xf0]  ;;  %v9334_v28 = vld [vmem:[#allocation8 + $0x158] sm:$0xf]  ;;  %v9351_v35 = vor.u32 %v12477_v22, %v9350_v21  ;;  %v9163_v36 = vor.u32 %v12426_v23, %v9160_v25 }
  0x63   : > { %2228 = vmatpush.bf16.msra.mxu3 %v9427_v62  ;;  %v12472_v29 = vld [vmem:[#allocation8 + $0x16c] sm:$0xf0]  ;;  %v9526_v30 = vld [vmem:[#allocation8 + $0x2d8] sm:$0xf]  ;;  %v12469_v33 = vld [vmem:[#allocation8 + $0x15c] sm:$0xf]  ;;  %v9355_v39 = vor.u32 %v12474_v26, %v9352_v27 }
  0x64   : > { %2190 = vmatpush.bf16.msra.mxu0 %v9207_v4  ;;  %v12520_v32 = vld [vmem:[#allocation8 + $0x2ec] sm:$0xf0]  ;;  %v9336_v34 = vld [vmem:[#allocation8 + $0x170] sm:$0xf0]  ;;  %v12517_v37 = vld [vmem:[#allocation8 + $0x2dc] sm:$0xf]  ;;  %v9335_v40 = vor.u32 %v12472_v29, %v9334_v28 }
  0x65   : > { %2203 = vmatpush.bf16.msra.mxu1 %v9399_v5  ;;  %v9528_v38 = vld [vmem:[#allocation8 + $0x2f0] sm:$0xf0]  ;;  %v1586_v42 = vld [vmem:[%s13834_s18 + $0x8] sm:$0xff]  ;;  %v9527_v43 = vor.u32 %v12520_v32, %v9526_v30  ;;  %v9339_v44 = vor.u32 %v12469_v33, %v9336_v34  ;;  %v12466_v46 = vld [vmem:[#allocation8 + $0x13c] sm:$0xf0]  ;;  %15294 = sst [smem:[#allocation30_spill]] %s13855_s29 }
  0x66   : > { %2216 = vmatpush.bf16.msra.mxu2 %v9211_v6  ;;  %v1585_v41 = vld [vmem:[%s13834_s18] sm:$0xff]  ;;  %v9310_v45 = vld [vmem:[#allocation8 + $0x128] sm:$0xf]  ;;  %v9531_v48 = vor.u32 %v12517_v37, %v9528_v38  ;;  %v12463_v50 = vld [vmem:[#allocation8 + $0x12c] sm:$0xf]  ;;  %v13844_v55 = vpack.c.bf16 %v1586_v42, %v1586_v42  ;;  %s13858_s19 = sld [smem:[#allocation4 + %s13855_s29]] }
  0x67   : > { %2229 = vmatpush.bf16.msra.mxu3 %v9403_v10  ;;  %v9502_v47 = vld [vmem:[#allocation8 + $0x2a8] sm:$0xf]  ;;  %v12514_v49 = vld [vmem:[#allocation8 + $0x2bc] sm:$0xf0]  ;;  %v9312_v51 = vld [vmem:[#allocation8 + $0x140] sm:$0xf0]  ;;  %v13842_v52 = vpack.c.bf16 %v1585_v41, %v1585_v41  ;;  %v9311_v56 = vor.u32 %v12466_v46, %v9310_v45 }
  0x68   : > { %2191 = vmatpush.bf16.msra.mxu0 %v9183_v16  ;;  %v12511_v53 = vld [vmem:[#allocation8 + $0x2ac] sm:$0xf]  ;;  %v9504_v54 = vld [vmem:[#allocation8 + $0x2c0] sm:$0xf0]  ;;  %v9503_v57 = vor.u32 %v12514_v49, %v9502_v47  ;;  %v9315_v58 = vor.u32 %v12463_v50, %v9312_v51  ;;  %v9286_v59 = vld [vmem:[#allocation8 + $0xf8] sm:$0xf] }
  0x69   : > { %2204 = vmatpush.bf16.msra.mxu1 %v9375_v19  ;;  %v12460_v60 = vld [vmem:[#allocation8 + $0x10c] sm:$0xf0]  ;;  %v9478_v61 = vld [vmem:[#allocation8 + $0x278] sm:$0xf]  ;;  %v9507_v62 = vor.u32 %v12511_v53, %v9504_v54  ;;  %v12457_v0 = vld [vmem:[#allocation8 + $0xfc] sm:$0xf] }
  0x6a   : > { %2217 = vmatpush.bf16.msra.mxu2 %v9187_v20  ;;  %v12508_v63 = vld [vmem:[#allocation8 + $0x28c] sm:$0xf0]  ;;  %v9288_v1 = vld [vmem:[#allocation8 + $0x110] sm:$0xf0]  ;;  %v12505_v2 = vld [vmem:[#allocation8 + $0x27c] sm:$0xf]  ;;  %v9287_v4 = vor.u32 %v12460_v60, %v9286_v59 }
  0x6b   : > { %2230 = vmatpush.bf16.msra.mxu3 %v9379_v24  ;;  %v9480_v3 = vld [vmem:[#allocation8 + $0x290] sm:$0xf0]  ;;  %v9479_v5 = vor.u32 %v12508_v63, %v9478_v61  ;;  %v9291_v6 = vor.u32 %v12457_v0, %v9288_v1  ;;  %v9262_v7 = vld [vmem:[#allocation8 + $0xc8] sm:$0xf]  ;;  %v12454_v8 = vld [vmem:[#allocation8 + $0xdc] sm:$0xf0] }
  0x6c   : > { %2192 = vmatpush.bf16.msra.mxu0 %v9159_v31  ;;  %v9454_v9 = vld [vmem:[#allocation8 + $0x248] sm:$0xf]  ;;  %v9483_v10 = vor.u32 %v12505_v2, %v9480_v3  ;;  %v12502_v11 = vld [vmem:[#allocation8 + $0x25c] sm:$0xf0]  ;;  %v12451_v12 = vld [vmem:[#allocation8 + $0xcc] sm:$0xf]  ;;  %v9263_v16 = vor.u32 %v12454_v8, %v9262_v7 }
  0x6d   : > { %2205 = vmatpush.bf16.msra.mxu1 %v9351_v35  ;;  %v9264_v13 = vld [vmem:[#allocation8 + $0xe0] sm:$0xf0]  ;;  %v12499_v14 = vld [vmem:[#allocation8 + $0x24c] sm:$0xf]  ;;  %v9455_v17 = vor.u32 %v12502_v11, %v9454_v9  ;;  %v9238_v19 = vld [vmem:[#allocation8 + $0x98] sm:$0xf] }
  0x6e   : > { %2218 = vmatpush.bf16.msra.mxu2 %v9163_v36  ;;  %v9456_v15 = vld [vmem:[#allocation8 + $0x260] sm:$0xf0]  ;;  %v9267_v18 = vor.u32 %v12451_v12, %v9264_v13  ;;  %v12448_v20 = vld [vmem:[#allocation8 + $0xac] sm:$0xf0]  ;;  %v9430_v21 = vld [vmem:[#allocation8 + $0x218] sm:$0xf] }
  0x6f   : > { %2231 = vmatpush.bf16.msra.mxu3 %v9355_v39  ;;  %2193 = vmatmul.bf16.vlgmr.msra.gmra.mxu0 %v13842_v52  ;;  %v9459_v22 = vor.u32 %v12499_v14, %v9456_v15  ;;  %v12496_v23 = vld [vmem:[#allocation8 + $0x22c] sm:$0xf0]  ;;  %v12445_v24 = vld [vmem:[#allocation8 + $0x9c] sm:$0xf]  ;;  %v9240_v25 = vld [vmem:[#allocation8 + $0xb0] sm:$0xf0]  ;;  %v9239_v28 = vor.u32 %v12448_v20, %v9238_v19 }
  0x70   : > { %2237 = vmatpush.bf16.msrb.mxu0 %v9335_v40  ;;  %2206 = vmatmul.bf16.vlgmr.msra.gmra.mxu1 %v13844_v55  ;;  %v12493_v26 = vld [vmem:[#allocation8 + $0x21c] sm:$0xf]  ;;  %v9432_v27 = vld [vmem:[#allocation8 + $0x230] sm:$0xf0]  ;;  %v9431_v29 = vor.u32 %v12496_v23, %v9430_v21  ;;  %v9243_v30 = vor.u32 %v12445_v24, %v9240_v25  ;;  %v9214_v31 = vld [vmem:[#allocation8 + $0x68] sm:$0xf] }
  0x71   : > { %2250 = vmatpush.bf16.msrb.mxu1 %v9527_v43  ;;  %2219 = vmatmul.bf16.vlgmr.msra.gmra.mxu2 %v13842_v52  ;;  %v12442_v32 = vld [vmem:[#allocation8 + $0x7c] sm:$0xf0]  ;;  %v9406_v33 = vld [vmem:[#allocation8 + $0x1e8] sm:$0xf]  ;;  %v9435_v34 = vor.u32 %v12493_v26, %v9432_v27  ;;  %v12439_v36 = vld [vmem:[#allocation8 + $0x6c] sm:$0xf] }
  0x72   : > { %2263 = vmatpush.bf16.msrb.mxu2 %v9339_v44  ;;  %2232 = vmatmul.bf16.vlgmr.msra.gmra.mxu3 %v13844_v55  ;;  %v12490_v35 = vld [vmem:[#allocation8 + $0x1fc] sm:$0xf0]  ;;  %v9216_v37 = vld [vmem:[#allocation8 + $0x80] sm:$0xf0]  ;;  %v12487_v38 = vld [vmem:[#allocation8 + $0x1ec] sm:$0xf]  ;;  %v9215_v40 = vor.u32 %v12442_v32, %v9214_v31 }
  0x73   : > { %2276 = vmatpush.bf16.msrb.mxu3 %v9531_v48  ;;  %v9408_v39 = vld [vmem:[#allocation8 + $0x200] sm:$0xf0]  ;;  %v9407_v41 = vor.u32 %v12490_v35, %v9406_v33  ;;  %v9219_v42 = vor.u32 %v12439_v36, %v9216_v37  ;;  %v9190_v43 = vld [vmem:[#allocation8 + $0x38] sm:$0xf]  ;;  %v12436_v44 = vld [vmem:[#allocation8 + $0x4c] sm:$0xf0] }
  0x74   : > { %2238 = vmatpush.bf16.msrb.mxu0 %v9311_v56  ;;  %v9382_v45 = vld [vmem:[#allocation8 + $0x1b8] sm:$0xf]  ;;  %v9411_v46 = vor.u32 %v12487_v38, %v9408_v39  ;;  %v12484_v47 = vld [vmem:[#allocation8 + $0x1cc] sm:$0xf0]  ;;  %v12433_v48 = vld [vmem:[#allocation8 + $0x3c] sm:$0xf]  ;;  %v9191_v53 = vor.u32 %v12436_v44, %v9190_v43 }
  0x75   : > { %2251 = vmatpush.bf16.msrb.mxu1 %v9503_v57  ;;  %v9192_v49 = vld [vmem:[#allocation8 + $0x50] sm:$0xf0]  ;;  %v12481_v50 = vld [vmem:[#allocation8 + $0x1bc] sm:$0xf]  ;;  %v9166_v54 = vld [vmem:[#allocation8 + $0x8] sm:$0xf]  ;;  %v9383_v57 = vor.u32 %v12484_v47, %v9382_v45 }
  0x76   : > { %2264 = vmatpush.bf16.msrb.mxu2 %v9315_v58  ;;  %v9384_v51 = vld [vmem:[#allocation8 + $0x1d0] sm:$0xf0]  ;;  %v12430_v56 = vld [vmem:[#allocation8 + $0x1c] sm:$0xf0]  ;;  %v9195_v58 = vor.u32 %v12433_v48, %v9192_v49  ;;  %v9358_v59 = vld [vmem:[#allocation8 + $0x188] sm:$0xf] }
  0x77   : > { %2277 = vmatpush.bf16.msrb.mxu3 %v9507_v62  ;;  %v12478_v60 = vld [vmem:[#allocation8 + $0x19c] sm:$0xf0]  ;;  %v12427_v61 = vld [vmem:[#allocation8 + $0xc] sm:$0xf]  ;;  %v9387_v62 = vor.u32 %v12481_v50, %v9384_v51  ;;  %v9168_v63 = vld [vmem:[#allocation8 + $0x20] sm:$0xf0] }
  0x78   : > { %2239 = vmatpush.bf16.msrb.mxu0 %v9287_v4  ;;  %v12475_v0 = vld [vmem:[#allocation8 + $0x18c] sm:$0xf]  ;;  %v9360_v1 = vld [vmem:[#allocation8 + $0x1a0] sm:$0xf0]  ;;  %v9342_v2 = vld [vmem:[#allocation8 + $0x160] sm:$0xf]  ;;  %v9359_v9 = vor.u32 %v12478_v60, %v9358_v59 }
  0x79   : > { %2252 = vmatpush.bf16.msrb.mxu1 %v9479_v5  ;;  %v12473_v3 = vld [vmem:[#allocation8 + $0x174] sm:$0xf0]  ;;  %v9534_v4 = vld [vmem:[#allocation8 + $0x2e0] sm:$0xf]  ;;  %v9167_v5 = vor.u32 %v12430_v56, %v9166_v54  ;;  %v12470_v7 = vld [vmem:[#allocation8 + $0x164] sm:$0xf]  ;;  %v9363_v13 = vor.u32 %v12475_v0, %v9360_v1 }
  0x7a   : > { %2265 = vmatpush.bf16.msrb.mxu2 %v9291_v6  ;;  %v12521_v6 = vld [vmem:[#allocation8 + $0x2f4] sm:$0xf0]  ;;  %v9344_v8 = vld [vmem:[#allocation8 + $0x178] sm:$0xf0]  ;;  %v12518_v11 = vld [vmem:[#allocation8 + $0x2e4] sm:$0xf]  ;;  %v9343_v14 = vor.u32 %v12473_v3, %v9342_v2 }
  0x7b   : > { %2278 = vmatpush.bf16.msrb.mxu3 %v9483_v10  ;;  %v9171_v10 = vor.u32 %v12427_v61, %v9168_v63  ;;  %v9536_v12 = vld [vmem:[#allocation8 + $0x2f8] sm:$0xf0]  ;;  %v9535_v15 = vor.u32 %v12521_v6, %v9534_v4  ;;  %v9510_v19 = vld [vmem:[#allocation8 + $0x2b0] sm:$0xf]  ;;  %v12515_v21 = vld [vmem:[#allocation8 + $0x2c4] sm:$0xf0] }
  0x7c   : > { %2240 = vmatpush.bf16.msrb.mxu0 %v9263_v16  ;;  %v9347_v16 = vor.u32 %v12470_v7, %v9344_v8  ;;  %v9539_v20 = vor.u32 %v12518_v11, %v9536_v12  ;;  %v9320_v23 = vld [vmem:[#allocation8 + $0x148] sm:$0xf0]  ;;  %v12512_v24 = vld [vmem:[#allocation8 + $0x2b4] sm:$0xf]  ;;  %v9511_v27 = vor.u32 %v12515_v21, %v9510_v19  ;;  %v9486_v31 = vld [vmem:[#allocation8 + $0x280] sm:$0xf] }
  0x7d   : > { %2253 = vmatpush.bf16.msrb.mxu1 %v9455_v17  ;;  %v9318_v17 = vld [vmem:[#allocation8 + $0x130] sm:$0xf]  ;;  %v9512_v25 = vld [vmem:[#allocation8 + $0x2c8] sm:$0xf0]  ;;  %v12509_v33 = vld [vmem:[#allocation8 + $0x294] sm:$0xf0] }
  0x7e   : > { %2266 = vmatpush.bf16.msrb.mxu2 %v9267_v18  ;;  %v12467_v18 = vld [vmem:[#allocation8 + $0x144] sm:$0xf0]  ;;  %v9515_v32 = vor.u32 %v12512_v24, %v9512_v25  ;;  %v9296_v35 = vld [vmem:[#allocation8 + $0x118] sm:$0xf0]  ;;  %v12506_v36 = vld [vmem:[#allocation8 + $0x284] sm:$0xf]  ;;  %v9487_v39 = vor.u32 %v12509_v33, %v9486_v31 }
  0x7f   : > { %2279 = vmatpush.bf16.msrb.mxu3 %v9459_v22  ;;  %v12464_v22 = vld [vmem:[#allocation8 + $0x134] sm:$0xf]  ;;  %v9319_v26 = vor.u32 %v12467_v18, %v9318_v17  ;;  %v9488_v37 = vld [vmem:[#allocation8 + $0x298] sm:$0xf0]  ;;  %v9462_v43 = vld [vmem:[#allocation8 + $0x250] sm:$0xf] }
  0x80   : > { %2241 = vmatpush.bf16.msrb.mxu0 %v9239_v28  ;;  %v9323_v28 = vor.u32 %v12464_v22, %v9320_v23  ;;  %v9491_v44 = vor.u32 %v12506_v36, %v9488_v37  ;;  %v12503_v45 = vld [vmem:[#allocation8 + $0x264] sm:$0xf0]  ;;  %v9272_v47 = vld [vmem:[#allocation8 + $0xe8] sm:$0xf0]  ;;  %v12500_v48 = vld [vmem:[#allocation8 + $0x254] sm:$0xf] }
  0x81   : > { %2254 = vmatpush.bf16.msrb.mxu1 %v9431_v29  ;;  %v9294_v29 = vld [vmem:[#allocation8 + $0x100] sm:$0xf]  ;;  %v9464_v49 = vld [vmem:[#allocation8 + $0x268] sm:$0xf0]  ;;  %s13861_s20 = sadd.s32 128, %s13855_s29  ;;  %p297_p1 = scmp.gt.s32.totalorder %s13858_s19, 0 }
  0x82   : > { %2267 = vmatpush.bf16.msrb.mxu2 %v9243_v30  ;;  %v12461_v30 = vld [vmem:[#allocation8 + $0x114] sm:$0xf0]  ;;  %15295 = sst [smem:[#allocation31_spill]] %s13861_s20  ;;  %v9246_v51 = vld [vmem:[#allocation8 + $0xa0] sm:$0xf]  ;;  %v9467_v59 = vor.u32 %v12500_v48, %v9464_v49  ;;  %s13868_s23 = sadd.s32 256, %s13855_s29 }
  0x83   : > { %2280 = vmatpush.bf16.msrb.mxu3 %v9435_v34  ;;  %v12458_v34 = vld [vmem:[#allocation8 + $0x104] sm:$0xf]  ;;  %v9295_v38 = vor.u32 %v12461_v30, %v9294_v29  ;;  %v12449_v56 = vld [vmem:[#allocation8 + $0xb4] sm:$0xf0]  ;;  %v9248_v61 = vld [vmem:[#allocation8 + $0xb8] sm:$0xf0] }
  0x84   : > { %2242 = vmatpush.bf16.msrb.mxu0 %v9215_v40  ;;  %v9299_v40 = vor.u32 %v12458_v34, %v9296_v35  ;;  %v12446_v60 = vld [vmem:[#allocation8 + $0xa4] sm:$0xf]  ;;  %s13864_s22 = sld [smem:[#allocation4 + %s13861_s20]]  ;;  %v9440_v63 = vld [vmem:[#allocation8 + $0x238] sm:$0xf0]  ;;  %v9247_v0 = vor.u32 %v12449_v56, %v9246_v51  ;;  %s13871_s9 = sadd.s32 384, %s13855_s29 }
  0x85   : > { %2255 = vmatpush.bf16.msrb.mxu1 %v9407_v41  ;;  %v9270_v41 = vld [vmem:[#allocation8 + $0xd0] sm:$0xf]  ;;  %v9251_v2 = vor.u32 %v12446_v60, %v9248_v61  ;;  %v12443_v4 = vld [vmem:[#allocation8 + $0x84] sm:$0xf0]  ;;  %v12440_v8 = vld [vmem:[#allocation8 + $0x74] sm:$0xf] }
  0x86   : > { %2268 = vmatpush.bf16.msrb.mxu2 %v9219_v42  ;;  %v12455_v42 = vld [vmem:[#allocation8 + $0xe4] sm:$0xf0]  ;;  %v9222_v3 = vld [vmem:[#allocation8 + $0x70] sm:$0xf]  ;;  %v9416_v11 = vld [vmem:[#allocation8 + $0x208] sm:$0xf0] }
  0x87   : > { %2281 = vmatpush.bf16.msrb.mxu3 %v9411_v46  ;;  %v12452_v46 = vld [vmem:[#allocation8 + $0xd4] sm:$0xf]  ;;  %v9271_v50 = vor.u32 %v12455_v42, %v9270_v41  ;;  %v12491_v7 = vld [vmem:[#allocation8 + $0x204] sm:$0xf0]  ;;  %v9223_v12 = vor.u32 %v12443_v4, %v9222_v3  ;;  %v9390_v17 = vld [vmem:[#allocation8 + $0x1c0] sm:$0xf] }
  0x88   : > { %2243 = vmatpush.bf16.msrb.mxu0 %v9191_v53  ;;  %v9463_v53 = vor.u32 %v12503_v45, %v9462_v43  ;;  %v9275_v54 = vor.u32 %v12452_v46, %v9272_v47  ;;  %v12485_v18 = vld [vmem:[#allocation8 + $0x1d4] sm:$0xf0]  ;;  %15296 = sst [smem:[#allocation32_spill]] %s13868_s23  ;;  %v9200_v21 = vld [vmem:[#allocation8 + $0x58] sm:$0xf0]  ;;  %p8765_p4 = scmp.lt.s32.totalorder %s13858_s19, 63 }
  0x89   : > { %2256 = vmatpush.bf16.msrb.mxu1 %v9383_v57  ;;  %v9438_v57 = vld [vmem:[#allocation8 + $0x220] sm:$0xf]  ;;  %15297 = sst [smem:[#allocation33_spill]] %s13871_s9  ;;  %v12482_v22 = vld [vmem:[#allocation8 + $0x1c4] sm:$0xf]  ;;  %s13893_s30 = sadd.s32 512, %s13855_s29 }
  0x8a   : > { %2269 = vmatpush.bf16.msrb.mxu2 %v9195_v58  ;;  %v12497_v58 = vld [vmem:[#allocation8 + $0x234] sm:$0xf0]  ;;  %p321_p6 = scmp.gt.s32.totalorder %s13864_s22, 0  ;;  %v9392_v23 = vld [vmem:[#allocation8 + $0x1d8] sm:$0xf0]  ;;  %s13879_s12 = sld [smem:[#allocation4 + %s13868_s23]] }
  0x8b   : > { %2282 = vmatpush.bf16.msrb.mxu3 %v9387_v62  ;;  %v12494_v62 = vld [vmem:[#allocation8 + $0x224] sm:$0xf]  ;;  %v9439_v1 = vor.u32 %v12497_v58, %v9438_v57  ;;  %s298_s13 = scalar_select %p297_p1, %s13858_s19, 0  ;;  %v9174_v25 = vld [vmem:[#allocation8 + $0x10] sm:$0xf]  ;;  %v9395_v31 = vor.u32 %v12482_v22, %v9392_v23 }
  0x8c   : > { %2244 = vmatpush.bf16.msrb.mxu0 %v9167_v5  ;;  %v9414_v5 = vld [vmem:[#allocation8 + $0x1f0] sm:$0xf]  ;;  %v9443_v6 = vor.u32 %v12494_v62, %v9440_v63  ;;  %v12479_v30 = vld [vmem:[#allocation8 + $0x1a4] sm:$0xf0]  ;;  %p8772_p13 = scmp.lt.s32.totalorder %s13864_s22, 63  ;;  %s13883_s14 = sld [smem:[#allocation4 + %s13871_s9]] }
  0x8d   : > { %2257 = vmatpush.bf16.msrb.mxu1 %v9359_v9  ;;  %v9224_v9 = vld [vmem:[#allocation8 + $0x88] sm:$0xf0]  ;;  %v9366_v29 = vld [vmem:[#allocation8 + $0x190] sm:$0xf]  ;;  %s322_s15 = scalar_select %p321_p6, %s13864_s22, 0 }
  0x8e   : > { %2270 = vmatpush.bf16.msrb.mxu2 %v9171_v10  ;;  %v12488_v10 = vld [vmem:[#allocation8 + $0x1f4] sm:$0xf]  ;;  %v9176_v33 = vld [vmem:[#allocation8 + $0x28] sm:$0xf0]  ;;  %s15407_s13 = smov (!%p8765_p4, %s298_s13), 63  ;;  %15298 = sst [smem:[#allocation34_spill]] %s13893_s30  ;;  %v9367_v37 = vor.u32 %v12479_v30, %v9366_v29 }
  0x8f   : > { %2283 = vmatpush.bf16.msrb.mxu3 %v9363_v13  ;;  %2245 = vmatmul.bf16.vlgmr.msrb.gmra.mxu0 %v13842_v52  ;;  %v9198_v13 = vld [vmem:[#allocation8 + $0x40] sm:$0xf]  ;;  %v9419_v19 = vor.u32 %v12488_v10, %v9416_v11  ;;  %v12476_v34 = vld [vmem:[#allocation8 + $0x194] sm:$0xf]  ;;  %v9368_v35 = vld [vmem:[#allocation8 + $0x1a8] sm:$0xf0] }
  0x90   : > { %2289 = vmatpush.bf16.msra.mxu0 %v9343_v14  ;;  %2258 = vmatmul.bf16.vlgmr.msrb.gmra.mxu1 %v13844_v55  ;;  %v12437_v14 = vld [vmem:[#allocation8 + $0x54] sm:$0xf0]  ;;  %s13896_s11 = sadd.s32 640, %s13855_s29  ;;  %s15409_s15 = smov (!%p8772_p13, %s322_s15), 63  ;;  %v12567_v3 = vld [vmem:[#allocation8 + $0x164] sm:$0xf0] }
  0x91   : > { %2302 = vmatpush.bf16.msra.mxu1 %v9535_v15  ;;  %2271 = vmatmul.bf16.vlgmr.msrb.gmra.mxu2 %v13842_v52  ;;  %v9415_v15 = vor.u32 %v12491_v7, %v9414_v5  ;;  %v9199_v24 = vor.u32 %v12437_v14, %v9198_v13  ;;  %15299 = sst [smem:[#allocation35_spill]] %s13896_s11  ;;  %s301_s17 = sshra.s32 %s15407_s13, 3  ;;  %v12564_v4 = vld [vmem:[#allocation8 + $0x154] sm:$0xf]  ;;  %v9716_v5 = vld [vmem:[#allocation8 + $0x168] sm:$0xf0] }
  0x92   : > { %2315 = vmatpush.bf16.msra.mxu2 %v9347_v16  ;;  %2284 = vmatmul.bf16.vlgmr.msrb.gmra.mxu3 %v13844_v55  ;;  %v9227_v16 = vor.u32 %v12440_v8, %v9224_v9  ;;  %s13904_s19 = sld [smem:[#allocation4 + %s13893_s30]]  ;;  %p342_p2 = scmp.gt.s32.totalorder %s13879_s12, 0  ;;  %v9719_v7 = vor.u32 %v12564_v4, %v9716_v5  ;;  %v9690_v8 = vld [vmem:[#allocation8 + $0x120] sm:$0xf]  ;;  %v12561_v9 = vld [vmem:[#allocation8 + $0x134] sm:$0xf0] }
  0x93   : > { %2328 = vmatpush.bf16.msra.mxu3 %v9539_v20  ;;  %v12434_v20 = vld [vmem:[#allocation8 + $0x44] sm:$0xf]  ;;  %s13908_s8 = sld [smem:[#allocation4 + %s13896_s11]]  ;;  %s304_s1 = sand.u32 7, %s15407_s13  ;;  %v9692_v11 = vld [vmem:[#allocation8 + $0x138] sm:$0xf0] }
  0x94   : > { %2290 = vmatpush.bf16.msra.mxu0 %v9319_v26  ;;  %v12431_v26 = vld [vmem:[#allocation8 + $0x24] sm:$0xf0]  ;;  %s13912_s22 = sadd.s32 768, %s13855_s29  ;;  %s8770_s2 = smul.u32 48, %s301_s17  ;;  %v12558_v10 = vld [vmem:[#allocation8 + $0x124] sm:$0xf] }
  0x95   : > { %2303 = vmatpush.bf16.msra.mxu1 %v9511_v27  ;;  %v9391_v27 = vor.u32 %v12485_v18, %v9390_v17  ;;  %v9175_v36 = vor.u32 %v12431_v26, %v9174_v25  ;;  %15300 = sst [smem:[#allocation36_spill]] %s13912_s22  ;;  %s325_s4 = sshra.s32 %s15409_s15, 3  ;;  %v9695_v13 = vor.u32 %v12558_v10, %v9692_v11  ;;  %v14003_v14 = vld [vmem:[%s15235_s3] sm:$0x3f]  ;;  %v12612_v17 = vld [vmem:[#allocation8 + $0x2d4] sm:$0xf] }
  0x96   : > { %2316 = vmatpush.bf16.msra.mxu2 %v9323_v28  ;;  %v9203_v28 = vor.u32 %v12434_v20, %v9200_v21  ;;  %p8779_p8 = scmp.lt.s32.totalorder %s13879_s12, 63  ;;  %p363_p9 = scmp.gt.s32.totalorder %s13883_s14, 0  ;;  %v9666_v21 = vld [vmem:[#allocation8 + $0xf0] sm:$0xf]  ;;  %v12555_v22 = vld [vmem:[#allocation8 + $0x104] sm:$0xf0] }
  0x97   : > { %2329 = vmatpush.bf16.msra.mxu3 %v9515_v32  ;;  %v12428_v32 = vld [vmem:[#allocation8 + $0x14] sm:$0xf]  ;;  %s15411_s12 = smov (!%p342_p2, %s13879_s12), 0  ;;  %s328_s13 = sand.u32 7, %s15409_s15  ;;  %v1693_v23 = vperm.slane %v14003_v14, 0 }
  0x98   : > { %2291 = vmatpush.bf16.msra.mxu0 %v9295_v38  ;;  %v9179_v38 = vor.u32 %v12428_v32, %v9176_v33  ;;  %s8777_s17 = smul.u32 48, %s325_s4  ;;  %s13925_s0 = sadd.s32 %s8770_s2, %s304_s1  ;;  %v12552_v25 = vld [vmem:[#allocation8 + $0xf4] sm:$0xf]  ;;  %v9668_v26 = vld [vmem:[#allocation8 + $0x108] sm:$0xf0]  ;;  %v1694_v33 = vperm.slane %v14003_v14, 1 }
  0x99   : > { %2304 = vmatpush.bf16.msra.mxu1 %v9487_v39  ;;  %v9371_v39 = vor.u32 %v12476_v34, %v9368_v35  ;;  %p8786_p10 = scmp.lt.s32.totalorder %s13883_s14, 63  ;;  %s15413_s14 = smov (!%p363_p9, %s13883_s14), 0  ;;  %v9882_v29 = vld [vmem:[#allocation8 + $0x2a0] sm:$0xf]  ;;  %v12609_v30 = vld [vmem:[#allocation8 + $0x2b4] sm:$0xf0] }
  0x9a   : > { %2317 = vmatpush.bf16.msra.mxu2 %v9299_v40  ;;  %s15415_s12 = smov (!%p8779_p8, %s15411_s12), 63  ;;  %s425_s27 = sld [smem:[#allocation4 + %s13912_s22]]  ;;  %v312_v40 = vlaneseq  ;;  %v9883_v34 = vor.u32 %v12609_v30, %v9882_v29  ;;  %v9884_v35 = vld [vmem:[#allocation8 + $0x2b8] sm:$0xf0]  ;;  %v12534_v10 = vld [vmem:[#allocation8 + $0x64] sm:$0xf] }
  0x9b   : > { %2330 = vmatpush.bf16.msra.mxu3 %v9491_v44  ;;  %p384_p11 = scmp.gt.s32.totalorder %s13904_s19, 0  ;;  %s13934_s26 = sadd.s32 896, %s13855_s29  ;;  %v9572_v29 = vld [vmem:[#allocation8 + $0x48] sm:$0xf0] }
  0x9c   : > { %2292 = vmatpush.bf16.msra.mxu0 %v9271_v50  ;;  %15301 = sst [smem:[#allocation37_spill]] %s13934_s26  ;;  %s15417_s14 = smov (!%p8786_p10, %s15413_s14), 63  ;;  %vm13960_vm0 = vcmp.lt.s32.totalorder %v312_v40, 768 }
  0x9d   : > { %2305 = vmatpush.bf16.msra.mxu1 %v9463_v53  ;;  %s13938_s21 = sadd.s32 %s8777_s17, %s328_s13  ;;  %p405_p0 = scmp.gt.s32.totalorder %s13908_s8, 0 }
  0x9e   : > { %2318 = vmatpush.bf16.msra.mxu2 %v9275_v54  ;;  %p8793_p3 = scmp.lt.s32.totalorder %s13904_s19, 63  ;;  %s446_s1 = sld [smem:[#allocation4 + %s13934_s26]] }
  0x9f   : > { %2331 = vmatpush.bf16.msra.mxu3 %v9467_v59  ;;  %s15419_s19 = smov (!%p384_p11, %s13904_s19), 0  ;;  %p8800_p5 = scmp.lt.s32.totalorder %s13908_s8, 63 }
  0xa0   : > { %2293 = vmatpush.bf16.msra.mxu0 %v9247_v0  ;;  %s15421_s8 = smov (!%p405_p0, %s13908_s8), 0  ;;  %s346_s2 = sshra.s32 %s15415_s12, 3 }
  0xa1   : > { %2306 = vmatpush.bf16.msra.mxu1 %v9439_v1  ;;  %p426_p1 = scmp.gt.s32.totalorder %s425_s27, 0  ;;  %s15423_s19 = smov (!%p8793_p3, %s15419_s19), 63 }
  0xa2   : > { %2319 = vmatpush.bf16.msra.mxu2 %v9251_v2  ;;  %s349_s4 = sand.u32 7, %s15415_s12  ;;  %s15425_s8 = smov (!%p8800_p5, %s15421_s8), 63  ;;  %v9714_v2 = vld [vmem:[#allocation8 + $0x150] sm:$0xf] }
  0xa3   : > { %2332 = vmatpush.bf16.msra.mxu3 %v9443_v6  ;;  %s427_s15 = scalar_select %p426_p1, %s425_s27, 0  ;;  %v9715_v6 = vor.u32 %v12567_v3, %v9714_v2 }
  0xa4   : > { %2294 = vmatpush.bf16.msra.mxu0 %v9223_v12  ;;  %p447_p4 = scmp.gt.s32.totalorder %s446_s1, 0  ;;  %p8807_p6 = scmp.lt.s32.totalorder %s425_s27, 63  ;;  %v9691_v12 = vor.u32 %v12561_v9, %v9690_v8  ;;  %v9594_v8 = vld [vmem:[#allocation8 + $0x60] sm:$0xf]  ;;  %v12537_v9 = vld [vmem:[#allocation8 + $0x74] sm:$0xf0] }
  0xa5   : > { %2307 = vmatpush.bf16.msra.mxu1 %v9415_v15  ;;  %p8814_p13 = scmp.lt.s32.totalorder %s446_s1, 63  ;;  %s8784_s13 = smul.u32 48, %s346_s2  ;;  %v9906_v15 = vld [vmem:[#allocation8 + $0x2d0] sm:$0xf]  ;;  %v9595_v11 = vor.u32 %v12537_v9, %v9594_v8  ;;  %v12613_v9 = vld [vmem:[#allocation8 + $0x2dc] sm:$0xf] }
  0xa6   : > { %2320 = vmatpush.bf16.msra.mxu2 %v9227_v16  ;;  %s15427_s1 = smov (!%p447_p4, %s446_s1), 0  ;;  %s367_s17 = sshra.s32 %s15417_s14, 3  ;;  %v12615_v16 = vld [vmem:[#allocation8 + $0x2e4] sm:$0xf0]  ;;  %v12616_v8 = vld [vmem:[#allocation8 + $0x2ec] sm:$0xf0] }
  0xa7   : > { %2333 = vmatpush.bf16.msra.mxu3 %v9419_v19  ;;  %s388_s28 = sshra.s32 %s15423_s19, 3  ;;  %s409_s10 = sshra.s32 %s15425_s8, 3  ;;  %v9907_v18 = vor.u32 %v12615_v16, %v9906_v15  ;;  %v9908_v19 = vld [vmem:[#allocation8 + $0x2e8] sm:$0xf0]  ;;  %v9810_v16 = vld [vmem:[#allocation8 + $0x210] sm:$0xf] }
  0xa8   : > { %2295 = vmatpush.bf16.msra.mxu0 %v9199_v24  ;;  %s15429_s15 = smov (!%p8807_p6, %s427_s15), 63  ;;  %s15431_s1 = smov (!%p8814_p13, %s15427_s1), 63  ;;  %v9911_v20 = vor.u32 %v12612_v17, %v9908_v19  ;;  %v9667_v24 = vor.u32 %v12555_v22, %v9666_v21  ;;  %v12591_v17 = vld [vmem:[#allocation8 + $0x224] sm:$0xf0]  ;;  %v12588_v21 = vld [vmem:[#allocation8 + $0x214] sm:$0xf] }
  0xa9   : > { %2308 = vmatpush.bf16.msra.mxu1 %v9391_v27  ;;  %s370_s25 = sand.u32 7, %s15417_s14  ;;  %s8791_s24 = smul.u32 48, %s367_s17  ;;  %v9812_v22 = vld [vmem:[#allocation8 + $0x228] sm:$0xf0] }
  0xaa   : > { %2321 = vmatpush.bf16.msra.mxu2 %v9203_v28  ;;  %s391_s6 = sand.u32 7, %s15423_s19  ;;  %s8798_s5 = smul.u32 48, %s388_s28  ;;  %v9671_v28 = vor.u32 %v12552_v25, %v9668_v26  ;;  %v9570_v25 = vld [vmem:[#allocation8 + $0x30] sm:$0xf]  ;;  %v12531_v26 = vld [vmem:[#allocation8 + $0x44] sm:$0xf0] }
  0xab   : > { %2334 = vmatpush.bf16.msra.mxu3 %v9395_v31  ;;  %s8805_s7 = smul.u32 48, %s409_s10  ;;  %s430_s26 = sshra.s32 %s15429_s15, 3  ;;  %v12606_v31 = vld [vmem:[#allocation8 + $0x2a4] sm:$0xf] }
  0xac   : > { %2296 = vmatpush.bf16.msra.mxu0 %v9175_v36  ;;  %s412_s12 = sand.u32 7, %s15425_s8  ;;  %s451_s22 = sshra.s32 %s15431_s1, 3  ;;  %v9887_v36 = vor.u32 %v12606_v31, %v9884_v35 }
  0xad   : > { %2309 = vmatpush.bf16.msra.mxu1 %v9367_v37  ;;  %s352_s11 = sadd.s32 %s8784_s13, %s349_s4  ;;  %s373_s27 = sadd.s32 %s8791_s24, %s370_s25  ;;  %v9642_v37 = vld [vmem:[#allocation8 + $0xc0] sm:$0xf] }
  0xae   : > { %2322 = vmatpush.bf16.msra.mxu2 %v9179_v38  ;;  %s13950_s30 = sadd.s32 %s8798_s5, %s391_s6  ;;  %s8812_s2 = smul.u32 48, %s430_s26  ;;  %v12549_v38 = vld [vmem:[#allocation8 + $0xd4] sm:$0xf0] }
  0xaf   : > { %2335 = vmatpush.bf16.msra.mxu3 %v9371_v39  ;;  %2297 = vmatmul.bf16.vlgmr.msra.gmra.mxu0 %v13842_v52  ;;  %s13952_s9 = sadd.s32 %s8805_s7, %s412_s12  ;;  %s8819_s23 = smul.u32 48, %s451_s22  ;;  %v12546_v39 = vld [vmem:[#allocation8 + $0xc4] sm:$0xf] }
  0xb0   : > { %2310 = vmatmul.bf16.vlgmr.msra.gmra.mxu1 %v13844_v55  ;;  %s433_s20 = sand.u32 7, %s15429_s15  ;;  %s454_s29 = sand.u32 7, %s15431_s1  ;;  %3035 = vmatpush.bf16.msrb.mxu0 %v9715_v6  ;;  %v9836_v6 = vld [vmem:[#allocation8 + $0x258] sm:$0xf0] }
  0xb1   : > { %2323 = vmatmul.bf16.vlgmr.msra.gmra.mxu2 %v13842_v52  ;;  %s13954_s14 = sadd.s32 %s8812_s2, %s433_s20  ;;  %s13956_s19 = sadd.s32 %s8819_s23, %s454_s29  ;;  %3048 = vmatpush.bf16.msrb.mxu1 %v9907_v18 }
  0xb2   : > { %2336 = vmatmul.bf16.vlgmr.msra.gmra.mxu3 %v13844_v55  ;;  %s308_s28 = scalar_lea.vmem [#allocation5], %s13925_s0  ;;  %s332_s10 = scalar_lea.vmem [#allocation5], %s13938_s21  ;;  %3061 = vmatpush.bf16.msrb.mxu2 %v9719_v7 }
  0xb3   : > { %v309_v52 = vld [vmem:[%s308_s28] ss:$8 sm:$0xf]  ;;  %s353_s5 = scalar_lea.vmem [#allocation5], %s352_s11  ;;  %s374_s6 = scalar_lea.vmem [#allocation5], %s373_s27  ;;  %3074 = vmatpush.bf16.msrb.mxu3 %v9911_v20  ;;  %v9811_v20 = vor.u32 %v12591_v17, %v9810_v16 }
  0xb4   : > { %v310_v55 = vld [vmem:[%s308_s28] ss:$8 sm:$0x30]  ;;  %s395_s25 = scalar_lea.vmem [#allocation5], %s13950_s30  ;;  %s416_s26 = scalar_lea.vmem [#allocation5], %s13952_s9  ;;  %3036 = vmatpush.bf16.msrb.mxu0 %v9691_v12 }
  0xb5   : > { %v311_v41 = vor.u32 %v310_v55, %v309_v52  ;;  %v333_v42 = vld [vmem:[%s332_s10] ss:$8 sm:$0xf]  ;;  %s437_s7 = scalar_lea.vmem [#allocation5], %s13954_s14  ;;  %s458_s21 = scalar_lea.vmem [#allocation5], %s13956_s19  ;;  %3049 = vmatpush.bf16.msrb.mxu1 %v9883_v34  ;;  %v9643_v52 = vor.u32 %v12549_v38, %v9642_v37 }
  0xb6   : > { %v334_v43 = vld [vmem:[%s332_s10] ss:$8 sm:$0x30]  ;;  %3062 = vmatpush.bf16.msrb.mxu2 %v9695_v13  ;;  %v9644_v55 = vld [vmem:[#allocation8 + $0xd8] sm:$0xf0]  ;;  %s8761_s8 = sshll.u32 %s13829_s16, 7 }
  0xb7   : > { %v335_v45 = vor.u32 %v334_v43, %v333_v42  ;;  %v354_v46 = vld [vmem:[%s353_s5] ss:$8 sm:$0xf]  ;;  %316 = vst.msk [vmem:[#allocation2] ss:$8 sm:$0xf] %vm13960_vm0, %v311_v41  ;;  %3075 = vmatpush.bf16.msrb.mxu3 %v9887_v36 }
  0xb8   : > { %v355_v47 = vld [vmem:[%s353_s5] ss:$8 sm:$0x30]  ;;  %317 = vst.msk [vmem:[#allocation2] ss:$8 sm:$0x30] %vm13960_vm0, %v311_v41  ;;  %3037 = vmatpush.bf16.msrb.mxu0 %v9667_v24  ;;  %v9647_v41 = vor.u32 %v12546_v39, %v9644_v55  ;;  %v9815_v24 = vor.u32 %v12588_v21, %v9812_v22 }
  0xb9   : > { %337 = vst.msk [vmem:[#allocation2 + $0x1] ss:$8 sm:$0xf] %vm13960_vm0, %v335_v45  ;;  %v356_v48 = vor.u32 %v355_v47, %v354_v46  ;;  %v375_v49 = vld [vmem:[%s374_s6] ss:$8 sm:$0xf] }
  0xba   : > { %v376_v50 = vld [vmem:[%s374_s6] ss:$8 sm:$0x30]  ;;  %338 = vst.msk [vmem:[#allocation2 + $0x1] ss:$8 sm:$0x30] %vm13960_vm0, %v335_v45  ;;  %3063 = vmatpush.bf16.msrb.mxu2 %v9671_v28  ;;  %v9571_v28 = vor.u32 %v12531_v26, %v9570_v25 }
  0xbb   : > { %v396_v51 = vld [vmem:[%s395_s25] ss:$8 sm:$0xf]  ;;  %358 = vst.msk [vmem:[#allocation2 + $0x2] ss:$8 sm:$0xf] %vm13960_vm0, %v356_v48  ;;  %v377_v53 = vor.u32 %v376_v50, %v375_v49 }
  0xbc   : > { %v397_v54 = vld [vmem:[%s395_s25] ss:$8 sm:$0x30]  ;;  %359 = vst.msk [vmem:[#allocation2 + $0x2] ss:$8 sm:$0x30] %vm13960_vm0, %v356_v48  ;;  %3038 = vmatpush.bf16.msrb.mxu0 %v9643_v52 }
  0xbd   : > { %v398_v56 = vor.u32 %v397_v54, %v396_v51  ;;  %v417_v57 = vld [vmem:[%s416_s26] ss:$8 sm:$0xf]  ;;  %379 = vst.msk [vmem:[#allocation2 + $0x3] ss:$8 sm:$0xf] %vm13960_vm0, %v377_v53 }
  0xbe   : > { %v418_v58 = vld [vmem:[%s416_s26] ss:$8 sm:$0x30]  ;;  %380 = vst.msk [vmem:[#allocation2 + $0x3] ss:$8 sm:$0x30] %vm13960_vm0, %v377_v53  ;;  %3064 = vmatpush.bf16.msrb.mxu2 %v9647_v41 }
  0xbf   : > { %v419_v59 = vor.u32 %v418_v58, %v417_v57  ;;  %v438_v60 = vld [vmem:[%s437_s7] ss:$8 sm:$0xf]  ;;  %400 = vst.msk [vmem:[#allocation2 + $0x4] ss:$8 sm:$0xf] %vm13960_vm0, %v398_v56 }
  0xc0   : > { %v439_v61 = vld [vmem:[%s437_s7] ss:$8 sm:$0x30]  ;;  %401 = vst.msk [vmem:[#allocation2 + $0x4] ss:$8 sm:$0x30] %vm13960_vm0, %v398_v56 }
  0xc1   : > { %421 = vst.msk [vmem:[#allocation2 + $0x5] ss:$8 sm:$0xf] %vm13960_vm0, %v419_v59  ;;  %v440_v62 = vor.u32 %v439_v61, %v438_v60  ;;  %v459_v63 = vld [vmem:[%s458_s21] ss:$8 sm:$0xf] }
  0xc2   : > { %v460_v0 = vld [vmem:[%s458_s21] ss:$8 sm:$0x30]  ;;  %422 = vst.msk [vmem:[#allocation2 + $0x5] ss:$8 sm:$0x30] %vm13960_vm0, %v419_v59 }
  0xc3   : > { %442 = vst.msk [vmem:[#allocation2 + $0x6] ss:$8 sm:$0xf] %vm13960_vm0, %v440_v62  ;;  %v461_v1 = vor.u32 %v460_v0, %v459_v63  ;;  %v9858_v42 = vld [vmem:[#allocation8 + $0x270] sm:$0xf]  ;;  %s14101_s29 = scalar_lea.vmem [#allocation11], %s8761_s8 }
  0xc4   : > { %443 = vst.msk [vmem:[#allocation2 + $0x6] ss:$8 sm:$0x30] %vm13960_vm0, %v440_v62  ;;  %v12603_v43 = vld [vmem:[#allocation8 + $0x284] sm:$0xf0]  ;;  %s15313_s20 = sld [smem:[#allocation31_spill]] }
  0xc5   : > { %463 = vst.msk [vmem:[#allocation2 + $0x7] ss:$8 sm:$0xf] %vm13960_vm0, %v461_v1  ;;  %v9859_v46 = vor.u32 %v12603_v43, %v9858_v42  ;;  %v12600_v47 = vld [vmem:[#allocation8 + $0x274] sm:$0xf]  ;;  %s15314_s9 = sld [smem:[#allocation32_spill]] }
  0xc6   : > { %464 = vst.msk [vmem:[#allocation2 + $0x7] ss:$8 sm:$0x30] %vm13960_vm0, %v461_v1  ;;  %v9860_v48 = vld [vmem:[#allocation8 + $0x288] sm:$0xf0]  ;;  %s15315_s22 = sld [smem:[#allocation33_spill]] }
  0xc7   : > { %v9863_v51 = vor.u32 %v12600_v47, %v9860_v48  ;;  %v9618_v53 = vld [vmem:[#allocation8 + $0x90] sm:$0xf]  ;;  %v12543_v54 = vld [vmem:[#allocation8 + $0xa4] sm:$0xf0]  ;;  %v12540_v56 = vld [vmem:[#allocation8 + $0x94] sm:$0xf]  ;;  %3050 = vmatpush.bf16.msrb.mxu1 %v9859_v46 }
  0xc8   : > { %v9619_v57 = vor.u32 %v12543_v54, %v9618_v53  ;;  %v9620_v58 = vld [vmem:[#allocation8 + $0xa8] sm:$0xf0]  ;;  %v9834_v62 = vld [vmem:[#allocation8 + $0x240] sm:$0xf]  ;;  %v12597_v63 = vld [vmem:[#allocation8 + $0x254] sm:$0xf0] }
  0xc9   : > { %3076 = vmatpush.bf16.msrb.mxu3 %v9863_v51  ;;  %v9623_v61 = vor.u32 %v12540_v56, %v9620_v58  ;;  %v12594_v0 = vld [vmem:[#allocation8 + $0x244] sm:$0xf]  ;;  %v9835_v5 = vor.u32 %v12597_v63, %v9834_v62  ;;  %v9596_v12 = vld [vmem:[#allocation8 + $0x78] sm:$0xf0]  ;;  %v9546_v39 = vld [vmem:[#allocation8] sm:$0xf] }
  0xca   : > { %3039 = vmatpush.bf16.msrb.mxu0 %v9619_v57  ;;  %v9839_v7 = vor.u32 %v12594_v0, %v9836_v6  ;;  %v9599_v15 = vor.u32 %v12534_v10, %v9596_v12  ;;  %v12582_v36 = vld [vmem:[#allocation8 + $0x1e4] sm:$0xf]  ;;  %v9788_v37 = vld [vmem:[#allocation8 + $0x1f8] sm:$0xf0]  ;;  %v12525_v52 = vld [vmem:[#allocation8 + $0x14] sm:$0xf0] }
  0xcb   : > { %3065 = vmatpush.bf16.msrb.mxu2 %v9623_v61  ;;  %3051 = vmatpush.bf16.msrb.mxu1 %v9835_v5  ;;  %v9791_v38 = vor.u32 %v12582_v36, %v9788_v37  ;;  %v12522_v55 = vld [vmem:[#allocation8 + $0x4] sm:$0xf]  ;;  %v9548_v41 = vld [vmem:[#allocation8 + $0x18] sm:$0xf0]  ;;  %v9722_v42 = vld [vmem:[#allocation8 + $0x158] sm:$0xf] }
  0xcc   : > { %v1587_v1 = vld [vmem:[#allocation2] sm:$0xff]  ;;  %v1588_v2 = vld [vmem:[#allocation2 + $0x8] sm:$0xff]  ;;  %v12568_v43 = vld [vmem:[#allocation8 + $0x16c] sm:$0xf0]  ;;  %v1695_v6 = vperm.slane %v14003_v14, 2  ;;  %s485_s30 = sadd.s32 1, %s15313_s20 }
  0xcd   : > { %3077 = vmatpush.bf16.msrb.mxu3 %v9839_v7  ;;  %v9723_v46 = vor.u32 %v12568_v43, %v9722_v42  ;;  %v12565_v47 = vld [vmem:[#allocation8 + $0x15c] sm:$0xf]  ;;  %v9724_v48 = vld [vmem:[#allocation8 + $0x170] sm:$0xf0]  ;;  %v12579_v51 = vld [vmem:[#allocation8 + $0x1c4] sm:$0xf0] }
  0xce   : > { %3040 = vmatpush.bf16.msrb.mxu0 %v9595_v11  ;;  %v12576_v53 = vld [vmem:[#allocation8 + $0x1b4] sm:$0xf]  ;;  %v9764_v56 = vld [vmem:[#allocation8 + $0x1c8] sm:$0xf0]  ;;  %v9698_v58 = vld [vmem:[#allocation8 + $0x128] sm:$0xf] }
  0xcf   : > { %3066 = vmatpush.bf16.msrb.mxu2 %v9599_v15  ;;  %3052 = vmatpush.bf16.msrb.mxu1 %v9811_v20  ;;  %v9767_v57 = vor.u32 %v12576_v53, %v9764_v56  ;;  %v9700_v62 = vld [vmem:[#allocation8 + $0x140] sm:$0xf0]  ;;  %v9738_v63 = vld [vmem:[#allocation8 + $0x180] sm:$0xf]  ;;  %v12573_v0 = vld [vmem:[#allocation8 + $0x194] sm:$0xf0] }
  0xd0   : > { %v9914_v5 = vld [vmem:[#allocation8 + $0x2d8] sm:$0xf]  ;;  %v9916_v12 = vld [vmem:[#allocation8 + $0x2f0] sm:$0xf0]  ;;  %v12556_v16 = vld [vmem:[#allocation8 + $0x10c] sm:$0xf0] }
  0xd1   : > { %3078 = vmatpush.bf16.msrb.mxu3 %v9815_v24  ;;  %v9915_v11 = vor.u32 %v12616_v8, %v9914_v5  ;;  %v9919_v15 = vor.u32 %v12613_v9, %v9916_v12  ;;  %v12553_v17 = vld [vmem:[#allocation8 + $0xfc] sm:$0xf]  ;;  %v9890_v22 = vld [vmem:[#allocation8 + $0x2a8] sm:$0xf]  ;;  %v12607_v24 = vld [vmem:[#allocation8 + $0x2ac] sm:$0xf] }
  0xd2   : > { %3041 = vmatpush.bf16.msrb.mxu0 %v9571_v28  ;;  %v12547_v36 = vld [vmem:[#allocation8 + $0xcc] sm:$0xf]  ;;  %v12601_v42 = vld [vmem:[#allocation8 + $0x27c] sm:$0xf]  ;;  %v9628_v56 = vld [vmem:[#allocation8 + $0xb0] sm:$0xf0] }
  0xd3   : > { %v12535_v8 = vld [vmem:[#allocation8 + $0x6c] sm:$0xf]  ;;  %s486_s1 = sld [smem:[#allocation4 + %s485_s30]]  ;;  %s505_s4 = sadd.s32 1, %s15314_s9 }
  0xd4   : > { %s15316_s15 = sld [smem:[#allocation34_spill]]  ;;  %s525_s17 = sadd.s32 1, %s15315_s22 }
  0xd5   : > { %3079 = vmatpush.bf16.msrb.mxu3 %v9791_v38  ;;  %v1696_v38 = vperm.slane %v14003_v14, 3  ;;  %s14125_s13 = sld [smem:[#allocation4 + %s505_s4]] }
  0xd6   : > { %s15317_s12 = sld [smem:[#allocation35_spill]] }
  0xd7   : > { %s526_s27 = sld [smem:[#allocation4 + %s525_s17]] }
  0xd8   : > { %s15318_s2 = sld [smem:[#allocation36_spill]] }
  0xd9   : > { %3080 = vmatpush.bf16.msrb.mxu3 %v9767_v57  ;;  %p487_p8 = scmp.gt.s32.totalorder %s486_s1, 0  ;;  %p8826_p10 = scmp.lt.s32.totalorder %s486_s1, 63 }
  0xda   : > { %s15319_s14 = sld [smem:[#allocation37_spill]]  ;;  %s545_s28 = sadd.s32 1, %s15316_s15 }
  0xdb   : > { %s15435_s1 = smov (!%p487_p8, %s486_s1), 0  ;;  %p507_p11 = scmp.gt.s32.totalorder %s14125_s13, 0 }
  0xdc   : > { %s15439_s1 = smov (!%p8826_p10, %s15435_s1), 63  ;;  %p8832_p3 = scmp.lt.s32.totalorder %s14125_s13, 63 }
  0xdd   : > { %s508_s10 = scalar_select %p507_p11, %s14125_s13, 0 }
  0xde   : > { %s491_s6 = sshra.s32 %s15439_s1, 3  ;;  %p527_p0 = scmp.gt.s32.totalorder %s526_s27, 0 }
  0xdf   : > { %s494_s26 = sand.u32 7, %s15439_s1  ;;  %s8831_s7 = smul.u32 48, %s491_s6 }
  0xe0   : > { %s565_s21 = sadd.s32 1, %s15317_s12  ;;  %s546_s24 = sld [smem:[#allocation4 + %s545_s28]] }
  0xe1   : > { %s585_s0 = sadd.s32 1, %s15318_s2  ;;  %s605_s30 = sadd.s32 1, %s15319_s14 }
  0xe2   : > { %s528_s8 = scalar_select %p527_p0, %s526_s27, 0 }
  0xe3   : > { %p8838_p5 = scmp.lt.s32.totalorder %s526_s27, 63  ;;  %s586_s4 = sld [smem:[#allocation4 + %s585_s0]] }
  0xe4   : > { %s15441_s10 = smov (!%p8832_p3, %s508_s10), 63  ;;  %s14139_s16 = sadd.s32 %s8831_s7, %s494_s26 }
  0xe5   : > { %s15443_s8 = smov (!%p8838_p5, %s528_s8), 63  ;;  %s511_s1 = sshra.s32 %s15441_s10, 3 }
  0xe6   : > { %p547_p1 = scmp.gt.s32.totalorder %s546_s24, 0  ;;  %p8844_p4 = scmp.lt.s32.totalorder %s546_s24, 63 }
  0xe7   : > { %s531_s13 = sshra.s32 %s15443_s8, 3  ;;  %s534_s0 = sand.u32 7, %s15443_s8 }
  0xe8   : > { %s15445_s24 = smov (!%p547_p1, %s546_s24), 0 }
  0xe9   : > { %p587_p13 = scmp.gt.s32.totalorder %s586_s4, 0  ;;  %s15451_s24 = smov (!%p8844_p4, %s15445_s24), 63 }
  0xea   : > { %s551_s28 = sshra.s32 %s15451_s24, 3  ;;  %s554_s14 = sand.u32 7, %s15451_s24 }
  0xeb   : > { %s588_s27 = scalar_select %p587_p13, %s586_s4, 0 }
  0xec   : > { %v2194_v27 = vpop.f32.mrf.mxu0  ;;  %s8849_s7 = smul.u32 48, %s551_s28  ;;  %s498_s24 = scalar_lea.vmem [#allocation5], %s14139_s16 }
  0xed   : > { %v2207_v32 = vpop.f32.mrf.mxu1  ;;  %v2195_v40 = vadd.f32 %v2194_v27, %v1693_v23  ;;  %v12528_v27 = vld [vmem:[#allocation8 + $0x34] sm:$0xf] }
  0xee   : > { %v9575_v31 = vor.u32 %v12528_v27, %v9572_v29 }
  0xef   : > { %v2208_v59 = vadd.f32 %v2207_v32, %v2195_v40  ;;  %v9786_v32 = vld [vmem:[#allocation8 + $0x1e0] sm:$0xf]  ;;  %v9547_v40 = vor.u32 %v12525_v52, %v9546_v39  ;;  %v9652_v39 = vld [vmem:[#allocation8 + $0xe0] sm:$0xf0] }
  0xf0   : > { %3067 = vmatpush.bf16.msrb.mxu2 %v9575_v31  ;;  %v1589_v31 = vld [vmem:[#allocation2 + $0x10] sm:$0xff]  ;;  %v9655_v43 = vor.u32 %v12547_v36, %v9652_v39  ;;  %v12583_v39 = vld [vmem:[#allocation8 + $0x1ec] sm:$0xf] }
  0xf1   : > { %v2341_v13 = vadd.f32 %v2208_v59, %v1587_v1  ;;  %3042 = vmatpush.bf16.msrb.mxu0 %v9547_v40  ;;  %v12562_v59 = vld [vmem:[#allocation8 + $0x13c] sm:$0xf0]  ;;  %v9866_v40 = vld [vmem:[#allocation8 + $0x278] sm:$0xf] }
  0xf2   : > { %v9699_v61 = vor.u32 %v12562_v59, %v9698_v58 }
  0xf3   : > { %v9540_v30 = vmul.f32 -1.442695, %v2341_v13  ;;  %v9674_v13 = vld [vmem:[#allocation8 + $0xf8] sm:$0xf] }
  0xf4   : > { %v2220_v45 = vpop.f32.mrf.mxu2  ;;  %v2196_v60 = vpop.f32.mrf.mxu0  ;;  %v9675_v20 = vor.u32 %v12556_v16, %v9674_v13  ;;  %v12592_v16 = vld [vmem:[#allocation8 + $0x22c] sm:$0xf0] }
  0xf5   : > { %v2221_v49 = vadd.f32 %v2220_v45, %v1694_v33  ;;  %v2233_v50 = vpop.f32.mrf.mxu3  ;;  %v2209_v4 = vpop.f32.mrf.mxu1  ;;  %v12585_v33 = vld [vmem:[#allocation8 + $0x1f4] sm:$0xf0]  ;;  %v9551_v45 = vor.u32 %v12522_v55, %v9548_v41  ;;  %13283 = vpow2.f32 %v9540_v30  ;;  %3087 = vmatpush.bf16.msra.mxu0 %v9723_v46  ;;  %v12559_v60 = vld [vmem:[#allocation8 + $0x12c] sm:$0xf]  ;;  %v9892_v30 = vld [vmem:[#allocation8 + $0x2c0] sm:$0xf0] }
  0xf6   : > { %v9787_v35 = vor.u32 %v12585_v33, %v9786_v32  ;;  %v9703_v1 = vor.u32 %v12559_v60, %v9700_v62  ;;  %v9740_v4 = vld [vmem:[#allocation8 + $0x198] sm:$0xf0]  ;;  %v9895_v32 = vor.u32 %v12607_v24, %v9892_v30  ;;  %v9650_v33 = vld [vmem:[#allocation8 + $0xc8] sm:$0xf]  ;;  %v12604_v41 = vld [vmem:[#allocation8 + $0x28c] sm:$0xf0] }
  0xf7   : > { %v2234_v3 = vadd.f32 %v2233_v50, %v2221_v49  ;;  %v9762_v49 = vld [vmem:[#allocation8 + $0x1b0] sm:$0xf]  ;;  %v9727_v50 = vor.u32 %v12565_v47, %v9724_v48  ;;  %3068 = vmatpush.bf16.msrb.mxu2 %v9551_v45  ;;  %v9867_v45 = vor.u32 %v12604_v41, %v9866_v40  ;;  %v9868_v46 = vld [vmem:[#allocation8 + $0x290] sm:$0xf0]  ;;  %v9626_v47 = vld [vmem:[#allocation8 + $0x98] sm:$0xf] }
  0xf8   : > { %3053 = vmatpush.bf16.msrb.mxu1 %v9787_v35  ;;  %v9763_v54 = vor.u32 %v12579_v51, %v9762_v49  ;;  %v12550_v35 = vld [vmem:[#allocation8 + $0xdc] sm:$0xf0]  ;;  %v12544_v48 = vld [vmem:[#allocation8 + $0xac] sm:$0xf0]  ;;  %v9871_v51 = vor.u32 %v12601_v42, %v9868_v46  ;;  %v9580_v30 = vld [vmem:[#allocation8 + $0x50] sm:$0xf0] }
  0xf9   : > { %v2342_v18 = vadd.f32 %v2234_v3, %v1588_v2  ;;  %v9739_v2 = vor.u32 %v12573_v0, %v9738_v63  ;;  %v12570_v3 = vld [vmem:[#allocation8 + $0x184] sm:$0xf]  ;;  %3088 = vmatpush.bf16.msra.mxu0 %v9699_v61  ;;  %v9651_v55 = vor.u32 %v12550_v35, %v9650_v33  ;;  %v9627_v53 = vor.u32 %v12544_v48, %v9626_v47  ;;  %v9842_v61 = vld [vmem:[#allocation8 + $0x248] sm:$0xf]  ;;  %v12598_v62 = vld [vmem:[#allocation8 + $0x25c] sm:$0xf0] }
  0xfa   : > { %v9743_v7 = vor.u32 %v12570_v3, %v9740_v4  ;;  %v12595_v63 = vld [vmem:[#allocation8 + $0x24c] sm:$0xf]  ;;  %v1590_v0 = vld [vmem:[#allocation2 + $0x18] sm:$0xff]  ;;  %v9844_v3 = vld [vmem:[#allocation8 + $0x260] sm:$0xf0] }
  0xfb   : > { %v9541_v34 = vmul.f32 -1.442695, %v2342_v18  ;;  %3113 = vmatpush.bf16.msra.mxu2 %v9727_v50  ;;  %v13284_v10 = vpop.eup %13283  ;;  %v9676_v18 = vld [vmem:[#allocation8 + $0x110] sm:$0xf0]  ;;  %v9847_v5 = vor.u32 %v12595_v63, %v9844_v3  ;;  %v12532_v24 = vld [vmem:[#allocation8 + $0x4c] sm:$0xf0] }
  0xfc   : > { %v2222_v19 = vpop.f32.mrf.mxu2  ;;  %3054 = vmatpush.bf16.msrb.mxu1 %v9763_v54  ;;  %3081 = vmatpush.bf16.msrb.mxu3 %v9743_v7  ;;  %v9679_v21 = vor.u32 %v12553_v17, %v9676_v18  ;;  %v14008_v26 = vadd.f32 1.0, %v13284_v10  ;;  %v12541_v54 = vld [vmem:[#allocation8 + $0x9c] sm:$0xf]  ;;  %v12538_v7 = vld [vmem:[#allocation8 + $0x7c] sm:$0xf0] }
  0xfd   : > { %v2235_v23 = vpop.f32.mrf.mxu3  ;;  %13285 = vpow2.f32 %v9541_v34  ;;  %3089 = vmatpush.bf16.msra.mxu0 %v9675_v20  ;;  %v9631_v60 = vor.u32 %v12541_v54, %v9628_v56  ;;  %v12589_v17 = vld [vmem:[#allocation8 + $0x21c] sm:$0xf]  ;;  %v12586_v35 = vld [vmem:[#allocation8 + $0x1fc] sm:$0xf0]  ;;  %v9554_v40 = vld [vmem:[#allocation8 + $0x8] sm:$0xf] }
  0xfe   : > { %v12610_v23 = vld [vmem:[#allocation8 + $0x2bc] sm:$0xf0]  ;;  %13287 = vrcp.f32 %v14008_v26  ;;  %v12577_v54 = vld [vmem:[#allocation8 + $0x1bc] sm:$0xf]  ;;  %v9772_v56 = vld [vmem:[#allocation8 + $0x1d0] sm:$0xf0]  ;;  %vm2356_vm1 = vweird.f32 %v14008_v26 }
  0xff   : > { %3114 = vmatpush.bf16.msra.mxu2 %v9703_v1  ;;  %v9891_v29 = vor.u32 %v12610_v23, %v9890_v22  ;;  %v9578_v23 = vld [vmem:[#allocation8 + $0x38] sm:$0xf]  ;;  %v12526_v42 = vld [vmem:[#allocation8 + $0x1c] sm:$0xf0]  ;;  %v9746_v63 = vld [vmem:[#allocation8 + $0x188] sm:$0xf] }
 0x100   : > { %3055 = vmatpush.bf16.msrb.mxu1 %v9739_v2  ;;  %3126 = vmatpush.bf16.msra.mxu3 %v9919_v15  ;;  %v9843_v2 = vor.u32 %v12598_v62, %v9842_v61  ;;  %v9818_v15 = vld [vmem:[#allocation8 + $0x218] sm:$0xf]  ;;  %v9555_v47 = vor.u32 %v12526_v42, %v9554_v40  ;;  %v2362_v61 = vand.u32 2147483648, %v14008_v26  ;;  %v9748_v3 = vld [vmem:[#allocation8 + $0x1a0] sm:$0xf0] }
 0x101   : > { %3090 = vmatpush.bf16.msra.mxu0 %v9651_v55  ;;  %v9819_v18 = vor.u32 %v12592_v16, %v9818_v15 }
 0x102   : > { %v2363_v16 = vor.u32 1.1754944e-38, %v2362_v61  ;;  %v9730_v61 = vld [vmem:[#allocation8 + $0x160] sm:$0xf] }
 0x103   : > { %v13286_v25 = vpop.eup %13285  ;;  %3115 = vmatpush.bf16.msra.mxu2 %v9679_v21 }
 0x104   : > { %3100 = vmatpush.bf16.msra.mxu1 %v9915_v11  ;;  %v14010_v37 = vadd.f32 1.0, %v13286_v25  ;;  %3127 = vmatpush.bf16.msra.mxu3 %v9895_v32  ;;  %v14014_v9 = vpop.eup %13287  ;;  %v9604_v11 = vld [vmem:[#allocation8 + $0x80] sm:$0xf0] }
 0x105   : > { %3091 = vmatpush.bf16.msra.mxu0 %v9627_v53  ;;  %v9607_v13 = vor.u32 %v12535_v8, %v9604_v11  ;;  %v2352_v21 = vmul.f32 %v14014_v9, %v14008_v26  ;;  %v12580_v53 = vld [vmem:[#allocation8 + $0x1cc] sm:$0xf0]  ;;  %vm2357_vm2 = vweird.f32 %v14014_v9 }
 0x106   : > { %vm14044_vm3 = vmor %vm2356_vm1, %vm2357_vm2  ;;  %vm2371_vm4 = vweird.f32 %v14010_v37 }
 0x107   : > { %3116 = vmatpush.bf16.msra.mxu2 %v9655_v43  ;;  %v2353_v55 = vsub.f32 1.0, %v2352_v21  ;;  %v12523_v43 = vld [vmem:[#allocation8 + $0xc] sm:$0xf]  ;;  %v2377_v21 = vand.u32 2147483648, %v14010_v37 }
 0x108   : > { %3101 = vmatpush.bf16.msra.mxu1 %v9891_v29  ;;  %3128 = vmatpush.bf16.msra.mxu3 %v9871_v51  ;;  %v12529_v29 = vld [vmem:[#allocation8 + $0x3c] sm:$0xf] }
 0x109   : > { %v9583_v33 = vor.u32 %v12529_v29, %v9580_v30  ;;  %v2354_v51 = vmul.f32 %v14014_v9, %v2353_v55  ;;  %v1698_v30 = vperm.slane %v14003_v14, 5 }
 0x10b   : > { %3117 = vmatpush.bf16.msra.mxu2 %v9631_v60 }
 0x10c   : > { %v2246_v19 = vpop.f32.mrf.mxu0  ;;  %3102 = vmatpush.bf16.msra.mxu1 %v9867_v45  ;;  %3129 = vmatpush.bf16.msra.mxu3 %v9847_v5  ;;  %v9556_v45 = vld [vmem:[#allocation8 + $0x20] sm:$0xf0]  ;;  %v2355_v5 = vadd.f32 %v14014_v9, %v2354_v51 }
 0x10d   : > { %v2247_v27 = vadd.f32 %v2246_v19, %v1695_v6  ;;  %v2259_v28 = vpop.f32.mrf.mxu1  ;;  %v9602_v6 = vld [vmem:[#allocation8 + $0x68] sm:$0xf]  ;;  %v9820_v19 = vld [vmem:[#allocation8 + $0x230] sm:$0xf0]  ;;  %v9559_v48 = vor.u32 %v12523_v43, %v9556_v45 }
 0x10e   : > { %v9603_v10 = vor.u32 %v12538_v7, %v9602_v6  ;;  %v9823_v22 = vor.u32 %v12589_v17, %v9820_v19  ;;  %v2360_v6 = vand.u32 2147483647, %v14008_v26  ;;  %v2359_v26 = vsel %vm14044_vm3, %v14014_v9, %v2355_v5 }
 0x10f   : > { %v2260_v34 = vadd.f32 %v2259_v28, %v2247_v27  ;;  %v9579_v28 = vor.u32 %v12532_v24, %v9578_v23  ;;  %3118 = vmatpush.bf16.msra.mxu2 %v9607_v13 }
 0x110   : > { %3103 = vmatpush.bf16.msra.mxu1 %v9843_v2  ;;  %3092 = vmatpush.bf16.msra.mxu0 %v9603_v10  ;;  %v12571_v2 = vld [vmem:[#allocation8 + $0x18c] sm:$0xf]  ;;  %vm2361_vm5 = vcmp.eq.f32.partialorder %v2360_v6, 8.507059e+37  ;;  %v9706_v10 = vld [vmem:[#allocation8 + $0x130] sm:$0xf] }
 0x111   : > { %v2381_v52 = vadd.f32 %v2260_v34, %v1589_v31  ;;  %v9794_v34 = vld [vmem:[#allocation8 + $0x1e8] sm:$0xf]  ;;  %3130 = vmatpush.bf16.msra.mxu3 %v9823_v22  ;;  %v9751_v11 = vor.u32 %v12571_v2, %v9748_v3  ;;  %v12566_v3 = vld [vmem:[#allocation8 + $0x164] sm:$0xf] }
 0x113   : > { %v9542_v49 = vmul.f32 -1.442695, %v2381_v52  ;;  %v9796_v52 = vld [vmem:[#allocation8 + $0x200] sm:$0xf0]  ;;  %3119 = vmatpush.bf16.msra.mxu2 %v9583_v33 }
 0x114   : > { %v2272_v50 = vpop.f32.mrf.mxu2  ;;  %v2248_v59 = vpop.f32.mrf.mxu0  ;;  %3104 = vmatpush.bf16.msra.mxu1 %v9819_v18  ;;  %3093 = vmatpush.bf16.msra.mxu0 %v9579_v28  ;;  %v9799_v41 = vor.u32 %v12583_v39, %v9796_v52 }
 0x115   : > { %v2273_v57 = vadd.f32 %v2272_v50, %v1696_v38  ;;  %v2285_v58 = vpop.f32.mrf.mxu3  ;;  %13289 = vpow2.f32 %v9542_v49  ;;  %v2261_v1 = vpop.f32.mrf.mxu1  ;;  %v9795_v38 = vor.u32 %v12586_v35, %v9794_v34  ;;  %v9770_v49 = vld [vmem:[#allocation8 + $0x1b8] sm:$0xf]  ;;  %v9775_v59 = vor.u32 %v12577_v54, %v9772_v56 }
 0x116   : > { %13291 = vrcp.f32 %v14010_v37  ;;  %3131 = vmatpush.bf16.msra.mxu3 %v9799_v41  ;;  %v12574_v1 = vld [vmem:[#allocation8 + $0x19c] sm:$0xf0] }
 0x117   : > { %v2286_v4 = vadd.f32 %v2285_v58, %v2273_v57  ;;  %v9771_v58 = vor.u32 %v12580_v53, %v9770_v49  ;;  %3120 = vmatpush.bf16.msra.mxu2 %v9559_v48  ;;  %v9747_v7 = vor.u32 %v12574_v1, %v9746_v63  ;;  %v1592_v48 = vld [vmem:[#allocation2 + $0x28] sm:$0xff]  ;;  %v13443_v1 = vld [vmem:[%s13834_s18] sm:$0xff] }
 0x118   : > { %3105 = vmatpush.bf16.msra.mxu1 %v9795_v38  ;;  %3094 = vmatpush.bf16.msra.mxu0 %v9555_v47  ;;  %v2378_v38 = vor.u32 1.1754944e-38, %v2377_v21  ;;  %v13444_v21 = vld [vmem:[%s13834_s18 + $0x8] sm:$0xff]  ;;  %v12542_v53 = vld [vmem:[#allocation8 + $0xa4] sm:$0xf]  ;;  %s15312_s18 = sld [smem:[#allocation30_spill]] }
 0x119   : > { %v2382_v12 = vadd.f32 %v2286_v4, %v1590_v0  ;;  %v1697_v4 = vperm.slane %v14003_v14, 4 }
 0x11a   : > { %3132 = vmatpush.bf16.msra.mxu3 %v9775_v59 }
 0x11b   : > { %v9543_v20 = vmul.f32 -1.442695, %v2382_v12  ;;  %v13290_v25 = vpop.eup %13289 }
 0x11c   : > { %v2274_v27 = vpop.f32.mrf.mxu2  ;;  %v14019_v31 = vadd.f32 1.0, %v13290_v25  ;;  %v14021_v36 = vpop.eup %13291  ;;  %3106 = vmatpush.bf16.msra.mxu1 %v9771_v58  ;;  %v1591_v25 = vld [vmem:[#allocation2 + $0x20] sm:$0xff] }
 0x11d   : > { %13293 = vpow2.f32 %v9543_v20  ;;  %v2287_v32 = vpop.f32.mrf.mxu3  ;;  %v2367_v46 = vmul.f32 %v14021_v36, %v14010_v37  ;;  %vm2372_vm6 = vweird.f32 %v14021_v36  ;;  %v2375_v20 = vand.u32 2147483647, %v14010_v37 }
 0x11e   : > { %13295 = vrcp.f32 %v14019_v31  ;;  %3133 = vmatpush.bf16.msra.mxu3 %v9751_v11  ;;  %vm2396_vm7 = vweird.f32 %v14019_v31  ;;  %v2402_v22 = vand.u32 2147483648, %v14019_v31  ;;  %v2364_v27 = vsel %vm2361_vm5, %v2363_v16, %v2359_v26  ;;  %vm14072_vm9 = vmor %vm2371_vm4, %vm2372_vm6  ;;  %v12563_v11 = vld [vmem:[#allocation8 + $0x144] sm:$0xf0]  ;;  %v9922_v26 = vld [vmem:[#allocation8 + $0x2e0] sm:$0xf]  ;;  %s465_s23 = sadd.s32 1, %s15312_s18 }
 0x11f   : > { %v2368_v62 = vsub.f32 1.0, %v2367_v46  ;;  %v2400_v29 = vand.u32 2147483647, %v14019_v31  ;;  %vm2376_vm11 = vcmp.eq.f32.partialorder %v2375_v20, 8.507059e+37  ;;  %s466_s11 = sld [smem:[#allocation4 + %s465_s23]] }
 0x120   : > { %3107 = vmatpush.bf16.msra.mxu1 %v9747_v7  ;;  %v2403_v39 = vor.u32 1.1754944e-38, %v2402_v22  ;;  %s566_s23 = sld [smem:[#allocation4 + %s565_s21]] }
 0x121   : > { %v2369_v12 = vmul.f32 %v14021_v36, %v2368_v62  ;;  %vm2401_vm12 = vcmp.eq.f32.partialorder %v2400_v29, 8.507059e+37  ;;  %v12569_v62 = vld [vmem:[#allocation8 + $0x174] sm:$0xf0]  ;;  %v9684_v29 = vld [vmem:[#allocation8 + $0x118] sm:$0xf0] }
 0x122   : > { %v9731_v7 = vor.u32 %v12569_v62, %v9730_v61  ;;  %v12596_v61 = vld [vmem:[#allocation8 + $0x254] sm:$0xf]  ;;  %v9852_v62 = vld [vmem:[#allocation8 + $0x268] sm:$0xf0] }
 0x123   : > { %v13294_v50 = vpop.eup %13293  ;;  %v2370_v9 = vadd.f32 %v14021_v36, %v2369_v12 }
 0x124   : > { %v14027_v57 = vadd.f32 1.0, %v13294_v50  ;;  %v14029_v60 = vpop.eup %13295 }
 0x125   : > { %v2392_v0 = vmul.f32 %v14029_v60, %v14019_v31  ;;  %vm2397_vm8 = vweird.f32 %v14029_v60  ;;  %v2374_v37 = vsel %vm14072_vm9, %v14021_v36, %v2370_v9  ;;  %v9924_v9 = vld [vmem:[#allocation8 + $0x2f8] sm:$0xf0]  ;;  %p467_p2 = scmp.gt.s32.totalorder %s466_s11, 0  ;;  %p8820_p9 = scmp.lt.s32.totalorder %s466_s11, 63 }
 0x126   : > { %13297 = vrcp.f32 %v14027_v57  ;;  %vm14076_vm10 = vmor %vm2396_vm7, %vm2397_vm8  ;;  %v2379_v46 = vsel %vm2376_vm11, %v2378_v38, %v2374_v37  ;;  %vm2411_vm13 = vweird.f32 %v14027_v57  ;;  %v2417_v49 = vand.u32 2147483648, %v14027_v57  ;;  %v12608_v38 = vld [vmem:[#allocation8 + $0x2b4] sm:$0xf]  ;;  %v9658_v37 = vld [vmem:[#allocation8 + $0xd0] sm:$0xf]  ;;  %p567_p6 = scmp.gt.s32.totalorder %s566_s23, 0 }
 0x127   : > { %v2393_v8 = vsub.f32 1.0, %v2392_v0  ;;  %v2415_v51 = vand.u32 2147483647, %v14027_v57  ;;  %s15433_s11 = smov (!%p467_p2, %s466_s11), 0  ;;  %p8850_p2 = scmp.lt.s32.totalorder %s566_s23, 63 }
 0x128   : > { %v2418_v63 = vor.u32 1.1754944e-38, %v2417_v49  ;;  %v9876_v49 = vld [vmem:[#allocation8 + $0x298] sm:$0xf0]  ;;  %s15437_s11 = smov (!%p8820_p9, %s15433_s11), 63  ;;  %s15447_s23 = smov (!%p567_p6, %s566_s23), 0 }
 0x129   : > { %v2394_v13 = vmul.f32 %v14029_v60, %v2393_v8  ;;  %vm2416_vm1 = vcmp.eq.f32.partialorder %v2415_v51, 8.507059e+37  ;;  %v12545_v51 = vld [vmem:[#allocation8 + $0xb4] sm:$0xf0]  ;;  %s471_s19 = sshra.s32 %s15437_s11, 3  ;;  %s474_s5 = sand.u32 7, %s15437_s11 }
 0x12a   : > { %s8825_s25 = smul.u32 48, %s471_s19  ;;  %s606_s11 = sld [smem:[#allocation4 + %s605_s30]] }
 0x12b   : > { %v2395_v28 = vadd.f32 %v14029_v60, %v2394_v13  ;;  %v12560_v13 = vld [vmem:[#allocation8 + $0x134] sm:$0xf]  ;;  %p8856_p9 = scmp.lt.s32.totalorder %s586_s4, 63  ;;  %s15453_s23 = smov (!%p8850_p2, %s15447_s23), 63 }
 0x12c   : > { %v2298_v15 = vpop.f32.mrf.mxu0  ;;  %v14055_v19 = vpop.eup %13297  ;;  %s14137_s17 = sadd.s32 %s8825_s25, %s474_s5  ;;  %s514_s19 = sand.u32 7, %s15441_s10 }
 0x12d   : > { %v2299_v17 = vadd.f32 %v2298_v15, %v1697_v4  ;;  %v2311_v18 = vpop.f32.mrf.mxu1  ;;  %v2407_v23 = vmul.f32 %v14055_v19, %v14027_v57  ;;  %v2399_v55 = vsel %vm14076_vm10, %v14029_v60, %v2395_v28  ;;  %vm2412_vm14 = vweird.f32 %v14055_v19  ;;  %v9732_v4 = vld [vmem:[#allocation8 + $0x178] sm:$0xf0]  ;;  %v9708_v15 = vld [vmem:[#allocation8 + $0x148] sm:$0xf0]  ;;  %v12554_v28 = vld [vmem:[#allocation8 + $0x104] sm:$0xf]  ;;  %s557_s10 = sadd.s32 %s8849_s7, %s554_s14 }
 0x12e   : > { %v2404_v47 = vsel %vm2401_vm12, %v2403_v39, %v2399_v55  ;;  %vm14092_vm15 = vmor %vm2411_vm13, %vm2412_vm14  ;;  %v9735_v8 = vor.u32 %v12566_v3, %v9732_v4  ;;  %v12551_v55 = vld [vmem:[#allocation8 + $0xe4] sm:$0xf0]  ;;  %v9612_v3 = vld [vmem:[#allocation8 + $0x88] sm:$0xf0]  ;;  %s15455_s27 = smov (!%p8856_p9, %s588_s27), 63  ;;  %s8837_s5 = smul.u32 48, %s511_s1 }
 0x12f   : > { %v2312_v24 = vadd.f32 %v2311_v18, %v2299_v17  ;;  %v2408_v34 = vsub.f32 1.0, %v2407_v23  ;;  %v2427_v54 = vsub.f32 1.0, %v2404_v47  ;;  %v2431_v2 = vmul.f32 %v13443_v1, %v2404_v47  ;;  %v9610_v1 = vld [vmem:[#allocation8 + $0x70] sm:$0xf]  ;;  %s571_s6 = sshra.s32 %s15453_s23, 3  ;;  %s8843_s25 = smul.u32 48, %s531_s13 }
 0x130   : > { %v9707_v18 = vor.u32 %v12563_v11, %v9706_v10  ;;  %v9711_v23 = vor.u32 %v12560_v13, %v9708_v15  ;;  %v9828_v10 = vld [vmem:[#allocation8 + $0x238] sm:$0xf0]  ;;  %v9586_v15 = vld [vmem:[#allocation8 + $0x40] sm:$0xf]  ;;  %p607_p8 = scmp.gt.s32.totalorder %s606_s11, 0  ;;  %p8862_p10 = scmp.lt.s32.totalorder %s606_s11, 63 }
 0x131   : > { %v2421_v35 = vmul.f32 %v2364_v27, %v2312_v24  ;;  %v2409_v31 = vmul.f32 %v14055_v19, %v2408_v34  ;;  %v12614_v24 = vld [vmem:[#allocation8 + $0x2e4] sm:$0xf]  ;;  %v12557_v27 = vld [vmem:[#allocation8 + $0x114] sm:$0xf0]  ;;  %v9898_v34 = vld [vmem:[#allocation8 + $0x2b0] sm:$0xf]  ;;  %s517_s9 = sadd.s32 %s8837_s5, %s514_s19  ;;  %s537_s20 = sadd.s32 %s8843_s25, %s534_s0 }
 0x132   : > { %v9927_v33 = vor.u32 %v12614_v24, %v9924_v9  ;;  %s15449_s11 = smov (!%p607_p8, %s606_s11), 0  ;;  %s591_s26 = sshra.s32 %s15455_s27, 3 }
 0x133   : > { %v2423_v14 = vadd.f32 %v2421_v35, %v1591_v25  ;;  %v2410_v36 = vadd.f32 %v14055_v19, %v2409_v31  ;;  %v9682_v25 = vld [vmem:[#allocation8 + $0x100] sm:$0xf]  ;;  %v12611_v35 = vld [vmem:[#allocation8 + $0x2c4] sm:$0xf0]  ;;  %s15457_s11 = smov (!%p8862_p10, %s15449_s11), 63  ;;  %s8855_s30 = smul.u32 48, %s571_s6 }
 0x134   : > { %v2324_v52 = vpop.f32.mrf.mxu2  ;;  %v2300_v42 = vpop.f32.mrf.mxu0  ;;  %v9683_v31 = vor.u32 %v12557_v27, %v9682_v25  ;;  %v9562_v25 = vld [vmem:[#allocation8 + $0x10] sm:$0xf]  ;;  %v12527_v27 = vld [vmem:[#allocation8 + $0x24] sm:$0xf0]  ;;  %s611_s21 = sshra.s32 %s15457_s11, 3  ;;  %s8861_s4 = smul.u32 48, %s591_s26 }
 0x135   : > { %v2325_v40 = vadd.f32 %v2324_v52, %v1698_v30  ;;  %v2337_v41 = vpop.f32.mrf.mxu3  ;;  %13299 = vtanh.f32 %v2423_v14  ;;  %v2313_v43 = vpop.f32.mrf.mxu1  ;;  %v2414_v59 = vsel %vm14092_vm15, %v14055_v19, %v2410_v36  ;;  %v12617_v19 = vld [vmem:[#allocation8 + $0x2f4] sm:$0xf0]  ;;  %v9687_v14 = vor.u32 %v12554_v28, %v9684_v29  ;;  %v9900_v52 = vld [vmem:[#allocation8 + $0x2c8] sm:$0xf0]  ;;  %v12602_v36 = vld [vmem:[#allocation8 + $0x284] sm:$0xf] }
 0x136   : > { %v2419_v6 = vsel %vm2416_vm1, %v2418_v63, %v2414_v59  ;;  %v9923_v32 = vor.u32 %v12617_v19, %v9922_v26  ;;  %v9899_v42 = vor.u32 %v12611_v35, %v9898_v34  ;;  %v9903_v43 = vor.u32 %v12608_v38, %v9900_v52  ;;  %v9850_v59 = vld [vmem:[#allocation8 + $0x250] sm:$0xf]  ;;  %v12524_v28 = vld [vmem:[#allocation8 + $0x14] sm:$0xf]  ;;  %v9564_v29 = vld [vmem:[#allocation8 + $0x28] sm:$0xf0] }
 0x137   : > { %v2338_v45 = vadd.f32 %v2337_v41, %v2325_v40  ;;  %v2428_v16 = vsub.f32 1.0, %v2419_v6  ;;  %v2432_v22 = vmul.f32 %v13444_v21, %v2419_v6  ;;  %v12548_v40 = vld [vmem:[#allocation8 + $0xd4] sm:$0xf]  ;;  %v9660_v41 = vld [vmem:[#allocation8 + $0xe8] sm:$0xf0]  ;;  %s574_s2 = sand.u32 7, %s15453_s23 }
 0x138   : > { %v9663_v47 = vor.u32 %v12548_v40, %v9660_v41  ;;  %v9826_v6 = vld [vmem:[#allocation8 + $0x220] sm:$0xf]  ;;  %v12587_v21 = vld [vmem:[#allocation8 + $0x204] sm:$0xf0]  ;;  %v12581_v34 = vld [vmem:[#allocation8 + $0x1d4] sm:$0xf0]  ;;  %s14147_s18 = sadd.s32 %s8855_s30, %s574_s2 }
 0x139   : > { %v2422_v50 = vmul.f32 %v2379_v46, %v2338_v45  ;;  %v9874_v45 = vld [vmem:[#allocation8 + $0x280] sm:$0xf]  ;;  %v9659_v46 = vor.u32 %v12551_v55, %v9658_v37  ;;  %v12578_v35 = vld [vmem:[#allocation8 + $0x1c4] sm:$0xf]  ;;  %v9780_v38 = vld [vmem:[#allocation8 + $0x1d8] sm:$0xf0] }
 0x13a   : > { %v9783_v37 = vor.u32 %v12578_v35, %v9780_v38  ;;  %v9754_v55 = vld [vmem:[#allocation8 + $0x190] sm:$0xf]  ;;  %v12575_v40 = vld [vmem:[#allocation8 + $0x1a4] sm:$0xf0]  ;;  %v12572_v41 = vld [vmem:[#allocation8 + $0x194] sm:$0xf] }
 0x13b   : > { %v2424_v56 = vadd.f32 %v2422_v50, %v1592_v48  ;;  %v13300_v58 = vpop.eup %13299  ;;  %v12605_v48 = vld [vmem:[#allocation8 + $0x294] sm:$0xf0]  ;;  %v9634_v50 = vld [vmem:[#allocation8 + $0xa0] sm:$0xf]  ;;  %s8867_s12 = smul.u32 48, %s611_s21  ;;  %s594_s15 = sand.u32 7, %s15455_s27 }
 0x13c   : > { %v2326_v60 = vpop.f32.mrf.mxu2  ;;  %v2429_v0 = vmul.f32 %v13300_v58, %v2427_v54  ;;  %v9636_v54 = vld [vmem:[#allocation8 + $0xb8] sm:$0xf0]  ;;  %v9879_v58 = vor.u32 %v12602_v36, %v9876_v49  ;;  %v9635_v63 = vor.u32 %v12545_v51, %v9634_v50  ;;  %s614_s22 = sand.u32 7, %s15457_s11  ;;  %s14149_s1 = sadd.s32 %s8861_s4, %s594_s15  ;;  %v12702_v35 = vld [vmem:[#allocation8 + $0x2a4] sm:$0xf] }
 0x13d   : > { %13301 = vtanh.f32 %v2424_v56  ;;  %v2339_v57 = vpop.f32.mrf.mxu3  ;;  %v9875_v56 = vor.u32 %v12605_v48, %v9874_v45  ;;  %v12599_v60 = vld [vmem:[#allocation8 + $0x264] sm:$0xf0]  ;;  %s14151_s13 = sadd.s32 %s8867_s12, %s614_s22  ;;  %s478_s28 = scalar_lea.vmem [#allocation5], %s14137_s17  ;;  %v10274_v38 = vld [vmem:[#allocation8 + $0x2b8] sm:$0xf0] }
 0x13e   : > { %v2433_v5 = vadd.f32 %v2431_v2, %v2429_v0  ;;  %v9639_v0 = vor.u32 %v12542_v53, %v9636_v54  ;;  %v12539_v2 = vld [vmem:[#allocation8 + $0x84] sm:$0xf0]  ;;  %v12536_v57 = vld [vmem:[#allocation8 + $0x74] sm:$0xf]  ;;  %v9851_v4 = vor.u32 %v12599_v60, %v9850_v59  ;;  %s518_s8 = scalar_lea.vmem [#allocation5], %s517_s9  ;;  %s538_s15 = scalar_lea.vmem [#allocation5], %s537_s20 }
 0x13f   : > { %v9611_v11 = vor.u32 %v12539_v2, %v9610_v1  ;;  %v9615_v13 = vor.u32 %v12536_v57, %v9612_v3  ;;  %v500_v48 = vld [vmem:[%s498_s24] ss:$8 sm:$0x30]  ;;  %s558_s16 = scalar_lea.vmem [#allocation5], %s557_s10  ;;  %s578_s9 = scalar_lea.vmem [#allocation5], %s14147_s18 }
 0x140   : > { %2435 = vst [vmem:[%s14101_s29] sm:$0xff] %v2433_v5  ;;  %v14104_v12 = vpack.c.bf16 %v2433_v5, %v2433_v5  ;;  %v9855_v5 = vor.u32 %v12596_v61, %v9852_v62  ;;  %v519_v49 = vld [vmem:[%s518_s8] ss:$8 sm:$0xf]  ;;  %s598_s20 = scalar_lea.vmem [#allocation5], %s14149_s1  ;;  %s618_s22 = scalar_lea.vmem [#allocation5], %s14151_s13 }
 0x141   : > { %v520_v50 = vld [vmem:[%s518_s8] ss:$8 sm:$0x30]  ;;  %s15324_s2 = sld [smem:[#allocation30_spill]] }
 0x142   : > { %3043 = vmatmul.bf16.vlgmr.msrb.gmra.mxu0 %v14104_v12  ;;  %3069 = vmatmul.bf16.vlgmr.msrb.gmra.mxu2 %v14104_v12  ;;  %v521_v51 = vor.u32 %v520_v50, %v519_v49  ;;  %v539_v53 = vld [vmem:[%s538_s15] ss:$8 sm:$0xf]  ;;  %v10010_v49 = vld [vmem:[#allocation8 + $0xa8] sm:$0xf0]  ;;  %s15325_s14 = sld [smem:[#allocation31_spill]] }
 0x143   : > { %v13302_v17 = vpop.eup %13301  ;;  %3139 = vmatpush.bf16.msrb.mxu0 %v9731_v7  ;;  %3165 = vmatpush.bf16.msrb.mxu2 %v9735_v8  ;;  %v12593_v7 = vld [vmem:[#allocation8 + $0x234] sm:$0xf0]  ;;  %v12590_v8 = vld [vmem:[#allocation8 + $0x224] sm:$0xf]  ;;  %s15326_s11 = sld [smem:[#allocation32_spill]] }
 0x144   : > { %v2430_v20 = vmul.f32 %v13302_v17, %v2428_v16  ;;  %v12533_v16 = vld [vmem:[#allocation8 + $0x54] sm:$0xf0]  ;;  %v12530_v17 = vld [vmem:[#allocation8 + $0x44] sm:$0xf]  ;;  %v9827_v26 = vor.u32 %v12593_v7, %v9826_v6  ;;  %v9831_v19 = vor.u32 %v12590_v8, %v9828_v10  ;;  %v12663_v6 = vld [vmem:[#allocation8 + $0x164] sm:$0xf0] }
 0x145   : > { %v9587_v24 = vor.u32 %v12533_v16, %v9586_v15  ;;  %v540_v54 = vld [vmem:[%s538_s15] ss:$8 sm:$0x30]  ;;  %523 = vst.msk [vmem:[#allocation2 + $0x32] ss:$8 sm:$0xf] %vm13960_vm0, %v521_v51 }
 0x146   : > { %v2434_v30 = vadd.f32 %v2432_v22, %v2430_v20  ;;  %v9802_v20 = vld [vmem:[#allocation8 + $0x1f0] sm:$0xf]  ;;  %v12584_v22 = vld [vmem:[#allocation8 + $0x1f4] sm:$0xf]  ;;  %v10106_v10 = vld [vmem:[#allocation8 + $0x168] sm:$0xf0] }
 0x147   : > { %3140 = vmatpush.bf16.msrb.mxu0 %v9707_v18  ;;  %3166 = vmatpush.bf16.msrb.mxu2 %v9711_v23  ;;  %v9588_v18 = vld [vmem:[#allocation8 + $0x58] sm:$0xf0]  ;;  %v9804_v23 = vld [vmem:[#allocation8 + $0x208] sm:$0xf0]  ;;  %v12660_v8 = vld [vmem:[#allocation8 + $0x154] sm:$0xf] }
 0x148   : > { %2436 = vst [vmem:[%s14101_s29 + $0x8] sm:$0xff] %v2434_v30  ;;  %v14110_v39 = vpack.c.bf16 %v2434_v30, %v2434_v30  ;;  %v9591_v9 = vor.u32 %v12530_v17, %v9588_v18  ;;  %v9803_v30 = vor.u32 %v12587_v21, %v9802_v20  ;;  %v560_v59 = vld [vmem:[%s558_s16] ss:$8 sm:$0x30]  ;;  %v12657_v15 = vld [vmem:[#allocation8 + $0x134] sm:$0xf0] }
 0x149   : > { %v579_v60 = vld [vmem:[%s578_s9] ss:$8 sm:$0xf]  ;;  %524 = vst.msk [vmem:[#allocation2 + $0x32] ss:$8 sm:$0x30] %vm13960_vm0, %v521_v51 }
 0x14a   : > { %3056 = vmatmul.bf16.vlgmr.msrb.gmra.mxu1 %v14110_v39  ;;  %3082 = vmatmul.bf16.vlgmr.msrb.gmra.mxu3 %v14110_v39  ;;  %v580_v62 = vld [vmem:[%s578_s9] ss:$8 sm:$0x30]  ;;  %v12654_v17 = vld [vmem:[#allocation8 + $0x124] sm:$0xf]  ;;  %s625_s23 = sadd.s32 2, %s15324_s2 }
 0x14b   : > { %3152 = vmatpush.bf16.msrb.mxu1 %v9923_v32  ;;  %3178 = vmatpush.bf16.msrb.mxu3 %v9927_v33  ;;  %v9807_v32 = vor.u32 %v12584_v22, %v9804_v23  ;;  %v9778_v33 = vld [vmem:[#allocation8 + $0x1c0] sm:$0xf]  ;;  %v10082_v18 = vld [vmem:[#allocation8 + $0x138] sm:$0xf0]  ;;  %v12711_v20 = vld [vmem:[#allocation8 + $0x2e4] sm:$0xf0] }
 0x14c   : > { %3141 = vmatpush.bf16.msrb.mxu0 %v9683_v31  ;;  %3167 = vmatpush.bf16.msrb.mxu2 %v9687_v14  ;;  %v9563_v31 = vor.u32 %v12527_v27, %v9562_v25  ;;  %v9567_v14 = vor.u32 %v12524_v28, %v9564_v29  ;;  %v9779_v52 = vor.u32 %v12581_v34, %v9778_v33  ;;  %v600_v1 = vld [vmem:[%s598_s20] ss:$8 sm:$0x30]  ;;  %v12708_v21 = vld [vmem:[#allocation8 + $0x2d4] sm:$0xf]  ;;  %s645_s17 = sadd.s32 2, %s15325_s14 }
 0x14d   : > { %v619_v57 = vld [vmem:[%s618_s22] ss:$8 sm:$0xf]  ;;  %v10298_v22 = vld [vmem:[#allocation8 + $0x2e8] sm:$0xf0]  ;;  %s626_s27 = sld [smem:[#allocation4 + %s625_s23]] }
 0x14e   : > { %v620_v3 = vld [vmem:[%s618_s22] ss:$8 sm:$0x30]  ;;  %v12648_v27 = vld [vmem:[#allocation8 + $0xf4] sm:$0xf]  ;;  %s646_s19 = sld [smem:[#allocation4 + %s645_s17]] }
 0x14f   : > { %3153 = vmatpush.bf16.msrb.mxu1 %v9899_v42  ;;  %3179 = vmatpush.bf16.msrb.mxu3 %v9903_v43  ;;  %v9756_v42 = vld [vmem:[#allocation8 + $0x1a8] sm:$0xf0]  ;;  %v9755_v43 = vor.u32 %v12575_v40, %v9754_v55  ;;  %v12651_v25 = vld [vmem:[#allocation8 + $0x104] sm:$0xf0]  ;;  %v10034_v55 = vld [vmem:[#allocation8 + $0xd8] sm:$0xf0] }
 0x150   : > { %3142 = vmatpush.bf16.msrb.mxu0 %v9659_v46  ;;  %3168 = vmatpush.bf16.msrb.mxu2 %v9663_v47  ;;  %v9759_v45 = vor.u32 %v12572_v41, %v9756_v42  ;;  %v499_v47 = vld [vmem:[%s498_s24] ss:$8 sm:$0xf]  ;;  %v10058_v29 = vld [vmem:[#allocation8 + $0x108] sm:$0xf0]  ;;  %s15327_s5 = sld [smem:[#allocation33_spill]] }
 0x151   : > { %v501_v36 = vor.u32 %v500_v48, %v499_v47  ;;  %v10061_v33 = vor.u32 %v12648_v27, %v10058_v29  ;;  %v10248_v42 = vld [vmem:[#allocation8 + $0x270] sm:$0xf]  ;;  %v12639_v48 = vld [vmem:[#allocation8 + $0xa4] sm:$0xf0]  ;;  %v10224_v51 = vld [vmem:[#allocation8 + $0x240] sm:$0xf] }
 0x152   : > { %3095 = vmatmul.bf16.vlgmr.msra.gmra.mxu0 %v14104_v12  ;;  %3121 = vmatmul.bf16.vlgmr.msra.gmra.mxu2 %v14104_v12  ;;  %v9936_v27 = vld [vmem:[#allocation8] sm:$0xf]  ;;  %v12618_v29 = vld [vmem:[#allocation8 + $0x4] sm:$0xf]  ;;  %s15328_s6 = sld [smem:[#allocation34_spill]]  ;;  %s665_s25 = sadd.s32 2, %s15326_s11 }
 0x153   : > { %3154 = vmatpush.bf16.msrb.mxu1 %v9875_v56  ;;  %3180 = vmatpush.bf16.msrb.mxu3 %v9879_v58  ;;  %503 = vst.msk [vmem:[#allocation2 + $0x31] ss:$8 sm:$0xf] %vm13960_vm0, %v501_v36  ;;  %v541_v56 = vor.u32 %v540_v54, %v539_v53  ;;  %v559_v58 = vld [vmem:[%s558_s16] ss:$8 sm:$0xf] }
 0x154   : > { %3143 = vmatpush.bf16.msrb.mxu0 %v9635_v63  ;;  %3169 = vmatpush.bf16.msrb.mxu2 %v9639_v0  ;;  %v561_v61 = vor.u32 %v560_v59, %v559_v58  ;;  %v581_v63 = vor.u32 %v580_v62, %v579_v60  ;;  %v599_v0 = vld [vmem:[%s598_s20] ss:$8 sm:$0xf]  ;;  %504 = vst.msk [vmem:[#allocation2 + $0x31] ss:$8 sm:$0x30] %vm13960_vm0, %v501_v36 }
 0x155   : > { %543 = vst.msk [vmem:[#allocation2 + $0x33] ss:$8 sm:$0xf] %vm13960_vm0, %v541_v56  ;;  %v601_v2 = vor.u32 %v600_v1, %v599_v0  ;;  %v12636_v36 = vld [vmem:[#allocation8 + $0x94] sm:$0xf]  ;;  %p627_p11 = scmp.gt.s32.totalorder %s626_s27, 0 }
 0x156   : > { %563 = vst.msk [vmem:[#allocation2 + $0x34] ss:$8 sm:$0xf] %vm13960_vm0, %v561_v61  ;;  %v12693_v53 = vld [vmem:[#allocation8 + $0x254] sm:$0xf0]  ;;  %p647_p0 = scmp.gt.s32.totalorder %s646_s19, 0 }
 0x157   : > { %3155 = vmatpush.bf16.msrb.mxu1 %v9851_v4  ;;  %3181 = vmatpush.bf16.msrb.mxu3 %v9855_v5  ;;  %583 = vst.msk [vmem:[#allocation2 + $0x35] ss:$8 sm:$0xf] %vm13960_vm0, %v581_v63  ;;  %v621_v4 = vor.u32 %v620_v3, %v619_v57  ;;  %v10104_v5 = vld [vmem:[#allocation8 + $0x150] sm:$0xf]  ;;  %v10225_v1 = vor.u32 %v12693_v53, %v10224_v51  ;;  %p8868_p3 = scmp.lt.s32.totalorder %s626_s27, 63 }
 0x158   : > { %3144 = vmatpush.bf16.msrb.mxu0 %v9611_v11  ;;  %3170 = vmatpush.bf16.msrb.mxu2 %v9615_v13  ;;  %603 = vst.msk [vmem:[#allocation2 + $0x36] ss:$8 sm:$0xf] %vm13960_vm0, %v601_v2  ;;  %v10105_v7 = vor.u32 %v12663_v6, %v10104_v5  ;;  %v10109_v11 = vor.u32 %v12660_v8, %v10106_v10  ;;  %v10080_v13 = vld [vmem:[#allocation8 + $0x120] sm:$0xf]  ;;  %s15459_s27 = smov (!%p627_p11, %s626_s27), 0 }
 0x159   : > { %623 = vst.msk [vmem:[#allocation2 + $0x37] ss:$8 sm:$0xf] %vm13960_vm0, %v621_v4  ;;  %v10081_v16 = vor.u32 %v12657_v15, %v10080_v13  ;;  %v12690_v54 = vld [vmem:[#allocation8 + $0x244] sm:$0xf]  ;;  %s648_s26 = scalar_select %p647_p0, %s646_s19, 0 }
 0x15a   : > { %3108 = vmatmul.bf16.vlgmr.msra.gmra.mxu1 %v14110_v39  ;;  %3134 = vmatmul.bf16.vlgmr.msra.gmra.mxu3 %v14110_v39  ;;  %544 = vst.msk [vmem:[#allocation2 + $0x33] ss:$8 sm:$0x30] %vm13960_vm0, %v541_v56  ;;  %v10013_v56 = vor.u32 %v12636_v36, %v10010_v49  ;;  %v10226_v58 = vld [vmem:[#allocation8 + $0x258] sm:$0xf0]  ;;  %p8874_p5 = scmp.lt.s32.totalorder %s646_s19, 63 }
 0x15b   : > { %3156 = vmatpush.bf16.msrb.mxu1 %v9827_v26  ;;  %3182 = vmatpush.bf16.msrb.mxu3 %v9831_v19  ;;  %564 = vst.msk [vmem:[#allocation2 + $0x34] ss:$8 sm:$0x30] %vm13960_vm0, %v561_v61  ;;  %v10085_v26 = vor.u32 %v12654_v17, %v10082_v18  ;;  %v10296_v19 = vld [vmem:[#allocation8 + $0x2d0] sm:$0xf]  ;;  %s15329_s7 = sld [smem:[#allocation35_spill]] }
 0x15c   : > { %3145 = vmatpush.bf16.msrb.mxu0 %v9587_v24  ;;  %3171 = vmatpush.bf16.msrb.mxu2 %v9591_v9  ;;  %584 = vst.msk [vmem:[#allocation2 + $0x35] ss:$8 sm:$0x30] %vm13960_vm0, %v581_v63  ;;  %v10297_v23 = vor.u32 %v12711_v20, %v10296_v19  ;;  %v10301_v24 = vor.u32 %v12708_v21, %v10298_v22  ;;  %v10056_v9 = vld [vmem:[#allocation8 + $0xf0] sm:$0xf]  ;;  %s685_s21 = sadd.s32 2, %s15327_s5 }
 0x15d   : > { %604 = vst.msk [vmem:[#allocation2 + $0x36] ss:$8 sm:$0x30] %vm13960_vm0, %v601_v2  ;;  %v10057_v28 = vor.u32 %v12651_v25, %v10056_v9  ;;  %v9984_v59 = vld [vmem:[#allocation8 + $0x60] sm:$0xf]  ;;  %v10229_v2 = vor.u32 %v12690_v54, %v10226_v58  ;;  %s666_s0 = sld [smem:[#allocation4 + %s665_s25]] }
 0x15e   : > { %624 = vst.msk [vmem:[#allocation2 + $0x37] ss:$8 sm:$0x30] %vm13960_vm0, %v621_v4  ;;  %v12633_v60 = vld [vmem:[#allocation8 + $0x74] sm:$0xf0]  ;;  %s15461_s27 = smov (!%p8868_p3, %s15459_s27), 63 }
 0x15f   : > { %3157 = vmatpush.bf16.msrb.mxu1 %v9803_v30  ;;  %3183 = vmatpush.bf16.msrb.mxu3 %v9807_v32  ;;  %v10272_v30 = vld [vmem:[#allocation8 + $0x2a0] sm:$0xf]  ;;  %v12705_v32 = vld [vmem:[#allocation8 + $0x2b4] sm:$0xf0]  ;;  %v12630_v62 = vld [vmem:[#allocation8 + $0x64] sm:$0xf]  ;;  %v9985_v3 = vor.u32 %v12633_v60, %v9984_v59 }
 0x160   : > { %3146 = vmatpush.bf16.msrb.mxu0 %v9563_v31  ;;  %3172 = vmatpush.bf16.msrb.mxu2 %v9567_v14  ;;  %v10273_v34 = vor.u32 %v12705_v32, %v10272_v30  ;;  %v10032_v31 = vld [vmem:[#allocation8 + $0xc0] sm:$0xf]  ;;  %v10277_v14 = vor.u32 %v12702_v35, %v10274_v38  ;;  %v9986_v63 = vld [vmem:[#allocation8 + $0x78] sm:$0xf0]  ;;  %v10200_v57 = vld [vmem:[#allocation8 + $0x210] sm:$0xf] }
 0x161   : > { %v14193_v61 = vld [vmem:[%s15235_s3] sm:$0x3f]  ;;  %v12687_v4 = vld [vmem:[#allocation8 + $0x224] sm:$0xf0]  ;;  %v12684_v5 = vld [vmem:[#allocation8 + $0x214] sm:$0xf]  ;;  %v9989_v8 = vor.u32 %v12630_v62, %v9986_v63 }
 0x162   : > { %v10202_v6 = vld [vmem:[#allocation8 + $0x228] sm:$0xf0]  ;;  %v9960_v10 = vld [vmem:[#allocation8 + $0x30] sm:$0xf]  ;;  %v12624_v13 = vld [vmem:[#allocation8 + $0x34] sm:$0xf]  ;;  %v10201_v17 = vor.u32 %v12687_v4, %v10200_v57 }
 0x163   : > { %3158 = vmatpush.bf16.msrb.mxu1 %v9779_v52  ;;  %3184 = vmatpush.bf16.msrb.mxu3 %v9783_v37  ;;  %v12645_v52 = vld [vmem:[#allocation8 + $0xd4] sm:$0xf0]  ;;  %v12642_v37 = vld [vmem:[#allocation8 + $0xc4] sm:$0xf]  ;;  %v9962_v15 = vld [vmem:[#allocation8 + $0x48] sm:$0xf0]  ;;  %v10205_v18 = vor.u32 %v12684_v5, %v10202_v6 }
 0x164   : > { %3147 = vmatmul.bf16.vlgmr.msrb.gmra.mxu0 %v14104_v12  ;;  %3173 = vmatmul.bf16.vlgmr.msrb.gmra.mxu2 %v14104_v12  ;;  %v479_v12 = vld [vmem:[%s478_s28] ss:$8 sm:$0xf]  ;;  %v10033_v40 = vor.u32 %v12645_v52, %v10032_v31  ;;  %v10037_v41 = vor.u32 %v12642_v37, %v10034_v55  ;;  %v12678_v22 = vld [vmem:[#allocation8 + $0x1e4] sm:$0xf]  ;;  %v9965_v25 = vor.u32 %v12624_v13, %v9962_v15  ;;  %s15330_s30 = sld [smem:[#allocation36_spill]] }
 0x165   : > { %3886 = vmatpush.bf16.msra.mxu0 %v10105_v7  ;;  %3912 = vmatpush.bf16.msra.mxu2 %v10109_v11  ;;  %v2543_v7 = vperm.slane %v14193_v61, 0  ;;  %v12627_v11 = vld [vmem:[#allocation8 + $0x44] sm:$0xf0]  ;;  %v12681_v21 = vld [vmem:[#allocation8 + $0x1f4] sm:$0xf0]  ;;  %s686_s4 = sld [smem:[#allocation4 + %s685_s21]] }
 0x166   : > { %v9961_v20 = vor.u32 %v12627_v11, %v9960_v10  ;;  %v9938_v32 = vld [vmem:[#allocation8 + $0x18] sm:$0xf0]  ;;  %v10114_v37 = vld [vmem:[#allocation8 + $0x170] sm:$0xf0]  ;;  %v10152_v55 = vld [vmem:[#allocation8 + $0x1b0] sm:$0xf] }
 0x167   : > { %3159 = vmatpush.bf16.msrb.mxu1 %v9755_v43  ;;  %3185 = vmatpush.bf16.msrb.mxu3 %v9759_v45  ;;  %v12699_v43 = vld [vmem:[#allocation8 + $0x284] sm:$0xf0]  ;;  %v12696_v45 = vld [vmem:[#allocation8 + $0x274] sm:$0xf]  ;;  %v12661_v52 = vld [vmem:[#allocation8 + $0x15c] sm:$0xf] }
 0x168   : > { %v12658_v36 = vld [vmem:[#allocation8 + $0x13c] sm:$0xf0]  ;;  %v12655_v49 = vld [vmem:[#allocation8 + $0x12c] sm:$0xf]  ;;  %v12669_v59 = vld [vmem:[#allocation8 + $0x194] sm:$0xf0] }
 0x169   : > { %3887 = vmatpush.bf16.msra.mxu0 %v10081_v16  ;;  %3913 = vmatpush.bf16.msra.mxu2 %v10085_v26  ;;  %v2544_v16 = vperm.slane %v14193_v61, 1  ;;  %v10176_v26 = vld [vmem:[#allocation8 + $0x1e0] sm:$0xf]  ;;  %v12666_v62 = vld [vmem:[#allocation8 + $0x184] sm:$0xf]  ;;  %s15463_s26 = smov (!%p8874_p5, %s648_s26), 63 }
 0x16a   : > { %3160 = vmatmul.bf16.vlgmr.msrb.gmra.mxu1 %v14110_v39  ;;  %3186 = vmatmul.bf16.vlgmr.msrb.gmra.mxu3 %v14110_v39  ;;  %v480_v39 = vld [vmem:[%s478_s28] ss:$8 sm:$0x30]  ;;  %v10177_v31 = vor.u32 %v12681_v21, %v10176_v26  ;;  %v10130_v63 = vld [vmem:[#allocation8 + $0x198] sm:$0xf0]  ;;  %s631_s10 = sshra.s32 %s15461_s27, 3 }
 0x16b   : > { %v481_v46 = vor.u32 %v480_v39, %v479_v12  ;;  %3899 = vmatpush.bf16.msra.mxu1 %v10297_v23  ;;  %3925 = vmatpush.bf16.msra.mxu3 %v10301_v24  ;;  %v10250_v12 = vld [vmem:[#allocation8 + $0x288] sm:$0xf0]  ;;  %v10008_v39 = vld [vmem:[#allocation8 + $0x90] sm:$0xf]  ;;  %v10178_v23 = vld [vmem:[#allocation8 + $0x1f8] sm:$0xf0]  ;;  %v10133_v15 = vor.u32 %v12666_v62, %v10130_v63 }
 0x16c   : > { %v10253_v47 = vor.u32 %v12696_v45, %v10250_v12  ;;  %v10009_v50 = vor.u32 %v12639_v48, %v10008_v39  ;;  %v9941_v12 = vor.u32 %v12618_v29, %v9938_v32  ;;  %v10117_v48 = vor.u32 %v12661_v52, %v10114_v37  ;;  %v10128_v58 = vld [vmem:[#allocation8 + $0x180] sm:$0xf]  ;;  %v12709_v4 = vld [vmem:[#allocation8 + $0x2dc] sm:$0xf]  ;;  %v10306_v5 = vld [vmem:[#allocation8 + $0x2f0] sm:$0xf0] }
 0x16d   : > { %483 = vst.msk [vmem:[#allocation2 + $0x30] ss:$8 sm:$0xf] %vm13960_vm0, %v481_v46  ;;  %3888 = vmatpush.bf16.msra.mxu0 %v10057_v28  ;;  %3914 = vmatpush.bf16.msra.mxu2 %v10061_v33  ;;  %v12621_v28 = vld [vmem:[#allocation8 + $0x14] sm:$0xf0]  ;;  %v10129_v13 = vor.u32 %v12669_v59, %v10128_v58  ;;  %s15331_s1 = sld [smem:[#allocation37_spill]] }
 0x16e   : > { %484 = vst.msk [vmem:[#allocation2 + $0x30] ss:$8 sm:$0x30] %vm13960_vm0, %v481_v46  ;;  %v10249_v46 = vor.u32 %v12699_v43, %v10248_v42  ;;  %v10112_v33 = vld [vmem:[#allocation8 + $0x158] sm:$0xf]  ;;  %s634_s13 = sand.u32 7, %s15461_s27 }
 0x16f   : > { %3900 = vmatpush.bf16.msra.mxu1 %v10273_v34  ;;  %3926 = vmatpush.bf16.msra.mxu3 %v10277_v14  ;;  %v12664_v34 = vld [vmem:[#allocation8 + $0x16c] sm:$0xf0]  ;;  %v10181_v14 = vor.u32 %v12678_v22, %v10178_v23  ;;  %v12672_v42 = vld [vmem:[#allocation8 + $0x1b4] sm:$0xf]  ;;  %v10154_v43 = vld [vmem:[#allocation8 + $0x1c8] sm:$0xf0] }
 0x170   : > { %v10113_v39 = vor.u32 %v12664_v34, %v10112_v33  ;;  %v12652_v10 = vld [vmem:[#allocation8 + $0x10c] sm:$0xf0]  ;;  %v10280_v21 = vld [vmem:[#allocation8 + $0x2a8] sm:$0xf]  ;;  %v12706_v22 = vld [vmem:[#allocation8 + $0x2bc] sm:$0xf0] }
 0x171   : > { %3889 = vmatpush.bf16.msra.mxu0 %v10033_v40  ;;  %3915 = vmatpush.bf16.msra.mxu2 %v10037_v41  ;;  %v9937_v40 = vor.u32 %v12621_v28, %v9936_v27  ;;  %v12675_v41 = vld [vmem:[#allocation8 + $0x1c4] sm:$0xf0]  ;;  %v12646_v29 = vld [vmem:[#allocation8 + $0xdc] sm:$0xf0]  ;;  %v12643_v32 = vld [vmem:[#allocation8 + $0xcc] sm:$0xf] }
 0x172   : > { %v10153_v54 = vor.u32 %v12675_v41, %v10152_v55  ;;  %v10040_v28 = vld [vmem:[#allocation8 + $0xc8] sm:$0xf]  ;;  %v10042_v33 = vld [vmem:[#allocation8 + $0xe0] sm:$0xf0]  ;;  %v12700_v55 = vld [vmem:[#allocation8 + $0x28c] sm:$0xf0] }
 0x173   : > { %3901 = vmatpush.bf16.msra.mxu1 %v10249_v46  ;;  %3927 = vmatpush.bf16.msra.mxu3 %v10253_v47  ;;  %v10088_v46 = vld [vmem:[#allocation8 + $0x128] sm:$0xf]  ;;  %v10041_v37 = vor.u32 %v12646_v29, %v10040_v28  ;;  %v10258_v41 = vld [vmem:[#allocation8 + $0x290] sm:$0xf0]  ;;  %v12691_v62 = vld [vmem:[#allocation8 + $0x24c] sm:$0xf] }
 0x174   : > { %v2437_v19 = vld [vmem:[#allocation2 + $0x30] sm:$0xff]  ;;  %v2438_v47 = vld [vmem:[#allocation2 + $0x38] sm:$0xff]  ;;  %v10089_v57 = vor.u32 %v12658_v36, %v10088_v46  ;;  %v10234_v63 = vld [vmem:[#allocation8 + $0x260] sm:$0xf0]  ;;  %s651_s28 = sshra.s32 %s15463_s26, 3  ;;  %p667_p1 = scmp.gt.s32.totalorder %s666_s0, 0 }
 0x175   : > { %3890 = vmatpush.bf16.msra.mxu0 %v10009_v50  ;;  %3916 = vmatpush.bf16.msra.mxu2 %v10013_v56  ;;  %v10090_v50 = vld [vmem:[#allocation8 + $0x140] sm:$0xf0]  ;;  %v10157_v56 = vor.u32 %v12672_v42, %v10154_v43  ;;  %v12640_v46 = vld [vmem:[#allocation8 + $0xac] sm:$0xf0]  ;;  %v12637_v36 = vld [vmem:[#allocation8 + $0x9c] sm:$0xf] }
 0x176   : > { %v2439_v42 = vld [vmem:[#allocation2 + $0x40] sm:$0xff]  ;;  %v12625_v28 = vld [vmem:[#allocation8 + $0x3c] sm:$0xf]  ;;  %v9970_v29 = vld [vmem:[#allocation8 + $0x50] sm:$0xf0]  ;;  %s705_s24 = sadd.s32 2, %s15328_s6 }
 0x177   : > { %3902 = vmatpush.bf16.msra.mxu1 %v10225_v1  ;;  %3928 = vmatpush.bf16.msra.mxu3 %v10229_v2  ;;  %s8873_s8 = smul.u32 48, %s631_s10  ;;  %s654_s15 = sand.u32 7, %s15463_s26 }
 0x178   : > { %s8879_s16 = smul.u32 48, %s651_s28  ;;  %p687_p4 = scmp.gt.s32.totalorder %s686_s4, 0 }
 0x179   : > { %3891 = vmatpush.bf16.msra.mxu0 %v9985_v3  ;;  %3917 = vmatpush.bf16.msra.mxu2 %v9989_v8  ;;  %v12712_v3 = vld [vmem:[#allocation8 + $0x2ec] sm:$0xf0]  ;;  %v10064_v8 = vld [vmem:[#allocation8 + $0xf8] sm:$0xf]  ;;  %s14284_s9 = sld [smem:[#allocation4 + %s705_s24]]  ;;  %s725_s20 = sadd.s32 2, %s15329_s7 }
 0x17a   : > { %s668_s22 = scalar_select %p667_p1, %s666_s0, 0 }
 0x17b   : > { %3903 = vmatpush.bf16.msra.mxu1 %v10201_v17  ;;  %3929 = vmatpush.bf16.msra.mxu3 %v10205_v18  ;;  %v10066_v17 = vld [vmem:[#allocation8 + $0x110] sm:$0xf0]  ;;  %v2545_v18 = vperm.slane %v14193_v61, 2  ;;  %p8880_p6 = scmp.lt.s32.totalorder %s666_s0, 63  ;;  %s745_s18 = sadd.s32 2, %s15330_s30 }
 0x17c   : > { %s688_s12 = scalar_select %p687_p4, %s686_s4, 0 }
 0x17d   : > { %3892 = vmatpush.bf16.msra.mxu0 %v9961_v20  ;;  %3918 = vmatpush.bf16.msra.mxu2 %v9965_v25  ;;  %v10309_v20 = vor.u32 %v12709_v4, %v10306_v5  ;;  %v10282_v25 = vld [vmem:[#allocation8 + $0x2c0] sm:$0xf0]  ;;  %v12631_v5 = vld [vmem:[#allocation8 + $0x6c] sm:$0xf]  ;;  %s726_s23 = sld [smem:[#allocation4 + %s725_s20]]  ;;  %s765_s17 = sadd.s32 2, %s15331_s1 }
 0x17e   : > { %p8886_p13 = scmp.lt.s32.totalorder %s686_s4, 63  ;;  %s746_s27 = sld [smem:[#allocation4 + %s745_s18]] }
 0x17f   : > { %3904 = vmatpush.bf16.msra.mxu1 %v10177_v31  ;;  %3930 = vmatpush.bf16.msra.mxu3 %v10181_v14  ;;  %v10256_v14 = vld [vmem:[#allocation8 + $0x278] sm:$0xf]  ;;  %s15465_s22 = smov (!%p8880_p6, %s668_s22), 63  ;;  %s14291_s19 = sadd.s32 %s8873_s8, %s634_s13 }
 0x180   : > { %s766_s25 = sld [smem:[#allocation4 + %s765_s17]]  ;;  %s14293_s26 = sadd.s32 %s8879_s16, %s654_s15 }
 0x181   : > { %3893 = vmatpush.bf16.msra.mxu0 %v9937_v40  ;;  %3919 = vmatpush.bf16.msra.mxu2 %v9941_v12  ;;  %v12697_v40 = vld [vmem:[#allocation8 + $0x27c] sm:$0xf]  ;;  %v10045_v12 = vor.u32 %v12643_v32, %v10042_v33  ;;  %s15467_s12 = smov (!%p8886_p13, %s688_s12), 63  ;;  %p707_p2 = scmp.gt.s32.totalorder %s14284_s9, 0 }
 0x182   : > { %s671_s21 = sshra.s32 %s15465_s22, 3  ;;  %p8892_p8 = scmp.lt.s32.totalorder %s14284_s9, 63 }
 0x183   : > { %3905 = vmatpush.bf16.msra.mxu1 %v10153_v54  ;;  %3931 = vmatpush.bf16.msra.mxu3 %v10157_v56  ;;  %v10232_v54 = vld [vmem:[#allocation8 + $0x248] sm:$0xf]  ;;  %p727_p9 = scmp.gt.s32.totalorder %s726_s23, 0  ;;  %s691_s0 = sshra.s32 %s15467_s12, 3 }
 0x184   : > { %p747_p10 = scmp.gt.s32.totalorder %s746_s27, 0  ;;  %s15469_s9 = smov (!%p707_p2, %s14284_s9), 0 }
 0x185   : > { %3938 = vmatpush.bf16.msrb.mxu0 %v10113_v39  ;;  %3964 = vmatpush.bf16.msrb.mxu2 %v10117_v48  ;;  %v10016_v39 = vld [vmem:[#allocation8 + $0x98] sm:$0xf]  ;;  %v2546_v48 = vperm.slane %v14193_v61, 3  ;;  %p8898_p11 = scmp.lt.s32.totalorder %s726_s23, 63  ;;  %s15471_s23 = smov (!%p727_p9, %s726_s23), 0 }
 0x186   : > { %v10017_v59 = vor.u32 %v12640_v46, %v10016_v39  ;;  %p767_p0 = scmp.gt.s32.totalorder %s766_s25, 0  ;;  %p8904_p3 = scmp.lt.s32.totalorder %s746_s27, 63 }
 0x187   : > { %3906 = vmatpush.bf16.msra.mxu1 %v10129_v13  ;;  %3932 = vmatpush.bf16.msra.mxu3 %v10133_v15  ;;  %v10237_v13 = vor.u32 %v12691_v62, %v10234_v63  ;;  %v10208_v15 = vld [vmem:[#allocation8 + $0x218] sm:$0xf]  ;;  %s748_s4 = scalar_select %p747_p10, %s746_s27, 0 }
 0x188   : > { %p8910_p5 = scmp.lt.s32.totalorder %s766_s25, 63  ;;  %s15473_s25 = smov (!%p767_p0, %s766_s25), 0 }
 0x189   : > { %3939 = vmatpush.bf16.msrb.mxu0 %v10089_v57  ;;  %v12634_v57 = vld [vmem:[#allocation8 + $0x7c] sm:$0xf0]  ;;  %s15475_s9 = smov (!%p8892_p8, %s15469_s9), 63  ;;  %s15477_s23 = smov (!%p8898_p11, %s15471_s23), 63 }
 0x18a   : > { %s15479_s4 = smov (!%p8904_p3, %s748_s4), 63  ;;  %s15481_s25 = smov (!%p8910_p5, %s15473_s25), 63 }
 0x18b   : > { %3977 = vmatpush.bf16.msrb.mxu3 %v10309_v20  ;;  %v10210_v20 = vld [vmem:[#allocation8 + $0x230] sm:$0xf0]  ;;  %s674_s10 = sand.u32 7, %s15465_s22  ;;  %s711_s13 = sshra.s32 %s15475_s9, 3 }
 0x18c   : > { %s8885_s28 = smul.u32 48, %s671_s21  ;;  %s731_s24 = sshra.s32 %s15477_s23, 3 }
 0x18d   : > { %s8891_s8 = smul.u32 48, %s691_s0  ;;  %s751_s15 = sshra.s32 %s15479_s4, 3 }
 0x18e   : > { %s8897_s16 = smul.u32 48, %s711_s13  ;;  %s771_s20 = sshra.s32 %s15481_s25, 3 }
 0x18f   : > { %s694_s18 = sand.u32 7, %s15467_s12  ;;  %s8903_s17 = smul.u32 48, %s731_s24 }
 0x190   : > { %s714_s1 = sand.u32 7, %s15475_s9  ;;  %s8909_s27 = smul.u32 48, %s751_s15 }
 0x191   : > { %s734_s30 = sand.u32 7, %s15477_s23  ;;  %s8915_s7 = smul.u32 48, %s771_s20 }
 0x192   : > { %s754_s6 = sand.u32 7, %s15479_s4  ;;  %s774_s5 = sand.u32 7, %s15481_s25 }
 0x193   : > { %s677_s11 = sadd.s32 %s8885_s28, %s674_s10  ;;  %s697_s14 = sadd.s32 %s8891_s8, %s694_s18 }
 0x194   : > { %s717_s22 = sadd.s32 %s8897_s16, %s714_s1  ;;  %s14304_s2 = sadd.s32 %s8903_s17, %s734_s30 }
 0x195   : > { %s14306_s21 = sadd.s32 %s8909_s27, %s754_s6  ;;  %s14308_s0 = sadd.s32 %s8915_s7, %s774_s5 }
 0x196   : > { %s638_s13 = scalar_lea.vmem [#allocation5], %s14291_s19  ;;  %s658_s9 = scalar_lea.vmem [#allocation5], %s14293_s26 }
 0x197   : > { %s678_s12 = scalar_lea.vmem [#allocation5], %s677_s11  ;;  %s698_s6 = scalar_lea.vmem [#allocation5], %s697_s14 }
 0x198   : > { %s718_s5 = scalar_lea.vmem [#allocation5], %s717_s22  ;;  %s738_s11 = scalar_lea.vmem [#allocation5], %s14304_s2 }
 0x199   : > { %s758_s14 = scalar_lea.vmem [#allocation5], %s14306_s21  ;;  %s778_s7 = scalar_lea.vmem [#allocation5], %s14308_s0 }
 0x19a   : > { %s15336_s1 = sld [smem:[#allocation30_spill]] }
 0x19b   : > { %s15337_s23 = sld [smem:[#allocation31_spill]] }
 0x19c   : > { %s15338_s26 = sld [smem:[#allocation32_spill]] }
 0x19d   : > { %s15339_s28 = sld [smem:[#allocation33_spill]] }
 0x19e   : > { %s15340_s24 = sld [smem:[#allocation34_spill]] }
 0x19f   : > { %s15341_s16 = sld [smem:[#allocation35_spill]] }
 0x1a0   : > { %s785_s19 = sadd.s32 3, %s15336_s1  ;;  %s15342_s17 = sld [smem:[#allocation36_spill]] }
 0x1a1   : > { %s805_s25 = sadd.s32 3, %s15337_s23  ;;  %s786_s4 = sld [smem:[#allocation4 + %s785_s19]] }
 0x1a2   : > { %s806_s10 = sld [smem:[#allocation4 + %s805_s25]]  ;;  %s825_s8 = sadd.s32 3, %s15338_s26 }
 0x1a3   : > { %s845_s20 = sadd.s32 3, %s15339_s28  ;;  %s826_s18 = sld [smem:[#allocation4 + %s825_s8]] }
 0x1a4   : > { %s846_s27 = sld [smem:[#allocation4 + %s845_s20]] }
 0x1a5   : > { %s15343_s21 = sld [smem:[#allocation37_spill]] }
 0x1a6   : > { %s905_s2 = sadd.s32 3, %s15342_s17 }
 0x1a7   : > { %p787_p1 = scmp.gt.s32.totalorder %s786_s4, 0  ;;  %p8916_p6 = scmp.lt.s32.totalorder %s786_s4, 63 }
 0x1a8   : > { %p807_p4 = scmp.gt.s32.totalorder %s806_s10, 0  ;;  %p8922_p13 = scmp.lt.s32.totalorder %s806_s10, 63 }
 0x1a9   : > { %s15483_s4 = smov (!%p787_p1, %s786_s4), 0  ;;  %p827_p2 = scmp.gt.s32.totalorder %s826_s18, 0 }
 0x1aa   : > { %s808_s15 = scalar_select %p807_p4, %s806_s10, 0 }
 0x1ab   : > { %s15485_s4 = smov (!%p8916_p6, %s15483_s4), 63  ;;  %p847_p8 = scmp.gt.s32.totalorder %s846_s27, 0 }
 0x1ac   : > { %s15487_s15 = smov (!%p8922_p13, %s808_s15), 63  ;;  %s791_s22 = sshra.s32 %s15485_s4, 3 }
 0x1ad   : > { %s794_s0 = sand.u32 7, %s15485_s4  ;;  %p8928_p9 = scmp.lt.s32.totalorder %s826_s18, 63 }
 0x1ae   : > { %s848_s30 = scalar_select %p847_p8, %s846_s27, 0 }
 0x1af   : > { %s925_s25 = sadd.s32 3, %s15343_s21  ;;  %p8934_p10 = scmp.lt.s32.totalorder %s846_s27, 63 }
 0x1b0   : > { %s906_s4 = sld [smem:[#allocation4 + %s905_s2]] }
 0x1b1   : > { %s926_s8 = sld [smem:[#allocation4 + %s925_s25]]  ;;  %s15491_s30 = smov (!%p8934_p10, %s848_s30), 63 }
 0x1b2   : > { %s854_s2 = sand.u32 7, %s15491_s30 }
 0x1b6   : > { %p907_p5 = scmp.gt.s32.totalorder %s906_s4, 0  ;;  %p8952_p6 = scmp.lt.s32.totalorder %s906_s4, 63 }
 0x1b7   : > { %p927_p4 = scmp.gt.s32.totalorder %s926_s8, 0  ;;  %p8958_p13 = scmp.lt.s32.totalorder %s926_s8, 63 }
 0x1b8   : > { %s908_s27 = scalar_select %p907_p5, %s906_s4, 0 }
 0x1b9   : > { %s15497_s8 = smov (!%p927_p4, %s926_s8), 0 }
 0x1ba   : > { %s15503_s27 = smov (!%p8952_p6, %s908_s27), 63  ;;  %s15505_s8 = smov (!%p8958_p13, %s15497_s8), 63 }
 0x1bb   : > { %s934_s28 = sand.u32 7, %s15505_s8 }
 0x1bf   : > { %v3044_v0 = vpop.f32.mrf.mxu0 }
 0x1c0   : > { %v3045_v24 = vadd.f32 %v3044_v0, %v2543_v7  ;;  %v10304_v0 = vld [vmem:[#allocation8 + $0x2d8] sm:$0xf]  ;;  %v10093_v7 = vor.u32 %v12655_v49, %v10090_v50  ;;  %v10018_v49 = vld [vmem:[#allocation8 + $0xb0] sm:$0xf0] }
 0x1c2   : > { %3965 = vmatpush.bf16.msrb.mxu2 %v10093_v7 }
 0x1c5   : > { %v3070_v9 = vpop.f32.mrf.mxu2 }
 0x1c6   : > { %v3071_v53 = vadd.f32 %v3070_v9, %v2544_v16  ;;  %v12649_v16 = vld [vmem:[#allocation8 + $0xfc] sm:$0xf]  ;;  %v12703_v9 = vld [vmem:[#allocation8 + $0x2ac] sm:$0xf] }
 0x1c7   : > { %v3057_v30 = vpop.f32.mrf.mxu1  ;;  %v3046_v38 = vpop.f32.mrf.mxu0  ;;  %v10069_v27 = vor.u32 %v12649_v16, %v10066_v17  ;;  %v10285_v31 = vor.u32 %v12703_v9, %v10282_v25  ;;  %v12628_v9 = vld [vmem:[#allocation8 + $0x4c] sm:$0xf0] }
 0x1c8   : > { %v3058_v35 = vadd.f32 %v3057_v30, %v3045_v24  ;;  %v10065_v24 = vor.u32 %v12652_v10, %v10064_v8  ;;  %v10281_v38 = vor.u32 %v12706_v22, %v10280_v21  ;;  %v2440_v8 = vld [vmem:[#allocation2 + $0x48] sm:$0xff] }
 0x1c9   : > { %3966 = vmatpush.bf16.msrb.mxu2 %v10069_v27  ;;  %3978 = vmatpush.bf16.msrb.mxu3 %v10285_v31  ;;  %v12682_v31 = vld [vmem:[#allocation8 + $0x1fc] sm:$0xf0] }
 0x1ca   : > { %v3191_v45 = vadd.f32 %v3058_v35, %v2437_v19  ;;  %v10305_v19 = vor.u32 %v12712_v3, %v10304_v0  ;;  %3940 = vmatpush.bf16.msrb.mxu0 %v10065_v24  ;;  %v9968_v24 = vld [vmem:[#allocation8 + $0x38] sm:$0xf] }
 0x1cc   : > { %v9928_v51 = vmul.f32 -1.442695, %v3191_v45  ;;  %3951 = vmatpush.bf16.msrb.mxu1 %v10305_v19  ;;  %v12685_v19 = vld [vmem:[#allocation8 + $0x21c] sm:$0xf] }
 0x1cd   : > { %v3083_v60 = vpop.f32.mrf.mxu3  ;;  %v3072_v2 = vpop.f32.mrf.mxu2  ;;  %3967 = vmatpush.bf16.msrb.mxu2 %v10045_v12  ;;  %v12622_v12 = vld [vmem:[#allocation8 + $0x1c] sm:$0xf0] }
 0x1ce   : > { %13303 = vpow2.f32 %v9928_v51  ;;  %v3084_v1 = vadd.f32 %v3083_v60, %v3071_v53  ;;  %v10257_v51 = vor.u32 %v12700_v55, %v10256_v14  ;;  %v10261_v53 = vor.u32 %v12697_v40, %v10258_v41  ;;  %3941 = vmatpush.bf16.msrb.mxu0 %v10041_v37  ;;  %v12694_v60 = vld [vmem:[#allocation8 + $0x25c] sm:$0xf0]  ;;  %v9992_v2 = vld [vmem:[#allocation8 + $0x68] sm:$0xf]  ;;  %v12679_v55 = vld [vmem:[#allocation8 + $0x1ec] sm:$0xf] }
 0x1cf   : > { %v3059_v6 = vpop.f32.mrf.mxu1  ;;  %v3096_v26 = vpop.f32.mrf.mxu0  ;;  %v9969_v37 = vor.u32 %v12628_v9, %v9968_v24  ;;  %v10186_v40 = vld [vmem:[#allocation8 + $0x200] sm:$0xf0]  ;;  %v2441_v24 = vld [vmem:[#allocation2 + $0x50] sm:$0xff] }
 0x1d0   : > { %v3192_v11 = vadd.f32 %v3084_v1, %v2438_v47  ;;  %v3097_v52 = vadd.f32 %v3096_v26, %v2545_v18  ;;  %3952 = vmatpush.bf16.msrb.mxu1 %v10281_v38  ;;  %v10021_v1 = vor.u32 %v12637_v36, %v10018_v49  ;;  %v9994_v6 = vld [vmem:[#allocation8 + $0x80] sm:$0xf0]  ;;  %3979 = vmatpush.bf16.msrb.mxu3 %v10261_v53  ;;  %v12688_v26 = vld [vmem:[#allocation8 + $0x22c] sm:$0xf0]  ;;  %v10184_v38 = vld [vmem:[#allocation8 + $0x1e8] sm:$0xf] }
 0x1d1   : > { %v9993_v18 = vor.u32 %v12634_v57, %v9992_v2  ;;  %v10209_v33 = vor.u32 %v12688_v26, %v10208_v15  ;;  %v12619_v36 = vld [vmem:[#allocation8 + $0xc] sm:$0xf]  ;;  %v9946_v49 = vld [vmem:[#allocation8 + $0x20] sm:$0xf0]  ;;  %v10185_v53 = vor.u32 %v12682_v31, %v10184_v38  ;;  %v10162_v2 = vld [vmem:[#allocation8 + $0x1d0] sm:$0xf0] }
 0x1d2   : > { %v9929_v23 = vmul.f32 -1.442695, %v3192_v11  ;;  %v10233_v11 = vor.u32 %v12694_v60, %v10232_v54  ;;  %3942 = vmatpush.bf16.msrb.mxu0 %v10017_v59  ;;  %3968 = vmatpush.bf16.msrb.mxu2 %v10021_v1  ;;  %v10189_v54 = vor.u32 %v12679_v55, %v10186_v40  ;;  %v12673_v1 = vld [vmem:[#allocation8 + $0x1bc] sm:$0xf]  ;;  %v12670_v26 = vld [vmem:[#allocation8 + $0x19c] sm:$0xf0] }
 0x1d4   : > { %v13304_v30 = vpop.eup %13303  ;;  %13305 = vpow2.f32 %v9929_v23  ;;  %3953 = vmatpush.bf16.msrb.mxu1 %v10257_v51  ;;  %v9997_v23 = vor.u32 %v12631_v5, %v9994_v6  ;;  %3980 = vmatpush.bf16.msrb.mxu3 %v10237_v13  ;;  %v9949_v5 = vor.u32 %v12619_v36, %v9946_v49 }
 0x1d5   : > { %v14198_v34 = vadd.f32 1.0, %v13304_v30  ;;  %v3085_v35 = vpop.f32.mrf.mxu3  ;;  %v3122_v45 = vpop.f32.mrf.mxu2  ;;  %v2547_v30 = vperm.slane %v14193_v61, 4 }
 0x1d6   : > { %v3123_v4 = vadd.f32 %v3122_v45, %v2546_v48  ;;  %v10213_v35 = vor.u32 %v12685_v19, %v10210_v20  ;;  %3943 = vmatpush.bf16.msrb.mxu0 %v9993_v18  ;;  %3969 = vmatpush.bf16.msrb.mxu2 %v9997_v23  ;;  %v9944_v45 = vld [vmem:[#allocation8 + $0x8] sm:$0xf]  ;;  %v12667_v19 = vld [vmem:[#allocation8 + $0x18c] sm:$0xf]  ;;  %v10138_v20 = vld [vmem:[#allocation8 + $0x1a0] sm:$0xf0] }
 0x1d7   : > { %13307 = vrcp.f32 %v14198_v34  ;;  %v3109_v43 = vpop.f32.mrf.mxu1  ;;  %v3098_v50 = vpop.f32.mrf.mxu0  ;;  %vm3206_vm3 = vweird.f32 %v14198_v34  ;;  %v9945_v63 = vor.u32 %v12622_v12, %v9944_v45 }
 0x1d8   : > { %v3110_v47 = vadd.f32 %v3109_v43, %v3097_v52  ;;  %3954 = vmatpush.bf16.msrb.mxu1 %v10233_v11  ;;  %v9973_v43 = vor.u32 %v12625_v28, %v9970_v29  ;;  %3981 = vmatpush.bf16.msrb.mxu3 %v10213_v35 }
 0x1da   : > { %v13306_v56 = vpop.eup %13305  ;;  %v3231_v58 = vadd.f32 %v3110_v47, %v2439_v42  ;;  %v3210_v42 = vand.u32 2147483647, %v14198_v34  ;;  %v3212_v47 = vand.u32 2147483648, %v14198_v34  ;;  %3944 = vmatpush.bf16.msrb.mxu0 %v9969_v37  ;;  %3970 = vmatpush.bf16.msrb.mxu2 %v9973_v43  ;;  %v2442_v43 = vld [vmem:[#allocation2 + $0x58] sm:$0xff] }
 0x1db   : > { %v14202_v0 = vadd.f32 1.0, %v13306_v56  ;;  %v10160_v56 = vld [vmem:[#allocation8 + $0x1b8] sm:$0xf] }
 0x1dc   : > { %v9930_v3 = vmul.f32 -1.442695, %v3231_v58  ;;  %3955 = vmatpush.bf16.msrb.mxu1 %v10209_v33  ;;  %v12676_v58 = vld [vmem:[#allocation8 + $0x1cc] sm:$0xf0]  ;;  %vm3211_vm5 = vcmp.eq.f32.partialorder %v3210_v42, 8.507059e+37  ;;  %3982 = vmatpush.bf16.msrb.mxu3 %v10189_v54 }
 0x1dd   : > { %v14204_v7 = vpop.eup %13307  ;;  %13309 = vrcp.f32 %v14202_v0  ;;  %v3135_v10 = vpop.f32.mrf.mxu3  ;;  %v3227_v13 = vand.u32 2147483648, %v14202_v0  ;;  %v10161_v15 = vor.u32 %v12676_v58, %v10160_v56  ;;  %vm3221_vm7 = vweird.f32 %v14202_v0 }
 0x1de   : > { %13311 = vpow2.f32 %v9930_v3  ;;  %v3136_v16 = vadd.f32 %v3135_v10, %v3123_v4  ;;  %v3202_v17 = vmul.f32 %v14204_v7, %v14198_v34  ;;  %v3124_v22 = vpop.f32.mrf.mxu2  ;;  %vm3207_vm2 = vweird.f32 %v14204_v7  ;;  %3945 = vmatpush.bf16.msrb.mxu0 %v9945_v63  ;;  %3971 = vmatpush.bf16.msrb.mxu2 %v9949_v5 }
 0x1df   : > { %v3111_v21 = vpop.f32.mrf.mxu1  ;;  %vm14224_vm4 = vmor %vm3206_vm3, %vm3207_vm2  ;;  %v2548_v3 = vperm.slane %v14193_v61, 5  ;;  %v3225_v23 = vand.u32 2147483647, %v14202_v0  ;;  %v3228_v35 = vor.u32 1.1754944e-38, %v3227_v13  ;;  %v12659_v13 = vld [vmem:[#allocation8 + $0x144] sm:$0xf0] }
 0x1e0   : > { %v3232_v25 = vadd.f32 %v3136_v16, %v2440_v8  ;;  %v3203_v27 = vsub.f32 1.0, %v3202_v17  ;;  %v3213_v8 = vor.u32 1.1754944e-38, %v3212_v47  ;;  %3956 = vmatpush.bf16.msrb.mxu1 %v10185_v53  ;;  %v10165_v16 = vor.u32 %v12673_v1, %v10162_v2  ;;  %v12665_v2 = vld [vmem:[#allocation8 + $0x174] sm:$0xf0] }
 0x1e1   : > { %v3148_v32 = vpop.f32.mrf.mxu0  ;;  %vm3226_vm9 = vcmp.eq.f32.partialorder %v3225_v23, 8.507059e+37  ;;  %v10314_v23 = vld [vmem:[#allocation8 + $0x2f8] sm:$0xf0] }
 0x1e2   : > { %v9931_v14 = vmul.f32 -1.442695, %v3232_v25  ;;  %v3204_v52 = vmul.f32 %v14204_v7, %v3203_v27  ;;  %v3149_v59 = vadd.f32 %v3148_v32, %v2547_v30  ;;  %3983 = vmatpush.bf16.msrb.mxu3 %v10165_v16  ;;  %v10141_v30 = vor.u32 %v12667_v19, %v10138_v20  ;;  %v13446_v19 = vld [vmem:[%s14101_s29 + $0x8] sm:$0xff]  ;;  %v10072_v25 = vld [vmem:[#allocation8 + $0x100] sm:$0xf] }
 0x1e3   : > { %v14211_v41 = vpop.eup %13309 }
 0x1e4   : > { %v13312_v39 = vpop.eup %13311  ;;  %13313 = vpow2.f32 %v9931_v14  ;;  %v3205_v46 = vadd.f32 %v14204_v7, %v3204_v52  ;;  %v3217_v48 = vmul.f32 %v14211_v41, %v14202_v0  ;;  %vm3222_vm6 = vweird.f32 %v14211_v41  ;;  %3957 = vmatpush.bf16.msrb.mxu1 %v10161_v15 }
 0x1e5   : > { %v14219_v50 = vadd.f32 1.0, %v13312_v39  ;;  %v3137_v51 = vpop.f32.mrf.mxu3  ;;  %vm14243_vm8 = vmor %vm3221_vm7, %vm3222_vm6 }
 0x1e6   : > { %v3218_v62 = vsub.f32 1.0, %v3217_v48  ;;  %v3209_v57 = vsel %vm14224_vm4, %v14204_v7, %v3205_v46  ;;  %v10136_v7 = vld [vmem:[#allocation8 + $0x188] sm:$0xf]  ;;  %3984 = vmatpush.bf16.msrb.mxu3 %v10141_v30 }
 0x1e7   : > { %13315 = vrcp.f32 %v14219_v50  ;;  %v3161_v34 = vpop.f32.mrf.mxu1  ;;  %v3174_v4 = vpop.f32.mrf.mxu2  ;;  %v3214_v61 = vsel %vm3211_vm5, %v3213_v8, %v3209_v57  ;;  %v10137_v0 = vor.u32 %v12670_v26, %v10136_v7  ;;  %v3252_v55 = vand.u32 2147483648, %v14219_v50  ;;  %v10122_v57 = vld [vmem:[#allocation8 + $0x178] sm:$0xf0]  ;;  %v12656_v7 = vld [vmem:[#allocation8 + $0x134] sm:$0xf] }
 0x1e8   : > { %v3162_v6 = vadd.f32 %v3161_v34, %v3149_v59  ;;  %v3219_v10 = vmul.f32 %v14211_v41, %v3218_v62  ;;  %v3175_v9 = vadd.f32 %v3174_v4, %v2548_v3  ;;  %v3250_v42 = vand.u32 2147483647, %v14219_v50  ;;  %v10120_v59 = vld [vmem:[#allocation8 + $0x160] sm:$0xf]  ;;  %v12662_v34 = vld [vmem:[#allocation8 + $0x164] sm:$0xf] }
 0x1e9   : > { %v3150_v11 = vpop.f32.mrf.mxu0  ;;  %3958 = vmatpush.bf16.msrb.mxu1 %v10137_v0  ;;  %vm3246_vm11 = vweird.f32 %v14219_v50  ;;  %v3253_v46 = vor.u32 1.1754944e-38, %v3252_v55  ;;  %v13445_v62 = vld [vmem:[%s14101_s29] sm:$0xff]  ;;  %v10121_v8 = vor.u32 %v12665_v2, %v10120_v59  ;;  %v10074_v0 = vld [vmem:[#allocation8 + $0x118] sm:$0xf0]  ;;  %v10048_v55 = vld [vmem:[#allocation8 + $0xd0] sm:$0xf] }
 0x1ea   : > { %v13314_v17 = vpop.eup %13313  ;;  %v3220_v18 = vadd.f32 %v14211_v41, %v3219_v10  ;;  %v3271_v22 = vmul.f32 %v3214_v61, %v3162_v6  ;;  %vm3251_vm13 = vcmp.eq.f32.partialorder %v3250_v42, 8.507059e+37  ;;  %v10125_v10 = vor.u32 %v12662_v34, %v10122_v57  ;;  %v10096_v11 = vld [vmem:[#allocation8 + $0x130] sm:$0xf]  ;;  %v10050_v42 = vld [vmem:[#allocation8 + $0xe8] sm:$0xf0] }
 0x1eb   : > { %v14237_v21 = vadd.f32 1.0, %v13314_v17  ;;  %v10098_v17 = vld [vmem:[#allocation8 + $0x148] sm:$0xf0]  ;;  %v12695_v59 = vld [vmem:[#allocation8 + $0x264] sm:$0xf0] }
 0x1ec   : > { %v3224_v29 = vsel %vm14243_vm8, %v14211_v41, %v3220_v18  ;;  %v3273_v38 = vadd.f32 %v3271_v22, %v2441_v24  ;;  %v10312_v18 = vld [vmem:[#allocation8 + $0x2e0] sm:$0xf]  ;;  %v12710_v22 = vld [vmem:[#allocation8 + $0x2e4] sm:$0xf]  ;;  %v10097_v24 = vor.u32 %v12659_v13, %v10096_v11  ;;  %v10000_v2 = vld [vmem:[#allocation8 + $0x70] sm:$0xf] }
 0x1ed   : > { %v13316_v27 = vpop.eup %13315  ;;  %13317 = vrcp.f32 %v14237_v21  ;;  %v3187_v28 = vpop.f32.mrf.mxu3  ;;  %v3229_v37 = vsel %vm3226_vm9, %v3228_v35, %v3224_v29  ;;  %v3267_v51 = vand.u32 2147483648, %v14237_v21  ;;  %v3265_v58 = vand.u32 2147483647, %v14237_v21  ;;  %v12650_v29 = vld [vmem:[#allocation8 + $0x104] sm:$0xf] }
 0x1ee   : > { %v3242_v32 = vmul.f32 %v13316_v27, %v14219_v50  ;;  %v3188_v33 = vadd.f32 %v3187_v28, %v3175_v9  ;;  %vm3247_vm10 = vweird.f32 %v13316_v27  ;;  %13319 = vtanh.f32 %v3273_v38  ;;  %v12653_v28 = vld [vmem:[#allocation8 + $0x114] sm:$0xf0]  ;;  %v12707_v35 = vld [vmem:[#allocation8 + $0x2c4] sm:$0xf0]  ;;  %v12632_v57 = vld [vmem:[#allocation8 + $0x74] sm:$0xf] }
 0x1ef   : > { %v3163_v31 = vpop.f32.mrf.mxu1  ;;  %v3176_v14 = vpop.f32.mrf.mxu2  ;;  %vm3248_vm12 = vmor %vm3246_vm11, %vm3247_vm10  ;;  %vm3261_vm15 = vweird.f32 %v14237_v21  ;;  %v3268_v3 = vor.u32 1.1754944e-38, %v3267_v51  ;;  %vm3266_vm2 = vcmp.eq.f32.partialorder %v3265_v58, 8.507059e+37  ;;  %v10101_v9 = vor.u32 %v12656_v7, %v10098_v17  ;;  %v12641_v51 = vld [vmem:[#allocation8 + $0xb4] sm:$0xf0]  ;;  %v12635_v34 = vld [vmem:[#allocation8 + $0x84] sm:$0xf0] }
 0x1f0   : > { %v3243_v52 = vsub.f32 1.0, %v3242_v32  ;;  %v3272_v40 = vmul.f32 %v3229_v37, %v3188_v33  ;;  %v10317_v32 = vor.u32 %v12710_v22, %v10314_v23  ;;  %v10288_v33 = vld [vmem:[#allocation8 + $0x2b0] sm:$0xf]  ;;  %v12704_v31 = vld [vmem:[#allocation8 + $0x2b4] sm:$0xf]  ;;  %v10077_v37 = vor.u32 %v12650_v29, %v10074_v0 }
 0x1f1   : > { %v10290_v14 = vld [vmem:[#allocation8 + $0x2c8] sm:$0xf0]  ;;  %v10218_v11 = vld [vmem:[#allocation8 + $0x238] sm:$0xf0]  ;;  %v10001_v13 = vor.u32 %v12635_v34, %v10000_v2  ;;  %v9976_v7 = vld [vmem:[#allocation8 + $0x40] sm:$0xf] }
 0x1f2   : > { %v3244_v41 = vmul.f32 %v13316_v27, %v3243_v52  ;;  %v3274_v47 = vadd.f32 %v3272_v40, %v2442_v43  ;;  %v10073_v52 = vor.u32 %v12653_v28, %v10072_v25  ;;  %v12647_v40 = vld [vmem:[#allocation8 + $0xe4] sm:$0xf0]  ;;  %v10289_v43 = vor.u32 %v12707_v35, %v10288_v33  ;;  %v12629_v17 = vld [vmem:[#allocation8 + $0x54] sm:$0xf0]  ;;  %v12680_v22 = vld [vmem:[#allocation8 + $0x1f4] sm:$0xf] }
 0x1f3   : > { %v13318_v45 = vpop.eup %13317  ;;  %v10194_v23 = vld [vmem:[#allocation8 + $0x208] sm:$0xf0]  ;;  %v9952_v25 = vld [vmem:[#allocation8 + $0x10] sm:$0xf]  ;;  %v12620_v28 = vld [vmem:[#allocation8 + $0x14] sm:$0xf] }
 0x1f4   : > { %v3257_v12 = vmul.f32 %v13318_v45, %v14237_v21  ;;  %v3245_v39 = vadd.f32 %v13316_v27, %v3244_v41  ;;  %vm3262_vm14 = vweird.f32 %v13318_v45  ;;  %v13320_v50 = vpop.eup %13319  ;;  %13321 = vtanh.f32 %v3274_v47  ;;  %v12713_v21 = vld [vmem:[#allocation8 + $0x2f4] sm:$0xf0]  ;;  %v12644_v41 = vld [vmem:[#allocation8 + $0xd4] sm:$0xf]  ;;  %v10266_v47 = vld [vmem:[#allocation8 + $0x298] sm:$0xf0] }
 0x1f5   : > { %v3189_v48 = vpop.f32.mrf.mxu3  ;;  %vm3263_vm1 = vmor %vm3261_vm15, %vm3262_vm14  ;;  %v10313_v30 = vor.u32 %v12713_v21, %v10312_v18  ;;  %v9978_v18 = vld [vmem:[#allocation8 + $0x58] sm:$0xf0]  ;;  %v12683_v21 = vld [vmem:[#allocation8 + $0x204] sm:$0xf0] }
 0x1f6   : > { %v3258_v36 = vsub.f32 1.0, %v3257_v12  ;;  %v3249_v49 = vsel %vm3248_vm12, %v13316_v27, %v3245_v39  ;;  %v10264_v12 = vld [vmem:[#allocation8 + $0x280] sm:$0xf]  ;;  %v12701_v39 = vld [vmem:[#allocation8 + $0x294] sm:$0xf0]  ;;  %v10049_v48 = vor.u32 %v12647_v40, %v10048_v55 }
 0x1f7   : > { %v3254_v53 = vsel %vm3251_vm13, %v3253_v46, %v3249_v49  ;;  %v12698_v46 = vld [vmem:[#allocation8 + $0x284] sm:$0xf]  ;;  %v10024_v49 = vld [vmem:[#allocation8 + $0xa0] sm:$0xf]  ;;  %v9954_v29 = vld [vmem:[#allocation8 + $0x28] sm:$0xf0] }
 0x1f8   : > { %v3259_v54 = vmul.f32 %v13318_v45, %v3258_v36  ;;  %v3277_v56 = vsub.f32 1.0, %v3254_v53  ;;  %v3281_v63 = vmul.f32 %v13445_v62, %v3254_v53  ;;  %v10053_v36 = vor.u32 %v12644_v41, %v10050_v42  ;;  %v12638_v53 = vld [vmem:[#allocation8 + $0xa4] sm:$0xf]  ;;  %v10242_v62 = vld [vmem:[#allocation8 + $0x268] sm:$0xf0] }
 0x1f9   : > { %v10269_v58 = vor.u32 %v12698_v46, %v10266_v47  ;;  %v12677_v33 = vld [vmem:[#allocation8 + $0x1d4] sm:$0xf0]  ;;  %v12674_v35 = vld [vmem:[#allocation8 + $0x1c4] sm:$0xf]  ;;  %v10144_v40 = vld [vmem:[#allocation8 + $0x190] sm:$0xf] }
 0x1fa   : > { %v3279_v60 = vmul.f32 %v13320_v50, %v3277_v56  ;;  %v3260_v1 = vadd.f32 %v13318_v45, %v3259_v54  ;;  %v13322_v61 = vpop.eup %13321  ;;  %v10026_v54 = vld [vmem:[#allocation8 + $0xb8] sm:$0xf0]  ;;  %v10265_v56 = vor.u32 %v12701_v39, %v10264_v12  ;;  %v10240_v50 = vld [vmem:[#allocation8 + $0x250] sm:$0xf]  ;;  %v12671_v41 = vld [vmem:[#allocation8 + $0x1a4] sm:$0xf0] }
 0x1fb   : > { %v12668_v42 = vld [vmem:[#allocation8 + $0x194] sm:$0xf]  ;;  %v659_v46 = vld [vmem:[%s658_s9] ss:$8 sm:$0xf] }
 0x1fc   : > { %v3283_v4 = vadd.f32 %v3281_v63, %v3279_v60  ;;  %v3264_v5 = vsel %vm3263_vm1, %v13318_v45, %v3260_v1  ;;  %v10293_v45 = vor.u32 %v12704_v31, %v10290_v14  ;;  %v12692_v60 = vld [vmem:[#allocation8 + $0x254] sm:$0xf]  ;;  %v10025_v63 = vor.u32 %v12641_v51, %v10024_v49  ;;  %v10170_v31 = vld [vmem:[#allocation8 + $0x1d8] sm:$0xf0] }
 0x1fd   : > { %v3269_v6 = vsel %vm3266_vm2, %v3268_v3, %v3264_v5  ;;  %v10029_v1 = vor.u32 %v12638_v53, %v10026_v54  ;;  %v10002_v3 = vld [vmem:[#allocation8 + $0x88] sm:$0xf0]  ;;  %v10245_v5 = vor.u32 %v12692_v60, %v10242_v62  ;;  %v10173_v55 = vor.u32 %v12674_v35, %v10170_v31  ;;  %v660_v47 = vld [vmem:[%s658_s9] ss:$8 sm:$0x30]  ;;  %s865_s9 = sadd.s32 3, %s15340_s24 }
 0x1fe   : > { %9932 = vst [vmem:[%s14101_s29 + $0x10] sm:$0xff] %v3283_v4  ;;  %v3278_v15 = vsub.f32 1.0, %v3269_v6  ;;  %v14261_v16 = vpack.c.bf16 %v3283_v4, %v3283_v4  ;;  %v3282_v20 = vmul.f32 %v13446_v19, %v3269_v6  ;;  %v10241_v4 = vor.u32 %v12695_v59, %v10240_v50  ;;  %v10216_v6 = vld [vmem:[#allocation8 + $0x220] sm:$0xf]  ;;  %v12798_v35 = vld [vmem:[#allocation8 + $0x2a4] sm:$0xf] }
 0x1ff   : > { %v680_v49 = vld [vmem:[%s678_s12] ss:$8 sm:$0x30]  ;;  %v10664_v31 = vld [vmem:[#allocation8 + $0x2b8] sm:$0xf0]  ;;  %s914_s24 = sand.u32 7, %s15503_s27 }
 0x200   : > { %v3280_v26 = vmul.f32 %v13322_v61, %v3278_v15  ;;  %3894 = vmatmul.bf16.vlgmr.msra.gmra.mxu0 %v14261_v16  ;;  %3920 = vmatmul.bf16.vlgmr.msra.gmra.mxu2 %v14261_v16  ;;  %v10005_v15 = vor.u32 %v12632_v57, %v10002_v3  ;;  %v12626_v61 = vld [vmem:[#allocation8 + $0x44] sm:$0xf]  ;;  %v699_v53 = vld [vmem:[%s698_s6] ss:$8 sm:$0xf] }
 0x201   : > { %3990 = vmatpush.bf16.msra.mxu0 %v10121_v8  ;;  %4016 = vmatpush.bf16.msra.mxu2 %v10125_v10  ;;  %v12689_v8 = vld [vmem:[#allocation8 + $0x234] sm:$0xf0]  ;;  %v12686_v10 = vld [vmem:[#allocation8 + $0x224] sm:$0xf] }
 0x202   : > { %v3284_v27 = vadd.f32 %v3282_v20, %v3280_v26  ;;  %v10217_v26 = vor.u32 %v12689_v8, %v10216_v6  ;;  %v10221_v19 = vor.u32 %v12686_v10, %v10218_v11  ;;  %v10192_v20 = vld [vmem:[#allocation8 + $0x1f0] sm:$0xf]  ;;  %v700_v54 = vld [vmem:[%s698_s6] ss:$8 sm:$0x30]  ;;  %s814_s6 = sand.u32 7, %s15487_s15 }
 0x203   : > { %v10193_v0 = vor.u32 %v12683_v21, %v10192_v20  ;;  %v720_v50 = vld [vmem:[%s718_s5] ss:$8 sm:$0x30]  ;;  %v12756_v10 = vld [vmem:[#allocation8 + $0x154] sm:$0xf] }
 0x204   : > { %9933 = vst [vmem:[%s14101_s29 + $0x18] sm:$0xff] %v3284_v27  ;;  %v14267_v38 = vpack.c.bf16 %v3284_v27, %v3284_v27  ;;  %v12623_v27 = vld [vmem:[#allocation8 + $0x24] sm:$0xf0]  ;;  %v10496_v11 = vld [vmem:[#allocation8 + $0x168] sm:$0xf0] }
 0x205   : > { %3991 = vmatpush.bf16.msra.mxu0 %v10097_v24  ;;  %4017 = vmatpush.bf16.msra.mxu2 %v10101_v9  ;;  %v9977_v24 = vor.u32 %v12629_v17, %v9976_v7  ;;  %v9981_v9 = vor.u32 %v12626_v61, %v9978_v18  ;;  %v9953_v14 = vor.u32 %v12623_v27, %v9952_v25  ;;  %v739_v59 = vld [vmem:[%s738_s11] ss:$8 sm:$0xf]  ;;  %v12750_v61 = vld [vmem:[#allocation8 + $0x124] sm:$0xf] }
 0x206   : > { %3907 = vmatmul.bf16.vlgmr.msra.gmra.mxu1 %v14267_v38  ;;  %3933 = vmatmul.bf16.vlgmr.msra.gmra.mxu3 %v14267_v38  ;;  %v740_v62 = vld [vmem:[%s738_s11] ss:$8 sm:$0x30]  ;;  %v12753_v7 = vld [vmem:[#allocation8 + $0x134] sm:$0xf0]  ;;  %s14443_s11 = sld [smem:[#allocation4 + %s865_s9]] }
 0x207   : > { %4003 = vmatpush.bf16.msra.mxu1 %v10313_v30  ;;  %4029 = vmatpush.bf16.msra.mxu3 %v10317_v32  ;;  %v10197_v30 = vor.u32 %v12680_v22, %v10194_v23  ;;  %v10168_v32 = vld [vmem:[#allocation8 + $0x1c0] sm:$0xf]  ;;  %v12759_v6 = vld [vmem:[#allocation8 + $0x164] sm:$0xf0]  ;;  %v10472_v18 = vld [vmem:[#allocation8 + $0x138] sm:$0xf0] }
 0x208   : > { %v760_v2 = vld [vmem:[%s758_s14] ss:$8 sm:$0x30]  ;;  %v12804_v21 = vld [vmem:[#allocation8 + $0x2d4] sm:$0xf] }
 0x209   : > { %3992 = vmatpush.bf16.msra.mxu0 %v10073_v52  ;;  %4018 = vmatpush.bf16.msra.mxu2 %v10077_v37  ;;  %v9957_v52 = vor.u32 %v12620_v28, %v9954_v29  ;;  %v10169_v37 = vor.u32 %v12677_v33, %v10168_v32  ;;  %v779_v57 = vld [vmem:[%s778_s7] ss:$8 sm:$0xf]  ;;  %v10688_v22 = vld [vmem:[#allocation8 + $0x2e8] sm:$0xf0] }
 0x20a   : > { %v780_v3 = vld [vmem:[%s778_s7] ss:$8 sm:$0x30]  ;;  %v12744_v27 = vld [vmem:[#allocation8 + $0xf4] sm:$0xf]  ;;  %s828_s7 = scalar_select %p827_p2, %s826_s18, 0 }
 0x20b   : > { %4004 = vmatpush.bf16.msra.mxu1 %v10289_v43  ;;  %4030 = vmatpush.bf16.msra.mxu3 %v10293_v45  ;;  %v10146_v43 = vld [vmem:[#allocation8 + $0x1a8] sm:$0xf0]  ;;  %v10145_v45 = vor.u32 %v12671_v41, %v10144_v40  ;;  %v12807_v20 = vld [vmem:[#allocation8 + $0x2e4] sm:$0xf0]  ;;  %v10424_v40 = vld [vmem:[#allocation8 + $0xd8] sm:$0xf0] }
 0x20c   : > { %v10149_v12 = vor.u32 %v12668_v42, %v10146_v43  ;;  %v12747_v25 = vld [vmem:[#allocation8 + $0x104] sm:$0xf0]  ;;  %v10448_v29 = vld [vmem:[#allocation8 + $0x108] sm:$0xf0]  ;;  %v10638_v43 = vld [vmem:[#allocation8 + $0x270] sm:$0xf] }
 0x20d   : > { %3993 = vmatpush.bf16.msra.mxu0 %v10049_v48  ;;  %4019 = vmatpush.bf16.msra.mxu2 %v10053_v36  ;;  %v661_v48 = vor.u32 %v660_v47, %v659_v46  ;;  %v679_v36 = vld [vmem:[%s678_s12] ss:$8 sm:$0xf]  ;;  %v10451_v32 = vor.u32 %v12744_v27, %v10448_v29  ;;  %s8921_s12 = smul.u32 48, %s791_s22  ;;  %s15489_s7 = smov (!%p8928_p9, %s828_s7), 63 }
 0x20e   : > { %v681_v51 = vor.u32 %v680_v49, %v679_v36  ;;  %v12732_v36 = vld [vmem:[#allocation8 + $0x94] sm:$0xf]  ;;  %v10400_v49 = vld [vmem:[#allocation8 + $0xa8] sm:$0xf0]  ;;  %v12717_v29 = vld [vmem:[#allocation8 + $0x14] sm:$0xf0] }
 0x20f   : > { %4005 = vmatpush.bf16.msra.mxu1 %v10265_v56  ;;  %4031 = vmatpush.bf16.msra.mxu3 %v10269_v58  ;;  %663 = vst.msk [vmem:[#allocation2 + $0x61] ss:$8 sm:$0xf] %vm13960_vm0, %v661_v48  ;;  %v701_v56 = vor.u32 %v700_v54, %v699_v53  ;;  %v719_v58 = vld [vmem:[%s718_s5] ss:$8 sm:$0xf]  ;;  %s14450_s10 = sadd.s32 %s8921_s12, %s794_s0 }
 0x210   : > { %3946 = vmatmul.bf16.vlgmr.msrb.gmra.mxu0 %v14261_v16  ;;  %3972 = vmatmul.bf16.vlgmr.msrb.gmra.mxu2 %v14261_v16  ;;  %683 = vst.msk [vmem:[#allocation2 + $0x62] ss:$8 sm:$0xf] %vm13960_vm0, %v681_v51  ;;  %v721_v60 = vor.u32 %v720_v50, %v719_v58  ;;  %v10614_v53 = vld [vmem:[#allocation8 + $0x240] sm:$0xf]  ;;  %v10403_v58 = vor.u32 %v12732_v36, %v10400_v49  ;;  %p867_p11 = scmp.gt.s32.totalorder %s14443_s11, 0 }
 0x211   : > { %3994 = vmatpush.bf16.msra.mxu0 %v10025_v63  ;;  %4020 = vmatpush.bf16.msra.mxu2 %v10029_v1  ;;  %703 = vst.msk [vmem:[#allocation2 + $0x63] ss:$8 sm:$0xf] %vm13960_vm0, %v701_v56  ;;  %v741_v63 = vor.u32 %v740_v62, %v739_v59  ;;  %v759_v1 = vld [vmem:[%s758_s14] ss:$8 sm:$0xf] }
 0x212   : > { %723 = vst.msk [vmem:[#allocation2 + $0x64] ss:$8 sm:$0xf] %vm13960_vm0, %v721_v60  ;;  %v761_v34 = vor.u32 %v760_v2, %v759_v1  ;;  %v12789_v54 = vld [vmem:[#allocation8 + $0x254] sm:$0xf0]  ;;  %s885_s14 = sadd.s32 3, %s15341_s16 }
 0x213   : > { %4006 = vmatpush.bf16.msra.mxu1 %v10241_v4  ;;  %4032 = vmatpush.bf16.msra.mxu3 %v10245_v5  ;;  %743 = vst.msk [vmem:[#allocation2 + $0x65] ss:$8 sm:$0xf] %vm13960_vm0, %v741_v63  ;;  %v781_v4 = vor.u32 %v780_v3, %v779_v57  ;;  %v10494_v5 = vld [vmem:[#allocation8 + $0x150] sm:$0xf]  ;;  %s886_s19 = sld [smem:[#allocation4 + %s885_s14]] }
 0x214   : > { %763 = vst.msk [vmem:[#allocation2 + $0x66] ss:$8 sm:$0xf] %vm13960_vm0, %v761_v34  ;;  %v10495_v8 = vor.u32 %v12759_v6, %v10494_v5  ;;  %v10616_v50 = vld [vmem:[#allocation8 + $0x258] sm:$0xf0]  ;;  %s831_s20 = sshra.s32 %s15489_s7, 3 }
 0x215   : > { %3995 = vmatpush.bf16.msra.mxu0 %v10001_v13  ;;  %4021 = vmatpush.bf16.msra.mxu2 %v10005_v15  ;;  %783 = vst.msk [vmem:[#allocation2 + $0x67] ss:$8 sm:$0xf] %vm13960_vm0, %v781_v4  ;;  %v10499_v13 = vor.u32 %v12756_v10, %v10496_v11  ;;  %v10470_v15 = vld [vmem:[#allocation8 + $0x120] sm:$0xf]  ;;  %p8940_p0 = scmp.lt.s32.totalorder %s14443_s11, 63 }
 0x216   : > { %3959 = vmatmul.bf16.vlgmr.msrb.gmra.mxu1 %v14267_v38  ;;  %3985 = vmatmul.bf16.vlgmr.msrb.gmra.mxu3 %v14267_v38  ;;  %664 = vst.msk [vmem:[#allocation2 + $0x61] ss:$8 sm:$0x30] %vm13960_vm0, %v661_v48  ;;  %v10471_v17 = vor.u32 %v12753_v7, %v10470_v15  ;;  %v12735_v48 = vld [vmem:[#allocation8 + $0xa4] sm:$0xf0]  ;;  %s851_s18 = sshra.s32 %s15491_s30, 3 }
 0x217   : > { %4007 = vmatpush.bf16.msra.mxu1 %v10217_v26  ;;  %4033 = vmatpush.bf16.msra.mxu3 %v10221_v19  ;;  %684 = vst.msk [vmem:[#allocation2 + $0x62] ss:$8 sm:$0x30] %vm13960_vm0, %v681_v51  ;;  %v10475_v26 = vor.u32 %v12750_v61, %v10472_v18  ;;  %v10686_v19 = vld [vmem:[#allocation8 + $0x2d0] sm:$0xf]  ;;  %s15493_s11 = smov (!%p867_p11, %s14443_s11), 0 }
 0x218   : > { %704 = vst.msk [vmem:[#allocation2 + $0x63] ss:$8 sm:$0x30] %vm13960_vm0, %v701_v56  ;;  %v10687_v23 = vor.u32 %v12807_v20, %v10686_v19  ;;  %v12786_v56 = vld [vmem:[#allocation8 + $0x244] sm:$0xf]  ;;  %s15499_s11 = smov (!%p8940_p0, %s15493_s11), 63 }
 0x219   : > { %3996 = vmatpush.bf16.msra.mxu0 %v9977_v24  ;;  %4022 = vmatpush.bf16.msra.mxu2 %v9981_v9  ;;  %724 = vst.msk [vmem:[#allocation2 + $0x64] ss:$8 sm:$0x30] %vm13960_vm0, %v721_v60  ;;  %v10691_v24 = vor.u32 %v12804_v21, %v10688_v22  ;;  %v10446_v9 = vld [vmem:[#allocation8 + $0xf0] sm:$0xf]  ;;  %v10619_v57 = vor.u32 %v12786_v56, %v10616_v50  ;;  %p887_p3 = scmp.gt.s32.totalorder %s886_s19, 0 }
 0x21a   : > { %744 = vst.msk [vmem:[#allocation2 + $0x65] ss:$8 sm:$0x30] %vm13960_vm0, %v741_v63  ;;  %v10447_v28 = vor.u32 %v12747_v25, %v10446_v9  ;;  %v10374_v59 = vld [vmem:[#allocation8 + $0x60] sm:$0xf]  ;;  %p8946_p1 = scmp.lt.s32.totalorder %s886_s19, 63 }
 0x21b   : > { %4008 = vmatpush.bf16.msra.mxu1 %v10193_v0  ;;  %4034 = vmatpush.bf16.msra.mxu3 %v10197_v30  ;;  %764 = vst.msk [vmem:[#allocation2 + $0x66] ss:$8 sm:$0x30] %vm13960_vm0, %v761_v34  ;;  %v10662_v0 = vld [vmem:[#allocation8 + $0x2a0] sm:$0xf]  ;;  %v10615_v34 = vor.u32 %v12789_v54, %v10614_v53  ;;  %s15495_s19 = smov (!%p887_p3, %s886_s19), 0 }
 0x21c   : > { %784 = vst.msk [vmem:[#allocation2 + $0x67] ss:$8 sm:$0x30] %vm13960_vm0, %v781_v4  ;;  %v12801_v30 = vld [vmem:[#allocation8 + $0x2b4] sm:$0xf0]  ;;  %s15501_s19 = smov (!%p8946_p1, %s15495_s19), 63 }
 0x21d   : > { %3997 = vmatpush.bf16.msra.mxu0 %v9953_v14  ;;  %4023 = vmatpush.bf16.msra.mxu2 %v9957_v52  ;;  %v10663_v33 = vor.u32 %v12801_v30, %v10662_v0  ;;  %v10422_v14 = vld [vmem:[#allocation8 + $0xc0] sm:$0xf]  ;;  %v10667_v52 = vor.u32 %v12798_v35, %v10664_v31  ;;  %v12729_v60 = vld [vmem:[#allocation8 + $0x74] sm:$0xf0]  ;;  %v12726_v62 = vld [vmem:[#allocation8 + $0x64] sm:$0xf] }
 0x21e   : > { %v10376_v63 = vld [vmem:[#allocation8 + $0x78] sm:$0xf0]  ;;  %v10590_v3 = vld [vmem:[#allocation8 + $0x210] sm:$0xf]  ;;  %v10375_v4 = vor.u32 %v12729_v60, %v10374_v59  ;;  %v12783_v5 = vld [vmem:[#allocation8 + $0x224] sm:$0xf0] }
 0x21f   : > { %4009 = vmatpush.bf16.msra.mxu1 %v10169_v37  ;;  %4035 = vmatpush.bf16.msra.mxu3 %v10173_v55  ;;  %v12741_v37 = vld [vmem:[#allocation8 + $0xd4] sm:$0xf0]  ;;  %v12738_v55 = vld [vmem:[#allocation8 + $0xc4] sm:$0xf]  ;;  %v12780_v6 = vld [vmem:[#allocation8 + $0x214] sm:$0xf]  ;;  %v10379_v10 = vor.u32 %v12726_v62, %v10376_v63  ;;  %v10591_v18 = vor.u32 %v12783_v5, %v10590_v3 }
 0x220   : > { %3998 = vmatmul.bf16.vlgmr.msra.gmra.mxu0 %v14261_v16  ;;  %4024 = vmatmul.bf16.vlgmr.msra.gmra.mxu2 %v14261_v16  ;;  %v639_v16 = vld [vmem:[%s638_s13] ss:$8 sm:$0xf]  ;;  %v10423_v41 = vor.u32 %v12741_v37, %v10422_v14  ;;  %v10427_v42 = vor.u32 %v12738_v55, %v10424_v40  ;;  %v12720_v15 = vld [vmem:[#allocation8 + $0x34] sm:$0xf]  ;;  %s834_s22 = sand.u32 7, %s15489_s7 }
 0x221   : > { %4737 = vmatpush.bf16.msrb.mxu0 %v10495_v8  ;;  %4763 = vmatpush.bf16.msrb.mxu2 %v10499_v13  ;;  %v10592_v8 = vld [vmem:[#allocation8 + $0x228] sm:$0xf0]  ;;  %v10350_v11 = vld [vmem:[#allocation8 + $0x30] sm:$0xf]  ;;  %v12723_v13 = vld [vmem:[#allocation8 + $0x44] sm:$0xf0] }
 0x222   : > { %v10352_v7 = vld [vmem:[#allocation8 + $0x48] sm:$0xf0]  ;;  %v10566_v19 = vld [vmem:[#allocation8 + $0x1e0] sm:$0xf]  ;;  %v10351_v21 = vor.u32 %v12723_v13, %v10350_v11  ;;  %v12777_v22 = vld [vmem:[#allocation8 + $0x1f4] sm:$0xf0] }
 0x223   : > { %4010 = vmatpush.bf16.msra.mxu1 %v10145_v45  ;;  %4036 = vmatpush.bf16.msra.mxu3 %v10149_v12  ;;  %v12795_v45 = vld [vmem:[#allocation8 + $0x284] sm:$0xf0]  ;;  %v12792_v12 = vld [vmem:[#allocation8 + $0x274] sm:$0xf]  ;;  %v10355_v27 = vor.u32 %v12720_v15, %v10352_v7  ;;  %v12714_v0 = vld [vmem:[#allocation8 + $0x4] sm:$0xf]  ;;  %v10567_v14 = vor.u32 %v12777_v22, %v10566_v19 }
 0x224   : > { %v10639_v46 = vor.u32 %v12795_v45, %v10638_v43  ;;  %v12760_v35 = vld [vmem:[#allocation8 + $0x16c] sm:$0xf0]  ;;  %v12757_v37 = vld [vmem:[#allocation8 + $0x15c] sm:$0xf]  ;;  %v10504_v55 = vld [vmem:[#allocation8 + $0x170] sm:$0xf0] }
 0x225   : > { %4738 = vmatpush.bf16.msrb.mxu0 %v10471_v17  ;;  %4764 = vmatpush.bf16.msrb.mxu2 %v10475_v26  ;;  %v10595_v26 = vor.u32 %v12780_v6, %v10592_v8  ;;  %v10542_v40 = vld [vmem:[#allocation8 + $0x1b0] sm:$0xf]  ;;  %v12771_v43 = vld [vmem:[#allocation8 + $0x1c4] sm:$0xf0]  ;;  %v12768_v45 = vld [vmem:[#allocation8 + $0x1b4] sm:$0xf]  ;;  %v10507_v49 = vor.u32 %v12757_v37, %v10504_v55 }
 0x226   : > { %4011 = vmatmul.bf16.vlgmr.msra.gmra.mxu1 %v14267_v38  ;;  %4037 = vmatmul.bf16.vlgmr.msra.gmra.mxu3 %v14267_v38  ;;  %v640_v38 = vld [vmem:[%s638_s13] ss:$8 sm:$0x30]  ;;  %v12751_v53 = vld [vmem:[#allocation8 + $0x12c] sm:$0xf]  ;;  %v10543_v56 = vor.u32 %v12771_v43, %v10542_v40  ;;  %s811_s13 = sshra.s32 %s15487_s15, 3 }
 0x227   : > { %v641_v39 = vor.u32 %v640_v38, %v639_v16  ;;  %4750 = vmatpush.bf16.msrb.mxu1 %v10687_v23  ;;  %4776 = vmatpush.bf16.msrb.mxu3 %v10691_v24  ;;  %v14350_v16 = vld [vmem:[%s15235_s3] sm:$0x3f]  ;;  %v10640_v38 = vld [vmem:[#allocation8 + $0x288] sm:$0xf0]  ;;  %v10568_v24 = vld [vmem:[#allocation8 + $0x1f8] sm:$0xf0] }
 0x228   : > { %v10643_v47 = vor.u32 %v12792_v12, %v10640_v38  ;;  %v3394_v1 = vperm.slane %v14350_v16, 0  ;;  %v3395_v61 = vperm.slane %v14350_v16, 1  ;;  %v12774_v23 = vld [vmem:[#allocation8 + $0x1e4] sm:$0xf]  ;;  %v10544_v12 = vld [vmem:[#allocation8 + $0x1c8] sm:$0xf0] }
 0x229   : > { %643 = vst.msk [vmem:[#allocation2 + $0x60] ss:$8 sm:$0xf] %vm13960_vm0, %v641_v39  ;;  %4739 = vmatpush.bf16.msrb.mxu0 %v10447_v28  ;;  %4765 = vmatpush.bf16.msrb.mxu2 %v10451_v32  ;;  %v10326_v28 = vld [vmem:[#allocation8] sm:$0xf]  ;;  %v3396_v19 = vperm.slane %v14350_v16, 2 }
 0x22a   : > { %644 = vst.msk [vmem:[#allocation2 + $0x60] ss:$8 sm:$0x30] %vm13960_vm0, %v641_v39  ;;  %v10398_v39 = vld [vmem:[#allocation8 + $0x90] sm:$0xf]  ;;  %s8927_s5 = smul.u32 48, %s811_s13 }
 0x22b   : > { %4751 = vmatpush.bf16.msrb.mxu1 %v10663_v33  ;;  %4777 = vmatpush.bf16.msrb.mxu3 %v10667_v52  ;;  %v10399_v51 = vor.u32 %v12735_v48, %v10398_v39  ;;  %v10328_v32 = vld [vmem:[#allocation8 + $0x18] sm:$0xf0]  ;;  %v10502_v33 = vld [vmem:[#allocation8 + $0x158] sm:$0xf]  ;;  %v10571_v52 = vor.u32 %v12774_v23, %v10568_v24  ;;  %v10480_v50 = vld [vmem:[#allocation8 + $0x140] sm:$0xf0] }
 0x22c   : > { %v10331_v39 = vor.u32 %v12714_v0, %v10328_v32  ;;  %v10518_v59 = vld [vmem:[#allocation8 + $0x180] sm:$0xf]  ;;  %v12765_v60 = vld [vmem:[#allocation8 + $0x194] sm:$0xf0]  ;;  %v12762_v63 = vld [vmem:[#allocation8 + $0x184] sm:$0xf]  ;;  %s14452_s15 = sadd.s32 %s8927_s5, %s814_s6 }
 0x22d   : > { %4740 = vmatpush.bf16.msrb.mxu0 %v10423_v41  ;;  %4766 = vmatpush.bf16.msrb.mxu2 %v10427_v42  ;;  %v10327_v42 = vor.u32 %v12717_v29, %v10326_v28  ;;  %v12805_v5 = vld [vmem:[#allocation8 + $0x2dc] sm:$0xf]  ;;  %v10696_v6 = vld [vmem:[#allocation8 + $0x2f0] sm:$0xf0]  ;;  %v10454_v11 = vld [vmem:[#allocation8 + $0xf8] sm:$0xf]  ;;  %v10519_v7 = vor.u32 %v12765_v60, %v10518_v59 }
 0x22e   : > { %v12748_v13 = vld [vmem:[#allocation8 + $0x10c] sm:$0xf0]  ;;  %v10670_v22 = vld [vmem:[#allocation8 + $0x2a8] sm:$0xf]  ;;  %v12802_v24 = vld [vmem:[#allocation8 + $0x2bc] sm:$0xf0] }
 0x22f   : > { %4752 = vmatpush.bf16.msrb.mxu1 %v10639_v46  ;;  %4778 = vmatpush.bf16.msrb.mxu3 %v10643_v47  ;;  %v10503_v46 = vor.u32 %v12760_v35, %v10502_v33  ;;  %v10478_v47 = vld [vmem:[#allocation8 + $0x128] sm:$0xf]  ;;  %v10455_v23 = vor.u32 %v12748_v13, %v10454_v11  ;;  %v12742_v0 = vld [vmem:[#allocation8 + $0xdc] sm:$0xf0]  ;;  %v12739_v33 = vld [vmem:[#allocation8 + $0xcc] sm:$0xf] }
 0x230   : > { %v3288_v17 = vld [vmem:[#allocation2 + $0x60] sm:$0xff]  ;;  %v3289_v38 = vld [vmem:[#allocation2 + $0x68] sm:$0xff]  ;;  %v10646_v55 = vld [vmem:[#allocation8 + $0x278] sm:$0xf]  ;;  %s871_s0 = sshra.s32 %s15499_s11, 3  ;;  %s8933_s13 = smul.u32 48, %s831_s20 }
 0x231   : > { %4741 = vmatpush.bf16.msrb.mxu0 %v10399_v51  ;;  %4767 = vmatpush.bf16.msrb.mxu2 %v10403_v58  ;;  %v12754_v51 = vld [vmem:[#allocation8 + $0x13c] sm:$0xf0]  ;;  %v10547_v58 = vor.u32 %v12768_v45, %v10544_v12  ;;  %v10430_v29 = vld [vmem:[#allocation8 + $0xc8] sm:$0xf]  ;;  %v10432_v35 = vld [vmem:[#allocation8 + $0xe0] sm:$0xf0] }
 0x232   : > { %v10479_v3 = vor.u32 %v12754_v51, %v10478_v47  ;;  %v12796_v43 = vld [vmem:[#allocation8 + $0x28c] sm:$0xf0]  ;;  %v12793_v45 = vld [vmem:[#allocation8 + $0x27c] sm:$0xf]  ;;  %v10648_v12 = vld [vmem:[#allocation8 + $0x290] sm:$0xf0]  ;;  %s837_s26 = sadd.s32 %s8933_s13, %s834_s22 }
 0x233   : > { %4753 = vmatpush.bf16.msrb.mxu1 %v10615_v34  ;;  %4779 = vmatpush.bf16.msrb.mxu3 %v10619_v57  ;;  %v10406_v47 = vld [vmem:[#allocation8 + $0x98] sm:$0xf]  ;;  %v10408_v51 = vld [vmem:[#allocation8 + $0xb0] sm:$0xf0]  ;;  %v12790_v59 = vld [vmem:[#allocation8 + $0x25c] sm:$0xf0] }
 0x234   : > { %v12727_v13 = vld [vmem:[#allocation8 + $0x6c] sm:$0xf]  ;;  %s891_s9 = sshra.s32 %s15501_s19, 3  ;;  %s8939_s12 = smul.u32 48, %s851_s18 }
 0x235   : > { %4742 = vmatpush.bf16.msrb.mxu0 %v10375_v4  ;;  %4768 = vmatpush.bf16.msrb.mxu2 %v10379_v10  ;;  %v12808_v4 = vld [vmem:[#allocation8 + $0x2ec] sm:$0xf0]  ;;  %v10483_v10 = vor.u32 %v12751_v53, %v10480_v50  ;;  %v10622_v50 = vld [vmem:[#allocation8 + $0x248] sm:$0xf]  ;;  %s911_s6 = sshra.s32 %s15503_s27, 3  ;;  %s8945_s5 = smul.u32 48, %s871_s0 }
 0x236   : > { %v10623_v11 = vor.u32 %v12790_v59, %v10622_v50  ;;  %s931_s14 = sshra.s32 %s15505_s8, 3  ;;  %s8951_s25 = smul.u32 48, %s891_s9 }
 0x237   : > { %4754 = vmatpush.bf16.msrb.mxu1 %v10591_v18  ;;  %4780 = vmatpush.bf16.msrb.mxu3 %v10595_v26  ;;  %v10456_v18 = vld [vmem:[#allocation8 + $0x110] sm:$0xf0]  ;;  %s874_s21 = sand.u32 7, %s15499_s11  ;;  %s8957_s4 = smul.u32 48, %s911_s6 }
 0x238   : > { %s894_s17 = sand.u32 7, %s15501_s19  ;;  %s8963_s16 = smul.u32 48, %s931_s14 }
 0x239   : > { %4743 = vmatpush.bf16.msrb.mxu0 %v10351_v21  ;;  %4769 = vmatpush.bf16.msrb.mxu2 %v10355_v27  ;;  %v10699_v21 = vor.u32 %v12805_v5, %v10696_v6  ;;  %v12730_v5 = vld [vmem:[#allocation8 + $0x7c] sm:$0xf0]  ;;  %s857_s23 = sadd.s32 %s8939_s12, %s854_s2  ;;  %s877_s7 = sadd.s32 %s8945_s5, %s874_s21 }
 0x23a   : > { %s14463_s1 = sadd.s32 %s8951_s25, %s894_s17  ;;  %s14465_s20 = sadd.s32 %s8957_s4, %s914_s24 }
 0x23b   : > { %4755 = vmatpush.bf16.msrb.mxu1 %v10567_v14  ;;  %4781 = vmatpush.bf16.msrb.mxu3 %v10571_v52  ;;  %v3290_v14 = vld [vmem:[#allocation2 + $0x70] sm:$0xff]  ;;  %v10671_v52 = vor.u32 %v12802_v24, %v10670_v22  ;;  %v12781_v22 = vld [vmem:[#allocation8 + $0x21c] sm:$0xf]  ;;  %s14467_s18 = sadd.s32 %s8963_s16, %s934_s28  ;;  %s798_s0 = scalar_lea.vmem [#allocation5], %s14450_s10 }
 0x23c   : > { %s818_s11 = scalar_lea.vmem [#allocation5], %s14452_s15  ;;  %s838_s30 = scalar_lea.vmem [#allocation5], %s837_s26 }
 0x23d   : > { %4744 = vmatpush.bf16.msrb.mxu0 %v10327_v42  ;;  %4770 = vmatpush.bf16.msrb.mxu2 %v10331_v39  ;;  %v10431_v42 = vor.u32 %v12742_v0, %v10430_v29  ;;  %v3397_v39 = vperm.slane %v14350_v16, 3  ;;  %v3398_v29 = vperm.slane %v14350_v16, 4  ;;  %s858_s24 = scalar_lea.vmem [#allocation5], %s857_s23  ;;  %s878_s28 = scalar_lea.vmem [#allocation5], %s877_s7 }
 0x23e   : > { %s898_s26 = scalar_lea.vmem [#allocation5], %s14463_s1  ;;  %s918_s23 = scalar_lea.vmem [#allocation5], %s14465_s20 }
 0x23f   : > { %4756 = vmatpush.bf16.msrb.mxu1 %v10543_v56  ;;  %4782 = vmatpush.bf16.msrb.mxu3 %v10547_v58  ;;  %v10647_v56 = vor.u32 %v12796_v43, %v10646_v55  ;;  %v10651_v58 = vor.u32 %v12793_v45, %v10648_v12  ;;  %v10574_v55 = vld [vmem:[#allocation8 + $0x1e8] sm:$0xf]  ;;  %v12775_v43 = vld [vmem:[#allocation8 + $0x1ec] sm:$0xf]  ;;  %v10576_v45 = vld [vmem:[#allocation8 + $0x200] sm:$0xf0] }
 0x240   : > { %v10579_v59 = vor.u32 %v12775_v43, %v10576_v45  ;;  %v3293_v45 = vld [vmem:[#allocation2 + $0x88] sm:$0xff]  ;;  %s938_s16 = scalar_lea.vmem [#allocation5], %s14467_s18  ;;  %s15348_s21 = sld [smem:[#allocation30_spill]] }
 0x241   : > { %4789 = vmatpush.bf16.msra.mxu0 %v10503_v46  ;;  %4815 = vmatpush.bf16.msra.mxu2 %v10507_v49  ;;  %v10435_v46 = vor.u32 %v12739_v33, %v10432_v35  ;;  %v12733_v49 = vld [vmem:[#allocation8 + $0x9c] sm:$0xf]  ;;  %v10360_v35 = vld [vmem:[#allocation8 + $0x50] sm:$0xf0]  ;;  %s15349_s19 = sld [smem:[#allocation31_spill]] }
 0x242   : > { %v12721_v33 = vld [vmem:[#allocation8 + $0x3c] sm:$0xf]  ;;  %s15350_s15 = sld [smem:[#allocation32_spill]] }
 0x243   : > { %4757 = vmatpush.bf16.msrb.mxu1 %v10519_v7  ;;  %s15351_s13 = sld [smem:[#allocation33_spill]] }
 0x244   : > { %s15352_s9 = sld [smem:[#allocation34_spill]] }
 0x245   : > { %4790 = vmatpush.bf16.msra.mxu0 %v10479_v3  ;;  %4816 = vmatpush.bf16.msra.mxu2 %v10483_v10  ;;  %v10411_v3 = vor.u32 %v12733_v49, %v10408_v51  ;;  %v12715_v51 = vld [vmem:[#allocation8 + $0xc] sm:$0xf]  ;;  %s15353_s5 = sld [smem:[#allocation35_spill]] }
 0x246   : > { %s945_s10 = sadd.s32 4, %s15348_s21  ;;  %s15354_s25 = sld [smem:[#allocation36_spill]] }
 0x247   : > { %s965_s8 = sadd.s32 4, %s15349_s19  ;;  %s946_s27 = sld [smem:[#allocation4 + %s945_s10]] }
 0x248   : > { %s966_s22 = sld [smem:[#allocation4 + %s965_s8]]  ;;  %s985_s12 = sadd.s32 4, %s15350_s15 }
 0x249   : > { %4791 = vmatpush.bf16.msra.mxu0 %v10455_v23  ;;  %v10600_v23 = vld [vmem:[#allocation8 + $0x230] sm:$0xf0]  ;;  %s1005_s14 = sadd.s32 4, %s15351_s13  ;;  %s986_s2 = sld [smem:[#allocation4 + %s985_s12]] }
 0x24a   : > { %s1006_s4 = sld [smem:[#allocation4 + %s1005_s14]] }
 0x24b   : > { %s15355_s20 = sld [smem:[#allocation37_spill]] }
 0x24c   : > { %s1065_s1 = sadd.s32 4, %s15354_s25 }
 0x24d   : > { %4792 = vmatpush.bf16.msra.mxu0 %v10431_v42  ;;  %v12778_v42 = vld [vmem:[#allocation8 + $0x1fc] sm:$0xf0]  ;;  %p947_p2 = scmp.gt.s32.totalorder %s946_s27, 0  ;;  %p8964_p9 = scmp.lt.s32.totalorder %s946_s27, 63 }
 0x24e   : > { %v10575_v50 = vor.u32 %v12778_v42, %v10574_v55  ;;  %p967_p8 = scmp.gt.s32.totalorder %s966_s22, 0  ;;  %p8970_p10 = scmp.lt.s32.totalorder %s966_s22, 63 }
 0x24f   : > { %s15507_s27 = smov (!%p947_p2, %s946_s27), 0  ;;  %p987_p11 = scmp.gt.s32.totalorder %s986_s2, 0 }
 0x250   : > { %s968_s6 = scalar_select %p967_p8, %s966_s22, 0 }
 0x251   : > { %s15509_s27 = smov (!%p8964_p9, %s15507_s27), 63  ;;  %p1007_p0 = scmp.gt.s32.totalorder %s1006_s4, 0 }
 0x252   : > { %s15511_s6 = smov (!%p8970_p10, %s968_s6), 63  ;;  %s951_s7 = sshra.s32 %s15509_s27, 3 }
 0x253   : > { %s954_s18 = sand.u32 7, %s15509_s27  ;;  %p8976_p3 = scmp.lt.s32.totalorder %s986_s2, 63 }
 0x254   : > { %s1008_s17 = scalar_select %p1007_p0, %s1006_s4, 0 }
 0x255   : > { %s1085_s8 = sadd.s32 4, %s15355_s20  ;;  %p8982_p5 = scmp.lt.s32.totalorder %s1006_s4, 63 }
 0x256   : > { %s1066_s27 = sld [smem:[#allocation4 + %s1065_s1]] }
 0x257   : > { %s1086_s12 = sld [smem:[#allocation4 + %s1085_s8]]  ;;  %s15515_s17 = smov (!%p8982_p5, %s1008_s17), 63 }
 0x258   : > { %s1014_s1 = sand.u32 7, %s15515_s17 }
 0x25c   : > { %p1067_p13 = scmp.gt.s32.totalorder %s1066_s27, 0  ;;  %p9000_p9 = scmp.lt.s32.totalorder %s1066_s27, 63 }
 0x25d   : > { %p1087_p8 = scmp.gt.s32.totalorder %s1086_s12, 0  ;;  %p9006_p10 = scmp.lt.s32.totalorder %s1086_s12, 63 }
 0x25e   : > { %s1068_s4 = scalar_select %p1067_p13, %s1066_s27, 0 }
 0x25f   : > { %s15521_s12 = smov (!%p1087_p8, %s1086_s12), 0 }
 0x260   : > { %s15527_s4 = smov (!%p9000_p9, %s1068_s4), 63  ;;  %s15529_s12 = smov (!%p9006_p10, %s15521_s12), 63 }
 0x261   : > { %s1094_s13 = sand.u32 7, %s15529_s12 }
 0x27d   : > { %v3895_v2 = vpop.f32.mrf.mxu0 }
 0x27e   : > { %v3896_v20 = vadd.f32 %v3895_v2, %v3394_v1  ;;  %v10520_v1 = vld [vmem:[#allocation8 + $0x198] sm:$0xf0]  ;;  %v10694_v2 = vld [vmem:[#allocation8 + $0x2d8] sm:$0xf] }
 0x283   : > { %v3908_v9 = vpop.f32.mrf.mxu1  ;;  %v3921_v25 = vpop.f32.mrf.mxu2 }
 0x284   : > { %v3909_v30 = vadd.f32 %v3908_v9, %v3896_v20  ;;  %v3922_v36 = vadd.f32 %v3921_v25, %v3395_v61  ;;  %v12745_v61 = vld [vmem:[#allocation8 + $0xfc] sm:$0xf]  ;;  %v10695_v20 = vor.u32 %v12808_v4, %v10694_v2  ;;  %v12799_v9 = vld [vmem:[#allocation8 + $0x2ac] sm:$0xf]  ;;  %v10672_v25 = vld [vmem:[#allocation8 + $0x2c0] sm:$0xf0] }
 0x285   : > { %v3897_v31 = vpop.f32.mrf.mxu0  ;;  %v10459_v28 = vor.u32 %v12745_v61, %v10456_v18  ;;  %v10675_v37 = vor.u32 %v12799_v9, %v10672_v25  ;;  %v10624_v2 = vld [vmem:[#allocation8 + $0x260] sm:$0xf0]  ;;  %v10382_v4 = vld [vmem:[#allocation8 + $0x68] sm:$0xf]  ;;  %v10598_v18 = vld [vmem:[#allocation8 + $0x218] sm:$0xf] }
 0x286   : > { %v4042_v41 = vadd.f32 %v3909_v30, %v3288_v17  ;;  %v10523_v17 = vor.u32 %v12762_v63, %v10520_v1  ;;  %4802 = vmatpush.bf16.msra.mxu1 %v10695_v20  ;;  %v12787_v1 = vld [vmem:[#allocation8 + $0x24c] sm:$0xf]  ;;  %v10383_v20 = vor.u32 %v12730_v5, %v10382_v4  ;;  %v12769_v4 = vld [vmem:[#allocation8 + $0x1bc] sm:$0xf]  ;;  %v10552_v5 = vld [vmem:[#allocation8 + $0x1d0] sm:$0xf0] }
 0x287   : > { %4817 = vmatpush.bf16.msra.mxu2 %v10459_v28  ;;  %v10627_v61 = vor.u32 %v12787_v1, %v10624_v2  ;;  %v12724_v28 = vld [vmem:[#allocation8 + $0x4c] sm:$0xf0] }
 0x288   : > { %v10318_v48 = vmul.f32 -1.442695, %v4042_v41  ;;  %4783 = vmatpush.bf16.msrb.mxu3 %v10523_v17 }
 0x289   : > { %v3934_v54 = vpop.f32.mrf.mxu3 }
 0x28a   : > { %13323 = vpow2.f32 %v10318_v48  ;;  %v3935_v62 = vadd.f32 %v3934_v54, %v3922_v36  ;;  %v12736_v48 = vld [vmem:[#allocation8 + $0xac] sm:$0xf0]  ;;  %4803 = vmatpush.bf16.msra.mxu1 %v10671_v52 }
 0x28b   : > { %v3910_v34 = vpop.f32.mrf.mxu1  ;;  %v3923_v57 = vpop.f32.mrf.mxu2  ;;  %v10407_v63 = vor.u32 %v12736_v48, %v10406_v47  ;;  %4818 = vmatpush.bf16.msra.mxu2 %v10435_v46  ;;  %v10363_v46 = vor.u32 %v12721_v33, %v10360_v35  ;;  %v10334_v47 = vld [vmem:[#allocation8 + $0x8] sm:$0xf]  ;;  %v12718_v48 = vld [vmem:[#allocation8 + $0x1c] sm:$0xf0] }
 0x28c   : > { %v4043_v8 = vadd.f32 %v3935_v62, %v3289_v38  ;;  %4828 = vmatpush.bf16.msra.mxu3 %v10699_v21  ;;  %v3291_v62 = vld [vmem:[#allocation2 + $0x78] sm:$0xff]  ;;  %v12784_v21 = vld [vmem:[#allocation8 + $0x22c] sm:$0xf0] }
 0x28d   : > { %v3947_v15 = vpop.f32.mrf.mxu0  ;;  %4793 = vmatpush.bf16.msra.mxu0 %v10407_v63  ;;  %v10599_v52 = vor.u32 %v12784_v21, %v10598_v18  ;;  %v12772_v63 = vld [vmem:[#allocation8 + $0x1cc] sm:$0xf0]  ;;  %v12766_v21 = vld [vmem:[#allocation8 + $0x19c] sm:$0xf0] }
 0x28e   : > { %v10319_v26 = vmul.f32 -1.442695, %v4043_v8  ;;  %v3948_v31 = vadd.f32 %v3947_v15, %v3396_v19  ;;  %v10384_v15 = vld [vmem:[#allocation8 + $0x80] sm:$0xf0]  ;;  %4804 = vmatpush.bf16.msra.mxu1 %v10647_v56 }
 0x28f   : > { %4819 = vmatpush.bf16.msra.mxu2 %v10411_v3  ;;  %v10387_v25 = vor.u32 %v12727_v13, %v10384_v15  ;;  %v10335_v3 = vor.u32 %v12718_v48, %v10334_v47 }
 0x290   : > { %v13324_v27 = vpop.eup %13323  ;;  %13325 = vpow2.f32 %v10319_v26  ;;  %4829 = vmatpush.bf16.msra.mxu3 %v10675_v37  ;;  %v10603_v37 = vor.u32 %v12781_v22, %v10600_v23  ;;  %v10528_v23 = vld [vmem:[#allocation8 + $0x1a0] sm:$0xf0] }
 0x291   : > { %v14355_v30 = vadd.f32 1.0, %v13324_v27  ;;  %v3936_v32 = vpop.f32.mrf.mxu3  ;;  %v10358_v27 = vld [vmem:[#allocation8 + $0x38] sm:$0xf]  ;;  %4794 = vmatpush.bf16.msra.mxu0 %v10383_v20  ;;  %v10526_v20 = vld [vmem:[#allocation8 + $0x188] sm:$0xf] }
 0x292   : > { %4805 = vmatpush.bf16.msra.mxu1 %v10623_v11 }
 0x293   : > { %13327 = vrcp.f32 %v14355_v30  ;;  %v3960_v40 = vpop.f32.mrf.mxu1  ;;  %v3973_v41 = vpop.f32.mrf.mxu2  ;;  %v4061_v10 = vand.u32 2147483647, %v14355_v30  ;;  %v4063_v32 = vand.u32 2147483648, %v14355_v30  ;;  %4820 = vmatpush.bf16.msra.mxu2 %v10387_v25  ;;  %vm4057_vm4 = vweird.f32 %v14355_v30  ;;  %v10462_v25 = vld [vmem:[#allocation8 + $0x100] sm:$0xf] }
 0x294   : > { %v3961_v38 = vadd.f32 %v3960_v40, %v3948_v31  ;;  %v3974_v57 = vadd.f32 %v3973_v41, %v3397_v39  ;;  %4830 = vmatpush.bf16.msra.mxu3 %v10651_v58  ;;  %v10359_v41 = vor.u32 %v12724_v28, %v10358_v27 }
 0x295   : > { %v3949_v36 = vpop.f32.mrf.mxu0  ;;  %v4064_v11 = vor.u32 1.1754944e-38, %v4063_v32  ;;  %vm4062_vm6 = vcmp.eq.f32.partialorder %v4061_v10, 8.507059e+37  ;;  %v12763_v10 = vld [vmem:[#allocation8 + $0x18c] sm:$0xf] }
 0x296   : > { %v13326_v53 = vpop.eup %13325  ;;  %v4082_v54 = vadd.f32 %v3961_v38, %v3290_v14  ;;  %4806 = vmatpush.bf16.msra.mxu1 %v10599_v52  ;;  %4795 = vmatpush.bf16.msra.mxu0 %v10359_v41  ;;  %v10531_v35 = vor.u32 %v12763_v10, %v10528_v23  ;;  %v12806_v10 = vld [vmem:[#allocation8 + $0x2e4] sm:$0xf]  ;;  %v10704_v23 = vld [vmem:[#allocation8 + $0x2f8] sm:$0xf0] }
 0x297   : > { %v14359_v60 = vadd.f32 1.0, %v13326_v53  ;;  %v10336_v53 = vld [vmem:[#allocation8 + $0x20] sm:$0xf0]  ;;  %4821 = vmatpush.bf16.msra.mxu2 %v10363_v46 }
 0x298   : > { %v10320_v34 = vmul.f32 -1.442695, %v4082_v54  ;;  %4831 = vmatpush.bf16.msra.mxu3 %v10627_v61  ;;  %v10339_v15 = vor.u32 %v12715_v51, %v10336_v53 }
 0x299   : > { %v14361_v6 = vpop.eup %13327  ;;  %13329 = vrcp.f32 %v14359_v60  ;;  %v3986_v8 = vpop.f32.mrf.mxu3  ;;  %vm4072_vm8 = vweird.f32 %v14359_v60 }
 0x29a   : > { %13331 = vpow2.f32 %v10320_v34  ;;  %v3987_v7 = vadd.f32 %v3986_v8, %v3974_v57  ;;  %v4053_v17 = vmul.f32 %v14361_v6, %v14355_v30  ;;  %vm4058_vm3 = vweird.f32 %v14361_v6  ;;  %4807 = vmatpush.bf16.msra.mxu1 %v10575_v50  ;;  %4796 = vmatpush.bf16.msra.mxu0 %v10335_v3  ;;  %v10512_v3 = vld [vmem:[#allocation8 + $0x178] sm:$0xf0] }
 0x29b   : > { %v3962_v26 = vpop.f32.mrf.mxu1  ;;  %v3975_v19 = vpop.f32.mrf.mxu2  ;;  %vm14381_vm5 = vmor %vm4057_vm4, %vm4058_vm3  ;;  %v3399_v34 = vperm.slane %v14350_v16, 5  ;;  %4822 = vmatpush.bf16.msra.mxu2 %v10339_v15 }
 0x29c   : > { %v4083_v24 = vadd.f32 %v3987_v7, %v3291_v62  ;;  %v4054_v9 = vsub.f32 1.0, %v4053_v17  ;;  %4832 = vmatpush.bf16.msra.mxu3 %v10603_v37  ;;  %v10550_v62 = vld [vmem:[#allocation8 + $0x1b8] sm:$0xf]  ;;  %v4078_v26 = vand.u32 2147483648, %v14359_v60  ;;  %v10555_v19 = vor.u32 %v12769_v4, %v10552_v5 }
 0x29d   : > { %v3999_v0 = vpop.f32.mrf.mxu0  ;;  %v10551_v16 = vor.u32 %v12772_v63, %v10550_v62  ;;  %v13447_v63 = vld [vmem:[%s14101_s29 + $0x10] sm:$0xff] }
 0x29e   : > { %v10321_v31 = vmul.f32 -1.442695, %v4083_v24  ;;  %v4055_v14 = vmul.f32 %v14361_v6, %v4054_v9  ;;  %v4000_v54 = vadd.f32 %v3999_v0, %v3398_v29  ;;  %v3292_v24 = vld [vmem:[#allocation2 + $0x80] sm:$0xff]  ;;  %v10527_v29 = vor.u32 %v12766_v21, %v10526_v20  ;;  %v13448_v21 = vld [vmem:[%s14101_s29 + $0x18] sm:$0xff] }
 0x29f   : > { %v14370_v40 = vpop.eup %13329  ;;  %v4079_v33 = vor.u32 1.1754944e-38, %v4078_v26  ;;  %4808 = vmatpush.bf16.msra.mxu1 %v10551_v16 }
 0x2a0   : > { %v13332_v12 = vpop.eup %13331  ;;  %13333 = vpow2.f32 %v10321_v31  ;;  %v4056_v38 = vadd.f32 %v14361_v6, %v4055_v14  ;;  %v4068_v39 = vmul.f32 %v14370_v40, %v14359_v60  ;;  %vm4073_vm7 = vweird.f32 %v14370_v40  ;;  %4833 = vmatpush.bf16.msra.mxu3 %v10579_v59  ;;  %v10510_v59 = vld [vmem:[#allocation8 + $0x160] sm:$0xf] }
 0x2a1   : > { %v14376_v36 = vadd.f32 1.0, %v13332_v12  ;;  %v3988_v49 = vpop.f32.mrf.mxu3  ;;  %vm14402_vm9 = vmor %vm4072_vm8, %vm4073_vm7 }
 0x2a2   : > { %v4069_v58 = vsub.f32 1.0, %v4068_v39  ;;  %v4060_v2 = vsel %vm14381_vm5, %v14361_v6, %v4056_v38  ;;  %v4076_v6 = vand.u32 2147483647, %v14359_v60 }
 0x2a3   : > { %13335 = vrcp.f32 %v14376_v36  ;;  %v4012_v1 = vpop.f32.mrf.mxu1  ;;  %v4025_v57 = vpop.f32.mrf.mxu2  ;;  %v4065_v61 = vsel %vm4062_vm6, %v4064_v11, %v4060_v2  ;;  %v4103_v41 = vand.u32 2147483648, %v14376_v36  ;;  %4809 = vmatpush.bf16.msra.mxu1 %v10527_v29  ;;  %vm4097_vm12 = vweird.f32 %v14376_v36  ;;  %v10464_v29 = vld [vmem:[#allocation8 + $0x118] sm:$0xf0] }
 0x2a4   : > { %v4013_v8 = vadd.f32 %v4012_v1, %v4000_v54  ;;  %v4070_v13 = vmul.f32 %v14370_v40, %v4069_v58  ;;  %v4026_v9 = vadd.f32 %v4025_v57, %v3399_v34  ;;  %4834 = vmatpush.bf16.msra.mxu3 %v10555_v19  ;;  %vm4077_vm10 = vcmp.eq.f32.partialorder %v4076_v6, 8.507059e+37  ;;  %v12761_v34 = vld [vmem:[#allocation8 + $0x174] sm:$0xf0]  ;;  %v12758_v57 = vld [vmem:[#allocation8 + $0x164] sm:$0xf] }
 0x2a5   : > { %v4001_v7 = vpop.f32.mrf.mxu0  ;;  %v4104_v46 = vor.u32 1.1754944e-38, %v4103_v41  ;;  %v10515_v15 = vor.u32 %v12758_v57, %v10512_v3  ;;  %v12755_v6 = vld [vmem:[#allocation8 + $0x144] sm:$0xf0]  ;;  %v10702_v19 = vld [vmem:[#allocation8 + $0x2e0] sm:$0xf] }
 0x2a6   : > { %v13334_v17 = vpop.eup %13333  ;;  %v4071_v18 = vadd.f32 %v14370_v40, %v4070_v13  ;;  %v4122_v30 = vmul.f32 %v4065_v61, %v4013_v8  ;;  %v10511_v13 = vor.u32 %v12761_v34, %v10510_v59  ;;  %v10486_v7 = vld [vmem:[#allocation8 + $0x130] sm:$0xf]  ;;  %v12752_v61 = vld [vmem:[#allocation8 + $0x134] sm:$0xf]  ;;  %v12791_v59 = vld [vmem:[#allocation8 + $0x264] sm:$0xf0] }
 0x2a7   : > { %v14397_v22 = vadd.f32 1.0, %v13334_v17  ;;  %v10438_v41 = vld [vmem:[#allocation8 + $0xd0] sm:$0xf]  ;;  %v12731_v57 = vld [vmem:[#allocation8 + $0x84] sm:$0xf0] }
 0x2a8   : > { %v4075_v60 = vsel %vm14402_vm9, %v14370_v40, %v4071_v18  ;;  %v4124_v31 = vadd.f32 %v4122_v30, %v3292_v24  ;;  %v4101_v40 = vand.u32 2147483647, %v14376_v36  ;;  %4835 = vmatpush.bf16.msra.mxu3 %v10531_v35  ;;  %v10488_v18 = vld [vmem:[#allocation8 + $0x148] sm:$0xf0]  ;;  %v12809_v30 = vld [vmem:[#allocation8 + $0x2f4] sm:$0xf0]  ;;  %v10487_v24 = vor.u32 %v12755_v6, %v10486_v7 }
 0x2a9   : > { %v13336_v27 = vpop.eup %13335  ;;  %13337 = vrcp.f32 %v14397_v22  ;;  %v4038_v28 = vpop.f32.mrf.mxu3  ;;  %v4080_v55 = vsel %vm4077_vm10, %v4079_v33, %v4075_v60  ;;  %v4118_v53 = vand.u32 2147483648, %v14397_v22  ;;  %v4116_v50 = vand.u32 2147483647, %v14397_v22  ;;  %v12746_v60 = vld [vmem:[#allocation8 + $0x104] sm:$0xf] }
 0x2aa   : > { %v4093_v0 = vmul.f32 %v13336_v27, %v14376_v36  ;;  %v4039_v32 = vadd.f32 %v4038_v28, %v4026_v9  ;;  %vm4098_vm11 = vweird.f32 %v13336_v27  ;;  %13339 = vtanh.f32 %v4124_v31  ;;  %v12749_v28 = vld [vmem:[#allocation8 + $0x114] sm:$0xf0]  ;;  %v10678_v33 = vld [vmem:[#allocation8 + $0x2b0] sm:$0xf]  ;;  %v12803_v35 = vld [vmem:[#allocation8 + $0x2c4] sm:$0xf0] }
 0x2ab   : > { %v4014_v14 = vpop.f32.mrf.mxu1  ;;  %v4027_v52 = vpop.f32.mrf.mxu2  ;;  %vm4099_vm13 = vmor %vm4097_vm12, %vm4098_vm11  ;;  %vm4102_vm14 = vcmp.eq.f32.partialorder %v4101_v40, 8.507059e+37  ;;  %vm4112_vm1 = vweird.f32 %v14397_v22  ;;  %v4119_v4 = vor.u32 1.1754944e-38, %v4118_v53  ;;  %vm4117_vm3 = vcmp.eq.f32.partialorder %v4116_v50, 8.507059e+37  ;;  %v10440_v40 = vld [vmem:[#allocation8 + $0xe8] sm:$0xf0] }
 0x2ac   : > { %v4094_v37 = vsub.f32 1.0, %v4093_v0  ;;  %v4123_v42 = vmul.f32 %v4080_v55, %v4039_v32  ;;  %v10491_v9 = vor.u32 %v12752_v61, %v10488_v18  ;;  %v10703_v0 = vor.u32 %v12809_v30, %v10702_v19  ;;  %v12800_v14 = vld [vmem:[#allocation8 + $0x2b4] sm:$0xf]  ;;  %v10680_v52 = vld [vmem:[#allocation8 + $0x2c8] sm:$0xf0] }
 0x2ad   : > { %v10707_v32 = vor.u32 %v12806_v10, %v10704_v23  ;;  %v10467_v55 = vor.u32 %v12746_v60, %v10464_v29  ;;  %v12737_v53 = vld [vmem:[#allocation8 + $0xb4] sm:$0xf0]  ;;  %v10390_v34 = vld [vmem:[#allocation8 + $0x70] sm:$0xf]  ;;  %v12728_v3 = vld [vmem:[#allocation8 + $0x74] sm:$0xf] }
 0x2ae   : > { %v4095_v43 = vmul.f32 %v13336_v27, %v4094_v37  ;;  %v4125_v47 = vadd.f32 %v4123_v42, %v3293_v45  ;;  %v10463_v37 = vor.u32 %v12749_v28, %v10462_v25  ;;  %v12743_v42 = vld [vmem:[#allocation8 + $0xe4] sm:$0xf0]  ;;  %v10679_v45 = vor.u32 %v12803_v35, %v10678_v33  ;;  %v10608_v7 = vld [vmem:[#allocation8 + $0x238] sm:$0xf0]  ;;  %v10366_v61 = vld [vmem:[#allocation8 + $0x40] sm:$0xf] }
 0x2af   : > { %v13338_v12 = vpop.eup %13337  ;;  %v10391_v6 = vor.u32 %v12731_v57, %v10390_v34  ;;  %v12725_v18 = vld [vmem:[#allocation8 + $0x54] sm:$0xf0]  ;;  %v10368_v19 = vld [vmem:[#allocation8 + $0x58] sm:$0xf0]  ;;  %v12779_v30 = vld [vmem:[#allocation8 + $0x204] sm:$0xf0] }
 0x2b0   : > { %v4108_v38 = vmul.f32 %v13338_v12, %v14397_v22  ;;  %v4096_v39 = vadd.f32 %v13336_v27, %v4095_v43  ;;  %vm4113_vm15 = vweird.f32 %v13338_v12  ;;  %v13340_v36 = vpop.eup %13339  ;;  %13341 = vtanh.f32 %v4125_v47  ;;  %v12740_v43 = vld [vmem:[#allocation8 + $0xd4] sm:$0xf]  ;;  %v10656_v47 = vld [vmem:[#allocation8 + $0x298] sm:$0xf0]  ;;  %v10584_v23 = vld [vmem:[#allocation8 + $0x208] sm:$0xf0] }
 0x2b1   : > { %v4040_v48 = vpop.f32.mrf.mxu3  ;;  %vm4114_vm2 = vmor %vm4112_vm1, %vm4113_vm15  ;;  %v12776_v10 = vld [vmem:[#allocation8 + $0x1f4] sm:$0xf]  ;;  %v10342_v25 = vld [vmem:[#allocation8 + $0x10] sm:$0xf] }
 0x2b2   : > { %v4109_v49 = vsub.f32 1.0, %v4108_v38  ;;  %v4100_v51 = vsel %vm4099_vm13, %v13336_v27, %v4096_v39  ;;  %v10654_v38 = vld [vmem:[#allocation8 + $0x280] sm:$0xf]  ;;  %v12797_v39 = vld [vmem:[#allocation8 + $0x294] sm:$0xf0]  ;;  %v10439_v48 = vor.u32 %v12743_v42, %v10438_v41 }
 0x2b3   : > { %v4105_v54 = vsel %vm4102_vm14, %v4104_v46, %v4100_v51  ;;  %v12794_v46 = vld [vmem:[#allocation8 + $0x284] sm:$0xf]  ;;  %v10414_v51 = vld [vmem:[#allocation8 + $0xa0] sm:$0xf]  ;;  %v12716_v28 = vld [vmem:[#allocation8 + $0x14] sm:$0xf] }
 0x2b4   : > { %v4110_v56 = vmul.f32 %v13338_v12, %v4109_v49  ;;  %v4128_v58 = vsub.f32 1.0, %v4105_v54  ;;  %v4132_v1 = vmul.f32 %v13447_v63, %v4105_v54  ;;  %v10443_v49 = vor.u32 %v12740_v43, %v10440_v40  ;;  %v12734_v54 = vld [vmem:[#allocation8 + $0xa4] sm:$0xf]  ;;  %v10632_v63 = vld [vmem:[#allocation8 + $0x268] sm:$0xf0] }
 0x2b5   : > { %v10659_v50 = vor.u32 %v12794_v46, %v10656_v47  ;;  %v10344_v60 = vld [vmem:[#allocation8 + $0x28] sm:$0xf0]  ;;  %v12773_v33 = vld [vmem:[#allocation8 + $0x1d4] sm:$0xf0]  ;;  %v12770_v35 = vld [vmem:[#allocation8 + $0x1c4] sm:$0xf] }
 0x2b6   : > { %v4130_v62 = vmul.f32 %v13340_v36, %v4128_v58  ;;  %v4111_v2 = vadd.f32 %v13338_v12, %v4110_v56  ;;  %v13342_v26 = vpop.eup %13341  ;;  %v10416_v56 = vld [vmem:[#allocation8 + $0xb8] sm:$0xf0]  ;;  %v10655_v58 = vor.u32 %v12797_v39, %v10654_v38  ;;  %v10630_v36 = vld [vmem:[#allocation8 + $0x250] sm:$0xf]  ;;  %v12767_v43 = vld [vmem:[#allocation8 + $0x1a4] sm:$0xf0] }
 0x2b7   : > { %v10534_v42 = vld [vmem:[#allocation8 + $0x190] sm:$0xf]  ;;  %v12764_v40 = vld [vmem:[#allocation8 + $0x194] sm:$0xf] }
 0x2b8   : > { %v4134_v5 = vadd.f32 %v4132_v1, %v4130_v62  ;;  %v4115_v8 = vsel %vm4114_vm2, %v13338_v12, %v4111_v2  ;;  %v10683_v12 = vor.u32 %v12800_v14, %v10680_v52  ;;  %v12788_v62 = vld [vmem:[#allocation8 + $0x254] sm:$0xf]  ;;  %v10415_v1 = vor.u32 %v12737_v53, %v10414_v51  ;;  %v10560_v14 = vld [vmem:[#allocation8 + $0x1d8] sm:$0xf0] }
 0x2b9   : > { %v4120_v11 = vsel %vm4117_vm3, %v4119_v4, %v4115_v8  ;;  %v10419_v2 = vor.u32 %v12734_v54, %v10416_v56  ;;  %v10392_v4 = vld [vmem:[#allocation8 + $0x88] sm:$0xf0]  ;;  %v10635_v8 = vor.u32 %v12788_v62, %v10632_v63  ;;  %v10563_v41 = vor.u32 %v12770_v35, %v10560_v14  ;;  %v819_v46 = vld [vmem:[%s818_s11] ss:$8 sm:$0xf] }
 0x2ba   : > { %10322 = vst [vmem:[%s14101_s29 + $0x20] sm:$0xff] %v4134_v5  ;;  %v4129_v16 = vsub.f32 1.0, %v4120_v11  ;;  %v14420_v17 = vpack.c.bf16 %v4134_v5, %v4134_v5  ;;  %v4133_v22 = vmul.f32 %v13448_v21, %v4120_v11  ;;  %v10631_v5 = vor.u32 %v12791_v59, %v10630_v36  ;;  %v10606_v11 = vld [vmem:[#allocation8 + $0x220] sm:$0xf]  ;;  %v12894_v35 = vld [vmem:[#allocation8 + $0x2a4] sm:$0xf] }
 0x2bb   : > { %v820_v47 = vld [vmem:[%s818_s11] ss:$8 sm:$0x30]  ;;  %v11054_v14 = vld [vmem:[#allocation8 + $0x2b8] sm:$0xf0]  ;;  %s1025_s11 = sadd.s32 4, %s15352_s9 }
 0x2bc   : > { %v4131_v20 = vmul.f32 %v13342_v26, %v4129_v16  ;;  %4745 = vmatmul.bf16.vlgmr.msrb.gmra.mxu0 %v14420_v17  ;;  %4771 = vmatmul.bf16.vlgmr.msrb.gmra.mxu2 %v14420_v17  ;;  %v10395_v16 = vor.u32 %v12728_v3, %v10392_v4  ;;  %v12722_v26 = vld [vmem:[#allocation8 + $0x44] sm:$0xf]  ;;  %v840_v51 = vld [vmem:[%s838_s30] ss:$8 sm:$0x30]  ;;  %s1074_s9 = sand.u32 7, %s15527_s4 }
 0x2bd   : > { %4841 = vmatpush.bf16.msrb.mxu0 %v10511_v13  ;;  %4867 = vmatpush.bf16.msrb.mxu2 %v10515_v15  ;;  %v12785_v13 = vld [vmem:[#allocation8 + $0x234] sm:$0xf0]  ;;  %v12782_v15 = vld [vmem:[#allocation8 + $0x224] sm:$0xf] }
 0x2be   : > { %v4135_v27 = vadd.f32 %v4133_v22, %v4131_v20  ;;  %v10607_v20 = vor.u32 %v12785_v13, %v10606_v11  ;;  %v10611_v21 = vor.u32 %v12782_v15, %v10608_v7  ;;  %v10582_v22 = vld [vmem:[#allocation8 + $0x1f0] sm:$0xf]  ;;  %v860_v56 = vld [vmem:[%s858_s24] ss:$8 sm:$0x30] }
 0x2bf   : > { %v10583_v29 = vor.u32 %v12779_v30, %v10582_v22  ;;  %v859_v54 = vld [vmem:[%s858_s24] ss:$8 sm:$0xf]  ;;  %v12852_v15 = vld [vmem:[#allocation8 + $0x154] sm:$0xf]  ;;  %s974_s24 = sand.u32 7, %s15511_s6 }
 0x2c0   : > { %10323 = vst [vmem:[%s14101_s29 + $0x28] sm:$0xff] %v4135_v27  ;;  %v14426_v31 = vpack.c.bf16 %v4135_v27, %v4135_v27  ;;  %v12719_v27 = vld [vmem:[#allocation8 + $0x24] sm:$0xf0]  ;;  %v10886_v7 = vld [vmem:[#allocation8 + $0x168] sm:$0xf0] }
 0x2c1   : > { %4842 = vmatpush.bf16.msrb.mxu0 %v10487_v24  ;;  %4868 = vmatpush.bf16.msrb.mxu2 %v10491_v9  ;;  %v10367_v24 = vor.u32 %v12725_v18, %v10366_v61  ;;  %v10371_v9 = vor.u32 %v12722_v26, %v10368_v19  ;;  %v10343_v52 = vor.u32 %v12719_v27, %v10342_v25  ;;  %v880_v36 = vld [vmem:[%s878_s28] ss:$8 sm:$0x30]  ;;  %v12849_v61 = vld [vmem:[#allocation8 + $0x134] sm:$0xf0] }
 0x2c2   : > { %4758 = vmatmul.bf16.vlgmr.msrb.gmra.mxu1 %v14426_v31  ;;  %4784 = vmatmul.bf16.vlgmr.msrb.gmra.mxu3 %v14426_v31  ;;  %v899_v59 = vld [vmem:[%s898_s26] ss:$8 sm:$0xf]  ;;  %v12846_v26 = vld [vmem:[#allocation8 + $0x124] sm:$0xf] }
 0x2c3   : > { %4854 = vmatpush.bf16.msrb.mxu1 %v10703_v0  ;;  %4880 = vmatpush.bf16.msrb.mxu3 %v10707_v32  ;;  %v10587_v0 = vor.u32 %v12776_v10, %v10584_v23  ;;  %v10558_v32 = vld [vmem:[#allocation8 + $0x1c0] sm:$0xf]  ;;  %v12855_v11 = vld [vmem:[#allocation8 + $0x164] sm:$0xf0]  ;;  %v10862_v19 = vld [vmem:[#allocation8 + $0x138] sm:$0xf0] }
 0x2c4   : > { %v900_v63 = vld [vmem:[%s898_s26] ss:$8 sm:$0x30]  ;;  %v12900_v30 = vld [vmem:[#allocation8 + $0x2d4] sm:$0xf]  ;;  %s14602_s26 = sld [smem:[#allocation4 + %s1025_s11]] }
 0x2c5   : > { %4843 = vmatpush.bf16.msrb.mxu0 %v10463_v37  ;;  %4869 = vmatpush.bf16.msrb.mxu2 %v10467_v55  ;;  %v10347_v37 = vor.u32 %v12716_v28, %v10344_v60  ;;  %v10559_v55 = vor.u32 %v12773_v33, %v10558_v32  ;;  %v920_v34 = vld [vmem:[%s918_s23] ss:$8 sm:$0x30]  ;;  %v11078_v10 = vld [vmem:[#allocation8 + $0x2e8] sm:$0xf0] }
 0x2c6   : > { %v939_v3 = vld [vmem:[%s938_s16] ss:$8 sm:$0xf]  ;;  %v12840_v27 = vld [vmem:[#allocation8 + $0xf4] sm:$0xf] }
 0x2c7   : > { %4855 = vmatpush.bf16.msrb.mxu1 %v10679_v45  ;;  %4881 = vmatpush.bf16.msrb.mxu3 %v10683_v12  ;;  %v10536_v45 = vld [vmem:[#allocation8 + $0x1a8] sm:$0xf0]  ;;  %v10535_v12 = vor.u32 %v12767_v43, %v10534_v42  ;;  %v940_v4 = vld [vmem:[%s938_s16] ss:$8 sm:$0x30]  ;;  %s988_s16 = scalar_select %p987_p11, %s986_s2, 0 }
 0x2c8   : > { %v10539_v38 = vor.u32 %v12764_v40, %v10536_v45  ;;  %v12903_v22 = vld [vmem:[#allocation8 + $0x2e4] sm:$0xf0]  ;;  %v10838_v60 = vld [vmem:[#allocation8 + $0x108] sm:$0xf0]  ;;  %v10814_v42 = vld [vmem:[#allocation8 + $0xd8] sm:$0xf0] }
 0x2c9   : > { %4844 = vmatpush.bf16.msrb.mxu0 %v10439_v48  ;;  %4870 = vmatpush.bf16.msrb.mxu2 %v10443_v49  ;;  %v821_v48 = vor.u32 %v820_v47, %v819_v46  ;;  %v839_v49 = vld [vmem:[%s838_s30] ss:$8 sm:$0xf]  ;;  %v10841_v32 = vor.u32 %v12840_v27, %v10838_v60  ;;  %s8969_s30 = smul.u32 48, %s951_s7  ;;  %s15513_s16 = smov (!%p8976_p3, %s988_s16), 63 }
 0x2ca   : > { %v841_v53 = vor.u32 %v840_v51, %v839_v49  ;;  %v12843_v25 = vld [vmem:[#allocation8 + $0x104] sm:$0xf0]  ;;  %v11028_v45 = vld [vmem:[#allocation8 + $0x270] sm:$0xf]  ;;  %v12828_v49 = vld [vmem:[#allocation8 + $0x94] sm:$0xf] }
 0x2cb   : > { %4856 = vmatpush.bf16.msrb.mxu1 %v10655_v58  ;;  %4882 = vmatpush.bf16.msrb.mxu3 %v10659_v50  ;;  %823 = vst.msk [vmem:[#allocation2 + $0x91] ss:$8 sm:$0xf] %vm13960_vm0, %v821_v48  ;;  %v861_v58 = vor.u32 %v860_v56, %v859_v54  ;;  %v879_v50 = vld [vmem:[%s878_s28] ss:$8 sm:$0xf]  ;;  %s14609_s22 = sadd.s32 %s8969_s30, %s954_s18 }
 0x2cc   : > { %4797 = vmatmul.bf16.vlgmr.msra.gmra.mxu0 %v14420_v17  ;;  %4823 = vmatmul.bf16.vlgmr.msra.gmra.mxu2 %v14420_v17  ;;  %843 = vst.msk [vmem:[#allocation2 + $0x92] ss:$8 sm:$0xf] %vm13960_vm0, %v841_v53  ;;  %v881_v62 = vor.u32 %v880_v36, %v879_v50  ;;  %v10790_v51 = vld [vmem:[#allocation8 + $0xa8] sm:$0xf0]  ;;  %p1027_p1 = scmp.gt.s32.totalorder %s14602_s26, 0 }
 0x2cd   : > { %4845 = vmatpush.bf16.msrb.mxu0 %v10415_v1  ;;  %4871 = vmatpush.bf16.msrb.mxu2 %v10419_v2  ;;  %863 = vst.msk [vmem:[#allocation2 + $0x93] ss:$8 sm:$0xf] %vm13960_vm0, %v861_v58  ;;  %v901_v1 = vor.u32 %v900_v63, %v899_v59  ;;  %v919_v2 = vld [vmem:[%s918_s23] ss:$8 sm:$0xf]  ;;  %v10793_v50 = vor.u32 %v12828_v49, %v10790_v51 }
 0x2ce   : > { %883 = vst.msk [vmem:[#allocation2 + $0x94] ss:$8 sm:$0xf] %vm13960_vm0, %v881_v62  ;;  %v921_v57 = vor.u32 %v920_v34, %v919_v2  ;;  %v11004_v54 = vld [vmem:[#allocation8 + $0x240] sm:$0xf]  ;;  %s1045_s23 = sadd.s32 4, %s15353_s5 }
 0x2cf   : > { %4857 = vmatpush.bf16.msrb.mxu1 %v10631_v5  ;;  %4883 = vmatpush.bf16.msrb.mxu3 %v10635_v8  ;;  %903 = vst.msk [vmem:[#allocation2 + $0x95] ss:$8 sm:$0xf] %vm13960_vm0, %v901_v1  ;;  %v941_v5 = vor.u32 %v940_v4, %v939_v3  ;;  %v10884_v8 = vld [vmem:[#allocation8 + $0x150] sm:$0xf]  ;;  %s1046_s10 = sld [smem:[#allocation4 + %s1045_s23]] }
 0x2d0   : > { %923 = vst.msk [vmem:[#allocation2 + $0x96] ss:$8 sm:$0xf] %vm13960_vm0, %v921_v57  ;;  %v10885_v13 = vor.u32 %v12855_v11, %v10884_v8  ;;  %v12885_v56 = vld [vmem:[#allocation8 + $0x254] sm:$0xf0]  ;;  %s991_s14 = sshra.s32 %s15513_s16, 3 }
 0x2d1   : > { %4846 = vmatpush.bf16.msrb.mxu0 %v10391_v6  ;;  %4872 = vmatpush.bf16.msrb.mxu2 %v10395_v16  ;;  %943 = vst.msk [vmem:[#allocation2 + $0x97] ss:$8 sm:$0xf] %vm13960_vm0, %v941_v5  ;;  %v10889_v6 = vor.u32 %v12852_v15, %v10886_v7  ;;  %v10860_v16 = vld [vmem:[#allocation8 + $0x120] sm:$0xf]  ;;  %p8988_p4 = scmp.lt.s32.totalorder %s14602_s26, 63 }
 0x2d2   : > { %4810 = vmatmul.bf16.vlgmr.msra.gmra.mxu1 %v14426_v31  ;;  %4836 = vmatmul.bf16.vlgmr.msra.gmra.mxu3 %v14426_v31  ;;  %824 = vst.msk [vmem:[#allocation2 + $0x91] ss:$8 sm:$0x30] %vm13960_vm0, %v821_v48  ;;  %v10861_v18 = vor.u32 %v12849_v61, %v10860_v16  ;;  %v12831_v48 = vld [vmem:[#allocation8 + $0xa4] sm:$0xf0]  ;;  %s1011_s2 = sshra.s32 %s15515_s17, 3 }
 0x2d3   : > { %4858 = vmatpush.bf16.msrb.mxu1 %v10607_v20  ;;  %4884 = vmatpush.bf16.msrb.mxu3 %v10611_v21  ;;  %844 = vst.msk [vmem:[#allocation2 + $0x92] ss:$8 sm:$0x30] %vm13960_vm0, %v841_v53  ;;  %v10865_v20 = vor.u32 %v12846_v26, %v10862_v19  ;;  %v11076_v21 = vld [vmem:[#allocation8 + $0x2d0] sm:$0xf]  ;;  %s15517_s26 = smov (!%p1027_p1, %s14602_s26), 0 }
 0x2d4   : > { %864 = vst.msk [vmem:[#allocation2 + $0x93] ss:$8 sm:$0x30] %vm13960_vm0, %v861_v58  ;;  %v11077_v23 = vor.u32 %v12903_v22, %v11076_v21  ;;  %v12882_v58 = vld [vmem:[#allocation8 + $0x244] sm:$0xf]  ;;  %s15523_s26 = smov (!%p8988_p4, %s15517_s26), 63 }
 0x2d5   : > { %4847 = vmatpush.bf16.msrb.mxu0 %v10367_v24  ;;  %4873 = vmatpush.bf16.msrb.mxu2 %v10371_v9  ;;  %884 = vst.msk [vmem:[#allocation2 + $0x94] ss:$8 sm:$0x30] %vm13960_vm0, %v881_v62  ;;  %v11081_v24 = vor.u32 %v12900_v30, %v11078_v10  ;;  %v10836_v9 = vld [vmem:[#allocation8 + $0xf0] sm:$0xf]  ;;  %p1047_p6 = scmp.gt.s32.totalorder %s1046_s10, 0 }
 0x2d6   : > { %904 = vst.msk [vmem:[#allocation2 + $0x95] ss:$8 sm:$0x30] %vm13960_vm0, %v901_v1  ;;  %v10837_v28 = vor.u32 %v12843_v25, %v10836_v9  ;;  %v11006_v36 = vld [vmem:[#allocation8 + $0x258] sm:$0xf0]  ;;  %p8994_p2 = scmp.lt.s32.totalorder %s1046_s10, 63 }
 0x2d7   : > { %4859 = vmatpush.bf16.msrb.mxu1 %v10583_v29  ;;  %4885 = vmatpush.bf16.msrb.mxu3 %v10587_v0  ;;  %924 = vst.msk [vmem:[#allocation2 + $0x96] ss:$8 sm:$0x30] %vm13960_vm0, %v921_v57  ;;  %v11052_v29 = vld [vmem:[#allocation8 + $0x2a0] sm:$0xf]  ;;  %v11005_v57 = vor.u32 %v12885_v56, %v11004_v54  ;;  %v11009_v3 = vor.u32 %v12882_v58, %v11006_v36  ;;  %s15519_s10 = smov (!%p1047_p6, %s1046_s10), 0 }
 0x2d8   : > { %944 = vst.msk [vmem:[#allocation2 + $0x97] ss:$8 sm:$0x30] %vm13960_vm0, %v941_v5  ;;  %v12897_v0 = vld [vmem:[#allocation8 + $0x2b4] sm:$0xf0]  ;;  %s15525_s10 = smov (!%p8994_p2, %s15519_s10), 63 }
 0x2d9   : > { %4848 = vmatpush.bf16.msrb.mxu0 %v10343_v52  ;;  %4874 = vmatpush.bf16.msrb.mxu2 %v10347_v37  ;;  %v11053_v33 = vor.u32 %v12897_v0, %v11052_v29  ;;  %v10812_v52 = vld [vmem:[#allocation8 + $0xc0] sm:$0xf]  ;;  %v11057_v37 = vor.u32 %v12894_v35, %v11054_v14  ;;  %v12825_v62 = vld [vmem:[#allocation8 + $0x74] sm:$0xf0]  ;;  %v12822_v63 = vld [vmem:[#allocation8 + $0x64] sm:$0xf] }
 0x2da   : > { %v10764_v59 = vld [vmem:[#allocation8 + $0x60] sm:$0xf]  ;;  %v10766_v1 = vld [vmem:[#allocation8 + $0x78] sm:$0xf0]  ;;  %v10980_v4 = vld [vmem:[#allocation8 + $0x210] sm:$0xf] }
 0x2db   : > { %4860 = vmatpush.bf16.msrb.mxu1 %v10559_v55  ;;  %4886 = vmatpush.bf16.msrb.mxu3 %v10563_v41  ;;  %v12837_v55 = vld [vmem:[#allocation8 + $0xd4] sm:$0xf0]  ;;  %v12834_v41 = vld [vmem:[#allocation8 + $0xc4] sm:$0xf]  ;;  %v10765_v5 = vor.u32 %v12825_v62, %v10764_v59  ;;  %v12879_v8 = vld [vmem:[#allocation8 + $0x224] sm:$0xf0]  ;;  %v10769_v15 = vor.u32 %v12822_v63, %v10766_v1 }
 0x2dc   : > { %4849 = vmatmul.bf16.vlgmr.msrb.gmra.mxu0 %v14420_v17  ;;  %4875 = vmatmul.bf16.vlgmr.msrb.gmra.mxu2 %v14420_v17  ;;  %v799_v17 = vld [vmem:[%s798_s0] ss:$8 sm:$0xf]  ;;  %v10813_v43 = vor.u32 %v12837_v55, %v10812_v52  ;;  %v10817_v40 = vor.u32 %v12834_v41, %v10814_v42  ;;  %v12876_v11 = vld [vmem:[#allocation8 + $0x214] sm:$0xf]  ;;  %v10981_v19 = vor.u32 %v12879_v8, %v10980_v4  ;;  %s994_s7 = sand.u32 7, %s15513_s16 }
 0x2dd   : > { %5588 = vmatpush.bf16.msra.mxu0 %v10885_v13  ;;  %5614 = vmatpush.bf16.msra.mxu2 %v10889_v6  ;;  %v10982_v13 = vld [vmem:[#allocation8 + $0x228] sm:$0xf0]  ;;  %v10740_v7 = vld [vmem:[#allocation8 + $0x30] sm:$0xf]  ;;  %v12819_v6 = vld [vmem:[#allocation8 + $0x44] sm:$0xf0] }
 0x2de   : > { %v12816_v16 = vld [vmem:[#allocation8 + $0x34] sm:$0xf]  ;;  %v10742_v61 = vld [vmem:[#allocation8 + $0x48] sm:$0xf0]  ;;  %v10956_v21 = vld [vmem:[#allocation8 + $0x1e0] sm:$0xf]  ;;  %v10741_v30 = vor.u32 %v12819_v6, %v10740_v7 }
 0x2df   : > { %4861 = vmatpush.bf16.msrb.mxu1 %v10535_v12  ;;  %4887 = vmatpush.bf16.msrb.mxu3 %v10539_v38  ;;  %v12891_v12 = vld [vmem:[#allocation8 + $0x284] sm:$0xf0]  ;;  %v12888_v38 = vld [vmem:[#allocation8 + $0x274] sm:$0xf]  ;;  %v12873_v10 = vld [vmem:[#allocation8 + $0x1f4] sm:$0xf0]  ;;  %v10745_v27 = vor.u32 %v12816_v16, %v10742_v61 }
 0x2e0   : > { %v11029_v46 = vor.u32 %v12891_v12, %v11028_v45  ;;  %v12813_v60 = vld [vmem:[#allocation8 + $0x14] sm:$0xf0]  ;;  %v12810_v29 = vld [vmem:[#allocation8 + $0x4] sm:$0xf]  ;;  %v12856_v35 = vld [vmem:[#allocation8 + $0x16c] sm:$0xf0]  ;;  %v10957_v52 = vor.u32 %v12873_v10, %v10956_v21 }
 0x2e1   : > { %5589 = vmatpush.bf16.msra.mxu0 %v10861_v18  ;;  %5615 = vmatpush.bf16.msra.mxu2 %v10865_v20  ;;  %v10985_v20 = vor.u32 %v12876_v11, %v10982_v13  ;;  %v12853_v55 = vld [vmem:[#allocation8 + $0x15c] sm:$0xf]  ;;  %v10894_v41 = vld [vmem:[#allocation8 + $0x170] sm:$0xf0]  ;;  %v10932_v42 = vld [vmem:[#allocation8 + $0x1b0] sm:$0xf] }
 0x2e2   : > { %4862 = vmatmul.bf16.vlgmr.msrb.gmra.mxu1 %v14426_v31  ;;  %4888 = vmatmul.bf16.vlgmr.msrb.gmra.mxu3 %v14426_v31  ;;  %v800_v31 = vld [vmem:[%s798_s0] ss:$8 sm:$0x30]  ;;  %v12864_v12 = vld [vmem:[#allocation8 + $0x1b4] sm:$0xf]  ;;  %v10897_v51 = vor.u32 %v12853_v55, %v10894_v41  ;;  %s971_s0 = sshra.s32 %s15511_s6, 3 }
 0x2e3   : > { %v801_v39 = vor.u32 %v800_v31, %v799_v17  ;;  %5601 = vmatpush.bf16.msra.mxu1 %v11077_v23  ;;  %5627 = vmatpush.bf16.msra.mxu3 %v11081_v24  ;;  %v14509_v17 = vld [vmem:[%s15235_s3] sm:$0x3f]  ;;  %v11030_v31 = vld [vmem:[#allocation8 + $0x288] sm:$0xf0]  ;;  %v10958_v24 = vld [vmem:[#allocation8 + $0x1f8] sm:$0xf0] }
 0x2e4   : > { %v11033_v47 = vor.u32 %v12888_v38, %v11030_v31  ;;  %v4245_v2 = vperm.slane %v14509_v17, 0  ;;  %v4246_v26 = vperm.slane %v14509_v17, 1  ;;  %v12870_v23 = vld [vmem:[#allocation8 + $0x1e4] sm:$0xf]  ;;  %v12867_v45 = vld [vmem:[#allocation8 + $0x1c4] sm:$0xf0] }
 0x2e5   : > { %803 = vst.msk [vmem:[#allocation2 + $0x90] ss:$8 sm:$0xf] %vm13960_vm0, %v801_v39  ;;  %5590 = vmatpush.bf16.msra.mxu0 %v10837_v28  ;;  %5616 = vmatpush.bf16.msra.mxu2 %v10841_v32  ;;  %v10716_v28 = vld [vmem:[#allocation8] sm:$0xf]  ;;  %v10933_v58 = vor.u32 %v12867_v45, %v10932_v42  ;;  %v4247_v21 = vperm.slane %v14509_v17, 2 }
 0x2e6   : > { %804 = vst.msk [vmem:[#allocation2 + $0x90] ss:$8 sm:$0x30] %vm13960_vm0, %v801_v39  ;;  %v10788_v39 = vld [vmem:[#allocation8 + $0x90] sm:$0xf]  ;;  %s8975_s28 = smul.u32 48, %s971_s0 }
 0x2e7   : > { %5602 = vmatpush.bf16.msra.mxu1 %v11053_v33  ;;  %5628 = vmatpush.bf16.msra.mxu3 %v11057_v37  ;;  %v10789_v53 = vor.u32 %v12831_v48, %v10788_v39  ;;  %v10718_v32 = vld [vmem:[#allocation8 + $0x18] sm:$0xf0]  ;;  %v10892_v33 = vld [vmem:[#allocation8 + $0x158] sm:$0xf]  ;;  %v10961_v37 = vor.u32 %v12870_v23, %v10958_v24  ;;  %v10934_v38 = vld [vmem:[#allocation8 + $0x1c8] sm:$0xf0] }
 0x2e8   : > { %v10721_v39 = vor.u32 %v12810_v29, %v10718_v32  ;;  %v12847_v54 = vld [vmem:[#allocation8 + $0x12c] sm:$0xf]  ;;  %v10870_v36 = vld [vmem:[#allocation8 + $0x140] sm:$0xf0]  ;;  %v10908_v59 = vld [vmem:[#allocation8 + $0x180] sm:$0xf]  ;;  %s14611_s6 = sadd.s32 %s8975_s28, %s974_s24 }
 0x2e9   : > { %5591 = vmatpush.bf16.msra.mxu0 %v10813_v43  ;;  %5617 = vmatpush.bf16.msra.mxu2 %v10817_v40  ;;  %v10717_v40 = vor.u32 %v12813_v60, %v10716_v28  ;;  %v12861_v62 = vld [vmem:[#allocation8 + $0x194] sm:$0xf0]  ;;  %v12858_v1 = vld [vmem:[#allocation8 + $0x184] sm:$0xf]  ;;  %v12901_v8 = vld [vmem:[#allocation8 + $0x2dc] sm:$0xf] }
 0x2ea   : > { %v11086_v11 = vld [vmem:[#allocation8 + $0x2f0] sm:$0xf0]  ;;  %v10844_v7 = vld [vmem:[#allocation8 + $0xf8] sm:$0xf]  ;;  %v12844_v6 = vld [vmem:[#allocation8 + $0x10c] sm:$0xf0]  ;;  %v10909_v61 = vor.u32 %v12861_v62, %v10908_v59 }
 0x2eb   : > { %5603 = vmatpush.bf16.msra.mxu1 %v11029_v46  ;;  %5629 = vmatpush.bf16.msra.mxu3 %v11033_v47  ;;  %v10893_v46 = vor.u32 %v12856_v35, %v10892_v33  ;;  %v10868_v47 = vld [vmem:[#allocation8 + $0x128] sm:$0xf]  ;;  %v10845_v23 = vor.u32 %v12844_v6, %v10844_v7  ;;  %v12898_v24 = vld [vmem:[#allocation8 + $0x2bc] sm:$0xf0]  ;;  %v12835_v33 = vld [vmem:[#allocation8 + $0xcc] sm:$0xf] }
 0x2ec   : > { %v4139_v18 = vld [vmem:[#allocation2 + $0x90] sm:$0xff]  ;;  %v4140_v31 = vld [vmem:[#allocation2 + $0x98] sm:$0xff]  ;;  %v11060_v10 = vld [vmem:[#allocation8 + $0x2a8] sm:$0xf]  ;;  %s1031_s18 = sshra.s32 %s15523_s26, 3  ;;  %s8981_s0 = smul.u32 48, %s991_s14 }
 0x2ed   : > { %5592 = vmatpush.bf16.msra.mxu0 %v10789_v53  ;;  %5618 = vmatpush.bf16.msra.mxu2 %v10793_v50  ;;  %v12850_v53 = vld [vmem:[#allocation8 + $0x13c] sm:$0xf0]  ;;  %v10937_v50 = vor.u32 %v12864_v12, %v10934_v38  ;;  %v10820_v60 = vld [vmem:[#allocation8 + $0xc8] sm:$0xf]  ;;  %v10822_v35 = vld [vmem:[#allocation8 + $0xe0] sm:$0xf0] }
 0x2ee   : > { %v10869_v4 = vor.u32 %v12850_v53, %v10868_v47  ;;  %v12838_v29 = vld [vmem:[#allocation8 + $0xdc] sm:$0xf0]  ;;  %v11036_v41 = vld [vmem:[#allocation8 + $0x278] sm:$0xf]  ;;  %v12892_v45 = vld [vmem:[#allocation8 + $0x28c] sm:$0xf0]  ;;  %s997_s15 = sadd.s32 %s8981_s0, %s994_s7 }
 0x2ef   : > { %5604 = vmatpush.bf16.msra.mxu1 %v11005_v57  ;;  %5630 = vmatpush.bf16.msra.mxu3 %v11009_v3  ;;  %v12889_v12 = vld [vmem:[#allocation8 + $0x27c] sm:$0xf]  ;;  %v11038_v38 = vld [vmem:[#allocation8 + $0x290] sm:$0xf0]  ;;  %v10796_v47 = vld [vmem:[#allocation8 + $0x98] sm:$0xf] }
 0x2f0   : > { %v10798_v53 = vld [vmem:[#allocation8 + $0xb0] sm:$0xf0]  ;;  %v12886_v59 = vld [vmem:[#allocation8 + $0x25c] sm:$0xf0]  ;;  %v12823_v6 = vld [vmem:[#allocation8 + $0x6c] sm:$0xf] }
 0x2f1   : > { %5593 = vmatpush.bf16.msra.mxu0 %v10765_v5  ;;  %5619 = vmatpush.bf16.msra.mxu2 %v10769_v15  ;;  %v12904_v5 = vld [vmem:[#allocation8 + $0x2ec] sm:$0xf0]  ;;  %v10873_v15 = vor.u32 %v12847_v54, %v10870_v36  ;;  %v11012_v36 = vld [vmem:[#allocation8 + $0x248] sm:$0xf]  ;;  %s1051_s11 = sshra.s32 %s15525_s10, 3  ;;  %s8987_s30 = smul.u32 48, %s1011_s2 }
 0x2f2   : > { %v11013_v7 = vor.u32 %v12886_v59, %v11012_v36  ;;  %s1071_s24 = sshra.s32 %s15527_s4, 3  ;;  %s8993_s28 = smul.u32 48, %s1031_s18 }
 0x2f3   : > { %5605 = vmatpush.bf16.msra.mxu1 %v10981_v19  ;;  %5631 = vmatpush.bf16.msra.mxu3 %v10985_v20  ;;  %v10846_v19 = vld [vmem:[#allocation8 + $0x110] sm:$0xf0]  ;;  %s1091_s23 = sshra.s32 %s15529_s12, 3  ;;  %s8999_s8 = smul.u32 48, %s1051_s11 }
 0x2f4   : > { %s1034_s20 = sand.u32 7, %s15523_s26  ;;  %s9005_s27 = smul.u32 48, %s1071_s24 }
 0x2f5   : > { %5594 = vmatpush.bf16.msra.mxu0 %v10741_v30  ;;  %5620 = vmatpush.bf16.msra.mxu2 %v10745_v27  ;;  %v11089_v30 = vor.u32 %v12901_v8, %v11086_v11  ;;  %v12826_v8 = vld [vmem:[#allocation8 + $0x7c] sm:$0xf0]  ;;  %s1054_s25 = sand.u32 7, %s15525_s10  ;;  %s9011_s5 = smul.u32 48, %s1091_s23 }
 0x2f6   : > { %s1017_s19 = sadd.s32 %s8987_s30, %s1014_s1  ;;  %s1037_s16 = sadd.s32 %s8993_s28, %s1034_s20 }
 0x2f7   : > { %5606 = vmatpush.bf16.msra.mxu1 %v10957_v52  ;;  %5632 = vmatpush.bf16.msra.mxu3 %v10961_v37  ;;  %v4141_v52 = vld [vmem:[#allocation2 + $0xa0] sm:$0xff]  ;;  %v11061_v37 = vor.u32 %v12898_v24, %v11060_v10  ;;  %v12877_v10 = vld [vmem:[#allocation8 + $0x21c] sm:$0xf]  ;;  %s14622_s21 = sadd.s32 %s8999_s8, %s1054_s25  ;;  %s14624_s14 = sadd.s32 %s9005_s27, %s1074_s9 }
 0x2f8   : > { %s14626_s2 = sadd.s32 %s9011_s5, %s1094_s13  ;;  %s958_s18 = scalar_lea.vmem [#allocation5], %s14609_s22 }
 0x2f9   : > { %5595 = vmatpush.bf16.msra.mxu0 %v10717_v40  ;;  %5621 = vmatpush.bf16.msra.mxu2 %v10721_v39  ;;  %v10821_v40 = vor.u32 %v12838_v29, %v10820_v60  ;;  %v4248_v39 = vperm.slane %v14509_v17, 3  ;;  %v4249_v60 = vperm.slane %v14509_v17, 4  ;;  %s978_s26 = scalar_lea.vmem [#allocation5], %s14611_s6  ;;  %s998_s17 = scalar_lea.vmem [#allocation5], %s997_s15 }
 0x2fa   : > { %s1018_s9 = scalar_lea.vmem [#allocation5], %s1017_s19  ;;  %s1038_s13 = scalar_lea.vmem [#allocation5], %s1037_s16 }
 0x2fb   : > { %5607 = vmatpush.bf16.msra.mxu1 %v10933_v58  ;;  %5633 = vmatpush.bf16.msra.mxu3 %v10937_v50  ;;  %v11037_v58 = vor.u32 %v12892_v45, %v11036_v41  ;;  %v11041_v50 = vor.u32 %v12889_v12, %v11038_v38  ;;  %v10964_v41 = vld [vmem:[#allocation8 + $0x1e8] sm:$0xf]  ;;  %v12871_v45 = vld [vmem:[#allocation8 + $0x1ec] sm:$0xf]  ;;  %v10966_v12 = vld [vmem:[#allocation8 + $0x200] sm:$0xf0] }
 0x2fc   : > { %v10969_v59 = vor.u32 %v12871_v45, %v10966_v12  ;;  %v4144_v12 = vld [vmem:[#allocation2 + $0xb8] sm:$0xff]  ;;  %s1058_s15 = scalar_lea.vmem [#allocation5], %s14622_s21  ;;  %s1078_s19 = scalar_lea.vmem [#allocation5], %s14624_s14 }
 0x2fd   : > { %5640 = vmatpush.bf16.msrb.mxu0 %v10893_v46  ;;  %5666 = vmatpush.bf16.msrb.mxu2 %v10897_v51  ;;  %v10825_v46 = vor.u32 %v12835_v33, %v10822_v35  ;;  %v12829_v51 = vld [vmem:[#allocation8 + $0x9c] sm:$0xf]  ;;  %v10750_v35 = vld [vmem:[#allocation8 + $0x50] sm:$0xf0]  ;;  %s1098_s5 = scalar_lea.vmem [#allocation5], %s14626_s2  ;;  %s15360_s20 = sld [smem:[#allocation30_spill]] }
 0x2fe   : > { %v12817_v33 = vld [vmem:[#allocation8 + $0x3c] sm:$0xf]  ;;  %s15361_s10 = sld [smem:[#allocation31_spill]] }
 0x2ff   : > { %5608 = vmatpush.bf16.msra.mxu1 %v10909_v61  ;;  %s15362_s6 = sld [smem:[#allocation32_spill]] }
 0x300   : > { %s15363_s0 = sld [smem:[#allocation33_spill]] }
 0x301   : > { %5641 = vmatpush.bf16.msrb.mxu0 %v10869_v4  ;;  %5667 = vmatpush.bf16.msrb.mxu2 %v10873_v15  ;;  %v10801_v4 = vor.u32 %v12829_v51, %v10798_v53  ;;  %v12811_v53 = vld [vmem:[#allocation8 + $0xc] sm:$0xf]  ;;  %s15364_s11 = sld [smem:[#allocation34_spill]] }
 0x302   : > { %s15365_s28 = sld [smem:[#allocation35_spill]] }
 0x303   : > { %s1105_s22 = sadd.s32 5, %s15360_s20  ;;  %s15366_s8 = sld [smem:[#allocation36_spill]] }
 0x304   : > { %s1125_s12 = sadd.s32 5, %s15361_s10  ;;  %s1106_s4 = sld [smem:[#allocation4 + %s1105_s22]] }
 0x305   : > { %5642 = vmatpush.bf16.msrb.mxu0 %v10845_v23  ;;  %v10990_v23 = vld [vmem:[#allocation8 + $0x230] sm:$0xf0]  ;;  %s1126_s7 = sld [smem:[#allocation4 + %s1125_s12]]  ;;  %s1145_s30 = sadd.s32 5, %s15362_s6 }
 0x306   : > { %s1165_s23 = sadd.s32 5, %s15363_s0  ;;  %s1146_s1 = sld [smem:[#allocation4 + %s1145_s30]] }
 0x307   : > { %s1166_s27 = sld [smem:[#allocation4 + %s1165_s23]] }
 0x308   : > { %s15367_s14 = sld [smem:[#allocation37_spill]] }
 0x309   : > { %5643 = vmatpush.bf16.msrb.mxu0 %v10821_v40  ;;  %v12874_v40 = vld [vmem:[#allocation8 + $0x1fc] sm:$0xf0]  ;;  %s1225_s21 = sadd.s32 5, %s15366_s8 }
 0x30a   : > { %v10965_v36 = vor.u32 %v12874_v40, %v10964_v41  ;;  %p1107_p11 = scmp.gt.s32.totalorder %s1106_s4, 0  ;;  %p9012_p3 = scmp.lt.s32.totalorder %s1106_s4, 63 }
 0x30b   : > { %p1127_p0 = scmp.gt.s32.totalorder %s1126_s7, 0  ;;  %p9018_p5 = scmp.lt.s32.totalorder %s1126_s7, 63 }
 0x30c   : > { %s15531_s4 = smov (!%p1107_p11, %s1106_s4), 0  ;;  %p1147_p1 = scmp.gt.s32.totalorder %s1146_s1, 0 }
 0x30d   : > { %s1128_s24 = scalar_select %p1127_p0, %s1126_s7, 0 }
 0x30e   : > { %s15533_s4 = smov (!%p9012_p3, %s15531_s4), 63  ;;  %p1167_p4 = scmp.gt.s32.totalorder %s1166_s27, 0 }
 0x30f   : > { %s15535_s24 = smov (!%p9018_p5, %s1128_s24), 63  ;;  %s1111_s16 = sshra.s32 %s15533_s4, 3 }
 0x310   : > { %s1114_s2 = sand.u32 7, %s15533_s4  ;;  %p9024_p6 = scmp.lt.s32.totalorder %s1146_s1, 63 }
 0x311   : > { %s1168_s25 = scalar_select %p1167_p4, %s1166_s27, 0 }
 0x312   : > { %s1245_s12 = sadd.s32 5, %s15367_s14  ;;  %p9030_p13 = scmp.lt.s32.totalorder %s1166_s27, 63 }
 0x313   : > { %s1226_s4 = sld [smem:[#allocation4 + %s1225_s21]] }
 0x314   : > { %s1246_s30 = sld [smem:[#allocation4 + %s1245_s12]]  ;;  %s15539_s25 = smov (!%p9030_p13, %s1168_s25), 63 }
 0x315   : > { %s1174_s21 = sand.u32 7, %s15539_s25 }
 0x319   : > { %p1227_p10 = scmp.gt.s32.totalorder %s1226_s4, 0  ;;  %p9048_p3 = scmp.lt.s32.totalorder %s1226_s4, 63 }
 0x31a   : > { %p1247_p0 = scmp.gt.s32.totalorder %s1246_s30, 0  ;;  %p9054_p5 = scmp.lt.s32.totalorder %s1246_s30, 63 }
 0x31b   : > { %s1228_s27 = scalar_select %p1227_p10, %s1226_s4, 0 }
 0x31c   : > { %s15545_s30 = smov (!%p1247_p0, %s1246_s30), 0 }
 0x31d   : > { %s15551_s27 = smov (!%p9048_p3, %s1228_s27), 63  ;;  %s15553_s30 = smov (!%p9054_p5, %s15545_s30), 63 }
 0x31e   : > { %s1254_s0 = sand.u32 7, %s15553_s30 }
 0x339   : > { %v4746_v34 = vpop.f32.mrf.mxu0 }
 0x33a   : > { %v4747_v22 = vadd.f32 %v4746_v34, %v4245_v2  ;;  %v10910_v2 = vld [vmem:[#allocation8 + $0x198] sm:$0xf0]  ;;  %v11084_v34 = vld [vmem:[#allocation8 + $0x2d8] sm:$0xf] }
 0x33f   : > { %v4759_v9 = vpop.f32.mrf.mxu1  ;;  %v4772_v25 = vpop.f32.mrf.mxu2 }
 0x340   : > { %v4760_v0 = vadd.f32 %v4759_v9, %v4747_v22  ;;  %v4773_v49 = vadd.f32 %v4772_v25, %v4246_v26  ;;  %v12841_v26 = vld [vmem:[#allocation8 + $0xfc] sm:$0xf]  ;;  %v11085_v22 = vor.u32 %v12904_v5, %v11084_v34  ;;  %v12895_v9 = vld [vmem:[#allocation8 + $0x2ac] sm:$0xf]  ;;  %v11062_v25 = vld [vmem:[#allocation8 + $0x2c0] sm:$0xf0] }
 0x341   : > { %v4748_v14 = vpop.f32.mrf.mxu0  ;;  %v10849_v28 = vor.u32 %v12841_v26, %v10846_v19  ;;  %v11065_v55 = vor.u32 %v12895_v9, %v11062_v25  ;;  %v11014_v34 = vld [vmem:[#allocation8 + $0x260] sm:$0xf0]  ;;  %v10772_v5 = vld [vmem:[#allocation8 + $0x68] sm:$0xf]  ;;  %v10988_v19 = vld [vmem:[#allocation8 + $0x218] sm:$0xf] }
 0x342   : > { %v4893_v43 = vadd.f32 %v4760_v0, %v4139_v18  ;;  %v10913_v18 = vor.u32 %v12858_v1, %v10910_v2  ;;  %5653 = vmatpush.bf16.msrb.mxu1 %v11085_v22  ;;  %v12883_v2 = vld [vmem:[#allocation8 + $0x24c] sm:$0xf]  ;;  %v10773_v22 = vor.u32 %v12826_v8, %v10772_v5  ;;  %v12865_v5 = vld [vmem:[#allocation8 + $0x1bc] sm:$0xf]  ;;  %v10942_v8 = vld [vmem:[#allocation8 + $0x1d0] sm:$0xf0] }
 0x343   : > { %5668 = vmatpush.bf16.msrb.mxu2 %v10849_v28  ;;  %v11017_v26 = vor.u32 %v12883_v2, %v11014_v34  ;;  %v12820_v28 = vld [vmem:[#allocation8 + $0x4c] sm:$0xf0] }
 0x344   : > { %v10708_v48 = vmul.f32 -1.442695, %v4893_v43  ;;  %5634 = vmatpush.bf16.msra.mxu3 %v10913_v18 }
 0x345   : > { %v4785_v56 = vpop.f32.mrf.mxu3 }
 0x346   : > { %13343 = vpow2.f32 %v10708_v48  ;;  %v4786_v63 = vadd.f32 %v4785_v56, %v4773_v49  ;;  %v12832_v48 = vld [vmem:[#allocation8 + $0xac] sm:$0xf0]  ;;  %5654 = vmatpush.bf16.msrb.mxu1 %v11061_v37 }
 0x347   : > { %v4761_v57 = vpop.f32.mrf.mxu1  ;;  %v4774_v3 = vpop.f32.mrf.mxu2  ;;  %v10797_v1 = vor.u32 %v12832_v48, %v10796_v47  ;;  %5669 = vmatpush.bf16.msrb.mxu2 %v10825_v46  ;;  %v10753_v46 = vor.u32 %v12817_v33, %v10750_v35  ;;  %v10724_v47 = vld [vmem:[#allocation8 + $0x8] sm:$0xf]  ;;  %v12814_v48 = vld [vmem:[#allocation8 + $0x1c] sm:$0xf0] }
 0x348   : > { %v4894_v13 = vadd.f32 %v4786_v63, %v4140_v31  ;;  %5679 = vmatpush.bf16.msrb.mxu3 %v11089_v30  ;;  %v4142_v63 = vld [vmem:[#allocation2 + $0xa8] sm:$0xff]  ;;  %v12880_v30 = vld [vmem:[#allocation8 + $0x22c] sm:$0xf0] }
 0x349   : > { %v4798_v16 = vpop.f32.mrf.mxu0  ;;  %5644 = vmatpush.bf16.msrb.mxu0 %v10797_v1  ;;  %v10989_v37 = vor.u32 %v12880_v30, %v10988_v19  ;;  %v12868_v1 = vld [vmem:[#allocation8 + $0x1cc] sm:$0xf0]  ;;  %v12862_v30 = vld [vmem:[#allocation8 + $0x19c] sm:$0xf0] }
 0x34a   : > { %v10709_v20 = vmul.f32 -1.442695, %v4894_v13  ;;  %v4799_v14 = vadd.f32 %v4798_v16, %v4247_v21  ;;  %v10774_v16 = vld [vmem:[#allocation8 + $0x80] sm:$0xf0]  ;;  %5655 = vmatpush.bf16.msrb.mxu1 %v11037_v58 }
 0x34b   : > { %5670 = vmatpush.bf16.msrb.mxu2 %v10801_v4  ;;  %v10777_v25 = vor.u32 %v12823_v6, %v10774_v16  ;;  %v10725_v4 = vor.u32 %v12814_v48, %v10724_v47 }
 0x34c   : > { %v13344_v27 = vpop.eup %13343  ;;  %13345 = vpow2.f32 %v10709_v20  ;;  %5680 = vmatpush.bf16.msrb.mxu3 %v11065_v55  ;;  %v10993_v55 = vor.u32 %v12877_v10, %v10990_v23  ;;  %v10918_v23 = vld [vmem:[#allocation8 + $0x1a0] sm:$0xf0] }
 0x34d   : > { %v14514_v0 = vadd.f32 1.0, %v13344_v27  ;;  %v4787_v32 = vpop.f32.mrf.mxu3  ;;  %v10748_v27 = vld [vmem:[#allocation8 + $0x38] sm:$0xf]  ;;  %5645 = vmatpush.bf16.msrb.mxu0 %v10773_v22  ;;  %v10916_v22 = vld [vmem:[#allocation8 + $0x188] sm:$0xf] }
 0x34e   : > { %5656 = vmatpush.bf16.msrb.mxu1 %v11013_v7 }
 0x34f   : > { %13347 = vrcp.f32 %v14514_v0  ;;  %v4811_v42 = vpop.f32.mrf.mxu1  ;;  %v4824_v43 = vpop.f32.mrf.mxu2  ;;  %v4912_v15 = vand.u32 2147483647, %v14514_v0  ;;  %v4914_v32 = vand.u32 2147483648, %v14514_v0  ;;  %5671 = vmatpush.bf16.msrb.mxu2 %v10777_v25  ;;  %vm4908_vm5 = vweird.f32 %v14514_v0  ;;  %v10852_v25 = vld [vmem:[#allocation8 + $0x100] sm:$0xf] }
 0x350   : > { %v4812_v31 = vadd.f32 %v4811_v42, %v4799_v14  ;;  %v4825_v3 = vadd.f32 %v4824_v43, %v4248_v39  ;;  %5681 = vmatpush.bf16.msrb.mxu3 %v11041_v50  ;;  %v10749_v43 = vor.u32 %v12820_v28, %v10748_v27 }
 0x351   : > { %v4800_v49 = vpop.f32.mrf.mxu0  ;;  %v4915_v7 = vor.u32 1.1754944e-38, %v4914_v32  ;;  %vm4913_vm7 = vcmp.eq.f32.partialorder %v4912_v15, 8.507059e+37  ;;  %v12859_v15 = vld [vmem:[#allocation8 + $0x18c] sm:$0xf] }
 0x352   : > { %v13346_v54 = vpop.eup %13345  ;;  %v4933_v56 = vadd.f32 %v4812_v31, %v4141_v52  ;;  %5657 = vmatpush.bf16.msrb.mxu1 %v10989_v37  ;;  %5646 = vmatpush.bf16.msrb.mxu0 %v10749_v43  ;;  %v10921_v35 = vor.u32 %v12859_v15, %v10918_v23  ;;  %v12902_v15 = vld [vmem:[#allocation8 + $0x2e4] sm:$0xf]  ;;  %v11094_v23 = vld [vmem:[#allocation8 + $0x2f8] sm:$0xf0] }
 0x353   : > { %v14518_v62 = vadd.f32 1.0, %v13346_v54  ;;  %v10726_v54 = vld [vmem:[#allocation8 + $0x20] sm:$0xf0]  ;;  %5672 = vmatpush.bf16.msrb.mxu2 %v10753_v46 }
 0x354   : > { %v10710_v57 = vmul.f32 -1.442695, %v4933_v56  ;;  %5682 = vmatpush.bf16.msrb.mxu3 %v11017_v26  ;;  %v10729_v16 = vor.u32 %v12811_v53, %v10726_v54 }
 0x355   : > { %v14520_v11 = vpop.eup %13347  ;;  %13349 = vrcp.f32 %v14518_v62  ;;  %v4837_v13 = vpop.f32.mrf.mxu3  ;;  %vm4923_vm9 = vweird.f32 %v14518_v62 }
 0x356   : > { %13351 = vpow2.f32 %v10710_v57  ;;  %v4838_v61 = vadd.f32 %v4837_v13, %v4825_v3  ;;  %v4904_v18 = vmul.f32 %v14520_v11, %v14514_v0  ;;  %vm4909_vm4 = vweird.f32 %v14520_v11  ;;  %5658 = vmatpush.bf16.msrb.mxu1 %v10965_v36  ;;  %5647 = vmatpush.bf16.msrb.mxu0 %v10725_v4  ;;  %v10902_v4 = vld [vmem:[#allocation8 + $0x178] sm:$0xf0] }
 0x357   : > { %v4813_v20 = vpop.f32.mrf.mxu1  ;;  %v4826_v21 = vpop.f32.mrf.mxu2  ;;  %vm14540_vm6 = vmor %vm4908_vm5, %vm4909_vm4  ;;  %v4250_v57 = vperm.slane %v14509_v17, 5  ;;  %5673 = vmatpush.bf16.msrb.mxu2 %v10729_v16 }
 0x358   : > { %v4934_v24 = vadd.f32 %v4838_v61, %v4142_v63  ;;  %v4905_v9 = vsub.f32 1.0, %v4904_v18  ;;  %5683 = vmatpush.bf16.msrb.mxu3 %v10993_v55  ;;  %v10940_v63 = vld [vmem:[#allocation8 + $0x1b8] sm:$0xf]  ;;  %v4929_v20 = vand.u32 2147483648, %v14518_v62  ;;  %v10945_v21 = vor.u32 %v12865_v5, %v10942_v8 }
 0x359   : > { %v4850_v29 = vpop.f32.mrf.mxu0  ;;  %v10941_v17 = vor.u32 %v12868_v1, %v10940_v63  ;;  %v13449_v1 = vld [vmem:[%s14101_s29 + $0x20] sm:$0xff] }
 0x35a   : > { %v10711_v14 = vmul.f32 -1.442695, %v4934_v24  ;;  %v4906_v52 = vmul.f32 %v14520_v11, %v4905_v9  ;;  %v4851_v56 = vadd.f32 %v4850_v29, %v4249_v60  ;;  %v4143_v24 = vld [vmem:[#allocation2 + $0xb0] sm:$0xff]  ;;  %v10917_v60 = vor.u32 %v12862_v30, %v10916_v22  ;;  %v13450_v30 = vld [vmem:[%s14101_s29 + $0x28] sm:$0xff] }
 0x35b   : > { %v14529_v42 = vpop.eup %13349  ;;  %v4930_v33 = vor.u32 1.1754944e-38, %v4929_v20  ;;  %5659 = vmatpush.bf16.msrb.mxu1 %v10941_v17 }
 0x35c   : > { %v13352_v38 = vpop.eup %13351  ;;  %13353 = vpow2.f32 %v10711_v14  ;;  %v4907_v31 = vadd.f32 %v14520_v11, %v4906_v52  ;;  %v4919_v39 = vmul.f32 %v14529_v42, %v14518_v62  ;;  %vm4924_vm8 = vweird.f32 %v14529_v42  ;;  %5684 = vmatpush.bf16.msrb.mxu3 %v10969_v59  ;;  %v10900_v59 = vld [vmem:[#allocation8 + $0x160] sm:$0xf] }
 0x35d   : > { %v14535_v49 = vadd.f32 1.0, %v13352_v38  ;;  %v4839_v51 = vpop.f32.mrf.mxu3  ;;  %vm14561_vm10 = vmor %vm4923_vm9, %vm4924_vm8 }
 0x35e   : > { %v4920_v50 = vsub.f32 1.0, %v4919_v39  ;;  %v4911_v34 = vsel %vm14540_vm6, %v14520_v11, %v4907_v31  ;;  %v4927_v11 = vand.u32 2147483647, %v14518_v62 }
 0x35f   : > { %13355 = vrcp.f32 %v14535_v49  ;;  %v4863_v2 = vpop.f32.mrf.mxu1  ;;  %v4876_v3 = vpop.f32.mrf.mxu2  ;;  %v4916_v26 = vsel %vm4913_vm7, %v4915_v7, %v4911_v34  ;;  %v4954_v43 = vand.u32 2147483648, %v14535_v49  ;;  %5660 = vmatpush.bf16.msrb.mxu1 %v10917_v60  ;;  %vm4948_vm13 = vweird.f32 %v14535_v49  ;;  %v10854_v60 = vld [vmem:[#allocation8 + $0x118] sm:$0xf0] }
 0x360   : > { %v4864_v13 = vadd.f32 %v4863_v2, %v4851_v56  ;;  %v4921_v6 = vmul.f32 %v14529_v42, %v4920_v50  ;;  %v4877_v9 = vadd.f32 %v4876_v3, %v4250_v57  ;;  %5685 = vmatpush.bf16.msrb.mxu3 %v10945_v21  ;;  %vm4928_vm11 = vcmp.eq.f32.partialorder %v4927_v11, 8.507059e+37  ;;  %v12857_v57 = vld [vmem:[#allocation8 + $0x174] sm:$0xf0]  ;;  %v12854_v3 = vld [vmem:[#allocation8 + $0x164] sm:$0xf] }
 0x361   : > { %v4852_v61 = vpop.f32.mrf.mxu0  ;;  %v4955_v46 = vor.u32 1.1754944e-38, %v4954_v43  ;;  %v10905_v16 = vor.u32 %v12854_v3, %v10902_v4  ;;  %v12851_v11 = vld [vmem:[#allocation8 + $0x144] sm:$0xf0]  ;;  %v11092_v21 = vld [vmem:[#allocation8 + $0x2e0] sm:$0xf] }
 0x362   : > { %v13354_v18 = vpop.eup %13353  ;;  %v4922_v19 = vadd.f32 %v14529_v42, %v4921_v6  ;;  %v4973_v0 = vmul.f32 %v4916_v26, %v4864_v13  ;;  %v10901_v6 = vor.u32 %v12857_v57, %v10900_v59  ;;  %v10876_v61 = vld [vmem:[#allocation8 + $0x130] sm:$0xf]  ;;  %v12848_v26 = vld [vmem:[#allocation8 + $0x134] sm:$0xf]  ;;  %v12887_v59 = vld [vmem:[#allocation8 + $0x264] sm:$0xf0] }
 0x363   : > { %v14556_v10 = vadd.f32 1.0, %v13354_v18  ;;  %v10828_v43 = vld [vmem:[#allocation8 + $0xd0] sm:$0xf]  ;;  %v12827_v3 = vld [vmem:[#allocation8 + $0x84] sm:$0xf0] }
 0x364   : > { %v4926_v62 = vsel %vm14561_vm10, %v14529_v42, %v4922_v19  ;;  %v4975_v14 = vadd.f32 %v4973_v0, %v4143_v24  ;;  %v4952_v42 = vand.u32 2147483647, %v14535_v49  ;;  %5686 = vmatpush.bf16.msrb.mxu3 %v10921_v35  ;;  %v10878_v19 = vld [vmem:[#allocation8 + $0x148] sm:$0xf0]  ;;  %v12905_v0 = vld [vmem:[#allocation8 + $0x2f4] sm:$0xf0]  ;;  %v10877_v24 = vor.u32 %v12851_v11, %v10876_v61 }
 0x365   : > { %v13356_v27 = vpop.eup %13355  ;;  %13357 = vrcp.f32 %v14556_v10  ;;  %v4889_v28 = vpop.f32.mrf.mxu3  ;;  %v4931_v41 = vsel %vm4928_vm11, %v4930_v33, %v4926_v62  ;;  %v4969_v54 = vand.u32 2147483648, %v14556_v10  ;;  %v4967_v36 = vand.u32 2147483647, %v14556_v10  ;;  %v12842_v62 = vld [vmem:[#allocation8 + $0x104] sm:$0xf] }
 0x366   : > { %v4944_v29 = vmul.f32 %v13356_v27, %v14535_v49  ;;  %v4890_v32 = vadd.f32 %v4889_v28, %v4877_v9  ;;  %vm4949_vm12 = vweird.f32 %v13356_v27  ;;  %13359 = vtanh.f32 %v4975_v14  ;;  %v12845_v28 = vld [vmem:[#allocation8 + $0x114] sm:$0xf0]  ;;  %v11068_v33 = vld [vmem:[#allocation8 + $0x2b0] sm:$0xf]  ;;  %v12899_v35 = vld [vmem:[#allocation8 + $0x2c4] sm:$0xf0] }
 0x367   : > { %v4865_v52 = vpop.f32.mrf.mxu1  ;;  %v4878_v37 = vpop.f32.mrf.mxu2  ;;  %vm4950_vm14 = vmor %vm4948_vm13, %vm4949_vm12  ;;  %vm4953_vm15 = vcmp.eq.f32.partialorder %v4952_v42, 8.507059e+37  ;;  %vm4963_vm2 = vweird.f32 %v14556_v10  ;;  %v4970_v5 = vor.u32 1.1754944e-38, %v4969_v54  ;;  %vm4968_vm4 = vcmp.eq.f32.partialorder %v4967_v36, 8.507059e+37  ;;  %v10830_v42 = vld [vmem:[#allocation8 + $0xe8] sm:$0xf0] }
 0x368   : > { %v4945_v55 = vsub.f32 1.0, %v4944_v29  ;;  %v4974_v40 = vmul.f32 %v4931_v41, %v4890_v32  ;;  %v10881_v9 = vor.u32 %v12848_v26, %v10878_v19  ;;  %v11093_v29 = vor.u32 %v12905_v0, %v11092_v21  ;;  %v12896_v52 = vld [vmem:[#allocation8 + $0x2b4] sm:$0xf]  ;;  %v11070_v37 = vld [vmem:[#allocation8 + $0x2c8] sm:$0xf0] }
 0x369   : > { %v11097_v32 = vor.u32 %v12902_v15, %v11094_v23  ;;  %v10857_v41 = vor.u32 %v12842_v62, %v10854_v60  ;;  %v12833_v54 = vld [vmem:[#allocation8 + $0xb4] sm:$0xf0]  ;;  %v10780_v57 = vld [vmem:[#allocation8 + $0x70] sm:$0xf]  ;;  %v12824_v4 = vld [vmem:[#allocation8 + $0x74] sm:$0xf] }
 0x36a   : > { %v4946_v45 = vmul.f32 %v13356_v27, %v4945_v55  ;;  %v4976_v47 = vadd.f32 %v4974_v40, %v4144_v12  ;;  %v10853_v55 = vor.u32 %v12845_v28, %v10852_v25  ;;  %v12839_v40 = vld [vmem:[#allocation8 + $0xe4] sm:$0xf0]  ;;  %v11069_v12 = vor.u32 %v12899_v35, %v11068_v33  ;;  %v10998_v61 = vld [vmem:[#allocation8 + $0x238] sm:$0xf0]  ;;  %v10756_v26 = vld [vmem:[#allocation8 + $0x40] sm:$0xf] }
 0x36b   : > { %v13358_v38 = vpop.eup %13357  ;;  %v10781_v11 = vor.u32 %v12827_v3, %v10780_v57  ;;  %v12821_v19 = vld [vmem:[#allocation8 + $0x54] sm:$0xf0]  ;;  %v10758_v21 = vld [vmem:[#allocation8 + $0x58] sm:$0xf0]  ;;  %v12875_v0 = vld [vmem:[#allocation8 + $0x204] sm:$0xf0] }
 0x36c   : > { %v4959_v31 = vmul.f32 %v13358_v38, %v14556_v10  ;;  %v4947_v39 = vadd.f32 %v13356_v27, %v4946_v45  ;;  %vm4964_vm1 = vweird.f32 %v13358_v38  ;;  %v13360_v49 = vpop.eup %13359  ;;  %13361 = vtanh.f32 %v4976_v47  ;;  %v12836_v45 = vld [vmem:[#allocation8 + $0xd4] sm:$0xf]  ;;  %v11046_v47 = vld [vmem:[#allocation8 + $0x298] sm:$0xf0]  ;;  %v10974_v23 = vld [vmem:[#allocation8 + $0x208] sm:$0xf0] }
 0x36d   : > { %v4891_v48 = vpop.f32.mrf.mxu3  ;;  %vm4965_vm3 = vmor %vm4963_vm2, %vm4964_vm1  ;;  %v12872_v15 = vld [vmem:[#allocation8 + $0x1f4] sm:$0xf]  ;;  %v10732_v25 = vld [vmem:[#allocation8 + $0x10] sm:$0xf] }
 0x36e   : > { %v4960_v51 = vsub.f32 1.0, %v4959_v31  ;;  %v4951_v53 = vsel %vm4950_vm14, %v13356_v27, %v4947_v39  ;;  %v11044_v31 = vld [vmem:[#allocation8 + $0x280] sm:$0xf]  ;;  %v12893_v39 = vld [vmem:[#allocation8 + $0x294] sm:$0xf0]  ;;  %v10829_v48 = vor.u32 %v12839_v40, %v10828_v43 }
 0x36f   : > { %v4956_v56 = vsel %vm4953_vm15, %v4955_v46, %v4951_v53  ;;  %v12890_v46 = vld [vmem:[#allocation8 + $0x284] sm:$0xf]  ;;  %v10804_v53 = vld [vmem:[#allocation8 + $0xa0] sm:$0xf]  ;;  %v12812_v28 = vld [vmem:[#allocation8 + $0x14] sm:$0xf] }
 0x370   : > { %v4961_v58 = vmul.f32 %v13358_v38, %v4960_v51  ;;  %v4979_v50 = vsub.f32 1.0, %v4956_v56  ;;  %v4983_v2 = vmul.f32 %v13449_v1, %v4956_v56  ;;  %v10833_v51 = vor.u32 %v12836_v45, %v10830_v42  ;;  %v12830_v56 = vld [vmem:[#allocation8 + $0xa4] sm:$0xf]  ;;  %v11022_v1 = vld [vmem:[#allocation8 + $0x268] sm:$0xf0] }
 0x371   : > { %v11049_v36 = vor.u32 %v12890_v46, %v11046_v47  ;;  %v10734_v62 = vld [vmem:[#allocation8 + $0x28] sm:$0xf0]  ;;  %v12869_v33 = vld [vmem:[#allocation8 + $0x1d4] sm:$0xf0]  ;;  %v12866_v35 = vld [vmem:[#allocation8 + $0x1c4] sm:$0xf] }
 0x372   : > { %v4981_v63 = vmul.f32 %v13360_v49, %v4979_v50  ;;  %v4962_v34 = vadd.f32 %v13358_v38, %v4961_v58  ;;  %v13362_v20 = vpop.eup %13361  ;;  %v10806_v58 = vld [vmem:[#allocation8 + $0xb8] sm:$0xf0]  ;;  %v11045_v50 = vor.u32 %v12893_v39, %v11044_v31  ;;  %v11020_v49 = vld [vmem:[#allocation8 + $0x250] sm:$0xf]  ;;  %v12863_v45 = vld [vmem:[#allocation8 + $0x1a4] sm:$0xf0] }
 0x373   : > { %v10924_v40 = vld [vmem:[#allocation8 + $0x190] sm:$0xf]  ;;  %v12860_v42 = vld [vmem:[#allocation8 + $0x194] sm:$0xf] }
 0x374   : > { %v4985_v8 = vadd.f32 %v4983_v2, %v4981_v63  ;;  %v4966_v13 = vsel %vm4965_vm3, %v13358_v38, %v4962_v34  ;;  %v11073_v38 = vor.u32 %v12896_v52, %v11070_v37  ;;  %v12884_v63 = vld [vmem:[#allocation8 + $0x254] sm:$0xf]  ;;  %v10805_v2 = vor.u32 %v12833_v54, %v10804_v53  ;;  %v10950_v52 = vld [vmem:[#allocation8 + $0x1d8] sm:$0xf0] }
 0x375   : > { %v4971_v7 = vsel %vm4968_vm4, %v4970_v5, %v4966_v13  ;;  %v10809_v34 = vor.u32 %v12830_v56, %v10806_v58  ;;  %v10782_v5 = vld [vmem:[#allocation8 + $0x88] sm:$0xf0]  ;;  %v11025_v13 = vor.u32 %v12884_v63, %v11022_v1  ;;  %v10953_v43 = vor.u32 %v12866_v35, %v10950_v52  ;;  %v979_v46 = vld [vmem:[%s978_s26] ss:$8 sm:$0xf] }
 0x376   : > { %10712 = vst [vmem:[%s14101_s29 + $0x30] sm:$0xff] %v4985_v8  ;;  %v4980_v17 = vsub.f32 1.0, %v4971_v7  ;;  %v14579_v18 = vpack.c.bf16 %v4985_v8, %v4985_v8  ;;  %v4984_v10 = vmul.f32 %v13450_v30, %v4971_v7  ;;  %v11021_v8 = vor.u32 %v12887_v59, %v11020_v49  ;;  %v10996_v7 = vld [vmem:[#allocation8 + $0x220] sm:$0xf]  ;;  %v12990_v35 = vld [vmem:[#allocation8 + $0x2a4] sm:$0xf] }
 0x377   : > { %v980_v47 = vld [vmem:[%s978_s26] ss:$8 sm:$0x30]  ;;  %v11444_v52 = vld [vmem:[#allocation8 + $0x2b8] sm:$0xf0]  ;;  %s1185_s26 = sadd.s32 5, %s15364_s11 }
 0x378   : > { %v4982_v22 = vmul.f32 %v13362_v20, %v4980_v17  ;;  %5596 = vmatmul.bf16.vlgmr.msra.gmra.mxu0 %v14579_v18  ;;  %5622 = vmatmul.bf16.vlgmr.msra.gmra.mxu2 %v14579_v18  ;;  %v10785_v17 = vor.u32 %v12824_v4, %v10782_v5  ;;  %v12818_v20 = vld [vmem:[#allocation8 + $0x44] sm:$0xf]  ;;  %v1000_v53 = vld [vmem:[%s998_s17] ss:$8 sm:$0x30]  ;;  %s1234_s11 = sand.u32 7, %s15551_s27 }
 0x379   : > { %5692 = vmatpush.bf16.msra.mxu0 %v10901_v6  ;;  %5718 = vmatpush.bf16.msra.mxu2 %v10905_v16  ;;  %v12881_v6 = vld [vmem:[#allocation8 + $0x234] sm:$0xf0]  ;;  %v12878_v16 = vld [vmem:[#allocation8 + $0x224] sm:$0xf] }
 0x37a   : > { %v4986_v27 = vadd.f32 %v4984_v10, %v4982_v22  ;;  %v10997_v22 = vor.u32 %v12881_v6, %v10996_v7  ;;  %v11001_v30 = vor.u32 %v12878_v16, %v10998_v61  ;;  %v10972_v10 = vld [vmem:[#allocation8 + $0x1f0] sm:$0xf]  ;;  %v1020_v58 = vld [vmem:[%s1018_s9] ss:$8 sm:$0x30] }
 0x37b   : > { %v10973_v60 = vor.u32 %v12875_v0, %v10972_v10  ;;  %v1019_v56 = vld [vmem:[%s1018_s9] ss:$8 sm:$0xf]  ;;  %v12948_v16 = vld [vmem:[#allocation8 + $0x154] sm:$0xf]  ;;  %s1134_s9 = sand.u32 7, %s15535_s24 }
 0x37c   : > { %10713 = vst [vmem:[%s14101_s29 + $0x38] sm:$0xff] %v4986_v27  ;;  %v14585_v14 = vpack.c.bf16 %v4986_v27, %v4986_v27  ;;  %v12815_v27 = vld [vmem:[#allocation8 + $0x24] sm:$0xf0]  ;;  %v11276_v61 = vld [vmem:[#allocation8 + $0x168] sm:$0xf0] }
 0x37d   : > { %5693 = vmatpush.bf16.msra.mxu0 %v10877_v24  ;;  %5719 = vmatpush.bf16.msra.mxu2 %v10881_v9  ;;  %v10757_v24 = vor.u32 %v12821_v19, %v10756_v26  ;;  %v10761_v9 = vor.u32 %v12818_v20, %v10758_v21  ;;  %v10733_v37 = vor.u32 %v12815_v27, %v10732_v25  ;;  %v1040_v49 = vld [vmem:[%s1038_s13] ss:$8 sm:$0x30]  ;;  %v12945_v26 = vld [vmem:[#allocation8 + $0x134] sm:$0xf0] }
 0x37e   : > { %5609 = vmatmul.bf16.vlgmr.msra.gmra.mxu1 %v14585_v14  ;;  %5635 = vmatmul.bf16.vlgmr.msra.gmra.mxu3 %v14585_v14  ;;  %v1059_v59 = vld [vmem:[%s1058_s15] ss:$8 sm:$0xf]  ;;  %v12942_v20 = vld [vmem:[#allocation8 + $0x124] sm:$0xf] }
 0x37f   : > { %5705 = vmatpush.bf16.msra.mxu1 %v11093_v29  ;;  %5731 = vmatpush.bf16.msra.mxu3 %v11097_v32  ;;  %v10977_v29 = vor.u32 %v12872_v15, %v10974_v23  ;;  %v10948_v32 = vld [vmem:[#allocation8 + $0x1c0] sm:$0xf]  ;;  %v12951_v7 = vld [vmem:[#allocation8 + $0x164] sm:$0xf0]  ;;  %v11252_v21 = vld [vmem:[#allocation8 + $0x138] sm:$0xf0] }
 0x380   : > { %v1060_v1 = vld [vmem:[%s1058_s15] ss:$8 sm:$0x30]  ;;  %v12996_v0 = vld [vmem:[#allocation8 + $0x2d4] sm:$0xf]  ;;  %s14761_s15 = sld [smem:[#allocation4 + %s1185_s26]] }
 0x381   : > { %5694 = vmatpush.bf16.msra.mxu0 %v10853_v55  ;;  %5720 = vmatpush.bf16.msra.mxu2 %v10857_v41  ;;  %v10737_v55 = vor.u32 %v12812_v28, %v10734_v62  ;;  %v10949_v41 = vor.u32 %v12869_v33, %v10948_v32  ;;  %v1080_v57 = vld [vmem:[%s1078_s19] ss:$8 sm:$0x30]  ;;  %v11468_v15 = vld [vmem:[#allocation8 + $0x2e8] sm:$0xf0] }
 0x382   : > { %v1099_v4 = vld [vmem:[%s1098_s5] ss:$8 sm:$0xf]  ;;  %v12936_v27 = vld [vmem:[#allocation8 + $0xf4] sm:$0xf] }
 0x383   : > { %5706 = vmatpush.bf16.msra.mxu1 %v11069_v12  ;;  %5732 = vmatpush.bf16.msra.mxu3 %v11073_v38  ;;  %v10926_v12 = vld [vmem:[#allocation8 + $0x1a8] sm:$0xf0]  ;;  %v10925_v38 = vor.u32 %v12863_v45, %v10924_v40  ;;  %v1100_v5 = vld [vmem:[%s1098_s5] ss:$8 sm:$0x30]  ;;  %s1148_s5 = scalar_select %p1147_p1, %s1146_s1, 0 }
 0x384   : > { %v10929_v31 = vor.u32 %v12860_v42, %v10926_v12  ;;  %v12999_v10 = vld [vmem:[#allocation8 + $0x2e4] sm:$0xf0]  ;;  %v11228_v62 = vld [vmem:[#allocation8 + $0x108] sm:$0xf0]  ;;  %v11204_v40 = vld [vmem:[#allocation8 + $0xd8] sm:$0xf0] }
 0x385   : > { %5695 = vmatpush.bf16.msra.mxu0 %v10829_v48  ;;  %5721 = vmatpush.bf16.msra.mxu2 %v10833_v51  ;;  %v981_v48 = vor.u32 %v980_v47, %v979_v46  ;;  %v999_v51 = vld [vmem:[%s998_s17] ss:$8 sm:$0xf]  ;;  %v11231_v32 = vor.u32 %v12936_v27, %v11228_v62  ;;  %s9017_s17 = smul.u32 48, %s1111_s16  ;;  %s15537_s5 = smov (!%p9024_p6, %s1148_s5), 63 }
 0x386   : > { %v1001_v54 = vor.u32 %v1000_v53, %v999_v51  ;;  %v12939_v25 = vld [vmem:[#allocation8 + $0x104] sm:$0xf0]  ;;  %v11418_v12 = vld [vmem:[#allocation8 + $0x270] sm:$0xf]  ;;  %v12924_v51 = vld [vmem:[#allocation8 + $0x94] sm:$0xf] }
 0x387   : > { %5707 = vmatpush.bf16.msra.mxu1 %v11045_v50  ;;  %5733 = vmatpush.bf16.msra.mxu3 %v11049_v36  ;;  %983 = vst.msk [vmem:[#allocation2 + $0xc1] ss:$8 sm:$0xf] %vm13960_vm0, %v981_v48  ;;  %v1021_v50 = vor.u32 %v1020_v58, %v1019_v56  ;;  %v1039_v36 = vld [vmem:[%s1038_s13] ss:$8 sm:$0xf]  ;;  %s14768_s7 = sadd.s32 %s9017_s17, %s1114_s2 }
 0x388   : > { %5648 = vmatmul.bf16.vlgmr.msrb.gmra.mxu0 %v14579_v18  ;;  %5674 = vmatmul.bf16.vlgmr.msrb.gmra.mxu2 %v14579_v18  ;;  %1003 = vst.msk [vmem:[#allocation2 + $0xc2] ss:$8 sm:$0xf] %vm13960_vm0, %v1001_v54  ;;  %v1041_v63 = vor.u32 %v1040_v49, %v1039_v36  ;;  %v11180_v53 = vld [vmem:[#allocation8 + $0xa8] sm:$0xf0]  ;;  %p1187_p2 = scmp.gt.s32.totalorder %s14761_s15, 0 }
 0x389   : > { %5696 = vmatpush.bf16.msra.mxu0 %v10805_v2  ;;  %5722 = vmatpush.bf16.msra.mxu2 %v10809_v34  ;;  %1023 = vst.msk [vmem:[#allocation2 + $0xc3] ss:$8 sm:$0xf] %vm13960_vm0, %v1021_v50  ;;  %v1061_v2 = vor.u32 %v1060_v1, %v1059_v59  ;;  %v1079_v34 = vld [vmem:[%s1078_s19] ss:$8 sm:$0xf]  ;;  %v11183_v36 = vor.u32 %v12924_v51, %v11180_v53 }
 0x38a   : > { %1043 = vst.msk [vmem:[#allocation2 + $0xc4] ss:$8 sm:$0xf] %vm13960_vm0, %v1041_v63  ;;  %v1081_v3 = vor.u32 %v1080_v57, %v1079_v34  ;;  %v11394_v56 = vld [vmem:[#allocation8 + $0x240] sm:$0xf]  ;;  %s1205_s19 = sadd.s32 5, %s15365_s28 }
 0x38b   : > { %5708 = vmatpush.bf16.msra.mxu1 %v11021_v8  ;;  %5734 = vmatpush.bf16.msra.mxu3 %v11025_v13  ;;  %1063 = vst.msk [vmem:[#allocation2 + $0xc5] ss:$8 sm:$0xf] %vm13960_vm0, %v1061_v2  ;;  %v1101_v8 = vor.u32 %v1100_v5, %v1099_v4  ;;  %v11274_v13 = vld [vmem:[#allocation8 + $0x150] sm:$0xf]  ;;  %s1206_s22 = sld [smem:[#allocation4 + %s1205_s19]] }
 0x38c   : > { %1083 = vst.msk [vmem:[#allocation2 + $0xc6] ss:$8 sm:$0xf] %vm13960_vm0, %v1081_v3  ;;  %v11275_v6 = vor.u32 %v12951_v7, %v11274_v13  ;;  %v12981_v58 = vld [vmem:[#allocation8 + $0x254] sm:$0xf0]  ;;  %s1151_s23 = sshra.s32 %s15537_s5, 3 }
 0x38d   : > { %5697 = vmatpush.bf16.msra.mxu0 %v10781_v11  ;;  %5723 = vmatpush.bf16.msra.mxu2 %v10785_v17  ;;  %1103 = vst.msk [vmem:[#allocation2 + $0xc7] ss:$8 sm:$0xf] %vm13960_vm0, %v1101_v8  ;;  %v11279_v11 = vor.u32 %v12948_v16, %v11276_v61  ;;  %v11250_v17 = vld [vmem:[#allocation8 + $0x120] sm:$0xf]  ;;  %p9036_p8 = scmp.lt.s32.totalorder %s14761_s15, 63 }
 0x38e   : > { %5661 = vmatmul.bf16.vlgmr.msrb.gmra.mxu1 %v14585_v14  ;;  %5687 = vmatmul.bf16.vlgmr.msrb.gmra.mxu3 %v14585_v14  ;;  %984 = vst.msk [vmem:[#allocation2 + $0xc1] ss:$8 sm:$0x30] %vm13960_vm0, %v981_v48  ;;  %v11251_v19 = vor.u32 %v12945_v26, %v11250_v17  ;;  %v12927_v48 = vld [vmem:[#allocation8 + $0xa4] sm:$0xf0]  ;;  %s1171_s1 = sshra.s32 %s15539_s25, 3 }
 0x38f   : > { %5709 = vmatpush.bf16.msra.mxu1 %v10997_v22  ;;  %5735 = vmatpush.bf16.msra.mxu3 %v11001_v30  ;;  %1004 = vst.msk [vmem:[#allocation2 + $0xc2] ss:$8 sm:$0x30] %vm13960_vm0, %v1001_v54  ;;  %v11255_v22 = vor.u32 %v12942_v20, %v11252_v21  ;;  %v11466_v30 = vld [vmem:[#allocation8 + $0x2d0] sm:$0xf]  ;;  %s15541_s15 = smov (!%p1187_p2, %s14761_s15), 0 }
 0x390   : > { %1024 = vst.msk [vmem:[#allocation2 + $0xc3] ss:$8 sm:$0x30] %vm13960_vm0, %v1021_v50  ;;  %v11467_v23 = vor.u32 %v12999_v10, %v11466_v30  ;;  %v12978_v50 = vld [vmem:[#allocation8 + $0x244] sm:$0xf]  ;;  %s15547_s15 = smov (!%p9036_p8, %s15541_s15), 63 }
 0x391   : > { %5698 = vmatpush.bf16.msra.mxu0 %v10757_v24  ;;  %5724 = vmatpush.bf16.msra.mxu2 %v10761_v9  ;;  %1044 = vst.msk [vmem:[#allocation2 + $0xc4] ss:$8 sm:$0x30] %vm13960_vm0, %v1041_v63  ;;  %v11471_v24 = vor.u32 %v12996_v0, %v11468_v15  ;;  %v11226_v9 = vld [vmem:[#allocation8 + $0xf0] sm:$0xf]  ;;  %p1207_p9 = scmp.gt.s32.totalorder %s1206_s22, 0 }
 0x392   : > { %1064 = vst.msk [vmem:[#allocation2 + $0xc5] ss:$8 sm:$0x30] %vm13960_vm0, %v1061_v2  ;;  %v11227_v28 = vor.u32 %v12939_v25, %v11226_v9  ;;  %v11396_v49 = vld [vmem:[#allocation8 + $0x258] sm:$0xf0]  ;;  %p9042_p11 = scmp.lt.s32.totalorder %s1206_s22, 63 }
 0x393   : > { %5710 = vmatpush.bf16.msra.mxu1 %v10973_v60  ;;  %5736 = vmatpush.bf16.msra.mxu3 %v10977_v29  ;;  %1084 = vst.msk [vmem:[#allocation2 + $0xc6] ss:$8 sm:$0x30] %vm13960_vm0, %v1081_v3  ;;  %v11442_v60 = vld [vmem:[#allocation8 + $0x2a0] sm:$0xf]  ;;  %v11395_v3 = vor.u32 %v12981_v58, %v11394_v56  ;;  %v11399_v4 = vor.u32 %v12978_v50, %v11396_v49  ;;  %s15543_s22 = smov (!%p1207_p9, %s1206_s22), 0 }
 0x394   : > { %1104 = vst.msk [vmem:[#allocation2 + $0xc7] ss:$8 sm:$0x30] %vm13960_vm0, %v1101_v8  ;;  %v12993_v29 = vld [vmem:[#allocation8 + $0x2b4] sm:$0xf0]  ;;  %s15549_s22 = smov (!%p9042_p11, %s15543_s22), 63 }
 0x395   : > { %5699 = vmatpush.bf16.msra.mxu0 %v10733_v37  ;;  %5725 = vmatpush.bf16.msra.mxu2 %v10737_v55  ;;  %v11443_v33 = vor.u32 %v12993_v29, %v11442_v60  ;;  %v11202_v37 = vld [vmem:[#allocation8 + $0xc0] sm:$0xf]  ;;  %v11447_v55 = vor.u32 %v12990_v35, %v11444_v52  ;;  %v12921_v63 = vld [vmem:[#allocation8 + $0x74] sm:$0xf0]  ;;  %v12918_v1 = vld [vmem:[#allocation8 + $0x64] sm:$0xf] }
 0x396   : > { %v11154_v59 = vld [vmem:[#allocation8 + $0x60] sm:$0xf]  ;;  %v11156_v2 = vld [vmem:[#allocation8 + $0x78] sm:$0xf0]  ;;  %v11370_v5 = vld [vmem:[#allocation8 + $0x210] sm:$0xf] }
 0x397   : > { %5711 = vmatpush.bf16.msra.mxu1 %v10949_v41  ;;  %5737 = vmatpush.bf16.msra.mxu3 %v10953_v43  ;;  %v12933_v41 = vld [vmem:[#allocation8 + $0xd4] sm:$0xf0]  ;;  %v12930_v43 = vld [vmem:[#allocation8 + $0xc4] sm:$0xf]  ;;  %v11155_v8 = vor.u32 %v12921_v63, %v11154_v59  ;;  %v12975_v13 = vld [vmem:[#allocation8 + $0x224] sm:$0xf0]  ;;  %v11159_v16 = vor.u32 %v12918_v1, %v11156_v2 }
 0x398   : > { %5700 = vmatmul.bf16.vlgmr.msra.gmra.mxu0 %v14579_v18  ;;  %5726 = vmatmul.bf16.vlgmr.msra.gmra.mxu2 %v14579_v18  ;;  %v959_v18 = vld [vmem:[%s958_s18] ss:$8 sm:$0xf]  ;;  %v11203_v45 = vor.u32 %v12933_v41, %v11202_v37  ;;  %v11207_v42 = vor.u32 %v12930_v43, %v11204_v40  ;;  %v12972_v7 = vld [vmem:[#allocation8 + $0x214] sm:$0xf]  ;;  %v11371_v21 = vor.u32 %v12975_v13, %v11370_v5  ;;  %s1154_s16 = sand.u32 7, %s15537_s5 }
 0x399   : > { %6439 = vmatpush.bf16.msrb.mxu0 %v11275_v6  ;;  %6465 = vmatpush.bf16.msrb.mxu2 %v11279_v11  ;;  %v11372_v6 = vld [vmem:[#allocation8 + $0x228] sm:$0xf0]  ;;  %v11130_v61 = vld [vmem:[#allocation8 + $0x30] sm:$0xf]  ;;  %v12915_v11 = vld [vmem:[#allocation8 + $0x44] sm:$0xf0] }
 0x39a   : > { %v12912_v17 = vld [vmem:[#allocation8 + $0x34] sm:$0xf]  ;;  %v11132_v26 = vld [vmem:[#allocation8 + $0x48] sm:$0xf0]  ;;  %v11346_v30 = vld [vmem:[#allocation8 + $0x1e0] sm:$0xf]  ;;  %v11131_v0 = vor.u32 %v12915_v11, %v11130_v61 }
 0x39b   : > { %5712 = vmatpush.bf16.msra.mxu1 %v10925_v38  ;;  %5738 = vmatpush.bf16.msra.mxu3 %v10929_v31  ;;  %v12987_v38 = vld [vmem:[#allocation8 + $0x284] sm:$0xf0]  ;;  %v12984_v31 = vld [vmem:[#allocation8 + $0x274] sm:$0xf]  ;;  %v12969_v15 = vld [vmem:[#allocation8 + $0x1f4] sm:$0xf0]  ;;  %v11135_v27 = vor.u32 %v12912_v17, %v11132_v26 }
 0x39c   : > { %v11419_v46 = vor.u32 %v12987_v38, %v11418_v12  ;;  %v12909_v62 = vld [vmem:[#allocation8 + $0x14] sm:$0xf0]  ;;  %v12906_v60 = vld [vmem:[#allocation8 + $0x4] sm:$0xf]  ;;  %v12952_v35 = vld [vmem:[#allocation8 + $0x16c] sm:$0xf0]  ;;  %v11347_v37 = vor.u32 %v12969_v15, %v11346_v30 }
 0x39d   : > { %6440 = vmatpush.bf16.msrb.mxu0 %v11251_v19  ;;  %6466 = vmatpush.bf16.msrb.mxu2 %v11255_v22  ;;  %v11375_v22 = vor.u32 %v12972_v7, %v11372_v6  ;;  %v12949_v41 = vld [vmem:[#allocation8 + $0x15c] sm:$0xf]  ;;  %v11284_v43 = vld [vmem:[#allocation8 + $0x170] sm:$0xf0]  ;;  %v11322_v40 = vld [vmem:[#allocation8 + $0x1b0] sm:$0xf] }
 0x39e   : > { %5713 = vmatmul.bf16.vlgmr.msra.gmra.mxu1 %v14585_v14  ;;  %5739 = vmatmul.bf16.vlgmr.msra.gmra.mxu3 %v14585_v14  ;;  %v960_v14 = vld [vmem:[%s958_s18] ss:$8 sm:$0x30]  ;;  %v12960_v38 = vld [vmem:[#allocation8 + $0x1b4] sm:$0xf]  ;;  %v11287_v53 = vor.u32 %v12949_v41, %v11284_v43  ;;  %s1131_s18 = sshra.s32 %s15535_s24, 3 }
 0x39f   : > { %v961_v39 = vor.u32 %v960_v14, %v959_v18  ;;  %6452 = vmatpush.bf16.msrb.mxu1 %v11467_v23  ;;  %6478 = vmatpush.bf16.msrb.mxu3 %v11471_v24  ;;  %v14668_v18 = vld [vmem:[%s15235_s3] sm:$0x3f]  ;;  %v11420_v14 = vld [vmem:[#allocation8 + $0x288] sm:$0xf0]  ;;  %v11348_v24 = vld [vmem:[#allocation8 + $0x1f8] sm:$0xf0] }
 0x3a0   : > { %v11423_v47 = vor.u32 %v12984_v31, %v11420_v14  ;;  %v5096_v34 = vperm.slane %v14668_v18, 0  ;;  %v5097_v20 = vperm.slane %v14668_v18, 1  ;;  %v12966_v23 = vld [vmem:[#allocation8 + $0x1e4] sm:$0xf]  ;;  %v12963_v12 = vld [vmem:[#allocation8 + $0x1c4] sm:$0xf0] }
 0x3a1   : > { %963 = vst.msk [vmem:[#allocation2 + $0xc0] ss:$8 sm:$0xf] %vm13960_vm0, %v961_v39  ;;  %6441 = vmatpush.bf16.msrb.mxu0 %v11227_v28  ;;  %6467 = vmatpush.bf16.msrb.mxu2 %v11231_v32  ;;  %v11106_v28 = vld [vmem:[#allocation8] sm:$0xf]  ;;  %v11323_v50 = vor.u32 %v12963_v12, %v11322_v40  ;;  %v5098_v30 = vperm.slane %v14668_v18, 2 }
 0x3a2   : > { %964 = vst.msk [vmem:[#allocation2 + $0xc0] ss:$8 sm:$0x30] %vm13960_vm0, %v961_v39  ;;  %v11178_v39 = vld [vmem:[#allocation8 + $0x90] sm:$0xf]  ;;  %s9023_s13 = smul.u32 48, %s1131_s18 }
 0x3a3   : > { %6453 = vmatpush.bf16.msrb.mxu1 %v11443_v33  ;;  %6479 = vmatpush.bf16.msrb.mxu3 %v11447_v55  ;;  %v11179_v54 = vor.u32 %v12927_v48, %v11178_v39  ;;  %v11108_v32 = vld [vmem:[#allocation8 + $0x18] sm:$0xf0]  ;;  %v11282_v33 = vld [vmem:[#allocation8 + $0x158] sm:$0xf]  ;;  %v11351_v55 = vor.u32 %v12966_v23, %v11348_v24  ;;  %v11324_v31 = vld [vmem:[#allocation8 + $0x1c8] sm:$0xf0] }
 0x3a4   : > { %v11111_v39 = vor.u32 %v12906_v60, %v11108_v32  ;;  %v12943_v56 = vld [vmem:[#allocation8 + $0x12c] sm:$0xf]  ;;  %v11260_v49 = vld [vmem:[#allocation8 + $0x140] sm:$0xf0]  ;;  %v11298_v59 = vld [vmem:[#allocation8 + $0x180] sm:$0xf]  ;;  %s14770_s24 = sadd.s32 %s9023_s13, %s1134_s9 }
 0x3a5   : > { %6442 = vmatpush.bf16.msrb.mxu0 %v11203_v45  ;;  %6468 = vmatpush.bf16.msrb.mxu2 %v11207_v42  ;;  %v11107_v42 = vor.u32 %v12909_v62, %v11106_v28  ;;  %v12957_v63 = vld [vmem:[#allocation8 + $0x194] sm:$0xf0]  ;;  %v12954_v2 = vld [vmem:[#allocation8 + $0x184] sm:$0xf]  ;;  %v12997_v13 = vld [vmem:[#allocation8 + $0x2dc] sm:$0xf] }
 0x3a6   : > { %v11476_v7 = vld [vmem:[#allocation8 + $0x2f0] sm:$0xf0]  ;;  %v11234_v61 = vld [vmem:[#allocation8 + $0xf8] sm:$0xf]  ;;  %v12940_v11 = vld [vmem:[#allocation8 + $0x10c] sm:$0xf0]  ;;  %v11299_v26 = vor.u32 %v12957_v63, %v11298_v59 }
 0x3a7   : > { %6454 = vmatpush.bf16.msrb.mxu1 %v11419_v46  ;;  %6480 = vmatpush.bf16.msrb.mxu3 %v11423_v47  ;;  %v11283_v46 = vor.u32 %v12952_v35, %v11282_v33  ;;  %v11258_v47 = vld [vmem:[#allocation8 + $0x128] sm:$0xf]  ;;  %v11235_v23 = vor.u32 %v12940_v11, %v11234_v61  ;;  %v12994_v24 = vld [vmem:[#allocation8 + $0x2bc] sm:$0xf0]  ;;  %v12931_v33 = vld [vmem:[#allocation8 + $0xcc] sm:$0xf] }
 0x3a8   : > { %v4990_v19 = vld [vmem:[#allocation2 + $0xc0] sm:$0xff]  ;;  %v4991_v14 = vld [vmem:[#allocation2 + $0xc8] sm:$0xff]  ;;  %v11426_v43 = vld [vmem:[#allocation8 + $0x278] sm:$0xf]  ;;  %s1191_s2 = sshra.s32 %s15547_s15, 3  ;;  %s9029_s18 = smul.u32 48, %s1151_s23 }
 0x3a9   : > { %6443 = vmatpush.bf16.msrb.mxu0 %v11179_v54  ;;  %6469 = vmatpush.bf16.msrb.mxu2 %v11183_v36  ;;  %v12946_v54 = vld [vmem:[#allocation8 + $0x13c] sm:$0xf0]  ;;  %v11327_v36 = vor.u32 %v12960_v38, %v11324_v31  ;;  %v11450_v15 = vld [vmem:[#allocation8 + $0x2a8] sm:$0xf]  ;;  %v11212_v35 = vld [vmem:[#allocation8 + $0xe0] sm:$0xf0] }
 0x3aa   : > { %v11259_v5 = vor.u32 %v12946_v54, %v11258_v47  ;;  %v11210_v62 = vld [vmem:[#allocation8 + $0xc8] sm:$0xf]  ;;  %v12934_v60 = vld [vmem:[#allocation8 + $0xdc] sm:$0xf0]  ;;  %v12988_v12 = vld [vmem:[#allocation8 + $0x28c] sm:$0xf0]  ;;  %s1157_s6 = sadd.s32 %s9029_s18, %s1154_s16 }
 0x3ab   : > { %6455 = vmatpush.bf16.msrb.mxu1 %v11395_v3  ;;  %6481 = vmatpush.bf16.msrb.mxu3 %v11399_v4  ;;  %v12985_v38 = vld [vmem:[#allocation8 + $0x27c] sm:$0xf]  ;;  %v11428_v31 = vld [vmem:[#allocation8 + $0x290] sm:$0xf0]  ;;  %v11186_v47 = vld [vmem:[#allocation8 + $0x98] sm:$0xf] }
 0x3ac   : > { %v11188_v54 = vld [vmem:[#allocation8 + $0xb0] sm:$0xf0]  ;;  %v12982_v59 = vld [vmem:[#allocation8 + $0x25c] sm:$0xf0]  ;;  %v12919_v11 = vld [vmem:[#allocation8 + $0x6c] sm:$0xf] }
 0x3ad   : > { %6444 = vmatpush.bf16.msrb.mxu0 %v11155_v8  ;;  %6470 = vmatpush.bf16.msrb.mxu2 %v11159_v16  ;;  %v13000_v8 = vld [vmem:[#allocation8 + $0x2ec] sm:$0xf0]  ;;  %v11263_v16 = vor.u32 %v12943_v56, %v11260_v49  ;;  %v11402_v49 = vld [vmem:[#allocation8 + $0x248] sm:$0xf]  ;;  %s1211_s26 = sshra.s32 %s15549_s22, 3  ;;  %s9035_s17 = smul.u32 48, %s1171_s1 }
 0x3ae   : > { %v11403_v61 = vor.u32 %v12982_v59, %v11402_v49  ;;  %s1231_s9 = sshra.s32 %s15551_s27, 3  ;;  %s9041_s13 = smul.u32 48, %s1191_s2 }
 0x3af   : > { %6456 = vmatpush.bf16.msrb.mxu1 %v11371_v21  ;;  %6482 = vmatpush.bf16.msrb.mxu3 %v11375_v22  ;;  %v11236_v21 = vld [vmem:[#allocation8 + $0x110] sm:$0xf0]  ;;  %s1251_s19 = sshra.s32 %s15553_s30, 3  ;;  %s9047_s12 = smul.u32 48, %s1211_s26 }
 0x3b0   : > { %s1194_s14 = sand.u32 7, %s15547_s15  ;;  %s9053_s4 = smul.u32 48, %s1231_s9 }
 0x3b1   : > { %6445 = vmatpush.bf16.msrb.mxu0 %v11131_v0  ;;  %6471 = vmatpush.bf16.msrb.mxu2 %v11135_v27  ;;  %v11479_v0 = vor.u32 %v12997_v13, %v11476_v7  ;;  %v12922_v13 = vld [vmem:[#allocation8 + $0x7c] sm:$0xf0]  ;;  %s1214_s8 = sand.u32 7, %s15549_s22  ;;  %s9059_s28 = smul.u32 48, %s1251_s19 }
 0x3b2   : > { %s1177_s10 = sadd.s32 %s9035_s17, %s1174_s21  ;;  %s1197_s5 = sadd.s32 %s9041_s13, %s1194_s14 }
 0x3b3   : > { %6457 = vmatpush.bf16.msrb.mxu1 %v11347_v37  ;;  %6483 = vmatpush.bf16.msrb.mxu3 %v11351_v55  ;;  %v4992_v37 = vld [vmem:[#allocation2 + $0xd0] sm:$0xff]  ;;  %v11451_v55 = vor.u32 %v12994_v24, %v11450_v15  ;;  %v12973_v15 = vld [vmem:[#allocation8 + $0x21c] sm:$0xf]  ;;  %s14781_s20 = sadd.s32 %s9047_s12, %s1214_s8  ;;  %s14783_s23 = sadd.s32 %s9053_s4, %s1234_s11 }
 0x3b4   : > { %s14785_s1 = sadd.s32 %s9059_s28, %s1254_s0  ;;  %s1118_s2 = scalar_lea.vmem [#allocation5], %s14768_s7 }
 0x3b5   : > { %6446 = vmatpush.bf16.msrb.mxu0 %v11107_v42  ;;  %6472 = vmatpush.bf16.msrb.mxu2 %v11111_v39  ;;  %v11211_v42 = vor.u32 %v12934_v60, %v11210_v62  ;;  %v5099_v39 = vperm.slane %v14668_v18, 3  ;;  %v5100_v62 = vperm.slane %v14668_v18, 4  ;;  %s1138_s15 = scalar_lea.vmem [#allocation5], %s14770_s24  ;;  %s1158_s25 = scalar_lea.vmem [#allocation5], %s1157_s6 }
 0x3b6   : > { %s1178_s11 = scalar_lea.vmem [#allocation5], %s1177_s10  ;;  %s1198_s0 = scalar_lea.vmem [#allocation5], %s1197_s5 }
 0x3b7   : > { %6458 = vmatpush.bf16.msrb.mxu1 %v11323_v50  ;;  %6484 = vmatpush.bf16.msrb.mxu3 %v11327_v36  ;;  %v11427_v50 = vor.u32 %v12988_v12, %v11426_v43  ;;  %v11431_v36 = vor.u32 %v12985_v38, %v11428_v31  ;;  %v11354_v43 = vld [vmem:[#allocation8 + $0x1e8] sm:$0xf]  ;;  %v12967_v12 = vld [vmem:[#allocation8 + $0x1ec] sm:$0xf]  ;;  %v11356_v38 = vld [vmem:[#allocation8 + $0x200] sm:$0xf0] }
 0x3b8   : > { %v11359_v59 = vor.u32 %v12967_v12, %v11356_v38  ;;  %v4995_v38 = vld [vmem:[#allocation2 + $0xe8] sm:$0xff]  ;;  %s1218_s6 = scalar_lea.vmem [#allocation5], %s14781_s20  ;;  %s1238_s10 = scalar_lea.vmem [#allocation5], %s14783_s23 }
 0x3b9   : > { %6491 = vmatpush.bf16.msra.mxu0 %v11283_v46  ;;  %6517 = vmatpush.bf16.msra.mxu2 %v11287_v53  ;;  %v11215_v46 = vor.u32 %v12931_v33, %v11212_v35  ;;  %v12925_v53 = vld [vmem:[#allocation8 + $0x9c] sm:$0xf]  ;;  %v11140_v35 = vld [vmem:[#allocation8 + $0x50] sm:$0xf0]  ;;  %s1258_s28 = scalar_lea.vmem [#allocation5], %s14785_s1  ;;  %s15372_s14 = sld [smem:[#allocation30_spill]] }
 0x3ba   : > { %v12913_v33 = vld [vmem:[#allocation8 + $0x3c] sm:$0xf]  ;;  %s15373_s22 = sld [smem:[#allocation31_spill]] }
 0x3bb   : > { %6459 = vmatpush.bf16.msrb.mxu1 %v11299_v26  ;;  %s15374_s24 = sld [smem:[#allocation32_spill]] }
 0x3bc   : > { %s15375_s18 = sld [smem:[#allocation33_spill]] }
 0x3bd   : > { %6492 = vmatpush.bf16.msra.mxu0 %v11259_v5  ;;  %6518 = vmatpush.bf16.msra.mxu2 %v11263_v16  ;;  %v11191_v5 = vor.u32 %v12925_v53, %v11188_v54  ;;  %v12907_v54 = vld [vmem:[#allocation8 + $0xc] sm:$0xf]  ;;  %s15376_s26 = sld [smem:[#allocation34_spill]] }
 0x3be   : > { %s15377_s13 = sld [smem:[#allocation35_spill]] }
 0x3bf   : > { %s1265_s7 = sadd.s32 6, %s15372_s14  ;;  %s15378_s12 = sld [smem:[#allocation36_spill]] }
 0x3c0   : > { %s1285_s30 = sadd.s32 6, %s15373_s22  ;;  %s1266_s27 = sld [smem:[#allocation4 + %s1265_s7]] }
 0x3c1   : > { %6493 = vmatpush.bf16.msra.mxu0 %v11235_v23  ;;  %v11380_v23 = vld [vmem:[#allocation8 + $0x230] sm:$0xf0]  ;;  %s1286_s16 = sld [smem:[#allocation4 + %s1285_s30]]  ;;  %s1305_s17 = sadd.s32 6, %s15374_s24 }
 0x3c2   : > { %s1325_s19 = sadd.s32 6, %s15375_s18  ;;  %s1306_s21 = sld [smem:[#allocation4 + %s1305_s17]] }
 0x3c3   : > { %s1326_s4 = sld [smem:[#allocation4 + %s1325_s19]] }
 0x3c4   : > { %s15379_s23 = sld [smem:[#allocation37_spill]] }
 0x3c5   : > { %6494 = vmatpush.bf16.msra.mxu0 %v11211_v42  ;;  %v12970_v42 = vld [vmem:[#allocation8 + $0x1fc] sm:$0xf0]  ;;  %s1385_s20 = sadd.s32 6, %s15378_s12 }
 0x3c6   : > { %v11355_v49 = vor.u32 %v12970_v42, %v11354_v43  ;;  %p1267_p1 = scmp.gt.s32.totalorder %s1266_s27, 0  ;;  %p9060_p6 = scmp.lt.s32.totalorder %s1266_s27, 63 }
 0x3c7   : > { %p1287_p4 = scmp.gt.s32.totalorder %s1286_s16, 0  ;;  %p9066_p13 = scmp.lt.s32.totalorder %s1286_s16, 63 }
 0x3c8   : > { %s15555_s27 = smov (!%p1267_p1, %s1266_s27), 0  ;;  %p1307_p2 = scmp.gt.s32.totalorder %s1306_s21, 0 }
 0x3c9   : > { %s1288_s9 = scalar_select %p1287_p4, %s1286_s16, 0 }
 0x3ca   : > { %s15557_s27 = smov (!%p9060_p6, %s15555_s27), 63  ;;  %p1327_p8 = scmp.gt.s32.totalorder %s1326_s4, 0 }
 0x3cb   : > { %s15559_s9 = smov (!%p9066_p13, %s1288_s9), 63  ;;  %s1271_s5 = sshra.s32 %s15557_s27, 3 }
 0x3cc   : > { %s1274_s1 = sand.u32 7, %s15557_s27  ;;  %p9072_p9 = scmp.lt.s32.totalorder %s1306_s21, 63 }
 0x3cd   : > { %s1328_s8 = scalar_select %p1327_p8, %s1326_s4, 0 }
 0x3ce   : > { %s1405_s30 = sadd.s32 6, %s15379_s23  ;;  %p9078_p10 = scmp.lt.s32.totalorder %s1326_s4, 63 }
 0x3cf   : > { %s1386_s27 = sld [smem:[#allocation4 + %s1385_s20]] }
 0x3d0   : > { %s1406_s17 = sld [smem:[#allocation4 + %s1405_s30]]  ;;  %s15563_s8 = smov (!%p9078_p10, %s1328_s8), 63 }
 0x3d1   : > { %s1334_s20 = sand.u32 7, %s15563_s8 }
 0x3d5   : > { %p1387_p5 = scmp.gt.s32.totalorder %s1386_s27, 0  ;;  %p9096_p6 = scmp.lt.s32.totalorder %s1386_s27, 63 }
 0x3d6   : > { %p1407_p4 = scmp.gt.s32.totalorder %s1406_s17, 0  ;;  %p9102_p13 = scmp.lt.s32.totalorder %s1406_s17, 63 }
 0x3d7   : > { %s1388_s4 = scalar_select %p1387_p5, %s1386_s27, 0 }
 0x3d8   : > { %s15569_s17 = smov (!%p1407_p4, %s1406_s17), 0 }
 0x3d9   : > { %s15575_s4 = smov (!%p9096_p6, %s1388_s4), 63  ;;  %s15577_s17 = smov (!%p9102_p13, %s15569_s17), 63 }
 0x3da   : > { %s1414_s18 = sand.u32 7, %s15577_s17 }
 0x3f5   : > { %v5597_v57 = vpop.f32.mrf.mxu0 }
 0x3f6   : > { %v5598_v10 = vadd.f32 %v5597_v57, %v5096_v34  ;;  %v11300_v34 = vld [vmem:[#allocation8 + $0x198] sm:$0xf0]  ;;  %v11474_v57 = vld [vmem:[#allocation8 + $0x2d8] sm:$0xf] }
 0x3fb   : > { %v5610_v9 = vpop.f32.mrf.mxu1  ;;  %v5623_v25 = vpop.f32.mrf.mxu2 }
 0x3fc   : > { %v5611_v29 = vadd.f32 %v5610_v9, %v5598_v10  ;;  %v5624_v51 = vadd.f32 %v5623_v25, %v5097_v20  ;;  %v12937_v20 = vld [vmem:[#allocation8 + $0xfc] sm:$0xf]  ;;  %v11475_v10 = vor.u32 %v13000_v8, %v11474_v57  ;;  %v12991_v9 = vld [vmem:[#allocation8 + $0x2ac] sm:$0xf]  ;;  %v11452_v25 = vld [vmem:[#allocation8 + $0x2c0] sm:$0xf0] }
 0x3fd   : > { %v5599_v52 = vpop.f32.mrf.mxu0  ;;  %v11239_v28 = vor.u32 %v12937_v20, %v11236_v21  ;;  %v11455_v41 = vor.u32 %v12991_v9, %v11452_v25  ;;  %v11404_v57 = vld [vmem:[#allocation8 + $0x260] sm:$0xf0]  ;;  %v11162_v8 = vld [vmem:[#allocation8 + $0x68] sm:$0xf]  ;;  %v11378_v21 = vld [vmem:[#allocation8 + $0x218] sm:$0xf] }
 0x3fe   : > { %v5744_v45 = vadd.f32 %v5611_v29, %v4990_v19  ;;  %v11303_v19 = vor.u32 %v12954_v2, %v11300_v34  ;;  %6504 = vmatpush.bf16.msra.mxu1 %v11475_v10  ;;  %v12979_v34 = vld [vmem:[#allocation8 + $0x24c] sm:$0xf]  ;;  %v11163_v10 = vor.u32 %v12922_v13, %v11162_v8  ;;  %v12961_v8 = vld [vmem:[#allocation8 + $0x1bc] sm:$0xf]  ;;  %v11332_v13 = vld [vmem:[#allocation8 + $0x1d0] sm:$0xf0] }
 0x3ff   : > { %6519 = vmatpush.bf16.msra.mxu2 %v11239_v28  ;;  %v11407_v20 = vor.u32 %v12979_v34, %v11404_v57  ;;  %v12916_v28 = vld [vmem:[#allocation8 + $0x4c] sm:$0xf0] }
 0x400   : > { %v11098_v48 = vmul.f32 -1.442695, %v5744_v45  ;;  %6485 = vmatpush.bf16.msrb.mxu3 %v11303_v19 }
 0x401   : > { %v5636_v58 = vpop.f32.mrf.mxu3 }
 0x402   : > { %13363 = vpow2.f32 %v11098_v48  ;;  %v5637_v1 = vadd.f32 %v5636_v58, %v5624_v51  ;;  %v12928_v48 = vld [vmem:[#allocation8 + $0xac] sm:$0xf0]  ;;  %6505 = vmatpush.bf16.msra.mxu1 %v11451_v55 }
 0x403   : > { %v5612_v3 = vpop.f32.mrf.mxu1  ;;  %v5625_v4 = vpop.f32.mrf.mxu2  ;;  %v11187_v2 = vor.u32 %v12928_v48, %v11186_v47  ;;  %6520 = vmatpush.bf16.msra.mxu2 %v11215_v46  ;;  %v11143_v46 = vor.u32 %v12913_v33, %v11140_v35  ;;  %v11114_v47 = vld [vmem:[#allocation8 + $0x8] sm:$0xf]  ;;  %v12910_v48 = vld [vmem:[#allocation8 + $0x1c] sm:$0xf0] }
 0x404   : > { %v5745_v6 = vadd.f32 %v5637_v1, %v4991_v14  ;;  %6530 = vmatpush.bf16.msra.mxu3 %v11479_v0  ;;  %v4993_v1 = vld [vmem:[#allocation2 + $0xd8] sm:$0xff]  ;;  %v12976_v0 = vld [vmem:[#allocation8 + $0x22c] sm:$0xf0] }
 0x405   : > { %v5649_v17 = vpop.f32.mrf.mxu0  ;;  %6495 = vmatpush.bf16.msra.mxu0 %v11187_v2  ;;  %v11379_v55 = vor.u32 %v12976_v0, %v11378_v21  ;;  %v12964_v2 = vld [vmem:[#allocation8 + $0x1cc] sm:$0xf0]  ;;  %v12958_v0 = vld [vmem:[#allocation8 + $0x19c] sm:$0xf0] }
 0x406   : > { %v11099_v22 = vmul.f32 -1.442695, %v5745_v6  ;;  %v5650_v52 = vadd.f32 %v5649_v17, %v5098_v30  ;;  %v11164_v17 = vld [vmem:[#allocation8 + $0x80] sm:$0xf0]  ;;  %6506 = vmatpush.bf16.msra.mxu1 %v11427_v50 }
 0x407   : > { %6521 = vmatpush.bf16.msra.mxu2 %v11191_v5  ;;  %v11167_v25 = vor.u32 %v12919_v11, %v11164_v17  ;;  %v11115_v5 = vor.u32 %v12910_v48, %v11114_v47 }
 0x408   : > { %v13364_v27 = vpop.eup %13363  ;;  %13365 = vpow2.f32 %v11099_v22  ;;  %6531 = vmatpush.bf16.msra.mxu3 %v11455_v41  ;;  %v11383_v41 = vor.u32 %v12973_v15, %v11380_v23  ;;  %v11308_v23 = vld [vmem:[#allocation8 + $0x1a0] sm:$0xf0] }
 0x409   : > { %v14673_v29 = vadd.f32 1.0, %v13364_v27  ;;  %v5638_v32 = vpop.f32.mrf.mxu3  ;;  %v11138_v27 = vld [vmem:[#allocation8 + $0x38] sm:$0xf]  ;;  %6496 = vmatpush.bf16.msra.mxu0 %v11163_v10  ;;  %v11306_v10 = vld [vmem:[#allocation8 + $0x188] sm:$0xf] }
 0x40a   : > { %6507 = vmatpush.bf16.msra.mxu1 %v11403_v61 }
 0x40b   : > { %13367 = vrcp.f32 %v14673_v29  ;;  %v5662_v40 = vpop.f32.mrf.mxu1  ;;  %v5675_v45 = vpop.f32.mrf.mxu2  ;;  %v5763_v16 = vand.u32 2147483647, %v14673_v29  ;;  %v5765_v32 = vand.u32 2147483648, %v14673_v29  ;;  %6522 = vmatpush.bf16.msra.mxu2 %v11167_v25  ;;  %vm5759_vm6 = vweird.f32 %v14673_v29  ;;  %v11242_v25 = vld [vmem:[#allocation8 + $0x100] sm:$0xf] }
 0x40c   : > { %v5663_v14 = vadd.f32 %v5662_v40, %v5650_v52  ;;  %v5676_v4 = vadd.f32 %v5675_v45, %v5099_v39  ;;  %6532 = vmatpush.bf16.msra.mxu3 %v11431_v36  ;;  %v11139_v45 = vor.u32 %v12916_v28, %v11138_v27 }
 0x40d   : > { %v5651_v51 = vpop.f32.mrf.mxu0  ;;  %v5766_v61 = vor.u32 1.1754944e-38, %v5765_v32  ;;  %vm5764_vm8 = vcmp.eq.f32.partialorder %v5763_v16, 8.507059e+37  ;;  %v12955_v16 = vld [vmem:[#allocation8 + $0x18c] sm:$0xf] }
 0x40e   : > { %v13366_v56 = vpop.eup %13365  ;;  %v5784_v58 = vadd.f32 %v5663_v14, %v4992_v37  ;;  %6508 = vmatpush.bf16.msra.mxu1 %v11379_v55  ;;  %6497 = vmatpush.bf16.msra.mxu0 %v11139_v45  ;;  %v11311_v35 = vor.u32 %v12955_v16, %v11308_v23  ;;  %v12998_v16 = vld [vmem:[#allocation8 + $0x2e4] sm:$0xf]  ;;  %v11484_v23 = vld [vmem:[#allocation8 + $0x2f8] sm:$0xf0] }
 0x40f   : > { %v14677_v63 = vadd.f32 1.0, %v13366_v56  ;;  %v11116_v56 = vld [vmem:[#allocation8 + $0x20] sm:$0xf0]  ;;  %6523 = vmatpush.bf16.msra.mxu2 %v11143_v46 }
 0x410   : > { %v11100_v3 = vmul.f32 -1.442695, %v5784_v58  ;;  %6533 = vmatpush.bf16.msra.mxu3 %v11407_v20  ;;  %v11119_v17 = vor.u32 %v12907_v54, %v11116_v56 }
 0x411   : > { %v14679_v7 = vpop.eup %13367  ;;  %13369 = vrcp.f32 %v14677_v63  ;;  %v5688_v6 = vpop.f32.mrf.mxu3  ;;  %vm5774_vm10 = vweird.f32 %v14677_v63 }
 0x412   : > { %13371 = vpow2.f32 %v11100_v3  ;;  %v5689_v26 = vadd.f32 %v5688_v6, %v5676_v4  ;;  %v5755_v19 = vmul.f32 %v14679_v7, %v14673_v29  ;;  %vm5760_vm5 = vweird.f32 %v14679_v7  ;;  %6509 = vmatpush.bf16.msra.mxu1 %v11355_v49  ;;  %6498 = vmatpush.bf16.msra.mxu0 %v11115_v5  ;;  %v11292_v5 = vld [vmem:[#allocation8 + $0x178] sm:$0xf0] }
 0x413   : > { %v5664_v22 = vpop.f32.mrf.mxu1  ;;  %v5677_v30 = vpop.f32.mrf.mxu2  ;;  %vm14699_vm7 = vmor %vm5759_vm6, %vm5760_vm5  ;;  %v5101_v3 = vperm.slane %v14668_v18, 5  ;;  %6524 = vmatpush.bf16.msra.mxu2 %v11119_v17 }
 0x414   : > { %v5785_v24 = vadd.f32 %v5689_v26, %v4993_v1  ;;  %v5756_v9 = vsub.f32 1.0, %v5755_v19  ;;  %6534 = vmatpush.bf16.msra.mxu3 %v11383_v41  ;;  %v11330_v1 = vld [vmem:[#allocation8 + $0x1b8] sm:$0xf]  ;;  %v5780_v22 = vand.u32 2147483648, %v14677_v63  ;;  %v11335_v30 = vor.u32 %v12961_v8, %v11332_v13 }
 0x415   : > { %v5701_v60 = vpop.f32.mrf.mxu0  ;;  %v11331_v18 = vor.u32 %v12964_v2, %v11330_v1  ;;  %v13451_v2 = vld [vmem:[%s14101_s29 + $0x30] sm:$0xff] }
 0x416   : > { %v11101_v52 = vmul.f32 -1.442695, %v5785_v24  ;;  %v5757_v37 = vmul.f32 %v14679_v7, %v5756_v9  ;;  %v5702_v58 = vadd.f32 %v5701_v60, %v5100_v62  ;;  %v4994_v24 = vld [vmem:[#allocation2 + $0xe0] sm:$0xff]  ;;  %v11307_v62 = vor.u32 %v12958_v0, %v11306_v10  ;;  %v13452_v0 = vld [vmem:[%s14101_s29 + $0x38] sm:$0xff] }
 0x417   : > { %v14688_v40 = vpop.eup %13369  ;;  %v5781_v33 = vor.u32 1.1754944e-38, %v5780_v22  ;;  %6510 = vmatpush.bf16.msra.mxu1 %v11331_v18 }
 0x418   : > { %v13372_v31 = vpop.eup %13371  ;;  %13373 = vpow2.f32 %v11101_v52  ;;  %v5758_v14 = vadd.f32 %v14679_v7, %v5757_v37  ;;  %v5770_v39 = vmul.f32 %v14688_v40, %v14677_v63  ;;  %vm5775_vm9 = vweird.f32 %v14688_v40  ;;  %6535 = vmatpush.bf16.msra.mxu3 %v11359_v59  ;;  %v11290_v59 = vld [vmem:[#allocation8 + $0x160] sm:$0xf] }
 0x419   : > { %v14694_v51 = vadd.f32 1.0, %v13372_v31  ;;  %v5690_v53 = vpop.f32.mrf.mxu3  ;;  %vm14720_vm11 = vmor %vm5774_vm10, %vm5775_vm9 }
 0x41a   : > { %v5771_v36 = vsub.f32 1.0, %v5770_v39  ;;  %v5762_v57 = vsel %vm14699_vm7, %v14679_v7, %v5758_v14  ;;  %v5778_v7 = vand.u32 2147483647, %v14677_v63 }
 0x41b   : > { %13375 = vrcp.f32 %v14694_v51  ;;  %v5714_v34 = vpop.f32.mrf.mxu1  ;;  %v5727_v4 = vpop.f32.mrf.mxu2  ;;  %v5767_v20 = vsel %vm5764_vm8, %v5766_v61, %v5762_v57  ;;  %v5805_v45 = vand.u32 2147483648, %v14694_v51  ;;  %6511 = vmatpush.bf16.msra.mxu1 %v11307_v62  ;;  %vm5799_vm14 = vweird.f32 %v14694_v51  ;;  %v11244_v62 = vld [vmem:[#allocation8 + $0x118] sm:$0xf0] }
 0x41c   : > { %v5715_v6 = vadd.f32 %v5714_v34, %v5702_v58  ;;  %v5772_v11 = vmul.f32 %v14688_v40, %v5771_v36  ;;  %v5728_v9 = vadd.f32 %v5727_v4, %v5101_v3  ;;  %6536 = vmatpush.bf16.msra.mxu3 %v11335_v30  ;;  %vm5779_vm12 = vcmp.eq.f32.partialorder %v5778_v7, 8.507059e+37  ;;  %v12953_v3 = vld [vmem:[#allocation8 + $0x174] sm:$0xf0]  ;;  %v12950_v4 = vld [vmem:[#allocation8 + $0x164] sm:$0xf] }
 0x41d   : > { %v5703_v26 = vpop.f32.mrf.mxu0  ;;  %v5806_v46 = vor.u32 1.1754944e-38, %v5805_v45  ;;  %v11295_v17 = vor.u32 %v12950_v4, %v11292_v5  ;;  %v12947_v7 = vld [vmem:[#allocation8 + $0x144] sm:$0xf0]  ;;  %v11482_v30 = vld [vmem:[#allocation8 + $0x2e0] sm:$0xf] }
 0x41e   : > { %v13374_v19 = vpop.eup %13373  ;;  %v5773_v21 = vadd.f32 %v14688_v40, %v5772_v11  ;;  %v5824_v29 = vmul.f32 %v5767_v20, %v5715_v6  ;;  %v11291_v11 = vor.u32 %v12953_v3, %v11290_v59  ;;  %v11266_v26 = vld [vmem:[#allocation8 + $0x130] sm:$0xf]  ;;  %v12944_v20 = vld [vmem:[#allocation8 + $0x134] sm:$0xf]  ;;  %v12983_v59 = vld [vmem:[#allocation8 + $0x264] sm:$0xf0] }
 0x41f   : > { %v14715_v15 = vadd.f32 1.0, %v13374_v19  ;;  %v11218_v45 = vld [vmem:[#allocation8 + $0xd0] sm:$0xf]  ;;  %v12923_v4 = vld [vmem:[#allocation8 + $0x84] sm:$0xf0] }
 0x420   : > { %v5777_v63 = vsel %vm14720_vm11, %v14688_v40, %v5773_v21  ;;  %v5826_v52 = vadd.f32 %v5824_v29, %v4994_v24  ;;  %v5803_v40 = vand.u32 2147483647, %v14694_v51  ;;  %6537 = vmatpush.bf16.msra.mxu3 %v11311_v35  ;;  %v11268_v21 = vld [vmem:[#allocation8 + $0x148] sm:$0xf0]  ;;  %v13001_v29 = vld [vmem:[#allocation8 + $0x2f4] sm:$0xf0]  ;;  %v11267_v24 = vor.u32 %v12947_v7, %v11266_v26 }
 0x421   : > { %v13376_v27 = vpop.eup %13375  ;;  %13377 = vrcp.f32 %v14715_v15  ;;  %v5740_v28 = vpop.f32.mrf.mxu3  ;;  %v5782_v43 = vsel %vm5779_vm12, %v5781_v33, %v5777_v63  ;;  %v5820_v56 = vand.u32 2147483648, %v14715_v15  ;;  %v5818_v49 = vand.u32 2147483647, %v14715_v15  ;;  %v12938_v63 = vld [vmem:[#allocation8 + $0x104] sm:$0xf] }
 0x422   : > { %v5795_v60 = vmul.f32 %v13376_v27, %v14694_v51  ;;  %v5741_v32 = vadd.f32 %v5740_v28, %v5728_v9  ;;  %vm5800_vm13 = vweird.f32 %v13376_v27  ;;  %13379 = vtanh.f32 %v5826_v52  ;;  %v12941_v28 = vld [vmem:[#allocation8 + $0x114] sm:$0xf0]  ;;  %v11458_v33 = vld [vmem:[#allocation8 + $0x2b0] sm:$0xf]  ;;  %v12995_v35 = vld [vmem:[#allocation8 + $0x2c4] sm:$0xf0] }
 0x423   : > { %v5716_v37 = vpop.f32.mrf.mxu1  ;;  %v5729_v55 = vpop.f32.mrf.mxu2  ;;  %vm5801_vm15 = vmor %vm5799_vm14, %vm5800_vm13  ;;  %vm5804_vm1 = vcmp.eq.f32.partialorder %v5803_v40, 8.507059e+37  ;;  %vm5814_vm3 = vweird.f32 %v14715_v15  ;;  %v5821_v8 = vor.u32 1.1754944e-38, %v5820_v56  ;;  %vm5819_vm5 = vcmp.eq.f32.partialorder %v5818_v49, 8.507059e+37  ;;  %v11220_v40 = vld [vmem:[#allocation8 + $0xe8] sm:$0xf0] }
 0x424   : > { %v5796_v41 = vsub.f32 1.0, %v5795_v60  ;;  %v5825_v42 = vmul.f32 %v5782_v43, %v5741_v32  ;;  %v11271_v9 = vor.u32 %v12944_v20, %v11268_v21  ;;  %v11483_v60 = vor.u32 %v13001_v29, %v11482_v30  ;;  %v12992_v37 = vld [vmem:[#allocation8 + $0x2b4] sm:$0xf]  ;;  %v11460_v55 = vld [vmem:[#allocation8 + $0x2c8] sm:$0xf0] }
 0x425   : > { %v11487_v32 = vor.u32 %v12998_v16, %v11484_v23  ;;  %v11247_v43 = vor.u32 %v12938_v63, %v11244_v62  ;;  %v12929_v56 = vld [vmem:[#allocation8 + $0xb4] sm:$0xf0]  ;;  %v11170_v3 = vld [vmem:[#allocation8 + $0x70] sm:$0xf]  ;;  %v12920_v5 = vld [vmem:[#allocation8 + $0x74] sm:$0xf] }
 0x426   : > { %v5797_v12 = vmul.f32 %v13376_v27, %v5796_v41  ;;  %v5827_v47 = vadd.f32 %v5825_v42, %v4995_v38  ;;  %v11243_v41 = vor.u32 %v12941_v28, %v11242_v25  ;;  %v12935_v42 = vld [vmem:[#allocation8 + $0xe4] sm:$0xf0]  ;;  %v11459_v38 = vor.u32 %v12995_v35, %v11458_v33  ;;  %v11388_v26 = vld [vmem:[#allocation8 + $0x238] sm:$0xf0]  ;;  %v11146_v20 = vld [vmem:[#allocation8 + $0x40] sm:$0xf] }
 0x427   : > { %v13378_v31 = vpop.eup %13377  ;;  %v11171_v7 = vor.u32 %v12923_v4, %v11170_v3  ;;  %v12917_v21 = vld [vmem:[#allocation8 + $0x54] sm:$0xf0]  ;;  %v11148_v30 = vld [vmem:[#allocation8 + $0x58] sm:$0xf0]  ;;  %v12971_v29 = vld [vmem:[#allocation8 + $0x204] sm:$0xf0] }
 0x428   : > { %v5810_v14 = vmul.f32 %v13378_v31, %v14715_v15  ;;  %v5798_v39 = vadd.f32 %v13376_v27, %v5797_v12  ;;  %vm5815_vm2 = vweird.f32 %v13378_v31  ;;  %v13380_v51 = vpop.eup %13379  ;;  %13381 = vtanh.f32 %v5827_v47  ;;  %v12932_v12 = vld [vmem:[#allocation8 + $0xd4] sm:$0xf]  ;;  %v11436_v47 = vld [vmem:[#allocation8 + $0x298] sm:$0xf0]  ;;  %v11364_v23 = vld [vmem:[#allocation8 + $0x208] sm:$0xf0] }
 0x429   : > { %v5742_v48 = vpop.f32.mrf.mxu3  ;;  %vm5816_vm4 = vmor %vm5814_vm3, %vm5815_vm2  ;;  %v12968_v16 = vld [vmem:[#allocation8 + $0x1f4] sm:$0xf]  ;;  %v11122_v25 = vld [vmem:[#allocation8 + $0x10] sm:$0xf] }
 0x42a   : > { %v5811_v53 = vsub.f32 1.0, %v5810_v14  ;;  %v5802_v54 = vsel %vm5801_vm15, %v13376_v27, %v5798_v39  ;;  %v11434_v14 = vld [vmem:[#allocation8 + $0x280] sm:$0xf]  ;;  %v12989_v39 = vld [vmem:[#allocation8 + $0x294] sm:$0xf0]  ;;  %v11219_v48 = vor.u32 %v12935_v42, %v11218_v45 }
 0x42b   : > { %v5807_v58 = vsel %vm5804_vm1, %v5806_v46, %v5802_v54  ;;  %v12986_v46 = vld [vmem:[#allocation8 + $0x284] sm:$0xf]  ;;  %v11194_v54 = vld [vmem:[#allocation8 + $0xa0] sm:$0xf]  ;;  %v12908_v28 = vld [vmem:[#allocation8 + $0x14] sm:$0xf] }
 0x42c   : > { %v5812_v50 = vmul.f32 %v13378_v31, %v5811_v53  ;;  %v5830_v36 = vsub.f32 1.0, %v5807_v58  ;;  %v5834_v34 = vmul.f32 %v13451_v2, %v5807_v58  ;;  %v11223_v53 = vor.u32 %v12932_v12, %v11220_v40  ;;  %v12926_v58 = vld [vmem:[#allocation8 + $0xa4] sm:$0xf]  ;;  %v11412_v2 = vld [vmem:[#allocation8 + $0x268] sm:$0xf0] }
 0x42d   : > { %v11439_v49 = vor.u32 %v12986_v46, %v11436_v47  ;;  %v11124_v63 = vld [vmem:[#allocation8 + $0x28] sm:$0xf0]  ;;  %v12965_v33 = vld [vmem:[#allocation8 + $0x1d4] sm:$0xf0]  ;;  %v12962_v35 = vld [vmem:[#allocation8 + $0x1c4] sm:$0xf] }
 0x42e   : > { %v5832_v1 = vmul.f32 %v13380_v51, %v5830_v36  ;;  %v5813_v57 = vadd.f32 %v13378_v31, %v5812_v50  ;;  %v13382_v22 = vpop.eup %13381  ;;  %v11196_v50 = vld [vmem:[#allocation8 + $0xb8] sm:$0xf0]  ;;  %v11435_v36 = vor.u32 %v12989_v39, %v11434_v14  ;;  %v11410_v51 = vld [vmem:[#allocation8 + $0x250] sm:$0xf]  ;;  %v12959_v12 = vld [vmem:[#allocation8 + $0x1a4] sm:$0xf0] }
 0x42f   : > { %v11314_v42 = vld [vmem:[#allocation8 + $0x190] sm:$0xf]  ;;  %v12956_v40 = vld [vmem:[#allocation8 + $0x194] sm:$0xf] }
 0x430   : > { %v5836_v13 = vadd.f32 %v5834_v34, %v5832_v1  ;;  %v5817_v6 = vsel %vm5816_vm4, %v13378_v31, %v5813_v57  ;;  %v11463_v31 = vor.u32 %v12992_v37, %v11460_v55  ;;  %v12980_v1 = vld [vmem:[#allocation8 + $0x254] sm:$0xf]  ;;  %v11195_v34 = vor.u32 %v12929_v56, %v11194_v54  ;;  %v11340_v37 = vld [vmem:[#allocation8 + $0x1d8] sm:$0xf0] }
 0x431   : > { %v5822_v61 = vsel %vm5819_vm5, %v5821_v8, %v5817_v6  ;;  %v11199_v57 = vor.u32 %v12926_v58, %v11196_v50  ;;  %v11172_v8 = vld [vmem:[#allocation8 + $0x88] sm:$0xf0]  ;;  %v11415_v6 = vor.u32 %v12980_v1, %v11412_v2  ;;  %v11343_v45 = vor.u32 %v12962_v35, %v11340_v37  ;;  %v1139_v46 = vld [vmem:[%s1138_s15] ss:$8 sm:$0xf] }
 0x432   : > { %11102 = vst [vmem:[%s14101_s29 + $0x40] sm:$0xff] %v5836_v13  ;;  %v5831_v18 = vsub.f32 1.0, %v5822_v61  ;;  %v14738_v19 = vpack.c.bf16 %v5836_v13, %v5836_v13  ;;  %v5835_v15 = vmul.f32 %v13452_v0, %v5822_v61  ;;  %v11411_v13 = vor.u32 %v12983_v59, %v11410_v51  ;;  %v11386_v61 = vld [vmem:[#allocation8 + $0x220] sm:$0xf]  ;;  %v13086_v35 = vld [vmem:[#allocation8 + $0x2a4] sm:$0xf] }
 0x433   : > { %v1140_v47 = vld [vmem:[%s1138_s15] ss:$8 sm:$0x30]  ;;  %v11834_v37 = vld [vmem:[#allocation8 + $0x2b8] sm:$0xf0]  ;;  %s1345_s15 = sadd.s32 6, %s15376_s26 }
 0x434   : > { %v5833_v10 = vmul.f32 %v13382_v22, %v5831_v18  ;;  %6447 = vmatmul.bf16.vlgmr.msrb.gmra.mxu0 %v14738_v19  ;;  %6473 = vmatmul.bf16.vlgmr.msrb.gmra.mxu2 %v14738_v19  ;;  %v11175_v18 = vor.u32 %v12920_v5, %v11172_v8  ;;  %v12914_v22 = vld [vmem:[#allocation8 + $0x44] sm:$0xf]  ;;  %v1160_v54 = vld [vmem:[%s1158_s25] ss:$8 sm:$0x30]  ;;  %s1394_s26 = sand.u32 7, %s15575_s4 }
 0x435   : > { %6543 = vmatpush.bf16.msrb.mxu0 %v11291_v11  ;;  %6569 = vmatpush.bf16.msrb.mxu2 %v11295_v17  ;;  %v12977_v11 = vld [vmem:[#allocation8 + $0x234] sm:$0xf0]  ;;  %v12974_v17 = vld [vmem:[#allocation8 + $0x224] sm:$0xf] }
 0x436   : > { %v5837_v27 = vadd.f32 %v5835_v15, %v5833_v10  ;;  %v11387_v10 = vor.u32 %v12977_v11, %v11386_v61  ;;  %v11391_v0 = vor.u32 %v12974_v17, %v11388_v26  ;;  %v11362_v15 = vld [vmem:[#allocation8 + $0x1f0] sm:$0xf]  ;;  %v1180_v50 = vld [vmem:[%s1178_s11] ss:$8 sm:$0x30] }
 0x437   : > { %v11363_v62 = vor.u32 %v12971_v29, %v11362_v15  ;;  %v1179_v58 = vld [vmem:[%s1178_s11] ss:$8 sm:$0xf]  ;;  %v13044_v17 = vld [vmem:[#allocation8 + $0x154] sm:$0xf]  ;;  %s1294_s11 = sand.u32 7, %s15559_s9 }
 0x438   : > { %11103 = vst [vmem:[%s14101_s29 + $0x48] sm:$0xff] %v5837_v27  ;;  %v14744_v52 = vpack.c.bf16 %v5837_v27, %v5837_v27  ;;  %v12911_v27 = vld [vmem:[#allocation8 + $0x24] sm:$0xf0]  ;;  %v11666_v26 = vld [vmem:[#allocation8 + $0x168] sm:$0xf0] }
 0x439   : > { %6544 = vmatpush.bf16.msrb.mxu0 %v11267_v24  ;;  %6570 = vmatpush.bf16.msrb.mxu2 %v11271_v9  ;;  %v11147_v24 = vor.u32 %v12917_v21, %v11146_v20  ;;  %v11151_v9 = vor.u32 %v12914_v22, %v11148_v30  ;;  %v11123_v55 = vor.u32 %v12911_v27, %v11122_v25  ;;  %v1200_v51 = vld [vmem:[%s1198_s0] ss:$8 sm:$0x30]  ;;  %v13041_v20 = vld [vmem:[#allocation8 + $0x134] sm:$0xf0] }
 0x43a   : > { %6460 = vmatmul.bf16.vlgmr.msrb.gmra.mxu1 %v14744_v52  ;;  %6486 = vmatmul.bf16.vlgmr.msrb.gmra.mxu3 %v14744_v52  ;;  %v1219_v59 = vld [vmem:[%s1218_s6] ss:$8 sm:$0xf]  ;;  %v13038_v22 = vld [vmem:[#allocation8 + $0x124] sm:$0xf] }
 0x43b   : > { %6556 = vmatpush.bf16.msrb.mxu1 %v11483_v60  ;;  %6582 = vmatpush.bf16.msrb.mxu3 %v11487_v32  ;;  %v11367_v60 = vor.u32 %v12968_v16, %v11364_v23  ;;  %v11338_v32 = vld [vmem:[#allocation8 + $0x1c0] sm:$0xf]  ;;  %v13047_v61 = vld [vmem:[#allocation8 + $0x164] sm:$0xf0]  ;;  %v11642_v30 = vld [vmem:[#allocation8 + $0x138] sm:$0xf0] }
 0x43c   : > { %v1220_v2 = vld [vmem:[%s1218_s6] ss:$8 sm:$0x30]  ;;  %v13092_v29 = vld [vmem:[#allocation8 + $0x2d4] sm:$0xf]  ;;  %s14920_s6 = sld [smem:[#allocation4 + %s1345_s15]] }
 0x43d   : > { %6545 = vmatpush.bf16.msrb.mxu0 %v11243_v41  ;;  %6571 = vmatpush.bf16.msrb.mxu2 %v11247_v43  ;;  %v11127_v41 = vor.u32 %v12908_v28, %v11124_v63  ;;  %v11339_v43 = vor.u32 %v12965_v33, %v11338_v32  ;;  %v1240_v3 = vld [vmem:[%s1238_s10] ss:$8 sm:$0x30]  ;;  %v11858_v16 = vld [vmem:[#allocation8 + $0x2e8] sm:$0xf0] }
 0x43e   : > { %v1259_v5 = vld [vmem:[%s1258_s28] ss:$8 sm:$0xf]  ;;  %v13032_v27 = vld [vmem:[#allocation8 + $0xf4] sm:$0xf] }
 0x43f   : > { %6557 = vmatpush.bf16.msrb.mxu1 %v11459_v38  ;;  %6583 = vmatpush.bf16.msrb.mxu3 %v11463_v31  ;;  %v11316_v38 = vld [vmem:[#allocation8 + $0x1a8] sm:$0xf0]  ;;  %v11315_v31 = vor.u32 %v12959_v12, %v11314_v42  ;;  %v1260_v8 = vld [vmem:[%s1258_s28] ss:$8 sm:$0x30]  ;;  %s1308_s28 = scalar_select %p1307_p2, %s1306_s21, 0 }
 0x440   : > { %v11319_v14 = vor.u32 %v12956_v40, %v11316_v38  ;;  %v13095_v15 = vld [vmem:[#allocation8 + $0x2e4] sm:$0xf0]  ;;  %v11618_v63 = vld [vmem:[#allocation8 + $0x108] sm:$0xf0]  ;;  %v11594_v42 = vld [vmem:[#allocation8 + $0xd8] sm:$0xf0] }
 0x441   : > { %6546 = vmatpush.bf16.msrb.mxu0 %v11219_v48  ;;  %6572 = vmatpush.bf16.msrb.mxu2 %v11223_v53  ;;  %v1141_v48 = vor.u32 %v1140_v47, %v1139_v46  ;;  %v1159_v53 = vld [vmem:[%s1158_s25] ss:$8 sm:$0xf]  ;;  %v11621_v32 = vor.u32 %v13032_v27, %v11618_v63  ;;  %s9065_s25 = smul.u32 48, %s1271_s5  ;;  %s15561_s28 = smov (!%p9072_p9, %s1308_s28), 63 }
 0x442   : > { %v1161_v56 = vor.u32 %v1160_v54, %v1159_v53  ;;  %v13035_v25 = vld [vmem:[#allocation8 + $0x104] sm:$0xf0]  ;;  %v11808_v38 = vld [vmem:[#allocation8 + $0x270] sm:$0xf]  ;;  %v13020_v53 = vld [vmem:[#allocation8 + $0x94] sm:$0xf] }
 0x443   : > { %6558 = vmatpush.bf16.msrb.mxu1 %v11435_v36  ;;  %6584 = vmatpush.bf16.msrb.mxu3 %v11439_v49  ;;  %1143 = vst.msk [vmem:[#allocation2 + $0xf1] ss:$8 sm:$0xf] %vm13960_vm0, %v1141_v48  ;;  %v1181_v36 = vor.u32 %v1180_v50, %v1179_v58  ;;  %v1199_v49 = vld [vmem:[%s1198_s0] ss:$8 sm:$0xf]  ;;  %s14927_s16 = sadd.s32 %s9065_s25, %s1274_s1 }
 0x444   : > { %6499 = vmatmul.bf16.vlgmr.msra.gmra.mxu0 %v14738_v19  ;;  %6525 = vmatmul.bf16.vlgmr.msra.gmra.mxu2 %v14738_v19  ;;  %1163 = vst.msk [vmem:[#allocation2 + $0xf2] ss:$8 sm:$0xf] %vm13960_vm0, %v1161_v56  ;;  %v1201_v1 = vor.u32 %v1200_v51, %v1199_v49  ;;  %v11570_v54 = vld [vmem:[#allocation8 + $0xa8] sm:$0xf0]  ;;  %p1347_p11 = scmp.gt.s32.totalorder %s14920_s6, 0 }
 0x445   : > { %6547 = vmatpush.bf16.msrb.mxu0 %v11195_v34  ;;  %6573 = vmatpush.bf16.msrb.mxu2 %v11199_v57  ;;  %1183 = vst.msk [vmem:[#allocation2 + $0xf3] ss:$8 sm:$0xf] %vm13960_vm0, %v1181_v36  ;;  %v1221_v34 = vor.u32 %v1220_v2, %v1219_v59  ;;  %v1239_v57 = vld [vmem:[%s1238_s10] ss:$8 sm:$0xf]  ;;  %v11573_v49 = vor.u32 %v13020_v53, %v11570_v54 }
 0x446   : > { %1203 = vst.msk [vmem:[#allocation2 + $0xf4] ss:$8 sm:$0xf] %vm13960_vm0, %v1201_v1  ;;  %v1241_v4 = vor.u32 %v1240_v3, %v1239_v57  ;;  %v11784_v58 = vld [vmem:[#allocation8 + $0x240] sm:$0xf]  ;;  %s1365_s10 = sadd.s32 6, %s15377_s13 }
 0x447   : > { %6559 = vmatpush.bf16.msrb.mxu1 %v11411_v13  ;;  %6585 = vmatpush.bf16.msrb.mxu3 %v11415_v6  ;;  %1223 = vst.msk [vmem:[#allocation2 + $0xf5] ss:$8 sm:$0xf] %vm13960_vm0, %v1221_v34  ;;  %v1261_v13 = vor.u32 %v1260_v8, %v1259_v5  ;;  %v11664_v6 = vld [vmem:[#allocation8 + $0x150] sm:$0xf]  ;;  %s1366_s7 = sld [smem:[#allocation4 + %s1365_s10]] }
 0x448   : > { %1243 = vst.msk [vmem:[#allocation2 + $0xf6] ss:$8 sm:$0xf] %vm13960_vm0, %v1241_v4  ;;  %v11665_v11 = vor.u32 %v13047_v61, %v11664_v6  ;;  %v13077_v50 = vld [vmem:[#allocation8 + $0x254] sm:$0xf0]  ;;  %s1311_s19 = sshra.s32 %s15561_s28, 3 }
 0x449   : > { %6548 = vmatpush.bf16.msrb.mxu0 %v11171_v7  ;;  %6574 = vmatpush.bf16.msrb.mxu2 %v11175_v18  ;;  %1263 = vst.msk [vmem:[#allocation2 + $0xf7] ss:$8 sm:$0xf] %vm13960_vm0, %v1261_v13  ;;  %v11669_v7 = vor.u32 %v13044_v17, %v11666_v26  ;;  %v11640_v18 = vld [vmem:[#allocation8 + $0x120] sm:$0xf]  ;;  %p9084_p0 = scmp.lt.s32.totalorder %s14920_s6, 63 }
 0x44a   : > { %6512 = vmatmul.bf16.vlgmr.msra.gmra.mxu1 %v14744_v52  ;;  %6538 = vmatmul.bf16.vlgmr.msra.gmra.mxu3 %v14744_v52  ;;  %1144 = vst.msk [vmem:[#allocation2 + $0xf1] ss:$8 sm:$0x30] %vm13960_vm0, %v1141_v48  ;;  %v11641_v21 = vor.u32 %v13041_v20, %v11640_v18  ;;  %v13023_v48 = vld [vmem:[#allocation8 + $0xa4] sm:$0xf0]  ;;  %s1331_s21 = sshra.s32 %s15563_s8, 3 }
 0x44b   : > { %6560 = vmatpush.bf16.msrb.mxu1 %v11387_v10  ;;  %6586 = vmatpush.bf16.msrb.mxu3 %v11391_v0  ;;  %1164 = vst.msk [vmem:[#allocation2 + $0xf2] ss:$8 sm:$0x30] %vm13960_vm0, %v1161_v56  ;;  %v11645_v10 = vor.u32 %v13038_v22, %v11642_v30  ;;  %v11856_v0 = vld [vmem:[#allocation8 + $0x2d0] sm:$0xf]  ;;  %s15565_s6 = smov (!%p1347_p11, %s14920_s6), 0 }
 0x44c   : > { %1184 = vst.msk [vmem:[#allocation2 + $0xf3] ss:$8 sm:$0x30] %vm13960_vm0, %v1181_v36  ;;  %v11857_v23 = vor.u32 %v13095_v15, %v11856_v0  ;;  %v13074_v36 = vld [vmem:[#allocation8 + $0x244] sm:$0xf]  ;;  %s15571_s6 = smov (!%p9084_p0, %s15565_s6), 63 }
 0x44d   : > { %6549 = vmatpush.bf16.msrb.mxu0 %v11147_v24  ;;  %6575 = vmatpush.bf16.msrb.mxu2 %v11151_v9  ;;  %1204 = vst.msk [vmem:[#allocation2 + $0xf4] ss:$8 sm:$0x30] %vm13960_vm0, %v1201_v1  ;;  %v11861_v24 = vor.u32 %v13092_v29, %v11858_v16  ;;  %v11616_v9 = vld [vmem:[#allocation8 + $0xf0] sm:$0xf]  ;;  %p1367_p3 = scmp.gt.s32.totalorder %s1366_s7, 0 }
 0x44e   : > { %1224 = vst.msk [vmem:[#allocation2 + $0xf5] ss:$8 sm:$0x30] %vm13960_vm0, %v1221_v34  ;;  %v11617_v28 = vor.u32 %v13035_v25, %v11616_v9  ;;  %v11786_v51 = vld [vmem:[#allocation8 + $0x258] sm:$0xf0]  ;;  %p9090_p1 = scmp.lt.s32.totalorder %s1366_s7, 63 }
 0x44f   : > { %6561 = vmatpush.bf16.msrb.mxu1 %v11363_v62  ;;  %6587 = vmatpush.bf16.msrb.mxu3 %v11367_v60  ;;  %1244 = vst.msk [vmem:[#allocation2 + $0xf6] ss:$8 sm:$0x30] %vm13960_vm0, %v1241_v4  ;;  %v11832_v62 = vld [vmem:[#allocation8 + $0x2a0] sm:$0xf]  ;;  %v11785_v4 = vor.u32 %v13077_v50, %v11784_v58  ;;  %v11789_v5 = vor.u32 %v13074_v36, %v11786_v51  ;;  %s15567_s7 = smov (!%p1367_p3, %s1366_s7), 0 }
 0x450   : > { %1264 = vst.msk [vmem:[#allocation2 + $0xf7] ss:$8 sm:$0x30] %vm13960_vm0, %v1261_v13  ;;  %v13089_v60 = vld [vmem:[#allocation8 + $0x2b4] sm:$0xf0]  ;;  %s15573_s7 = smov (!%p9090_p1, %s15567_s7), 63 }
 0x451   : > { %6550 = vmatpush.bf16.msrb.mxu0 %v11123_v55  ;;  %6576 = vmatpush.bf16.msrb.mxu2 %v11127_v41  ;;  %v11833_v33 = vor.u32 %v13089_v60, %v11832_v62  ;;  %v11592_v55 = vld [vmem:[#allocation8 + $0xc0] sm:$0xf]  ;;  %v11837_v41 = vor.u32 %v13086_v35, %v11834_v37  ;;  %v13017_v1 = vld [vmem:[#allocation8 + $0x74] sm:$0xf0]  ;;  %v13014_v2 = vld [vmem:[#allocation8 + $0x64] sm:$0xf] }
 0x452   : > { %v11544_v59 = vld [vmem:[#allocation8 + $0x60] sm:$0xf]  ;;  %v11546_v34 = vld [vmem:[#allocation8 + $0x78] sm:$0xf0]  ;;  %v11760_v8 = vld [vmem:[#allocation8 + $0x210] sm:$0xf] }
 0x453   : > { %6562 = vmatpush.bf16.msrb.mxu1 %v11339_v43  ;;  %6588 = vmatpush.bf16.msrb.mxu3 %v11343_v45  ;;  %v13029_v43 = vld [vmem:[#allocation8 + $0xd4] sm:$0xf0]  ;;  %v13026_v45 = vld [vmem:[#allocation8 + $0xc4] sm:$0xf]  ;;  %v11545_v13 = vor.u32 %v13017_v1, %v11544_v59  ;;  %v13071_v6 = vld [vmem:[#allocation8 + $0x224] sm:$0xf0]  ;;  %v11549_v17 = vor.u32 %v13014_v2, %v11546_v34 }
 0x454   : > { %6551 = vmatmul.bf16.vlgmr.msrb.gmra.mxu0 %v14738_v19  ;;  %6577 = vmatmul.bf16.vlgmr.msrb.gmra.mxu2 %v14738_v19  ;;  %v1119_v19 = vld [vmem:[%s1118_s2] ss:$8 sm:$0xf]  ;;  %v11593_v12 = vor.u32 %v13029_v43, %v11592_v55  ;;  %v11597_v40 = vor.u32 %v13026_v45, %v11594_v42  ;;  %v13068_v61 = vld [vmem:[#allocation8 + $0x214] sm:$0xf]  ;;  %v11761_v30 = vor.u32 %v13071_v6, %v11760_v8  ;;  %s1314_s5 = sand.u32 7, %s15561_s28 }
 0x455   : > { %7290 = vmatpush.bf16.msra.mxu0 %v11665_v11  ;;  %7316 = vmatpush.bf16.msra.mxu2 %v11669_v7  ;;  %v11762_v11 = vld [vmem:[#allocation8 + $0x228] sm:$0xf0]  ;;  %v11520_v26 = vld [vmem:[#allocation8 + $0x30] sm:$0xf]  ;;  %v13011_v7 = vld [vmem:[#allocation8 + $0x44] sm:$0xf0] }
 0x456   : > { %v13008_v18 = vld [vmem:[#allocation8 + $0x34] sm:$0xf]  ;;  %v11522_v20 = vld [vmem:[#allocation8 + $0x48] sm:$0xf0]  ;;  %v11736_v0 = vld [vmem:[#allocation8 + $0x1e0] sm:$0xf]  ;;  %v11521_v29 = vor.u32 %v13011_v7, %v11520_v26 }
 0x457   : > { %6563 = vmatpush.bf16.msrb.mxu1 %v11315_v31  ;;  %6589 = vmatpush.bf16.msrb.mxu3 %v11319_v14  ;;  %v13083_v31 = vld [vmem:[#allocation8 + $0x284] sm:$0xf0]  ;;  %v13080_v14 = vld [vmem:[#allocation8 + $0x274] sm:$0xf]  ;;  %v13065_v16 = vld [vmem:[#allocation8 + $0x1f4] sm:$0xf0]  ;;  %v11525_v27 = vor.u32 %v13008_v18, %v11522_v20 }
 0x458   : > { %v11809_v46 = vor.u32 %v13083_v31, %v11808_v38  ;;  %v13005_v63 = vld [vmem:[#allocation8 + $0x14] sm:$0xf0]  ;;  %v13002_v62 = vld [vmem:[#allocation8 + $0x4] sm:$0xf]  ;;  %v13048_v35 = vld [vmem:[#allocation8 + $0x16c] sm:$0xf0]  ;;  %v11737_v55 = vor.u32 %v13065_v16, %v11736_v0 }
 0x459   : > { %7291 = vmatpush.bf16.msra.mxu0 %v11641_v21  ;;  %7317 = vmatpush.bf16.msra.mxu2 %v11645_v10  ;;  %v11765_v10 = vor.u32 %v13068_v61, %v11762_v11  ;;  %v13045_v43 = vld [vmem:[#allocation8 + $0x15c] sm:$0xf]  ;;  %v11674_v45 = vld [vmem:[#allocation8 + $0x170] sm:$0xf0]  ;;  %v11712_v42 = vld [vmem:[#allocation8 + $0x1b0] sm:$0xf] }
 0x45a   : > { %6564 = vmatmul.bf16.vlgmr.msrb.gmra.mxu1 %v14744_v52  ;;  %6590 = vmatmul.bf16.vlgmr.msrb.gmra.mxu3 %v14744_v52  ;;  %v1120_v52 = vld [vmem:[%s1118_s2] ss:$8 sm:$0x30]  ;;  %v13056_v31 = vld [vmem:[#allocation8 + $0x1b4] sm:$0xf]  ;;  %v11677_v54 = vor.u32 %v13045_v43, %v11674_v45  ;;  %s1291_s2 = sshra.s32 %s15559_s9, 3 }
 0x45b   : > { %v1121_v39 = vor.u32 %v1120_v52, %v1119_v19  ;;  %7303 = vmatpush.bf16.msra.mxu1 %v11857_v23  ;;  %7329 = vmatpush.bf16.msra.mxu3 %v11861_v24  ;;  %v14827_v19 = vld [vmem:[%s15235_s3] sm:$0x3f]  ;;  %v11810_v52 = vld [vmem:[#allocation8 + $0x288] sm:$0xf0]  ;;  %v11738_v24 = vld [vmem:[#allocation8 + $0x1f8] sm:$0xf0] }
 0x45c   : > { %v11813_v47 = vor.u32 %v13080_v14, %v11810_v52  ;;  %v5947_v57 = vperm.slane %v14827_v19, 0  ;;  %v5948_v22 = vperm.slane %v14827_v19, 1  ;;  %v13062_v23 = vld [vmem:[#allocation8 + $0x1e4] sm:$0xf]  ;;  %v13059_v38 = vld [vmem:[#allocation8 + $0x1c4] sm:$0xf0] }
 0x45d   : > { %1123 = vst.msk [vmem:[#allocation2 + $0xf0] ss:$8 sm:$0xf] %vm13960_vm0, %v1121_v39  ;;  %7292 = vmatpush.bf16.msra.mxu0 %v11617_v28  ;;  %7318 = vmatpush.bf16.msra.mxu2 %v11621_v32  ;;  %v11496_v28 = vld [vmem:[#allocation8] sm:$0xf]  ;;  %v11713_v36 = vor.u32 %v13059_v38, %v11712_v42  ;;  %v5949_v0 = vperm.slane %v14827_v19, 2 }
 0x45e   : > { %1124 = vst.msk [vmem:[#allocation2 + $0xf0] ss:$8 sm:$0x30] %vm13960_vm0, %v1121_v39  ;;  %v11568_v39 = vld [vmem:[#allocation8 + $0x90] sm:$0xf]  ;;  %s9071_s0 = smul.u32 48, %s1291_s2 }
 0x45f   : > { %7304 = vmatpush.bf16.msra.mxu1 %v11833_v33  ;;  %7330 = vmatpush.bf16.msra.mxu3 %v11837_v41  ;;  %v11569_v56 = vor.u32 %v13023_v48, %v11568_v39  ;;  %v11498_v32 = vld [vmem:[#allocation8 + $0x18] sm:$0xf0]  ;;  %v11672_v33 = vld [vmem:[#allocation8 + $0x158] sm:$0xf]  ;;  %v11741_v41 = vor.u32 %v13062_v23, %v11738_v24  ;;  %v11714_v14 = vld [vmem:[#allocation8 + $0x1c8] sm:$0xf0] }
 0x460   : > { %v11501_v39 = vor.u32 %v13002_v62, %v11498_v32  ;;  %v13039_v58 = vld [vmem:[#allocation8 + $0x12c] sm:$0xf]  ;;  %v11650_v51 = vld [vmem:[#allocation8 + $0x140] sm:$0xf0]  ;;  %v11688_v59 = vld [vmem:[#allocation8 + $0x180] sm:$0xf]  ;;  %s14929_s9 = sadd.s32 %s9071_s0, %s1294_s11 }
 0x461   : > { %7293 = vmatpush.bf16.msra.mxu0 %v11593_v12  ;;  %7319 = vmatpush.bf16.msra.mxu2 %v11597_v40  ;;  %v11497_v40 = vor.u32 %v13005_v63, %v11496_v28  ;;  %v13053_v1 = vld [vmem:[#allocation8 + $0x194] sm:$0xf0]  ;;  %v13050_v34 = vld [vmem:[#allocation8 + $0x184] sm:$0xf]  ;;  %v13093_v6 = vld [vmem:[#allocation8 + $0x2dc] sm:$0xf] }
 0x462   : > { %v11866_v61 = vld [vmem:[#allocation8 + $0x2f0] sm:$0xf0]  ;;  %v11624_v26 = vld [vmem:[#allocation8 + $0xf8] sm:$0xf]  ;;  %v13036_v7 = vld [vmem:[#allocation8 + $0x10c] sm:$0xf0]  ;;  %v11689_v20 = vor.u32 %v13053_v1, %v11688_v59 }
 0x463   : > { %7305 = vmatpush.bf16.msra.mxu1 %v11809_v46  ;;  %7331 = vmatpush.bf16.msra.mxu3 %v11813_v47  ;;  %v11673_v46 = vor.u32 %v13048_v35, %v11672_v33  ;;  %v11648_v47 = vld [vmem:[#allocation8 + $0x128] sm:$0xf]  ;;  %v11625_v23 = vor.u32 %v13036_v7, %v11624_v26  ;;  %v13090_v24 = vld [vmem:[#allocation8 + $0x2bc] sm:$0xf0]  ;;  %v13027_v33 = vld [vmem:[#allocation8 + $0xcc] sm:$0xf] }
 0x464   : > { %v5841_v21 = vld [vmem:[#allocation2 + $0xf0] sm:$0xff]  ;;  %v5842_v52 = vld [vmem:[#allocation2 + $0xf8] sm:$0xff]  ;;  %v11840_v16 = vld [vmem:[#allocation8 + $0x2a8] sm:$0xf]  ;;  %s1351_s1 = sshra.s32 %s15571_s6, 3  ;;  %s9077_s2 = smul.u32 48, %s1311_s19 }
 0x465   : > { %7294 = vmatpush.bf16.msra.mxu0 %v11569_v56  ;;  %7320 = vmatpush.bf16.msra.mxu2 %v11573_v49  ;;  %v13042_v56 = vld [vmem:[#allocation8 + $0x13c] sm:$0xf0]  ;;  %v11717_v49 = vor.u32 %v13056_v31, %v11714_v14  ;;  %v11600_v63 = vld [vmem:[#allocation8 + $0xc8] sm:$0xf]  ;;  %v11602_v35 = vld [vmem:[#allocation8 + $0xe0] sm:$0xf0] }
 0x466   : > { %v11649_v8 = vor.u32 %v13042_v56, %v11648_v47  ;;  %v13030_v62 = vld [vmem:[#allocation8 + $0xdc] sm:$0xf0]  ;;  %v11816_v45 = vld [vmem:[#allocation8 + $0x278] sm:$0xf]  ;;  %v13084_v38 = vld [vmem:[#allocation8 + $0x28c] sm:$0xf0]  ;;  %s1317_s24 = sadd.s32 %s9077_s2, %s1314_s5 }
 0x467   : > { %7306 = vmatpush.bf16.msra.mxu1 %v11785_v4  ;;  %7332 = vmatpush.bf16.msra.mxu3 %v11789_v5  ;;  %v13081_v31 = vld [vmem:[#allocation8 + $0x27c] sm:$0xf]  ;;  %v11818_v14 = vld [vmem:[#allocation8 + $0x290] sm:$0xf0]  ;;  %v11576_v47 = vld [vmem:[#allocation8 + $0x98] sm:$0xf] }
 0x468   : > { %v11578_v56 = vld [vmem:[#allocation8 + $0xb0] sm:$0xf0]  ;;  %v13078_v59 = vld [vmem:[#allocation8 + $0x25c] sm:$0xf0]  ;;  %v13015_v7 = vld [vmem:[#allocation8 + $0x6c] sm:$0xf] }
 0x469   : > { %7295 = vmatpush.bf16.msra.mxu0 %v11545_v13  ;;  %7321 = vmatpush.bf16.msra.mxu2 %v11549_v17  ;;  %v13096_v13 = vld [vmem:[#allocation8 + $0x2ec] sm:$0xf0]  ;;  %v11653_v17 = vor.u32 %v13039_v58, %v11650_v51  ;;  %v11792_v51 = vld [vmem:[#allocation8 + $0x248] sm:$0xf]  ;;  %s1371_s15 = sshra.s32 %s15573_s7, 3  ;;  %s9083_s25 = smul.u32 48, %s1331_s21 }
 0x46a   : > { %v11793_v26 = vor.u32 %v13078_v59, %v11792_v51  ;;  %s1391_s11 = sshra.s32 %s15575_s4, 3  ;;  %s9089_s0 = smul.u32 48, %s1351_s1 }
 0x46b   : > { %7307 = vmatpush.bf16.msra.mxu1 %v11761_v30  ;;  %7333 = vmatpush.bf16.msra.mxu3 %v11765_v10  ;;  %v11626_v30 = vld [vmem:[#allocation8 + $0x110] sm:$0xf0]  ;;  %s1411_s10 = sshra.s32 %s15577_s17, 3  ;;  %s9095_s30 = smul.u32 48, %s1371_s15 }
 0x46c   : > { %s1354_s23 = sand.u32 7, %s15571_s6  ;;  %s9101_s27 = smul.u32 48, %s1391_s11 }
 0x46d   : > { %7296 = vmatpush.bf16.msra.mxu0 %v11521_v29  ;;  %7322 = vmatpush.bf16.msra.mxu2 %v11525_v27  ;;  %v11869_v29 = vor.u32 %v13093_v6, %v11866_v61  ;;  %v13018_v6 = vld [vmem:[#allocation8 + $0x7c] sm:$0xf0]  ;;  %s1374_s12 = sand.u32 7, %s15573_s7  ;;  %s9107_s13 = smul.u32 48, %s1411_s10 }
 0x46e   : > { %s1337_s22 = sadd.s32 %s9083_s25, %s1334_s20  ;;  %s1357_s28 = sadd.s32 %s9089_s0, %s1354_s23 }
 0x46f   : > { %7308 = vmatpush.bf16.msra.mxu1 %v11737_v55  ;;  %7334 = vmatpush.bf16.msra.mxu3 %v11741_v41  ;;  %v5843_v55 = vld [vmem:[#allocation2 + $0x100] sm:$0xff]  ;;  %v11841_v41 = vor.u32 %v13090_v24, %v11840_v16  ;;  %v13069_v16 = vld [vmem:[#allocation8 + $0x21c] sm:$0xf]  ;;  %s14940_s14 = sadd.s32 %s9095_s30, %s1374_s12  ;;  %s14942_s19 = sadd.s32 %s9101_s27, %s1394_s26 }
 0x470   : > { %s14944_s21 = sadd.s32 %s9107_s13, %s1414_s18  ;;  %s1278_s1 = scalar_lea.vmem [#allocation5], %s14927_s16 }
 0x471   : > { %7297 = vmatpush.bf16.msra.mxu0 %v11497_v40  ;;  %7323 = vmatpush.bf16.msra.mxu2 %v11501_v39  ;;  %v11601_v40 = vor.u32 %v13030_v62, %v11600_v63  ;;  %v5950_v39 = vperm.slane %v14827_v19, 3  ;;  %v5951_v63 = vperm.slane %v14827_v19, 4  ;;  %s1298_s6 = scalar_lea.vmem [#allocation5], %s14929_s9  ;;  %s1318_s8 = scalar_lea.vmem [#allocation5], %s1317_s24 }
 0x472   : > { %s1338_s26 = scalar_lea.vmem [#allocation5], %s1337_s22  ;;  %s1358_s18 = scalar_lea.vmem [#allocation5], %s1357_s28 }
 0x473   : > { %7309 = vmatpush.bf16.msra.mxu1 %v11713_v36  ;;  %7335 = vmatpush.bf16.msra.mxu3 %v11717_v49  ;;  %v11817_v36 = vor.u32 %v13084_v38, %v11816_v45  ;;  %v11821_v49 = vor.u32 %v13081_v31, %v11818_v14  ;;  %v11744_v45 = vld [vmem:[#allocation8 + $0x1e8] sm:$0xf]  ;;  %v13063_v38 = vld [vmem:[#allocation8 + $0x1ec] sm:$0xf]  ;;  %v11746_v31 = vld [vmem:[#allocation8 + $0x200] sm:$0xf0] }
 0x474   : > { %v11749_v59 = vor.u32 %v13063_v38, %v11746_v31  ;;  %v5846_v31 = vld [vmem:[#allocation2 + $0x118] sm:$0xff]  ;;  %s1378_s24 = scalar_lea.vmem [#allocation5], %s14940_s14  ;;  %s1398_s22 = scalar_lea.vmem [#allocation5], %s14942_s19 }
 0x475   : > { %7342 = vmatpush.bf16.msrb.mxu0 %v11673_v46  ;;  %7368 = vmatpush.bf16.msrb.mxu2 %v11677_v54  ;;  %v11605_v46 = vor.u32 %v13027_v33, %v11602_v35  ;;  %v13021_v54 = vld [vmem:[#allocation8 + $0x9c] sm:$0xf]  ;;  %v11530_v35 = vld [vmem:[#allocation8 + $0x50] sm:$0xf0]  ;;  %s1418_s13 = scalar_lea.vmem [#allocation5], %s14944_s21  ;;  %s15384_s23 = sld [smem:[#allocation30_spill]] }
 0x476   : > { %v13009_v33 = vld [vmem:[#allocation8 + $0x3c] sm:$0xf]  ;;  %s15385_s7 = sld [smem:[#allocation31_spill]] }
 0x477   : > { %7310 = vmatpush.bf16.msra.mxu1 %v11689_v20  ;;  %s15386_s9 = sld [smem:[#allocation32_spill]] }
 0x478   : > { %s15387_s2 = sld [smem:[#allocation33_spill]] }
 0x479   : > { %7343 = vmatpush.bf16.msrb.mxu0 %v11649_v8  ;;  %7369 = vmatpush.bf16.msrb.mxu2 %v11653_v17  ;;  %v11581_v8 = vor.u32 %v13021_v54, %v11578_v56  ;;  %v13003_v56 = vld [vmem:[#allocation8 + $0xc] sm:$0xf]  ;;  %s15388_s15 = sld [smem:[#allocation34_spill]] }
 0x47a   : > { %s15389_s0 = sld [smem:[#allocation35_spill]] }
 0x47b   : > { %s1425_s16 = sadd.s32 7, %s15384_s23  ;;  %s15390_s30 = sld [smem:[#allocation36_spill]] }
 0x47c   : > { %s1445_s17 = sadd.s32 7, %s15385_s7  ;;  %s1426_s4 = sld [smem:[#allocation4 + %s1425_s16]] }
 0x47d   : > { %7344 = vmatpush.bf16.msrb.mxu0 %v11625_v23  ;;  %v11770_v23 = vld [vmem:[#allocation8 + $0x230] sm:$0xf0]  ;;  %s1446_s5 = sld [smem:[#allocation4 + %s1445_s17]]  ;;  %s1465_s25 = sadd.s32 7, %s15386_s9 }
 0x47e   : > { %s1485_s10 = sadd.s32 7, %s15387_s2  ;;  %s1466_s20 = sld [smem:[#allocation4 + %s1465_s25]] }
 0x47f   : > { %s1486_s27 = sld [smem:[#allocation4 + %s1485_s10]] }
 0x480   : > { %s15391_s19 = sld [smem:[#allocation37_spill]] }
 0x481   : > { %7345 = vmatpush.bf16.msrb.mxu0 %v11601_v40  ;;  %v13066_v40 = vld [vmem:[#allocation8 + $0x1fc] sm:$0xf0]  ;;  %s1545_s14 = sadd.s32 7, %s15390_s30 }
 0x482   : > { %v11745_v51 = vor.u32 %v13066_v40, %v11744_v45  ;;  %p1427_p2 = scmp.gt.s32.totalorder %s1426_s4, 0  ;;  %p9108_p9 = scmp.lt.s32.totalorder %s1426_s4, 63 }
 0x483   : > { %p1447_p8 = scmp.gt.s32.totalorder %s1446_s5, 0  ;;  %p9114_p10 = scmp.lt.s32.totalorder %s1446_s5, 63 }
 0x484   : > { %s15579_s4 = smov (!%p1427_p2, %s1426_s4), 0  ;;  %p1467_p11 = scmp.gt.s32.totalorder %s1466_s20, 0 }
 0x485   : > { %s1448_s11 = scalar_select %p1447_p8, %s1446_s5, 0 }
 0x486   : > { %s15581_s4 = smov (!%p9108_p9, %s15579_s4), 63  ;;  %p1487_p0 = scmp.gt.s32.totalorder %s1486_s27, 0 }
 0x487   : > { %s15583_s11 = smov (!%p9114_p10, %s1448_s11), 63  ;;  %s1431_s28 = sshra.s32 %s15581_s4, 3 }
 0x488   : > { %s1434_s21 = sand.u32 7, %s15581_s4  ;;  %p9120_p3 = scmp.lt.s32.totalorder %s1466_s20, 63 }
 0x489   : > { %s1488_s12 = scalar_select %p1487_p0, %s1486_s27, 0 }
 0x48a   : > { %s1565_s7 = sadd.s32 7, %s15391_s19  ;;  %p9126_p5 = scmp.lt.s32.totalorder %s1486_s27, 63 }
 0x48b   : > { %s1546_s16 = sld [smem:[#allocation4 + %s1545_s14]] }
 0x48c   : > { %s1566_s9 = sld [smem:[#allocation4 + %s1565_s7]]  ;;  %s15587_s12 = smov (!%p9126_p5, %s1488_s12), 63 }
 0x48d   : > { %s1491_s2 = sshra.s32 %s15587_s12, 3  ;;  %s1494_s19 = sand.u32 7, %s15587_s12 }
 0x491   : > { %p1547_p13 = scmp.gt.s32.totalorder %s1546_s16, 0  ;;  %p9144_p9 = scmp.lt.s32.totalorder %s1546_s16, 63 }
 0x492   : > { %p1567_p8 = scmp.gt.s32.totalorder %s1566_s9, 0  ;;  %p9150_p10 = scmp.lt.s32.totalorder %s1566_s9, 63 }
 0x494   : > { %s15593_s9 = smov (!%p1567_p8, %s1566_s9), 0 }
 0x495   : > { %s15601_s9 = smov (!%p9150_p10, %s15593_s9), 63 }
 0x4b1   : > { %v6448_v3 = vpop.f32.mrf.mxu0 }
 0x4b2   : > { %v6449_v15 = vadd.f32 %v6448_v3, %v5947_v57  ;;  %v11690_v57 = vld [vmem:[#allocation8 + $0x198] sm:$0xf0]  ;;  %v11864_v3 = vld [vmem:[#allocation8 + $0x2d8] sm:$0xf] }
 0x4b7   : > { %v6461_v9 = vpop.f32.mrf.mxu1  ;;  %v6474_v25 = vpop.f32.mrf.mxu2 }
 0x4b8   : > { %v6462_v60 = vadd.f32 %v6461_v9, %v6449_v15  ;;  %v6475_v53 = vadd.f32 %v6474_v25, %v5948_v22  ;;  %v13033_v22 = vld [vmem:[#allocation8 + $0xfc] sm:$0xf]  ;;  %v11865_v15 = vor.u32 %v13096_v13, %v11864_v3  ;;  %v13087_v9 = vld [vmem:[#allocation8 + $0x2ac] sm:$0xf]  ;;  %v11842_v25 = vld [vmem:[#allocation8 + $0x2c0] sm:$0xf0] }
 0x4b9   : > { %v6450_v37 = vpop.f32.mrf.mxu0  ;;  %v11629_v28 = vor.u32 %v13033_v22, %v11626_v30  ;;  %v11845_v43 = vor.u32 %v13087_v9, %v11842_v25  ;;  %v11794_v3 = vld [vmem:[#allocation8 + $0x260] sm:$0xf0]  ;;  %v11552_v13 = vld [vmem:[#allocation8 + $0x68] sm:$0xf]  ;;  %v11768_v30 = vld [vmem:[#allocation8 + $0x218] sm:$0xf] }
 0x4ba   : > { %v6595_v12 = vadd.f32 %v6462_v60, %v5841_v21  ;;  %v11693_v21 = vor.u32 %v13050_v34, %v11690_v57  ;;  %7355 = vmatpush.bf16.msrb.mxu1 %v11865_v15  ;;  %v13075_v57 = vld [vmem:[#allocation8 + $0x24c] sm:$0xf]  ;;  %v11553_v15 = vor.u32 %v13018_v6, %v11552_v13  ;;  %v13057_v13 = vld [vmem:[#allocation8 + $0x1bc] sm:$0xf]  ;;  %v11722_v6 = vld [vmem:[#allocation8 + $0x1d0] sm:$0xf0] }
 0x4bb   : > { %7370 = vmatpush.bf16.msrb.mxu2 %v11629_v28  ;;  %v11797_v22 = vor.u32 %v13075_v57, %v11794_v3  ;;  %v13012_v28 = vld [vmem:[#allocation8 + $0x4c] sm:$0xf0] }
 0x4bc   : > { %v11488_v48 = vmul.f32 -1.442695, %v6595_v12  ;;  %7336 = vmatpush.bf16.msra.mxu3 %v11693_v21 }
 0x4bd   : > { %v6487_v50 = vpop.f32.mrf.mxu3 }
 0x4be   : > { %13383 = vpow2.f32 %v11488_v48  ;;  %v6488_v2 = vadd.f32 %v6487_v50, %v6475_v53  ;;  %v13024_v48 = vld [vmem:[#allocation8 + $0xac] sm:$0xf0]  ;;  %7356 = vmatpush.bf16.msrb.mxu1 %v11841_v41 }
 0x4bf   : > { %v6463_v4 = vpop.f32.mrf.mxu1  ;;  %v6476_v5 = vpop.f32.mrf.mxu2  ;;  %v11577_v34 = vor.u32 %v13024_v48, %v11576_v47  ;;  %7371 = vmatpush.bf16.msrb.mxu2 %v11605_v46  ;;  %v11533_v46 = vor.u32 %v13009_v33, %v11530_v35  ;;  %v11504_v47 = vld [vmem:[#allocation8 + $0x8] sm:$0xf]  ;;  %v13006_v48 = vld [vmem:[#allocation8 + $0x1c] sm:$0xf0] }
 0x4c0   : > { %v6596_v11 = vadd.f32 %v6488_v2, %v5842_v52  ;;  %7381 = vmatpush.bf16.msrb.mxu3 %v11869_v29  ;;  %v5844_v2 = vld [vmem:[#allocation2 + $0x108] sm:$0xff]  ;;  %v13072_v29 = vld [vmem:[#allocation8 + $0x22c] sm:$0xf0] }
 0x4c1   : > { %v6500_v18 = vpop.f32.mrf.mxu0  ;;  %7346 = vmatpush.bf16.msrb.mxu0 %v11577_v34  ;;  %v11769_v41 = vor.u32 %v13072_v29, %v11768_v30  ;;  %v13060_v34 = vld [vmem:[#allocation8 + $0x1cc] sm:$0xf0]  ;;  %v13054_v29 = vld [vmem:[#allocation8 + $0x19c] sm:$0xf0] }
 0x4c2   : > { %v11489_v10 = vmul.f32 -1.442695, %v6596_v11  ;;  %v6501_v37 = vadd.f32 %v6500_v18, %v5949_v0  ;;  %v11554_v18 = vld [vmem:[#allocation8 + $0x80] sm:$0xf0]  ;;  %7357 = vmatpush.bf16.msrb.mxu1 %v11817_v36 }
 0x4c3   : > { %7372 = vmatpush.bf16.msrb.mxu2 %v11581_v8  ;;  %v11557_v25 = vor.u32 %v13015_v7, %v11554_v18  ;;  %v11505_v8 = vor.u32 %v13006_v48, %v11504_v47 }
 0x4c4   : > { %v13384_v27 = vpop.eup %13383  ;;  %13385 = vpow2.f32 %v11489_v10  ;;  %7382 = vmatpush.bf16.msrb.mxu3 %v11845_v43  ;;  %v11773_v43 = vor.u32 %v13069_v16, %v11770_v23  ;;  %v11698_v23 = vld [vmem:[#allocation8 + $0x1a0] sm:$0xf0] }
 0x4c5   : > { %v14832_v60 = vadd.f32 1.0, %v13384_v27  ;;  %v6489_v32 = vpop.f32.mrf.mxu3  ;;  %v11528_v27 = vld [vmem:[#allocation8 + $0x38] sm:$0xf]  ;;  %7347 = vmatpush.bf16.msrb.mxu0 %v11553_v15  ;;  %v11696_v15 = vld [vmem:[#allocation8 + $0x188] sm:$0xf] }
 0x4c6   : > { %7358 = vmatpush.bf16.msrb.mxu1 %v11793_v26 }
 0x4c7   : > { %13387 = vrcp.f32 %v14832_v60  ;;  %v6513_v42 = vpop.f32.mrf.mxu1  ;;  %v6526_v12 = vpop.f32.mrf.mxu2  ;;  %v6614_v17 = vand.u32 2147483647, %v14832_v60  ;;  %v6616_v32 = vand.u32 2147483648, %v14832_v60  ;;  %7373 = vmatpush.bf16.msrb.mxu2 %v11557_v25  ;;  %vm6610_vm7 = vweird.f32 %v14832_v60  ;;  %v11632_v25 = vld [vmem:[#allocation8 + $0x100] sm:$0xf] }
 0x4c8   : > { %v6514_v52 = vadd.f32 %v6513_v42, %v6501_v37  ;;  %v6527_v5 = vadd.f32 %v6526_v12, %v5950_v39  ;;  %7383 = vmatpush.bf16.msrb.mxu3 %v11821_v49  ;;  %v11529_v12 = vor.u32 %v13012_v28, %v11528_v27 }
 0x4c9   : > { %v6502_v53 = vpop.f32.mrf.mxu0  ;;  %v6617_v26 = vor.u32 1.1754944e-38, %v6616_v32  ;;  %vm6615_vm9 = vcmp.eq.f32.partialorder %v6614_v17, 8.507059e+37  ;;  %v13051_v17 = vld [vmem:[#allocation8 + $0x18c] sm:$0xf] }
 0x4ca   : > { %v13386_v58 = vpop.eup %13385  ;;  %v6635_v50 = vadd.f32 %v6514_v52, %v5843_v55  ;;  %7359 = vmatpush.bf16.msrb.mxu1 %v11769_v41  ;;  %7348 = vmatpush.bf16.msrb.mxu0 %v11529_v12  ;;  %v11701_v35 = vor.u32 %v13051_v17, %v11698_v23  ;;  %v13094_v17 = vld [vmem:[#allocation8 + $0x2e4] sm:$0xf]  ;;  %v11874_v23 = vld [vmem:[#allocation8 + $0x2f8] sm:$0xf0] }
 0x4cb   : > { %v14836_v1 = vadd.f32 1.0, %v13386_v58  ;;  %v11506_v58 = vld [vmem:[#allocation8 + $0x20] sm:$0xf0]  ;;  %7374 = vmatpush.bf16.msrb.mxu2 %v11533_v46 }
 0x4cc   : > { %v11490_v4 = vmul.f32 -1.442695, %v6635_v50  ;;  %7384 = vmatpush.bf16.msrb.mxu3 %v11797_v22  ;;  %v11509_v18 = vor.u32 %v13003_v56, %v11506_v58 }
 0x4cd   : > { %v14838_v61 = vpop.eup %13387  ;;  %13389 = vrcp.f32 %v14836_v1  ;;  %v6539_v11 = vpop.f32.mrf.mxu3  ;;  %vm6625_vm11 = vweird.f32 %v14836_v1 }
 0x4ce   : > { %13391 = vpow2.f32 %v11490_v4  ;;  %v6540_v20 = vadd.f32 %v6539_v11, %v6527_v5  ;;  %v6606_v21 = vmul.f32 %v14838_v61, %v14832_v60  ;;  %vm6611_vm6 = vweird.f32 %v14838_v61  ;;  %7360 = vmatpush.bf16.msrb.mxu1 %v11745_v51  ;;  %7349 = vmatpush.bf16.msrb.mxu0 %v11505_v8  ;;  %v11682_v8 = vld [vmem:[#allocation8 + $0x178] sm:$0xf0] }
 0x4cf   : > { %v6515_v10 = vpop.f32.mrf.mxu1  ;;  %v6528_v0 = vpop.f32.mrf.mxu2  ;;  %vm14858_vm8 = vmor %vm6610_vm7, %vm6611_vm6  ;;  %v5952_v4 = vperm.slane %v14827_v19, 5  ;;  %7375 = vmatpush.bf16.msrb.mxu2 %v11509_v18 }
 0x4d0   : > { %v6636_v24 = vadd.f32 %v6540_v20, %v5844_v2  ;;  %v6607_v9 = vsub.f32 1.0, %v6606_v21  ;;  %7385 = vmatpush.bf16.msrb.mxu3 %v11773_v43  ;;  %v11720_v2 = vld [vmem:[#allocation8 + $0x1b8] sm:$0xf]  ;;  %v6631_v10 = vand.u32 2147483648, %v14836_v1  ;;  %v11725_v0 = vor.u32 %v13057_v13, %v11722_v6 }
 0x4d1   : > { %v6552_v62 = vpop.f32.mrf.mxu0  ;;  %v11721_v19 = vor.u32 %v13060_v34, %v11720_v2  ;;  %v13453_v34 = vld [vmem:[%s14101_s29 + $0x40] sm:$0xff] }
 0x4d2   : > { %v11491_v37 = vmul.f32 -1.442695, %v6636_v24  ;;  %v6608_v55 = vmul.f32 %v14838_v61, %v6607_v9  ;;  %v6553_v50 = vadd.f32 %v6552_v62, %v5951_v63  ;;  %v5845_v24 = vld [vmem:[#allocation2 + $0x110] sm:$0xff]  ;;  %v11697_v63 = vor.u32 %v13054_v29, %v11696_v15  ;;  %v13454_v29 = vld [vmem:[%s14101_s29 + $0x48] sm:$0xff] }
 0x4d3   : > { %v14847_v42 = vpop.eup %13389  ;;  %v6632_v33 = vor.u32 1.1754944e-38, %v6631_v10  ;;  %7361 = vmatpush.bf16.msrb.mxu1 %v11721_v19 }
 0x4d4   : > { %v13392_v14 = vpop.eup %13391  ;;  %13393 = vpow2.f32 %v11491_v37  ;;  %v6609_v52 = vadd.f32 %v14838_v61, %v6608_v55  ;;  %v6621_v39 = vmul.f32 %v14847_v42, %v14836_v1  ;;  %vm6626_vm10 = vweird.f32 %v14847_v42  ;;  %7386 = vmatpush.bf16.msrb.mxu3 %v11749_v59  ;;  %v11680_v59 = vld [vmem:[#allocation8 + $0x160] sm:$0xf] }
 0x4d5   : > { %v14853_v53 = vadd.f32 1.0, %v13392_v14  ;;  %v6541_v54 = vpop.f32.mrf.mxu3  ;;  %vm14879_vm12 = vmor %vm6625_vm11, %vm6626_vm10 }
 0x4d6   : > { %v6622_v49 = vsub.f32 1.0, %v6621_v39  ;;  %v6613_v3 = vsel %vm14858_vm8, %v14838_v61, %v6609_v52  ;;  %v6629_v61 = vand.u32 2147483647, %v14836_v1 }
 0x4d7   : > { %13395 = vrcp.f32 %v14853_v53  ;;  %v6565_v57 = vpop.f32.mrf.mxu1  ;;  %v6578_v5 = vpop.f32.mrf.mxu2  ;;  %v6618_v22 = vsel %vm6615_vm9, %v6617_v26, %v6613_v3  ;;  %v6656_v12 = vand.u32 2147483648, %v14853_v53  ;;  %7362 = vmatpush.bf16.msrb.mxu1 %v11697_v63  ;;  %vm6650_vm15 = vweird.f32 %v14853_v53  ;;  %v11634_v63 = vld [vmem:[#allocation8 + $0x118] sm:$0xf0] }
 0x4d8   : > { %v6566_v11 = vadd.f32 %v6565_v57, %v6553_v50  ;;  %v6623_v7 = vmul.f32 %v14847_v42, %v6622_v49  ;;  %v6579_v9 = vadd.f32 %v6578_v5, %v5952_v4  ;;  %7387 = vmatpush.bf16.msrb.mxu3 %v11725_v0  ;;  %vm6630_vm13 = vcmp.eq.f32.partialorder %v6629_v61, 8.507059e+37  ;;  %v13049_v4 = vld [vmem:[#allocation8 + $0x174] sm:$0xf0]  ;;  %v13046_v5 = vld [vmem:[#allocation8 + $0x164] sm:$0xf] }
 0x4d9   : > { %v6554_v20 = vpop.f32.mrf.mxu0  ;;  %v6657_v46 = vor.u32 1.1754944e-38, %v6656_v12  ;;  %v11685_v18 = vor.u32 %v13046_v5, %v11682_v8  ;;  %v13043_v61 = vld [vmem:[#allocation8 + $0x144] sm:$0xf0]  ;;  %v11872_v0 = vld [vmem:[#allocation8 + $0x2e0] sm:$0xf] }
 0x4da   : > { %v13394_v21 = vpop.eup %13393  ;;  %v6624_v30 = vadd.f32 %v14847_v42, %v6623_v7  ;;  %v6675_v60 = vmul.f32 %v6618_v22, %v6566_v11  ;;  %v11681_v7 = vor.u32 %v13049_v4, %v11680_v59  ;;  %v11656_v20 = vld [vmem:[#allocation8 + $0x130] sm:$0xf]  ;;  %v13040_v22 = vld [vmem:[#allocation8 + $0x134] sm:$0xf]  ;;  %v13079_v59 = vld [vmem:[#allocation8 + $0x264] sm:$0xf0] }
 0x4db   : > { %v14874_v16 = vadd.f32 1.0, %v13394_v21  ;;  %v11608_v12 = vld [vmem:[#allocation8 + $0xd0] sm:$0xf]  ;;  %v13019_v5 = vld [vmem:[#allocation8 + $0x84] sm:$0xf0] }
 0x4dc   : > { %v6628_v1 = vsel %vm14879_vm12, %v14847_v42, %v6624_v30  ;;  %v6677_v37 = vadd.f32 %v6675_v60, %v5845_v24  ;;  %v6654_v42 = vand.u32 2147483647, %v14853_v53  ;;  %7388 = vmatpush.bf16.msrb.mxu3 %v11701_v35  ;;  %v11658_v30 = vld [vmem:[#allocation8 + $0x148] sm:$0xf0]  ;;  %v13097_v60 = vld [vmem:[#allocation8 + $0x2f4] sm:$0xf0]  ;;  %v11657_v24 = vor.u32 %v13043_v61, %v11656_v20 }
 0x4dd   : > { %v13396_v27 = vpop.eup %13395  ;;  %13397 = vrcp.f32 %v14874_v16  ;;  %v6591_v28 = vpop.f32.mrf.mxu3  ;;  %v6633_v45 = vsel %vm6630_vm13, %v6632_v33, %v6628_v1  ;;  %v6671_v58 = vand.u32 2147483648, %v14874_v16  ;;  %v6669_v51 = vand.u32 2147483647, %v14874_v16  ;;  %v13034_v1 = vld [vmem:[#allocation8 + $0x104] sm:$0xf] }
 0x4de   : > { %v6646_v62 = vmul.f32 %v13396_v27, %v14853_v53  ;;  %v6592_v32 = vadd.f32 %v6591_v28, %v6579_v9  ;;  %vm6651_vm14 = vweird.f32 %v13396_v27  ;;  %13399 = vtanh.f32 %v6677_v37  ;;  %v13037_v28 = vld [vmem:[#allocation8 + $0x114] sm:$0xf0]  ;;  %v11848_v33 = vld [vmem:[#allocation8 + $0x2b0] sm:$0xf]  ;;  %v13091_v35 = vld [vmem:[#allocation8 + $0x2c4] sm:$0xf0] }
 0x4df   : > { %v6567_v55 = vpop.f32.mrf.mxu1  ;;  %v6580_v41 = vpop.f32.mrf.mxu2  ;;  %vm6652_vm1 = vmor %vm6650_vm15, %vm6651_vm14  ;;  %vm6655_vm2 = vcmp.eq.f32.partialorder %v6654_v42, 8.507059e+37  ;;  %vm6665_vm4 = vweird.f32 %v14874_v16  ;;  %v6672_v13 = vor.u32 1.1754944e-38, %v6671_v58  ;;  %vm6670_vm6 = vcmp.eq.f32.partialorder %v6669_v51, 8.507059e+37  ;;  %v11610_v42 = vld [vmem:[#allocation8 + $0xe8] sm:$0xf0] }
 0x4e0   : > { %v6647_v43 = vsub.f32 1.0, %v6646_v62  ;;  %v6676_v40 = vmul.f32 %v6633_v45, %v6592_v32  ;;  %v11661_v9 = vor.u32 %v13040_v22, %v11658_v30  ;;  %v11873_v62 = vor.u32 %v13097_v60, %v11872_v0  ;;  %v13088_v55 = vld [vmem:[#allocation8 + $0x2b4] sm:$0xf]  ;;  %v11850_v41 = vld [vmem:[#allocation8 + $0x2c8] sm:$0xf0] }
 0x4e1   : > { %v11877_v32 = vor.u32 %v13094_v17, %v11874_v23  ;;  %v11637_v45 = vor.u32 %v13034_v1, %v11634_v63  ;;  %v13025_v58 = vld [vmem:[#allocation8 + $0xb4] sm:$0xf0]  ;;  %v11560_v4 = vld [vmem:[#allocation8 + $0x70] sm:$0xf]  ;;  %v13016_v8 = vld [vmem:[#allocation8 + $0x74] sm:$0xf] }
 0x4e2   : > { %v6648_v38 = vmul.f32 %v13396_v27, %v6647_v43  ;;  %v6678_v47 = vadd.f32 %v6676_v40, %v5846_v31  ;;  %v11633_v43 = vor.u32 %v13037_v28, %v11632_v25  ;;  %v13031_v40 = vld [vmem:[#allocation8 + $0xe4] sm:$0xf0]  ;;  %v11849_v31 = vor.u32 %v13091_v35, %v11848_v33  ;;  %v11778_v20 = vld [vmem:[#allocation8 + $0x238] sm:$0xf0]  ;;  %v11536_v22 = vld [vmem:[#allocation8 + $0x40] sm:$0xf] }
 0x4e3   : > { %v13398_v14 = vpop.eup %13397  ;;  %v11561_v61 = vor.u32 %v13019_v5, %v11560_v4  ;;  %v13013_v30 = vld [vmem:[#allocation8 + $0x54] sm:$0xf0]  ;;  %v11538_v0 = vld [vmem:[#allocation8 + $0x58] sm:$0xf0]  ;;  %v13067_v60 = vld [vmem:[#allocation8 + $0x204] sm:$0xf0] }
 0x4e4   : > { %v6661_v52 = vmul.f32 %v13398_v14, %v14874_v16  ;;  %v6649_v39 = vadd.f32 %v13396_v27, %v6648_v38  ;;  %vm6666_vm3 = vweird.f32 %v13398_v14  ;;  %v13400_v53 = vpop.eup %13399  ;;  %13401 = vtanh.f32 %v6678_v47  ;;  %v13028_v38 = vld [vmem:[#allocation8 + $0xd4] sm:$0xf]  ;;  %v11826_v47 = vld [vmem:[#allocation8 + $0x298] sm:$0xf0]  ;;  %v11754_v23 = vld [vmem:[#allocation8 + $0x208] sm:$0xf0] }
 0x4e5   : > { %v6593_v48 = vpop.f32.mrf.mxu3  ;;  %vm6667_vm5 = vmor %vm6665_vm4, %vm6666_vm3  ;;  %v13064_v17 = vld [vmem:[#allocation8 + $0x1f4] sm:$0xf]  ;;  %v11512_v25 = vld [vmem:[#allocation8 + $0x10] sm:$0xf] }
 0x4e6   : > { %v6662_v54 = vsub.f32 1.0, %v6661_v52  ;;  %v6653_v56 = vsel %vm6652_vm1, %v13396_v27, %v6649_v39  ;;  %v11824_v52 = vld [vmem:[#allocation8 + $0x280] sm:$0xf]  ;;  %v13085_v39 = vld [vmem:[#allocation8 + $0x294] sm:$0xf0]  ;;  %v11609_v48 = vor.u32 %v13031_v40, %v11608_v12 }
 0x4e7   : > { %v6658_v50 = vsel %vm6655_vm2, %v6657_v46, %v6653_v56  ;;  %v13082_v46 = vld [vmem:[#allocation8 + $0x284] sm:$0xf]  ;;  %v11584_v56 = vld [vmem:[#allocation8 + $0xa0] sm:$0xf]  ;;  %v13004_v28 = vld [vmem:[#allocation8 + $0x14] sm:$0xf] }
 0x4e8   : > { %v6663_v36 = vmul.f32 %v13398_v14, %v6662_v54  ;;  %v6681_v49 = vsub.f32 1.0, %v6658_v50  ;;  %v6685_v57 = vmul.f32 %v13453_v34, %v6658_v50  ;;  %v11613_v54 = vor.u32 %v13028_v38, %v11610_v42  ;;  %v13022_v50 = vld [vmem:[#allocation8 + $0xa4] sm:$0xf]  ;;  %v11802_v34 = vld [vmem:[#allocation8 + $0x268] sm:$0xf0] }
 0x4e9   : > { %v11829_v51 = vor.u32 %v13082_v46, %v11826_v47  ;;  %v11514_v1 = vld [vmem:[#allocation8 + $0x28] sm:$0xf0]  ;;  %v13061_v33 = vld [vmem:[#allocation8 + $0x1d4] sm:$0xf0]  ;;  %v13058_v35 = vld [vmem:[#allocation8 + $0x1c4] sm:$0xf] }
 0x4ea   : > { %v6683_v2 = vmul.f32 %v13400_v53, %v6681_v49  ;;  %v6664_v3 = vadd.f32 %v13398_v14, %v6663_v36  ;;  %v13402_v10 = vpop.eup %13401  ;;  %v11586_v36 = vld [vmem:[#allocation8 + $0xb8] sm:$0xf0]  ;;  %v11825_v49 = vor.u32 %v13085_v39, %v11824_v52  ;;  %v11800_v53 = vld [vmem:[#allocation8 + $0x250] sm:$0xf]  ;;  %v13055_v38 = vld [vmem:[#allocation8 + $0x1a4] sm:$0xf0] }
 0x4eb   : > { %v11704_v40 = vld [vmem:[#allocation8 + $0x190] sm:$0xf]  ;;  %v13052_v42 = vld [vmem:[#allocation8 + $0x194] sm:$0xf] }
 0x4ec   : > { %v6687_v6 = vadd.f32 %v6685_v57, %v6683_v2  ;;  %v6668_v11 = vsel %vm6667_vm5, %v13398_v14, %v6664_v3  ;;  %v11853_v14 = vor.u32 %v13088_v55, %v11850_v41  ;;  %v13076_v2 = vld [vmem:[#allocation8 + $0x254] sm:$0xf]  ;;  %v11585_v57 = vor.u32 %v13025_v58, %v11584_v56  ;;  %v11730_v55 = vld [vmem:[#allocation8 + $0x1d8] sm:$0xf0] }
 0x4ed   : > { %v6673_v26 = vsel %vm6670_vm6, %v6672_v13, %v6668_v11  ;;  %v11589_v3 = vor.u32 %v13022_v50, %v11586_v36  ;;  %v11562_v13 = vld [vmem:[#allocation8 + $0x88] sm:$0xf0]  ;;  %v11805_v11 = vor.u32 %v13076_v2, %v11802_v34  ;;  %v11733_v12 = vor.u32 %v13058_v35, %v11730_v55  ;;  %v1299_v46 = vld [vmem:[%s1298_s6] ss:$8 sm:$0xf] }
 0x4ee   : > { %11492 = vst [vmem:[%s14101_s29 + $0x50] sm:$0xff] %v6687_v6  ;;  %v6682_v19 = vsub.f32 1.0, %v6673_v26  ;;  %v14897_v21 = vpack.c.bf16 %v6687_v6, %v6687_v6  ;;  %v6686_v16 = vmul.f32 %v13454_v29, %v6673_v26  ;;  %v11801_v6 = vor.u32 %v13079_v59, %v11800_v53  ;;  %v11776_v26 = vld [vmem:[#allocation8 + $0x220] sm:$0xf]  ;;  %v13182_v35 = vld [vmem:[#allocation8 + $0x2a4] sm:$0xf] }
 0x4ef   : > { %v1300_v47 = vld [vmem:[%s1298_s6] ss:$8 sm:$0x30]  ;;  %v12224_v55 = vld [vmem:[#allocation8 + $0x2b8] sm:$0xf0]  ;;  %s1505_s6 = sadd.s32 7, %s15388_s15 }
 0x4f0   : > { %v6684_v15 = vmul.f32 %v13402_v10, %v6682_v19  ;;  %7298 = vmatmul.bf16.vlgmr.msra.gmra.mxu0 %v14897_v21  ;;  %7324 = vmatmul.bf16.vlgmr.msra.gmra.mxu2 %v14897_v21  ;;  %v11565_v19 = vor.u32 %v13016_v8, %v11562_v13  ;;  %v13010_v10 = vld [vmem:[#allocation8 + $0x44] sm:$0xf]  ;;  %v1320_v56 = vld [vmem:[%s1318_s8] ss:$8 sm:$0x30]  ;;  %s1548_s15 = scalar_select %p1547_p13, %s1546_s16, 0 }
 0x4f1   : > { %7394 = vmatpush.bf16.msra.mxu0 %v11681_v7  ;;  %7420 = vmatpush.bf16.msra.mxu2 %v11685_v18  ;;  %v13073_v7 = vld [vmem:[#allocation8 + $0x234] sm:$0xf0]  ;;  %v13070_v18 = vld [vmem:[#allocation8 + $0x224] sm:$0xf] }
 0x4f2   : > { %v6688_v27 = vadd.f32 %v6686_v16, %v6684_v15  ;;  %v11777_v15 = vor.u32 %v13073_v7, %v11776_v26  ;;  %v11781_v29 = vor.u32 %v13070_v18, %v11778_v20  ;;  %v11752_v16 = vld [vmem:[#allocation8 + $0x1f0] sm:$0xf]  ;;  %v1340_v36 = vld [vmem:[%s1338_s26] ss:$8 sm:$0x30]  ;;  %s15599_s15 = smov (!%p9144_p9, %s1548_s15), 63 }
 0x4f3   : > { %v11753_v63 = vor.u32 %v13067_v60, %v11752_v16  ;;  %v1339_v50 = vld [vmem:[%s1338_s26] ss:$8 sm:$0xf]  ;;  %v13140_v18 = vld [vmem:[#allocation8 + $0x154] sm:$0xf]  ;;  %s1454_s26 = sand.u32 7, %s15583_s11 }
 0x4f4   : > { %11493 = vst [vmem:[%s14101_s29 + $0x58] sm:$0xff] %v6688_v27  ;;  %v14903_v37 = vpack.c.bf16 %v6688_v27, %v6688_v27  ;;  %v13007_v27 = vld [vmem:[#allocation8 + $0x24] sm:$0xf0]  ;;  %v12056_v20 = vld [vmem:[#allocation8 + $0x168] sm:$0xf0]  ;;  %s1551_s30 = sshra.s32 %s15599_s15, 3 }
 0x4f5   : > { %7395 = vmatpush.bf16.msra.mxu0 %v11657_v24  ;;  %7421 = vmatpush.bf16.msra.mxu2 %v11661_v9  ;;  %v11537_v24 = vor.u32 %v13013_v30, %v11536_v22  ;;  %v11541_v9 = vor.u32 %v13010_v10, %v11538_v0  ;;  %v11513_v41 = vor.u32 %v13007_v27, %v11512_v25  ;;  %v1360_v53 = vld [vmem:[%s1358_s18] ss:$8 sm:$0x30]  ;;  %v13137_v22 = vld [vmem:[#allocation8 + $0x134] sm:$0xf0] }
 0x4f6   : > { %7311 = vmatmul.bf16.vlgmr.msra.gmra.mxu1 %v14903_v37  ;;  %7337 = vmatmul.bf16.vlgmr.msra.gmra.mxu3 %v14903_v37  ;;  %v1379_v59 = vld [vmem:[%s1378_s24] ss:$8 sm:$0xf]  ;;  %v13134_v10 = vld [vmem:[#allocation8 + $0x124] sm:$0xf] }
 0x4f7   : > { %7407 = vmatpush.bf16.msra.mxu1 %v11873_v62  ;;  %7433 = vmatpush.bf16.msra.mxu3 %v11877_v32  ;;  %v11757_v62 = vor.u32 %v13064_v17, %v11754_v23  ;;  %v11728_v32 = vld [vmem:[#allocation8 + $0x1c0] sm:$0xf]  ;;  %v13143_v26 = vld [vmem:[#allocation8 + $0x164] sm:$0xf0]  ;;  %v12032_v0 = vld [vmem:[#allocation8 + $0x138] sm:$0xf0] }
 0x4f8   : > { %v1380_v34 = vld [vmem:[%s1378_s24] ss:$8 sm:$0x30]  ;;  %v13188_v60 = vld [vmem:[#allocation8 + $0x2d4] sm:$0xf]  ;;  %s15089_s24 = sld [smem:[#allocation4 + %s1505_s6]] }
 0x4f9   : > { %7396 = vmatpush.bf16.msra.mxu0 %v11633_v43  ;;  %7422 = vmatpush.bf16.msra.mxu2 %v11637_v45  ;;  %v11517_v43 = vor.u32 %v13004_v28, %v11514_v1  ;;  %v11729_v45 = vor.u32 %v13061_v33, %v11728_v32  ;;  %v1400_v4 = vld [vmem:[%s1398_s22] ss:$8 sm:$0x30]  ;;  %v12248_v17 = vld [vmem:[#allocation8 + $0x2e8] sm:$0xf0]  ;;  %s9149_s6 = smul.u32 48, %s1551_s30 }
 0x4fa   : > { %v1419_v8 = vld [vmem:[%s1418_s13] ss:$8 sm:$0xf]  ;;  %v13128_v27 = vld [vmem:[#allocation8 + $0xf4] sm:$0xf]  ;;  %s15393_s30 = sld [smem:[#allocation29_spill]] }
 0x4fb   : > { %7408 = vmatpush.bf16.msra.mxu1 %v11849_v31  ;;  %7434 = vmatpush.bf16.msra.mxu3 %v11853_v14  ;;  %v11706_v31 = vld [vmem:[#allocation8 + $0x1a8] sm:$0xf0]  ;;  %v11705_v14 = vor.u32 %v13055_v38, %v11704_v40  ;;  %v1420_v13 = vld [vmem:[%s1418_s13] ss:$8 sm:$0x30]  ;;  %s1468_s13 = scalar_select %p1467_p11, %s1466_s20, 0 }
 0x4fc   : > { %v11709_v52 = vor.u32 %v13052_v42, %v11706_v31  ;;  %v13191_v16 = vld [vmem:[#allocation8 + $0x2e4] sm:$0xf0]  ;;  %v12008_v1 = vld [vmem:[#allocation8 + $0x108] sm:$0xf0]  ;;  %v11984_v40 = vld [vmem:[#allocation8 + $0xd8] sm:$0xf0] }
 0x4fd   : > { %7397 = vmatpush.bf16.msra.mxu0 %v11609_v48  ;;  %7423 = vmatpush.bf16.msra.mxu2 %v11613_v54  ;;  %v1301_v48 = vor.u32 %v1300_v47, %v1299_v46  ;;  %v1319_v54 = vld [vmem:[%s1318_s8] ss:$8 sm:$0xf]  ;;  %v12011_v32 = vor.u32 %v13128_v27, %v12008_v1  ;;  %s9113_s8 = smul.u32 48, %s1431_s28  ;;  %s15585_s13 = smov (!%p9120_p3, %s1468_s13), 63 }
 0x4fe   : > { %v1321_v58 = vor.u32 %v1320_v56, %v1319_v54  ;;  %v13131_v25 = vld [vmem:[#allocation8 + $0x104] sm:$0xf0]  ;;  %v12198_v31 = vld [vmem:[#allocation8 + $0x270] sm:$0xf]  ;;  %v13116_v54 = vld [vmem:[#allocation8 + $0x94] sm:$0xf] }
 0x4ff   : > { %7409 = vmatpush.bf16.msra.mxu1 %v11825_v49  ;;  %7435 = vmatpush.bf16.msra.mxu3 %v11829_v51  ;;  %1303 = vst.msk [vmem:[#allocation2 + $0x121] ss:$8 sm:$0xf] %vm13960_vm0, %v1301_v48  ;;  %v1341_v49 = vor.u32 %v1340_v36, %v1339_v50  ;;  %v1359_v51 = vld [vmem:[%s1358_s18] ss:$8 sm:$0xf]  ;;  %s15096_s17 = sadd.s32 %s9113_s8, %s1434_s21 }
 0x500   : > { %7350 = vmatmul.bf16.vlgmr.msrb.gmra.mxu0 %v14897_v21  ;;  %7376 = vmatmul.bf16.vlgmr.msrb.gmra.mxu2 %v14897_v21  ;;  %1323 = vst.msk [vmem:[#allocation2 + $0x122] ss:$8 sm:$0xf] %vm13960_vm0, %v1321_v58  ;;  %v1361_v2 = vor.u32 %v1360_v53, %v1359_v51  ;;  %v11960_v56 = vld [vmem:[#allocation8 + $0xa8] sm:$0xf0]  ;;  %p1507_p1 = scmp.gt.s32.totalorder %s15089_s24, 0 }
 0x501   : > { %7398 = vmatpush.bf16.msra.mxu0 %v11585_v57  ;;  %7424 = vmatpush.bf16.msra.mxu2 %v11589_v3  ;;  %1343 = vst.msk [vmem:[#allocation2 + $0x123] ss:$8 sm:$0xf] %vm13960_vm0, %v1341_v49  ;;  %v1381_v57 = vor.u32 %v1380_v34, %v1379_v59  ;;  %v1399_v3 = vld [vmem:[%s1398_s22] ss:$8 sm:$0xf]  ;;  %v11963_v51 = vor.u32 %v13116_v54, %v11960_v56 }
 0x502   : > { %1363 = vst.msk [vmem:[#allocation2 + $0x124] ss:$8 sm:$0xf] %vm13960_vm0, %v1361_v2  ;;  %v1401_v5 = vor.u32 %v1400_v4, %v1399_v3  ;;  %v12174_v50 = vld [vmem:[#allocation8 + $0x240] sm:$0xf]  ;;  %s1525_s22 = sadd.s32 7, %s15389_s0 }
 0x503   : > { %7410 = vmatpush.bf16.msra.mxu1 %v11801_v6  ;;  %7436 = vmatpush.bf16.msra.mxu3 %v11805_v11  ;;  %1383 = vst.msk [vmem:[#allocation2 + $0x125] ss:$8 sm:$0xf] %vm13960_vm0, %v1381_v57  ;;  %v1421_v6 = vor.u32 %v1420_v13, %v1419_v8  ;;  %v12054_v11 = vld [vmem:[#allocation8 + $0x150] sm:$0xf]  ;;  %s1526_s23 = sld [smem:[#allocation4 + %s1525_s22]] }
 0x504   : > { %1403 = vst.msk [vmem:[#allocation2 + $0x126] ss:$8 sm:$0xf] %vm13960_vm0, %v1401_v5  ;;  %v12055_v7 = vor.u32 %v13143_v26, %v12054_v11  ;;  %v13173_v36 = vld [vmem:[#allocation8 + $0x254] sm:$0xf0]  ;;  %s1471_s5 = sshra.s32 %s15585_s13, 3 }
 0x505   : > { %7399 = vmatpush.bf16.msra.mxu0 %v11561_v61  ;;  %7425 = vmatpush.bf16.msra.mxu2 %v11565_v19  ;;  %1423 = vst.msk [vmem:[#allocation2 + $0x127] ss:$8 sm:$0xf] %vm13960_vm0, %v1421_v6  ;;  %v12059_v61 = vor.u32 %v13140_v18, %v12056_v20  ;;  %v12030_v19 = vld [vmem:[#allocation8 + $0x120] sm:$0xf]  ;;  %p9132_p4 = scmp.lt.s32.totalorder %s15089_s24, 63 }
 0x506   : > { %7363 = vmatmul.bf16.vlgmr.msrb.gmra.mxu1 %v14903_v37  ;;  %7389 = vmatmul.bf16.vlgmr.msrb.gmra.mxu3 %v14903_v37  ;;  %1304 = vst.msk [vmem:[#allocation2 + $0x121] ss:$8 sm:$0x30] %vm13960_vm0, %v1301_v48  ;;  %v12031_v30 = vor.u32 %v13137_v22, %v12030_v19  ;;  %v13119_v48 = vld [vmem:[#allocation8 + $0xa4] sm:$0xf0]  ;;  %s15589_s24 = smov (!%p1507_p1, %s15089_s24), 0 }
 0x507   : > { %7411 = vmatpush.bf16.msra.mxu1 %v11777_v15  ;;  %7437 = vmatpush.bf16.msra.mxu3 %v11781_v29  ;;  %1324 = vst.msk [vmem:[#allocation2 + $0x122] ss:$8 sm:$0x30] %vm13960_vm0, %v1321_v58  ;;  %v12035_v15 = vor.u32 %v13134_v10, %v12032_v0  ;;  %v12246_v29 = vld [vmem:[#allocation8 + $0x2d0] sm:$0xf]  ;;  %s15595_s24 = smov (!%p9132_p4, %s15589_s24), 63 }
 0x508   : > { %1344 = vst.msk [vmem:[#allocation2 + $0x123] ss:$8 sm:$0x30] %vm13960_vm0, %v1341_v49  ;;  %v12247_v23 = vor.u32 %v13191_v16, %v12246_v29  ;;  %v13170_v49 = vld [vmem:[#allocation8 + $0x244] sm:$0xf]  ;;  %s1474_s25 = sand.u32 7, %s15585_s13 }
 0x509   : > { %7400 = vmatpush.bf16.msra.mxu0 %v11537_v24  ;;  %7426 = vmatpush.bf16.msra.mxu2 %v11541_v9  ;;  %1364 = vst.msk [vmem:[#allocation2 + $0x124] ss:$8 sm:$0x30] %vm13960_vm0, %v1361_v2  ;;  %v12251_v24 = vor.u32 %v13188_v60, %v12248_v17  ;;  %v12006_v9 = vld [vmem:[#allocation8 + $0xf0] sm:$0xf]  ;;  %p1527_p6 = scmp.gt.s32.totalorder %s1526_s23, 0 }
 0x50a   : > { %1384 = vst.msk [vmem:[#allocation2 + $0x125] ss:$8 sm:$0x30] %vm13960_vm0, %v1381_v57  ;;  %v12007_v28 = vor.u32 %v13131_v25, %v12006_v9  ;;  %v12176_v53 = vld [vmem:[#allocation8 + $0x258] sm:$0xf0]  ;;  %p9138_p2 = scmp.lt.s32.totalorder %s1526_s23, 63 }
 0x50b   : > { %7412 = vmatpush.bf16.msra.mxu1 %v11753_v63  ;;  %7438 = vmatpush.bf16.msra.mxu3 %v11757_v62  ;;  %1404 = vst.msk [vmem:[#allocation2 + $0x126] ss:$8 sm:$0x30] %vm13960_vm0, %v1401_v5  ;;  %v12222_v63 = vld [vmem:[#allocation8 + $0x2a0] sm:$0xf]  ;;  %v12175_v5 = vor.u32 %v13173_v36, %v12174_v50  ;;  %v12179_v8 = vor.u32 %v13170_v49, %v12176_v53  ;;  %s15591_s23 = smov (!%p1527_p6, %s1526_s23), 0 }
 0x50c   : > { %1424 = vst.msk [vmem:[#allocation2 + $0x127] ss:$8 sm:$0x30] %vm13960_vm0, %v1421_v6  ;;  %v13185_v62 = vld [vmem:[#allocation8 + $0x2b4] sm:$0xf0]  ;;  %s15597_s23 = smov (!%p9138_p2, %s15591_s23), 63 }
 0x50d   : > { %7401 = vmatpush.bf16.msra.mxu0 %v11513_v41  ;;  %7427 = vmatpush.bf16.msra.mxu2 %v11517_v43  ;;  %v12223_v33 = vor.u32 %v13185_v62, %v12222_v63  ;;  %v11982_v41 = vld [vmem:[#allocation8 + $0xc0] sm:$0xf]  ;;  %v12227_v43 = vor.u32 %v13182_v35, %v12224_v55  ;;  %v13113_v2 = vld [vmem:[#allocation8 + $0x74] sm:$0xf0]  ;;  %v13110_v34 = vld [vmem:[#allocation8 + $0x64] sm:$0xf] }
 0x50e   : > { %v11934_v59 = vld [vmem:[#allocation8 + $0x60] sm:$0xf]  ;;  %v11936_v57 = vld [vmem:[#allocation8 + $0x78] sm:$0xf0]  ;;  %v12150_v13 = vld [vmem:[#allocation8 + $0x210] sm:$0xf] }
 0x50f   : > { %7413 = vmatpush.bf16.msra.mxu1 %v11729_v45  ;;  %7439 = vmatpush.bf16.msra.mxu3 %v11733_v12  ;;  %v13125_v45 = vld [vmem:[#allocation8 + $0xd4] sm:$0xf0]  ;;  %v13122_v12 = vld [vmem:[#allocation8 + $0xc4] sm:$0xf]  ;;  %v11935_v6 = vor.u32 %v13113_v2, %v11934_v59  ;;  %v13167_v11 = vld [vmem:[#allocation8 + $0x224] sm:$0xf0]  ;;  %v11939_v18 = vor.u32 %v13110_v34, %v11936_v57 }
 0x510   : > { %7402 = vmatmul.bf16.vlgmr.msra.gmra.mxu0 %v14897_v21  ;;  %7428 = vmatmul.bf16.vlgmr.msra.gmra.mxu2 %v14897_v21  ;;  %v1279_v21 = vld [vmem:[%s1278_s1] ss:$8 sm:$0xf]  ;;  %v11983_v38 = vor.u32 %v13125_v45, %v11982_v41  ;;  %v11987_v42 = vor.u32 %v13122_v12, %v11984_v40  ;;  %v13164_v26 = vld [vmem:[#allocation8 + $0x214] sm:$0xf]  ;;  %v12151_v0 = vor.u32 %v13167_v11, %v12150_v13  ;;  %s9125_s0 = smul.u32 48, %s1471_s5 }
 0x511   : > { %8141 = vmatpush.bf16.msrb.mxu0 %v12055_v7  ;;  %8167 = vmatpush.bf16.msrb.mxu2 %v12059_v61  ;;  %v12152_v7 = vld [vmem:[#allocation8 + $0x228] sm:$0xf0]  ;;  %v11910_v20 = vld [vmem:[#allocation8 + $0x30] sm:$0xf]  ;;  %v13107_v61 = vld [vmem:[#allocation8 + $0x44] sm:$0xf0] }
 0x512   : > { %v13104_v19 = vld [vmem:[#allocation8 + $0x34] sm:$0xf]  ;;  %v11912_v22 = vld [vmem:[#allocation8 + $0x48] sm:$0xf0]  ;;  %v12126_v29 = vld [vmem:[#allocation8 + $0x1e0] sm:$0xf]  ;;  %v11911_v60 = vor.u32 %v13107_v61, %v11910_v20  ;;  %s1477_s14 = sadd.s32 %s9125_s0, %s1474_s25 }
 0x513   : > { %7414 = vmatpush.bf16.msra.mxu1 %v11705_v14  ;;  %7440 = vmatpush.bf16.msra.mxu3 %v11709_v52  ;;  %v13179_v14 = vld [vmem:[#allocation8 + $0x284] sm:$0xf0]  ;;  %v13176_v52 = vld [vmem:[#allocation8 + $0x274] sm:$0xf]  ;;  %v13161_v17 = vld [vmem:[#allocation8 + $0x1f4] sm:$0xf0]  ;;  %v11915_v27 = vor.u32 %v13104_v19, %v11912_v22 }
 0x514   : > { %v12199_v46 = vor.u32 %v13179_v14, %v12198_v31  ;;  %v13101_v1 = vld [vmem:[#allocation8 + $0x14] sm:$0xf0]  ;;  %v13098_v63 = vld [vmem:[#allocation8 + $0x4] sm:$0xf]  ;;  %v13144_v35 = vld [vmem:[#allocation8 + $0x16c] sm:$0xf0]  ;;  %v12127_v41 = vor.u32 %v13161_v17, %v12126_v29 }
 0x515   : > { %8142 = vmatpush.bf16.msrb.mxu0 %v12031_v30  ;;  %8168 = vmatpush.bf16.msrb.mxu2 %v12035_v15  ;;  %v12155_v15 = vor.u32 %v13164_v26, %v12152_v7  ;;  %v13141_v45 = vld [vmem:[#allocation8 + $0x15c] sm:$0xf]  ;;  %v12064_v12 = vld [vmem:[#allocation8 + $0x170] sm:$0xf0]  ;;  %v12102_v40 = vld [vmem:[#allocation8 + $0x1b0] sm:$0xf] }
 0x516   : > { %7415 = vmatmul.bf16.vlgmr.msra.gmra.mxu1 %v14903_v37  ;;  %7441 = vmatmul.bf16.vlgmr.msra.gmra.mxu3 %v14903_v37  ;;  %v1280_v37 = vld [vmem:[%s1278_s1] ss:$8 sm:$0x30]  ;;  %v13152_v14 = vld [vmem:[#allocation8 + $0x1b4] sm:$0xf]  ;;  %v12067_v56 = vor.u32 %v13141_v45, %v12064_v12  ;;  %s1451_s1 = sshra.s32 %s15583_s11, 3 }
 0x517   : > { %v1281_v39 = vor.u32 %v1280_v37, %v1279_v21  ;;  %8154 = vmatpush.bf16.msrb.mxu1 %v12247_v23  ;;  %8180 = vmatpush.bf16.msrb.mxu3 %v12251_v24  ;;  %v14986_v21 = vld [vmem:[%s15235_s3] sm:$0x3f]  ;;  %v12200_v37 = vld [vmem:[#allocation8 + $0x288] sm:$0xf0]  ;;  %v12128_v24 = vld [vmem:[#allocation8 + $0x1f8] sm:$0xf0] }
 0x518   : > { %v12203_v47 = vor.u32 %v13176_v52, %v12200_v37  ;;  %v6798_v3 = vperm.slane %v14986_v21, 0  ;;  %v6799_v10 = vperm.slane %v14986_v21, 1  ;;  %v13158_v23 = vld [vmem:[#allocation8 + $0x1e4] sm:$0xf]  ;;  %v13155_v31 = vld [vmem:[#allocation8 + $0x1c4] sm:$0xf0] }
 0x519   : > { %1283 = vst.msk [vmem:[#allocation2 + $0x120] ss:$8 sm:$0xf] %vm13960_vm0, %v1281_v39  ;;  %8143 = vmatpush.bf16.msrb.mxu0 %v12007_v28  ;;  %8169 = vmatpush.bf16.msrb.mxu2 %v12011_v32  ;;  %v11886_v28 = vld [vmem:[#allocation8] sm:$0xf]  ;;  %v12103_v49 = vor.u32 %v13155_v31, %v12102_v40  ;;  %v6800_v29 = vperm.slane %v14986_v21, 2 }
 0x51a   : > { %1284 = vst.msk [vmem:[#allocation2 + $0x120] ss:$8 sm:$0x30] %vm13960_vm0, %v1281_v39  ;;  %v11958_v39 = vld [vmem:[#allocation8 + $0x90] sm:$0xf]  ;;  %s9119_s18 = smul.u32 48, %s1451_s1 }
 0x51b   : > { %8155 = vmatpush.bf16.msrb.mxu1 %v12223_v33  ;;  %8181 = vmatpush.bf16.msrb.mxu3 %v12227_v43  ;;  %v11959_v58 = vor.u32 %v13119_v48, %v11958_v39  ;;  %v11888_v32 = vld [vmem:[#allocation8 + $0x18] sm:$0xf0]  ;;  %v12062_v33 = vld [vmem:[#allocation8 + $0x158] sm:$0xf]  ;;  %v12131_v43 = vor.u32 %v13158_v23, %v12128_v24  ;;  %v12104_v52 = vld [vmem:[#allocation8 + $0x1c8] sm:$0xf0] }
 0x51c   : > { %v11891_v39 = vor.u32 %v13098_v63, %v11888_v32  ;;  %v13135_v50 = vld [vmem:[#allocation8 + $0x12c] sm:$0xf]  ;;  %v12040_v53 = vld [vmem:[#allocation8 + $0x140] sm:$0xf0]  ;;  %v12078_v59 = vld [vmem:[#allocation8 + $0x180] sm:$0xf]  ;;  %s15098_s4 = sadd.s32 %s9119_s18, %s1454_s26 }
 0x51d   : > { %8144 = vmatpush.bf16.msrb.mxu0 %v11983_v38  ;;  %8170 = vmatpush.bf16.msrb.mxu2 %v11987_v42  ;;  %v11887_v42 = vor.u32 %v13101_v1, %v11886_v28  ;;  %v13149_v2 = vld [vmem:[#allocation8 + $0x194] sm:$0xf0]  ;;  %v13146_v57 = vld [vmem:[#allocation8 + $0x184] sm:$0xf]  ;;  %v13189_v11 = vld [vmem:[#allocation8 + $0x2dc] sm:$0xf] }
 0x51e   : > { %v12256_v26 = vld [vmem:[#allocation8 + $0x2f0] sm:$0xf0]  ;;  %v12014_v20 = vld [vmem:[#allocation8 + $0xf8] sm:$0xf]  ;;  %v13132_v61 = vld [vmem:[#allocation8 + $0x10c] sm:$0xf0]  ;;  %v12079_v22 = vor.u32 %v13149_v2, %v12078_v59 }
 0x51f   : > { %8156 = vmatpush.bf16.msrb.mxu1 %v12199_v46  ;;  %8182 = vmatpush.bf16.msrb.mxu3 %v12203_v47  ;;  %v12063_v46 = vor.u32 %v13144_v35, %v12062_v33  ;;  %v12038_v47 = vld [vmem:[#allocation8 + $0x128] sm:$0xf]  ;;  %v12015_v23 = vor.u32 %v13132_v61, %v12014_v20  ;;  %v13186_v24 = vld [vmem:[#allocation8 + $0x2bc] sm:$0xf0]  ;;  %v13123_v33 = vld [vmem:[#allocation8 + $0xcc] sm:$0xf] }
 0x520   : > { %v6692_v30 = vld [vmem:[#allocation2 + $0x120] sm:$0xff]  ;;  %v6693_v37 = vld [vmem:[#allocation2 + $0x128] sm:$0xff]  ;;  %v12206_v12 = vld [vmem:[#allocation8 + $0x278] sm:$0xf]  ;;  %s1511_s11 = sshra.s32 %s15595_s24, 3  ;;  %s1531_s10 = sshra.s32 %s15597_s23, 3 }
 0x521   : > { %8145 = vmatpush.bf16.msrb.mxu0 %v11959_v58  ;;  %8171 = vmatpush.bf16.msrb.mxu2 %v11963_v51  ;;  %v13138_v58 = vld [vmem:[#allocation8 + $0x13c] sm:$0xf0]  ;;  %v12107_v51 = vor.u32 %v13152_v14, %v12104_v52  ;;  %v12230_v17 = vld [vmem:[#allocation8 + $0x2a8] sm:$0xf]  ;;  %v11992_v35 = vld [vmem:[#allocation8 + $0xe0] sm:$0xf0] }
 0x522   : > { %v12039_v13 = vor.u32 %v13138_v58, %v12038_v47  ;;  %v11990_v1 = vld [vmem:[#allocation8 + $0xc8] sm:$0xf]  ;;  %v13126_v63 = vld [vmem:[#allocation8 + $0xdc] sm:$0xf0]  ;;  %v13180_v31 = vld [vmem:[#allocation8 + $0x28c] sm:$0xf0] }
 0x523   : > { %8157 = vmatpush.bf16.msrb.mxu1 %v12175_v5  ;;  %8183 = vmatpush.bf16.msrb.mxu3 %v12179_v8  ;;  %v13177_v14 = vld [vmem:[#allocation8 + $0x27c] sm:$0xf]  ;;  %v12208_v52 = vld [vmem:[#allocation8 + $0x290] sm:$0xf0]  ;;  %v11966_v47 = vld [vmem:[#allocation8 + $0x98] sm:$0xf] }
 0x524   : > { %v11968_v58 = vld [vmem:[#allocation8 + $0xb0] sm:$0xf0]  ;;  %v13174_v59 = vld [vmem:[#allocation8 + $0x25c] sm:$0xf0]  ;;  %v13111_v61 = vld [vmem:[#allocation8 + $0x6c] sm:$0xf] }
 0x525   : > { %8146 = vmatpush.bf16.msrb.mxu0 %v11935_v6  ;;  %8172 = vmatpush.bf16.msrb.mxu2 %v11939_v18  ;;  %v13192_v6 = vld [vmem:[#allocation8 + $0x2ec] sm:$0xf0]  ;;  %v12043_v18 = vor.u32 %v13135_v50, %v12040_v53  ;;  %v12182_v53 = vld [vmem:[#allocation8 + $0x248] sm:$0xf]  ;;  %s9131_s20 = smul.u32 48, %s1491_s2  ;;  %s1571_s28 = sshra.s32 %s15601_s9, 3 }
 0x526   : > { %v12183_v20 = vor.u32 %v13174_v59, %v12182_v53  ;;  %s9137_s27 = smul.u32 48, %s1511_s11  ;;  %s1514_s1 = sand.u32 7, %s15595_s24 }
 0x527   : > { %8158 = vmatpush.bf16.msrb.mxu1 %v12151_v0  ;;  %8184 = vmatpush.bf16.msrb.mxu3 %v12155_v15  ;;  %v12016_v0 = vld [vmem:[#allocation8 + $0x110] sm:$0xf0]  ;;  %s9143_s21 = smul.u32 48, %s1531_s10  ;;  %s1534_s8 = sand.u32 7, %s15597_s23 }
 0x528   : > { %s9155_s26 = smul.u32 48, %s1571_s28  ;;  %s1554_s18 = sand.u32 7, %s15599_s15 }
 0x529   : > { %8147 = vmatpush.bf16.msrb.mxu0 %v11911_v60  ;;  %8173 = vmatpush.bf16.msrb.mxu2 %v11915_v27  ;;  %v12259_v60 = vor.u32 %v13189_v11, %v12256_v26  ;;  %v13114_v11 = vld [vmem:[#allocation8 + $0x7c] sm:$0xf0]  ;;  %s1574_s22 = sand.u32 7, %s15601_s9  ;;  %s1497_s7 = sadd.s32 %s9131_s20, %s1494_s19 }
 0x52a   : > { %s1517_s13 = sadd.s32 %s9137_s27, %s1514_s1  ;;  %s15109_s16 = sadd.s32 %s9143_s21, %s1534_s8 }
 0x52b   : > { %8159 = vmatpush.bf16.msrb.mxu1 %v12127_v41  ;;  %8185 = vmatpush.bf16.msrb.mxu3 %v12131_v43  ;;  %v6694_v41 = vld [vmem:[#allocation2 + $0x130] sm:$0xff]  ;;  %v12231_v43 = vor.u32 %v13186_v24, %v12230_v17  ;;  %v13165_v17 = vld [vmem:[#allocation8 + $0x21c] sm:$0xf]  ;;  %s15111_s5 = sadd.s32 %s9149_s6, %s1554_s18  ;;  %s15113_s2 = sadd.s32 %s9155_s26, %s1574_s22 }
 0x52c   : > { %s1438_s11 = scalar_lea.vmem [#allocation5], %s15096_s17  ;;  %s1458_s24 = scalar_lea.vmem [#allocation5], %s15098_s4 }
 0x52d   : > { %8148 = vmatpush.bf16.msrb.mxu0 %v11887_v42  ;;  %8174 = vmatpush.bf16.msrb.mxu2 %v11891_v39  ;;  %v11991_v42 = vor.u32 %v13126_v63, %v11990_v1  ;;  %v6801_v39 = vperm.slane %v14986_v21, 3  ;;  %v6802_v1 = vperm.slane %v14986_v21, 4  ;;  %s1478_s12 = scalar_lea.vmem [#allocation5], %s1477_s14  ;;  %s1498_s23 = scalar_lea.vmem [#allocation5], %s1497_s7 }
 0x52e   : > { %s1518_s17 = scalar_lea.vmem [#allocation5], %s1517_s13  ;;  %s1538_s9 = scalar_lea.vmem [#allocation5], %s15109_s16 }
 0x52f   : > { %8160 = vmatpush.bf16.msrb.mxu1 %v12103_v49  ;;  %8186 = vmatpush.bf16.msrb.mxu3 %v12107_v51  ;;  %v12207_v49 = vor.u32 %v13180_v31, %v12206_v12  ;;  %v12211_v51 = vor.u32 %v13177_v14, %v12208_v52  ;;  %v12134_v12 = vld [vmem:[#allocation8 + $0x1e8] sm:$0xf]  ;;  %v13159_v31 = vld [vmem:[#allocation8 + $0x1ec] sm:$0xf]  ;;  %v12136_v14 = vld [vmem:[#allocation8 + $0x200] sm:$0xf0] }
 0x530   : > { %v12139_v59 = vor.u32 %v13159_v31, %v12136_v14  ;;  %v6697_v14 = vld [vmem:[#allocation2 + $0x148] sm:$0xff]  ;;  %s1558_s4 = scalar_lea.vmem [#allocation5], %s15111_s5  ;;  %s1578_s15 = scalar_lea.vmem [#allocation5], %s15113_s2 }
 0x531   : > { %8193 = vmatpush.bf16.msra.mxu0 %v12063_v46  ;;  %8219 = vmatpush.bf16.msra.mxu2 %v12067_v56  ;;  %v11995_v46 = vor.u32 %v13123_v33, %v11992_v35  ;;  %v13117_v56 = vld [vmem:[#allocation8 + $0x9c] sm:$0xf]  ;;  %v11920_v35 = vld [vmem:[#allocation8 + $0x50] sm:$0xf0]  ;;  %s15392_s10 = sld [smem:[#allocation24_spill]]  ;;  %s8414_s1 = sshll.u32 %s14101_s29, 4  ;;  %s15173_s1 = int_to_ptr.vmem [resolvable:$true] %s8414_s1 }
 0x532   : > { %v13105_v33 = vld [vmem:[#allocation8 + $0x3c] sm:$0xf]  ;;  %s15394_s19 = sld [smem:[#allocation41_spill]]  ;;  %s15396_s14 = sshll.u32 %s15393_s30, 4 }
 0x533   : > { %8161 = vmatpush.bf16.msrb.mxu1 %v12079_v22  ;;  %s15395_s18 = sld [smem:[#allocation42_spill]]  ;;  %s15177_s7 = scalar_lea.vmem [#allocation12], %s15396_s14 }
 0x534   : > { %s8432_s16 = sshll.u32 %s15177_s7, 4  ;;  %s8397_s2 = scalar_lea.sflag [#allocation7], %s15393_s30  ;;  %s15183_s16 = int_to_ptr.vmem [resolvable:$true] %s8432_s16 }
 0x535   : > { %8194 = vmatpush.bf16.msra.mxu0 %v12039_v13  ;;  %8220 = vmatpush.bf16.msra.mxu2 %v12043_v18  ;;  %v11971_v13 = vor.u32 %v13117_v56, %v11968_v58  ;;  %v13099_v58 = vld [vmem:[#allocation8 + $0xc] sm:$0xf] }
 0x537   : > { %s13194_s20 = sshll.u32 %s15392_s10, 4 }
 0x538   : > { %s8413_s21 = scalar_lea.hbm %s15394_s19, %s13194_s20 }
 0x539   : > { %8195 = vmatpush.bf16.msra.mxu0 %v12015_v23  ;;  %v12160_v23 = vld [vmem:[#allocation8 + $0x230] sm:$0xf0]  ;;  %s8416_s6 = sshll.u32 %s8413_s21, 4  ;;  %s8430_s22 = scalar_lea.hbm %s15395_s18, %s13194_s20  ;;  %s8417_s6 = int_to_ptr.hbm [resolvable:$true] %s8416_s6 }
 0x53a   : > { %s8434_s5 = sshll.u32 %s8430_s22, 4  ;;  %s15185_s5 = int_to_ptr.hbm [resolvable:$true] %s8434_s5 }
 0x53d   : > { %8196 = vmatpush.bf16.msra.mxu0 %v11991_v42  ;;  %v13162_v42 = vld [vmem:[#allocation8 + $0x1fc] sm:$0xf0] }
 0x53e   : > { %v12135_v53 = vor.u32 %v13162_v42, %v12134_v12 }
 0x56d   : > { %v7299_v4 = vpop.f32.mrf.mxu0 }
 0x56e   : > { %v7300_v16 = vadd.f32 %v7299_v4, %v6798_v3  ;;  %v12080_v3 = vld [vmem:[#allocation8 + $0x198] sm:$0xf0]  ;;  %v12254_v4 = vld [vmem:[#allocation8 + $0x2d8] sm:$0xf] }
 0x573   : > { %v7312_v9 = vpop.f32.mrf.mxu1  ;;  %v7325_v25 = vpop.f32.mrf.mxu2 }
 0x574   : > { %v7313_v62 = vadd.f32 %v7312_v9, %v7300_v16  ;;  %v7326_v54 = vadd.f32 %v7325_v25, %v6799_v10  ;;  %v13129_v10 = vld [vmem:[#allocation8 + $0xfc] sm:$0xf]  ;;  %v12255_v16 = vor.u32 %v13192_v6, %v12254_v4  ;;  %v13183_v9 = vld [vmem:[#allocation8 + $0x2ac] sm:$0xf]  ;;  %v12232_v25 = vld [vmem:[#allocation8 + $0x2c0] sm:$0xf0] }
 0x575   : > { %v7301_v55 = vpop.f32.mrf.mxu0  ;;  %v12019_v28 = vor.u32 %v13129_v10, %v12016_v0  ;;  %v12235_v45 = vor.u32 %v13183_v9, %v12232_v25  ;;  %v12184_v4 = vld [vmem:[#allocation8 + $0x260] sm:$0xf0]  ;;  %v11942_v6 = vld [vmem:[#allocation8 + $0x68] sm:$0xf]  ;;  %v12158_v0 = vld [vmem:[#allocation8 + $0x218] sm:$0xf] }
 0x576   : > { %v7446_v38 = vadd.f32 %v7313_v62, %v6692_v30  ;;  %v12083_v30 = vor.u32 %v13146_v57, %v12080_v3  ;;  %8206 = vmatpush.bf16.msra.mxu1 %v12255_v16  ;;  %v13171_v3 = vld [vmem:[#allocation8 + $0x24c] sm:$0xf]  ;;  %v11943_v16 = vor.u32 %v13114_v11, %v11942_v6  ;;  %v13153_v6 = vld [vmem:[#allocation8 + $0x1bc] sm:$0xf]  ;;  %v12112_v11 = vld [vmem:[#allocation8 + $0x1d0] sm:$0xf0] }
 0x577   : > { %8221 = vmatpush.bf16.msra.mxu2 %v12019_v28  ;;  %v12187_v10 = vor.u32 %v13171_v3, %v12184_v4  ;;  %v13108_v28 = vld [vmem:[#allocation8 + $0x4c] sm:$0xf0] }
 0x578   : > { %v11878_v48 = vmul.f32 -1.442695, %v7446_v38  ;;  %8187 = vmatpush.bf16.msrb.mxu3 %v12083_v30 }
 0x579   : > { %v7338_v36 = vpop.f32.mrf.mxu3 }
 0x57a   : > { %13403 = vpow2.f32 %v11878_v48  ;;  %v7339_v34 = vadd.f32 %v7338_v36, %v7326_v54  ;;  %v13120_v48 = vld [vmem:[#allocation8 + $0xac] sm:$0xf0]  ;;  %8207 = vmatpush.bf16.msra.mxu1 %v12231_v43 }
 0x57b   : > { %v7314_v5 = vpop.f32.mrf.mxu1  ;;  %v7327_v8 = vpop.f32.mrf.mxu2  ;;  %v11967_v57 = vor.u32 %v13120_v48, %v11966_v47  ;;  %8222 = vmatpush.bf16.msra.mxu2 %v11995_v46  ;;  %v11923_v46 = vor.u32 %v13105_v33, %v11920_v35  ;;  %v11894_v47 = vld [vmem:[#allocation8 + $0x8] sm:$0xf]  ;;  %v13102_v48 = vld [vmem:[#allocation8 + $0x1c] sm:$0xf0] }
 0x57c   : > { %v7447_v7 = vadd.f32 %v7339_v34, %v6693_v37  ;;  %8232 = vmatpush.bf16.msra.mxu3 %v12259_v60  ;;  %v6695_v34 = vld [vmem:[#allocation2 + $0x138] sm:$0xff]  ;;  %v13168_v60 = vld [vmem:[#allocation8 + $0x22c] sm:$0xf0] }
 0x57d   : > { %v7351_v19 = vpop.f32.mrf.mxu0  ;;  %8197 = vmatpush.bf16.msra.mxu0 %v11967_v57  ;;  %v12159_v43 = vor.u32 %v13168_v60, %v12158_v0  ;;  %v13156_v57 = vld [vmem:[#allocation8 + $0x1cc] sm:$0xf0]  ;;  %v13150_v60 = vld [vmem:[#allocation8 + $0x19c] sm:$0xf0] }
 0x57e   : > { %v11879_v15 = vmul.f32 -1.442695, %v7447_v7  ;;  %v7352_v55 = vadd.f32 %v7351_v19, %v6800_v29  ;;  %v11944_v19 = vld [vmem:[#allocation8 + $0x80] sm:$0xf0]  ;;  %8208 = vmatpush.bf16.msra.mxu1 %v12207_v49 }
 0x57f   : > { %8223 = vmatpush.bf16.msra.mxu2 %v11971_v13  ;;  %v11947_v25 = vor.u32 %v13111_v61, %v11944_v19  ;;  %v11895_v13 = vor.u32 %v13102_v48, %v11894_v47 }
 0x580   : > { %v13404_v27 = vpop.eup %13403  ;;  %13405 = vpow2.f32 %v11879_v15  ;;  %8233 = vmatpush.bf16.msra.mxu3 %v12235_v45  ;;  %v12163_v45 = vor.u32 %v13165_v17, %v12160_v23  ;;  %v12088_v23 = vld [vmem:[#allocation8 + $0x1a0] sm:$0xf0] }
 0x581   : > { %v14991_v62 = vadd.f32 1.0, %v13404_v27  ;;  %v7340_v32 = vpop.f32.mrf.mxu3  ;;  %v11918_v27 = vld [vmem:[#allocation8 + $0x38] sm:$0xf]  ;;  %8198 = vmatpush.bf16.msra.mxu0 %v11943_v16  ;;  %v12086_v16 = vld [vmem:[#allocation8 + $0x188] sm:$0xf] }
 0x582   : > { %8209 = vmatpush.bf16.msra.mxu1 %v12183_v20 }
 0x583   : > { %13407 = vrcp.f32 %v14991_v62  ;;  %v7364_v40 = vpop.f32.mrf.mxu1  ;;  %v7377_v38 = vpop.f32.mrf.mxu2  ;;  %v7465_v18 = vand.u32 2147483647, %v14991_v62  ;;  %v7467_v32 = vand.u32 2147483648, %v14991_v62  ;;  %8224 = vmatpush.bf16.msra.mxu2 %v11947_v25  ;;  %vm7461_vm8 = vweird.f32 %v14991_v62  ;;  %v12022_v25 = vld [vmem:[#allocation8 + $0x100] sm:$0xf] }
 0x584   : > { %v7365_v37 = vadd.f32 %v7364_v40, %v7352_v55  ;;  %v7378_v8 = vadd.f32 %v7377_v38, %v6801_v39  ;;  %8234 = vmatpush.bf16.msra.mxu3 %v12211_v51  ;;  %v11919_v38 = vor.u32 %v13108_v28, %v11918_v27 }
 0x585   : > { %v7353_v54 = vpop.f32.mrf.mxu0  ;;  %v7468_v20 = vor.u32 1.1754944e-38, %v7467_v32  ;;  %vm7466_vm10 = vcmp.eq.f32.partialorder %v7465_v18, 8.507059e+37  ;;  %v13147_v18 = vld [vmem:[#allocation8 + $0x18c] sm:$0xf] }
 0x586   : > { %v13406_v50 = vpop.eup %13405  ;;  %v7486_v36 = vadd.f32 %v7365_v37, %v6694_v41  ;;  %8210 = vmatpush.bf16.msra.mxu1 %v12159_v43  ;;  %8199 = vmatpush.bf16.msra.mxu0 %v11919_v38  ;;  %v12091_v35 = vor.u32 %v13147_v18, %v12088_v23  ;;  %v13190_v18 = vld [vmem:[#allocation8 + $0x2e4] sm:$0xf]  ;;  %v12264_v23 = vld [vmem:[#allocation8 + $0x2f8] sm:$0xf0] }
 0x587   : > { %v14995_v2 = vadd.f32 1.0, %v13406_v50  ;;  %v11896_v50 = vld [vmem:[#allocation8 + $0x20] sm:$0xf0]  ;;  %8225 = vmatpush.bf16.msra.mxu2 %v11923_v46 }
 0x588   : > { %v11880_v5 = vmul.f32 -1.442695, %v7486_v36  ;;  %8235 = vmatpush.bf16.msra.mxu3 %v12187_v10  ;;  %v11899_v19 = vor.u32 %v13099_v58, %v11896_v50 }
 0x589   : > { %v14997_v26 = vpop.eup %13407  ;;  %13409 = vrcp.f32 %v14995_v2  ;;  %v7390_v7 = vpop.f32.mrf.mxu3  ;;  %vm7476_vm12 = vweird.f32 %v14995_v2 }
 0x58a   : > { %13411 = vpow2.f32 %v11880_v5  ;;  %v7391_v22 = vadd.f32 %v7390_v7, %v7378_v8  ;;  %v7457_v30 = vmul.f32 %v14997_v26, %v14991_v62  ;;  %vm7462_vm7 = vweird.f32 %v14997_v26  ;;  %8211 = vmatpush.bf16.msra.mxu1 %v12135_v53  ;;  %8200 = vmatpush.bf16.msra.mxu0 %v11895_v13  ;;  %v12072_v13 = vld [vmem:[#allocation8 + $0x178] sm:$0xf0] }
 0x58b   : > { %v7366_v15 = vpop.f32.mrf.mxu1  ;;  %v7379_v29 = vpop.f32.mrf.mxu2  ;;  %vm15017_vm9 = vmor %vm7461_vm8, %vm7462_vm7  ;;  %v6803_v5 = vperm.slane %v14986_v21, 5  ;;  %8226 = vmatpush.bf16.msra.mxu2 %v11899_v19 }
 0x58c   : > { %v7487_v24 = vadd.f32 %v7391_v22, %v6695_v34  ;;  %v7458_v9 = vsub.f32 1.0, %v7457_v30  ;;  %8236 = vmatpush.bf16.msra.mxu3 %v12163_v45  ;;  %v12110_v34 = vld [vmem:[#allocation8 + $0x1b8] sm:$0xf]  ;;  %v7482_v15 = vand.u32 2147483648, %v14995_v2  ;;  %v12115_v29 = vor.u32 %v13153_v6, %v12112_v11 }
 0x58d   : > { %v7403_v63 = vpop.f32.mrf.mxu0  ;;  %v12111_v21 = vor.u32 %v13156_v57, %v12110_v34  ;;  %v13455_v57 = vld [vmem:[%s14101_s29 + $0x50] sm:$0xff] }
 0x58e   : > { %v11881_v55 = vmul.f32 -1.442695, %v7487_v24  ;;  %v7459_v41 = vmul.f32 %v14997_v26, %v7458_v9  ;;  %v7404_v36 = vadd.f32 %v7403_v63, %v6802_v1  ;;  %v6696_v24 = vld [vmem:[#allocation2 + $0x140] sm:$0xff]  ;;  %v12087_v1 = vor.u32 %v13150_v60, %v12086_v16  ;;  %v13456_v60 = vld [vmem:[%s14101_s29 + $0x58] sm:$0xff] }
 0x58f   : > { %v15006_v40 = vpop.eup %13409  ;;  %v7483_v33 = vor.u32 1.1754944e-38, %v7482_v15  ;;  %8212 = vmatpush.bf16.msra.mxu1 %v12111_v21 }
 0x590   : > { %v13412_v52 = vpop.eup %13411  ;;  %13413 = vpow2.f32 %v11881_v55  ;;  %v7460_v37 = vadd.f32 %v14997_v26, %v7459_v41  ;;  %v7472_v39 = vmul.f32 %v15006_v40, %v14995_v2  ;;  %vm7477_vm11 = vweird.f32 %v15006_v40  ;;  %8237 = vmatpush.bf16.msra.mxu3 %v12139_v59  ;;  %v12070_v59 = vld [vmem:[#allocation8 + $0x160] sm:$0xf] }
 0x591   : > { %v15012_v54 = vadd.f32 1.0, %v13412_v52  ;;  %v7392_v56 = vpop.f32.mrf.mxu3  ;;  %vm15038_vm13 = vmor %vm7476_vm12, %vm7477_vm11 }
 0x592   : > { %v7473_v51 = vsub.f32 1.0, %v7472_v39  ;;  %v7464_v4 = vsel %vm15017_vm9, %v14997_v26, %v7460_v37  ;;  %v7480_v26 = vand.u32 2147483647, %v14995_v2 }
 0x593   : > { %13415 = vrcp.f32 %v15012_v54  ;;  %v7416_v3 = vpop.f32.mrf.mxu1  ;;  %v7429_v8 = vpop.f32.mrf.mxu2  ;;  %v7469_v10 = vsel %vm7466_vm10, %v7468_v20, %v7464_v4  ;;  %v7507_v38 = vand.u32 2147483648, %v15012_v54  ;;  %8213 = vmatpush.bf16.msra.mxu1 %v12087_v1  ;;  %vm7501_vm1 = vweird.f32 %v15012_v54  ;;  %v12024_v1 = vld [vmem:[#allocation8 + $0x118] sm:$0xf0] }
 0x594   : > { %v7417_v7 = vadd.f32 %v7416_v3, %v7404_v36  ;;  %v7474_v61 = vmul.f32 %v15006_v40, %v7473_v51  ;;  %v7430_v9 = vadd.f32 %v7429_v8, %v6803_v5  ;;  %8238 = vmatpush.bf16.msra.mxu3 %v12115_v29  ;;  %vm7481_vm14 = vcmp.eq.f32.partialorder %v7480_v26, 8.507059e+37  ;;  %v13145_v5 = vld [vmem:[#allocation8 + $0x174] sm:$0xf0]  ;;  %v13142_v8 = vld [vmem:[#allocation8 + $0x164] sm:$0xf] }
 0x595   : > { %v7405_v22 = vpop.f32.mrf.mxu0  ;;  %v7508_v46 = vor.u32 1.1754944e-38, %v7507_v38  ;;  %v12075_v19 = vor.u32 %v13142_v8, %v12072_v13  ;;  %v13139_v26 = vld [vmem:[#allocation8 + $0x144] sm:$0xf0]  ;;  %v12262_v29 = vld [vmem:[#allocation8 + $0x2e0] sm:$0xf] }
 0x596   : > { %v13414_v30 = vpop.eup %13413  ;;  %v7475_v0 = vadd.f32 %v15006_v40, %v7474_v61  ;;  %v7526_v62 = vmul.f32 %v7469_v10, %v7417_v7  ;;  %v12071_v61 = vor.u32 %v13145_v5, %v12070_v59  ;;  %v12046_v22 = vld [vmem:[#allocation8 + $0x130] sm:$0xf]  ;;  %v13136_v10 = vld [vmem:[#allocation8 + $0x134] sm:$0xf]  ;;  %v13175_v59 = vld [vmem:[#allocation8 + $0x264] sm:$0xf0] }
 0x597   : > { %v15033_v17 = vadd.f32 1.0, %v13414_v30  ;;  %v11998_v38 = vld [vmem:[#allocation8 + $0xd0] sm:$0xf]  ;;  %v13115_v8 = vld [vmem:[#allocation8 + $0x84] sm:$0xf0] }
 0x598   : > { %v7479_v2 = vsel %vm15038_vm13, %v15006_v40, %v7475_v0  ;;  %v7528_v55 = vadd.f32 %v7526_v62, %v6696_v24  ;;  %v7505_v40 = vand.u32 2147483647, %v15012_v54  ;;  %8239 = vmatpush.bf16.msra.mxu3 %v12091_v35  ;;  %v12048_v0 = vld [vmem:[#allocation8 + $0x148] sm:$0xf0]  ;;  %v13193_v62 = vld [vmem:[#allocation8 + $0x2f4] sm:$0xf0]  ;;  %v12047_v24 = vor.u32 %v13139_v26, %v12046_v22 }
 0x599   : > { %v13416_v27 = vpop.eup %13415  ;;  %13417 = vrcp.f32 %v15033_v17  ;;  %v7442_v28 = vpop.f32.mrf.mxu3  ;;  %v7484_v12 = vsel %vm7481_vm14, %v7483_v33, %v7479_v2  ;;  %v7522_v50 = vand.u32 2147483648, %v15033_v17  ;;  %v7520_v53 = vand.u32 2147483647, %v15033_v17  ;;  %v13130_v2 = vld [vmem:[#allocation8 + $0x104] sm:$0xf] }
 0x59a   : > { %v7497_v63 = vmul.f32 %v13416_v27, %v15012_v54  ;;  %v7443_v32 = vadd.f32 %v7442_v28, %v7430_v9  ;;  %vm7502_vm15 = vweird.f32 %v13416_v27  ;;  %13419 = vtanh.f32 %v7528_v55  ;;  %v13133_v28 = vld [vmem:[#allocation8 + $0x114] sm:$0xf0]  ;;  %v12238_v33 = vld [vmem:[#allocation8 + $0x2b0] sm:$0xf]  ;;  %v13187_v35 = vld [vmem:[#allocation8 + $0x2c4] sm:$0xf0] }
 0x59b   : > { %v7418_v41 = vpop.f32.mrf.mxu1  ;;  %v7431_v43 = vpop.f32.mrf.mxu2  ;;  %vm7503_vm2 = vmor %vm7501_vm1, %vm7502_vm15  ;;  %vm7506_vm3 = vcmp.eq.f32.partialorder %v7505_v40, 8.507059e+37  ;;  %vm7516_vm5 = vweird.f32 %v15033_v17  ;;  %v7523_v6 = vor.u32 1.1754944e-38, %v7522_v50  ;;  %vm7521_vm7 = vcmp.eq.f32.partialorder %v7520_v53, 8.507059e+37  ;;  %v12000_v40 = vld [vmem:[#allocation8 + $0xe8] sm:$0xf0] }
 0x59c   : > { %v7498_v45 = vsub.f32 1.0, %v7497_v63  ;;  %v7527_v42 = vmul.f32 %v7484_v12, %v7443_v32  ;;  %v12051_v9 = vor.u32 %v13136_v10, %v12048_v0  ;;  %v12263_v63 = vor.u32 %v13193_v62, %v12262_v29  ;;  %v13184_v41 = vld [vmem:[#allocation8 + $0x2b4] sm:$0xf]  ;;  %v12240_v43 = vld [vmem:[#allocation8 + $0x2c8] sm:$0xf0] }
 0x59d   : > { %v12267_v32 = vor.u32 %v13190_v18, %v12264_v23  ;;  %v12027_v12 = vor.u32 %v13130_v2, %v12024_v1  ;;  %v13121_v50 = vld [vmem:[#allocation8 + $0xb4] sm:$0xf0]  ;;  %v11950_v5 = vld [vmem:[#allocation8 + $0x70] sm:$0xf]  ;;  %v13112_v13 = vld [vmem:[#allocation8 + $0x74] sm:$0xf] }
 0x59e   : > { %v7499_v31 = vmul.f32 %v13416_v27, %v7498_v45  ;;  %v7529_v47 = vadd.f32 %v7527_v42, %v6697_v14  ;;  %v12023_v45 = vor.u32 %v13133_v28, %v12022_v25  ;;  %v13127_v42 = vld [vmem:[#allocation8 + $0xe4] sm:$0xf0]  ;;  %v12239_v14 = vor.u32 %v13187_v35, %v12238_v33  ;;  %v13166_v22 = vld [vmem:[#allocation8 + $0x224] sm:$0xf]  ;;  %v12168_v26 = vld [vmem:[#allocation8 + $0x238] sm:$0xf0] }
 0x59f   : > { %v13418_v52 = vpop.eup %13417  ;;  %v11926_v0 = vld [vmem:[#allocation8 + $0x40] sm:$0xf]  ;;  %v13106_v29 = vld [vmem:[#allocation8 + $0x44] sm:$0xf]  ;;  %v12142_v62 = vld [vmem:[#allocation8 + $0x1f0] sm:$0xf] }
 0x5a0   : > { %v7512_v37 = vmul.f32 %v13418_v52, %v15033_v17  ;;  %v7500_v39 = vadd.f32 %v13416_v27, %v7499_v31  ;;  %vm7517_vm4 = vweird.f32 %v13418_v52  ;;  %v13420_v54 = vpop.eup %13419  ;;  %13421 = vtanh.f32 %v7529_v47  ;;  %v13124_v31 = vld [vmem:[#allocation8 + $0xd4] sm:$0xf]  ;;  %v12216_v47 = vld [vmem:[#allocation8 + $0x298] sm:$0xf0]  ;;  %v13163_v18 = vld [vmem:[#allocation8 + $0x204] sm:$0xf0] }
 0x5a1   : > { %v7444_v48 = vpop.f32.mrf.mxu3  ;;  %vm7518_vm6 = vmor %vm7516_vm5, %vm7517_vm4  ;;  %v13160_v23 = vld [vmem:[#allocation8 + $0x1f4] sm:$0xf]  ;;  %v11902_v28 = vld [vmem:[#allocation8 + $0x10] sm:$0xf] }
 0x5a2   : > { %v7513_v56 = vsub.f32 1.0, %v7512_v37  ;;  %v7504_v58 = vsel %vm7503_vm2, %v13416_v27, %v7500_v39  ;;  %v12214_v37 = vld [vmem:[#allocation8 + $0x280] sm:$0xf]  ;;  %v13181_v39 = vld [vmem:[#allocation8 + $0x294] sm:$0xf0]  ;;  %v11999_v48 = vor.u32 %v13127_v42, %v11998_v38 }
 0x5a3   : > { %v7509_v36 = vsel %vm7506_vm3, %v7508_v46, %v7504_v58  ;;  %v13178_v46 = vld [vmem:[#allocation8 + $0x284] sm:$0xf]  ;;  %v11974_v58 = vld [vmem:[#allocation8 + $0xa0] sm:$0xf]  ;;  %v13103_v2 = vld [vmem:[#allocation8 + $0x24] sm:$0xf0] }
 0x5a4   : > { %v7514_v49 = vmul.f32 %v13418_v52, %v7513_v56  ;;  %v7532_v51 = vsub.f32 1.0, %v7509_v36  ;;  %v7536_v3 = vmul.f32 %v13455_v57, %v7509_v36  ;;  %v12003_v56 = vor.u32 %v13124_v31, %v12000_v40  ;;  %v13118_v36 = vld [vmem:[#allocation8 + $0xa4] sm:$0xf]  ;;  %v12192_v57 = vld [vmem:[#allocation8 + $0x268] sm:$0xf0] }
 0x5a5   : > { %v12219_v53 = vor.u32 %v13178_v46, %v12216_v47  ;;  %v13100_v1 = vld [vmem:[#allocation8 + $0x14] sm:$0xf]  ;;  %v12118_v35 = vld [vmem:[#allocation8 + $0x1c0] sm:$0xf]  ;;  %v12094_v40 = vld [vmem:[#allocation8 + $0x190] sm:$0xf] }
 0x5a6   : > { %v7534_v34 = vmul.f32 %v13420_v54, %v7532_v51  ;;  %v7515_v4 = vadd.f32 %v13418_v52, %v7514_v49  ;;  %v13422_v15 = vpop.eup %13421  ;;  %v11976_v49 = vld [vmem:[#allocation8 + $0xb8] sm:$0xf0]  ;;  %v12215_v51 = vor.u32 %v13181_v39, %v12214_v37  ;;  %v12190_v54 = vld [vmem:[#allocation8 + $0x250] sm:$0xf]  ;;  %v12096_v37 = vld [vmem:[#allocation8 + $0x1a8] sm:$0xf0] }
 0x5a8   : > { %v15055_v11 = vadd.f32 %v7536_v3, %v7534_v34  ;;  %v7519_v7 = vsel %vm7518_vm6, %v13418_v52, %v7515_v4  ;;  %v12243_v52 = vor.u32 %v13184_v41, %v12240_v43  ;;  %v13172_v34 = vld [vmem:[#allocation8 + $0x254] sm:$0xf]  ;;  %v11975_v3 = vor.u32 %v13121_v50, %v11974_v58  ;;  %v13157_v41 = vld [vmem:[#allocation8 + $0x1d4] sm:$0xf0]  ;;  %v13154_v43 = vld [vmem:[#allocation8 + $0x1c4] sm:$0xf] }
 0x5a9   : > { %v7524_v20 = vsel %vm7521_vm7, %v7523_v6, %v7519_v7  ;;  %v11979_v4 = vor.u32 %v13118_v36, %v11976_v49  ;;  %v11952_v6 = vld [vmem:[#allocation8 + $0x88] sm:$0xf0]  ;;  %v12191_v7 = vor.u32 %v13175_v59, %v12190_v54  ;;  %v12119_v42 = vor.u32 %v13157_v41, %v12118_v35  ;;  %v1479_v50 = vld [vmem:[%s1478_s12] ss:$8 sm:$0xf] }
 0x5aa   : > { %11882 = vst [vmem:[%s14101_s29 + $0x60] sm:$0xff] %v15055_v11  ;;  %v7533_v21 = vsub.f32 1.0, %v7524_v20  ;;  %v15061_v30 = vpack.c.bf16 %v15055_v11, %v15055_v11  ;;  %v7537_v17 = vmul.f32 %v13456_v60, %v7524_v20  ;;  %v12195_v20 = vor.u32 %v13172_v34, %v12192_v57  ;;  %v1480_v36 = vld [vmem:[%s1478_s12] ss:$8 sm:$0x30] }
 0x5ab   : > { %v11955_v10 = vor.u32 %v13112_v13, %v11952_v6  ;;  %v1481_v49 = vor.u32 %v1480_v36, %v1479_v50  ;;  %v1519_v59 = vld [vmem:[%s1518_s17] ss:$8 sm:$0xf] }
 0x5ac   : > { %v7535_v16 = vmul.f32 %v13422_v15, %v7533_v21  ;;  %8149 = vmatmul.bf16.vlgmr.msrb.gmra.mxu0 %v15061_v30  ;;  %8175 = vmatmul.bf16.vlgmr.msrb.gmra.mxu2 %v15061_v30  ;;  %v11951_v21 = vor.u32 %v13115_v8, %v11950_v5  ;;  %v13109_v15 = vld [vmem:[#allocation8 + $0x54] sm:$0xf0]  ;;  %v1520_v34 = vld [vmem:[%s1518_s17] ss:$8 sm:$0x30]  ;;  %s13579_s17 = scalar_lea.hbm %s15394_s19, 256 }
 0x5ad   : > { %8245 = vmatpush.bf16.msrb.mxu0 %v12071_v61  ;;  %8271 = vmatpush.bf16.msrb.mxu2 %v12075_v19  ;;  %v12166_v61 = vld [vmem:[#allocation8 + $0x220] sm:$0xf]  ;;  %v13169_v19 = vld [vmem:[#allocation8 + $0x234] sm:$0xf0] }
 0x5ae   : > { %v15066_v27 = vadd.f32 %v7537_v17, %v7535_v16  ;;  %v11928_v16 = vld [vmem:[#allocation8 + $0x58] sm:$0xf0]  ;;  %v12167_v60 = vor.u32 %v13169_v19, %v12166_v61  ;;  %v12171_v17 = vor.u32 %v13166_v22, %v12168_v26  ;;  %1483 = vst.msk [vmem:[#allocation2 + $0x152] ss:$8 sm:$0xf] %vm13960_vm0, %v1481_v49 }
 0x5af   : > { %v11931_v25 = vor.u32 %v13106_v29, %v11928_v16  ;;  %v1539_v57 = vld [vmem:[%s1538_s9] ss:$8 sm:$0xf]  ;;  %1484 = vst.msk [vmem:[#allocation2 + $0x152] ss:$8 sm:$0x30] %vm13960_vm0, %v1481_v49 }
 0x5b0   : > { %11883 = vst [vmem:[%s14101_s29 + $0x68] sm:$0xff] %v15066_v27  ;;  %v15072_v55 = vpack.c.bf16 %v15066_v27, %v15066_v27  ;;  %v1559_v8 = vld [vmem:[%s1558_s4] ss:$8 sm:$0xf] }
 0x5b1   : > { %8246 = vmatpush.bf16.msrb.mxu0 %v12047_v24  ;;  %8272 = vmatpush.bf16.msrb.mxu2 %v12051_v9  ;;  %v12144_v24 = vld [vmem:[#allocation8 + $0x208] sm:$0xf0]  ;;  %v11927_v9 = vor.u32 %v13109_v15, %v11926_v0  ;;  %v1560_v13 = vld [vmem:[%s1558_s4] ss:$8 sm:$0x30] }
 0x5b2   : > { %8162 = vmatmul.bf16.vlgmr.msrb.gmra.mxu1 %v15072_v55  ;;  %8188 = vmatmul.bf16.vlgmr.msrb.gmra.mxu3 %v15072_v55  ;;  %v12147_v33 = vor.u32 %v13160_v23, %v12144_v24  ;;  %v1561_v6 = vor.u32 %v1560_v13, %v1559_v8  ;;  %v15155_v19 = vld [vmem:[%s15235_s3] sm:$0x3f] }
 0x5b3   : > { %8258 = vmatpush.bf16.msrb.mxu1 %v12263_v63  ;;  %8284 = vmatpush.bf16.msrb.mxu3 %v12267_v32  ;;  %v11904_v63 = vld [vmem:[#allocation8 + $0x28] sm:$0xf0]  ;;  %v12143_v32 = vor.u32 %v13163_v18, %v12142_v62  ;;  %v7649_v26 = vperm.slane %v15155_v19, 0  ;;  %v7650_v16 = vperm.slane %v15155_v19, 1 }
 0x5b4   : > { %v11907_v38 = vor.u32 %v13100_v1, %v11904_v63  ;;  %1563 = vst.msk [vmem:[#allocation2 + $0x156] ss:$8 sm:$0xf] %vm13960_vm0, %v1561_v6  ;;  %v7651_v63 = vperm.slane %v15155_v19, 2 }
 0x5b5   : > { %8247 = vmatpush.bf16.msrb.mxu0 %v12023_v45  ;;  %8273 = vmatpush.bf16.msrb.mxu2 %v12027_v12  ;;  %v12120_v45 = vld [vmem:[#allocation8 + $0x1d8] sm:$0xf0]  ;;  %v11903_v12 = vor.u32 %v13103_v2, %v11902_v28  ;;  %1564 = vst.msk [vmem:[#allocation2 + $0x156] ss:$8 sm:$0x30] %vm13960_vm0, %v1561_v6 }
 0x5b6   : > { %v12123_v31 = vor.u32 %v13154_v43, %v12120_v45 }
 0x5b7   : > { %8259 = vmatpush.bf16.msrb.mxu1 %v12239_v14  ;;  %8285 = vmatpush.bf16.msrb.mxu3 %v12243_v52  ;;  %v13151_v14 = vld [vmem:[#allocation8 + $0x1a4] sm:$0xf0]  ;;  %v13148_v52 = vld [vmem:[#allocation8 + $0x194] sm:$0xf] }
 0x5b8   : > { %v12095_v39 = vor.u32 %v13151_v14, %v12094_v40  ;;  %v12099_v46 = vor.u32 %v13148_v52, %v12096_v37 }
 0x5b9   : > { %8248 = vmatpush.bf16.msrb.mxu0 %v11999_v48  ;;  %8274 = vmatpush.bf16.msrb.mxu2 %v12003_v56  ;;  %v1459_v48 = vld [vmem:[%s1458_s24] ss:$8 sm:$0xf] }
 0x5ba   : > { %v1460_v56 = vld [vmem:[%s1458_s24] ss:$8 sm:$0x30] }
 0x5bb   : > { %8260 = vmatpush.bf16.msrb.mxu1 %v12215_v51  ;;  %8286 = vmatpush.bf16.msrb.mxu3 %v12219_v53  ;;  %v1461_v58 = vor.u32 %v1460_v56, %v1459_v48  ;;  %v1499_v51 = vld [vmem:[%s1498_s23] ss:$8 sm:$0xf] }
 0x5bc   : > { %8201 = vmatmul.bf16.vlgmr.msra.gmra.mxu0 %v15061_v30  ;;  %8227 = vmatmul.bf16.vlgmr.msra.gmra.mxu2 %v15061_v30  ;;  %v1500_v53 = vld [vmem:[%s1498_s23] ss:$8 sm:$0x30] }
 0x5bd   : > { %8249 = vmatpush.bf16.msrb.mxu0 %v11975_v3  ;;  %8275 = vmatpush.bf16.msrb.mxu2 %v11979_v4  ;;  %1463 = vst.msk [vmem:[#allocation2 + $0x151] ss:$8 sm:$0xf] %vm13960_vm0, %v1461_v58  ;;  %v1501_v54 = vor.u32 %v1500_v53, %v1499_v51  ;;  %v1521_v3 = vor.u32 %v1520_v34, %v1519_v59  ;;  %v1540_v4 = vld [vmem:[%s1538_s9] ss:$8 sm:$0x30] }
 0x5be   : > { %v1541_v5 = vor.u32 %v1540_v4, %v1539_v57  ;;  %1464 = vst.msk [vmem:[#allocation2 + $0x151] ss:$8 sm:$0x30] %vm13960_vm0, %v1461_v58  ;;  %v7653_v53 = vperm.slane %v15155_v19, 4 }
 0x5bf   : > { %8261 = vmatpush.bf16.msrb.mxu1 %v12191_v7  ;;  %8287 = vmatpush.bf16.msrb.mxu3 %v12195_v20  ;;  %1503 = vst.msk [vmem:[#allocation2 + $0x153] ss:$8 sm:$0xf] %vm13960_vm0, %v1501_v54  ;;  %v1579_v7 = vld [vmem:[%s1578_s15] ss:$8 sm:$0xf] }
 0x5c0   : > { %1523 = vst.msk [vmem:[#allocation2 + $0x154] ss:$8 sm:$0xf] %vm13960_vm0, %v1521_v3  ;;  %v1580_v20 = vld [vmem:[%s1578_s15] ss:$8 sm:$0x30] }
 0x5c1   : > { %8250 = vmatpush.bf16.msrb.mxu0 %v11951_v21  ;;  %8276 = vmatpush.bf16.msrb.mxu2 %v11955_v10  ;;  %1543 = vst.msk [vmem:[#allocation2 + $0x155] ss:$8 sm:$0xf] %vm13960_vm0, %v1541_v5  ;;  %v1581_v61 = vor.u32 %v1580_v20, %v1579_v7 }
 0x5c2   : > { %8214 = vmatmul.bf16.vlgmr.msra.gmra.mxu1 %v15072_v55  ;;  %8240 = vmatmul.bf16.vlgmr.msra.gmra.mxu3 %v15072_v55  ;;  %1504 = vst.msk [vmem:[#allocation2 + $0x153] ss:$8 sm:$0x30] %vm13960_vm0, %v1501_v54 }
 0x5c3   : > { %8262 = vmatpush.bf16.msrb.mxu1 %v12167_v60  ;;  %8288 = vmatpush.bf16.msrb.mxu3 %v12171_v17  ;;  %1583 = vst.msk [vmem:[#allocation2 + $0x157] ss:$8 sm:$0xf] %vm13960_vm0, %v1581_v61 }
 0x5c4   : > { %1524 = vst.msk [vmem:[#allocation2 + $0x154] ss:$8 sm:$0x30] %vm13960_vm0, %v1521_v3 }
 0x5c5   : > { %8251 = vmatpush.bf16.msrb.mxu0 %v11927_v9  ;;  %8277 = vmatpush.bf16.msrb.mxu2 %v11931_v25  ;;  %1544 = vst.msk [vmem:[#allocation2 + $0x155] ss:$8 sm:$0x30] %vm13960_vm0, %v1541_v5 }
 0x5c6   : > { %1584 = vst.msk [vmem:[#allocation2 + $0x157] ss:$8 sm:$0x30] %vm13960_vm0, %v1581_v61 }
 0x5c7   : > { %8263 = vmatpush.bf16.msrb.mxu1 %v12143_v32  ;;  %8289 = vmatpush.bf16.msrb.mxu3 %v12147_v33 }
 0x5c9   : > { %8252 = vmatpush.bf16.msrb.mxu0 %v11903_v12  ;;  %8278 = vmatpush.bf16.msrb.mxu2 %v11907_v38 }
 0x5cb   : > { %8264 = vmatpush.bf16.msrb.mxu1 %v12119_v42  ;;  %8290 = vmatpush.bf16.msrb.mxu3 %v12123_v31  ;;  %v7652_v42 = vperm.slane %v15155_v19, 3 }
 0x5cc   : > { %8253 = vmatmul.bf16.vlgmr.msrb.gmra.mxu0 %v15061_v30  ;;  %8279 = vmatmul.bf16.vlgmr.msrb.gmra.mxu2 %v15061_v30  ;;  %v1439_v30 = vld [vmem:[%s1438_s11] ss:$8 sm:$0xf] }
 0x5cf   : > { %8265 = vmatpush.bf16.msrb.mxu1 %v12095_v39  ;;  %8291 = vmatpush.bf16.msrb.mxu3 %v12099_v46 }
 0x5d2   : > { %8266 = vmatmul.bf16.vlgmr.msrb.gmra.mxu1 %v15072_v55  ;;  %8292 = vmatmul.bf16.vlgmr.msrb.gmra.mxu3 %v15072_v55  ;;  %v1440_v55 = vld [vmem:[%s1438_s11] ss:$8 sm:$0x30]  ;;  %s13573_s11 = sshra.s32 %s8417_s6, 4  ;;  %s13574_s11 = int_to_ptr.hbm [resolvable:$true] %s13573_s11 }
 0x5d3   : > { %v1441_v47 = vor.u32 %v1440_v55, %v1439_v30  ;;  %s13575_s24 = scalar_lea.hbm %s13574_s11, 128  ;;  %p13580_p5 = scmp.lt.s32.totalorder %s13574_s11, %s15394_s19 }
 0x5d4   : > { %p13576_p11 = scmp.ne.s32.totalorder %s13574_s11, %s13575_s24  ;;  %p13581_p1 = scmp.lt.s32.totalorder %s13579_s17, %s13575_s24 }
 0x5d5   : > { %1443 = vst.msk [vmem:[#allocation2 + $0x150] ss:$8 sm:$0xf] %vm13960_vm0, %v1441_v47 }
 0x5d6   : > { %1444 = vst.msk [vmem:[#allocation2 + $0x150] ss:$8 sm:$0x30] %vm13960_vm0, %v1441_v47  ;;  %p13577_p0 = pnand %p13576_p11, %p13773_p12  ;;  %p13582_p4 = por %p13581_p1, %p13580_p5 }
 0x5d8   : > { %p13578_p3 = pneg %p13577_p0 }
 0x5da   : > { %p13583_p6 = pnand %p13582_p4, %p13578_p3 }
 0x5dc   : > { %v7543_v10 = vld [vmem:[#allocation2 + $0x150] sm:$0xff]  ;;  %v7544_v18 = vld [vmem:[#allocation2 + $0x158] sm:$0xff]  ;;  %v7545_v43 = vld [vmem:[#allocation2 + $0x160] sm:$0xff] }
 0x5dd   : > { %v7546_v30 = vld [vmem:[#allocation2 + $0x168] sm:$0xff] }
 0x629   : > { %v8150_v22 = vpop.f32.mrf.mxu0 }
 0x62a   : > { %v8151_v21 = vadd.f32 %v8150_v22, %v7649_v26 }
 0x62f   : > { %v8163_v0 = vpop.f32.mrf.mxu1  ;;  %v8176_v15 = vpop.f32.mrf.mxu2 }
 0x630   : > { %v8164_v29 = vadd.f32 %v8163_v0, %v8151_v21  ;;  %v8177_v44 = vadd.f32 %v8176_v15, %v7650_v16 }
 0x631   : > { %v8152_v60 = vpop.f32.mrf.mxu0 }
 0x632   : > { %v8297_v17 = vadd.f32 %v8164_v29, %v7543_v10  ;;  %v7654_v10 = vperm.slane %v15155_v19, 5 }
 0x634   : > { %v12268_v62 = vmul.f32 -1.442695, %v8297_v17 }
 0x635   : > { %v8189_v23 = vpop.f32.mrf.mxu3 }
 0x636   : > { %13423 = vpow2.f32 %v12268_v62  ;;  %v8190_v24 = vadd.f32 %v8189_v23, %v8177_v44  ;;  %v7547_v23 = vld [vmem:[#allocation2 + $0x170] sm:$0xff] }
 0x637   : > { %v8165_v9 = vpop.f32.mrf.mxu1  ;;  %v8178_v25 = vpop.f32.mrf.mxu2 }
 0x638   : > { %v8298_v28 = vadd.f32 %v8190_v24, %v7544_v18 }
 0x639   : > { %v8202_v2 = vpop.f32.mrf.mxu0 }
 0x63a   : > { %v12269_v1 = vmul.f32 -1.442695, %v8298_v28  ;;  %v8203_v41 = vadd.f32 %v8202_v2, %v7651_v63 }
 0x63c   : > { %v13424_v32 = vpop.eup %13423  ;;  %13425 = vpow2.f32 %v12269_v1 }
 0x63d   : > { %v8305_v33 = vadd.f32 1.0, %v13424_v32  ;;  %v8191_v35 = vpop.f32.mrf.mxu3 }
 0x63f   : > { %13427 = vrcp.f32 %v8305_v33  ;;  %v8215_v45 = vpop.f32.mrf.mxu1  ;;  %v8228_v12 = vpop.f32.mrf.mxu2  ;;  %v8318_v3 = vand.u32 2147483648, %v8305_v33  ;;  %vm8312_vm8 = vweird.f32 %v8305_v33  ;;  %v8316_v13 = vand.u32 2147483647, %v8305_v33 }
 0x640   : > { %v8216_v38 = vadd.f32 %v8215_v45, %v8203_v41  ;;  %v8229_v39 = vadd.f32 %v8228_v12, %v7652_v42  ;;  %v7548_v42 = vld [vmem:[#allocation2 + $0x178] sm:$0xff] }
 0x641   : > { %v8204_v31 = vpop.f32.mrf.mxu0  ;;  %v8319_v21 = vor.u32 1.1754944e-38, %v8318_v3  ;;  %vm8317_vm10 = vcmp.eq.f32.partialorder %v8316_v13, 8.507059e+37 }
 0x642   : > { %v13426_v40 = vpop.eup %13425  ;;  %v8337_v14 = vadd.f32 %v8216_v38, %v7545_v43 }
 0x643   : > { %v8306_v52 = vadd.f32 1.0, %v13426_v40 }
 0x644   : > { %v12270_v37 = vmul.f32 -1.442695, %v8337_v14 }
 0x645   : > { %v13428_v46 = vpop.eup %13427  ;;  %13429 = vrcp.f32 %v8306_v52  ;;  %v8241_v55 = vpop.f32.mrf.mxu3  ;;  %v8333_v17 = vand.u32 2147483648, %v8306_v52  ;;  %vm8327_vm12 = vweird.f32 %v8306_v52  ;;  %v8331_v18 = vand.u32 2147483647, %v8306_v52 }
 0x646   : > { %13431 = vpow2.f32 %v12270_v37  ;;  %v8242_v47 = vadd.f32 %v8241_v55, %v8229_v39  ;;  %v8308_v48 = vmul.f32 %v13428_v46, %v8305_v33  ;;  %vm8313_vm0 = vweird.f32 %v13428_v46 }
 0x647   : > { %v8217_v56 = vpop.f32.mrf.mxu1  ;;  %v8230_v58 = vpop.f32.mrf.mxu2  ;;  %vm8314_vm9 = vmor %vm8312_vm8, %vm8313_vm0  ;;  %v8334_v1 = vor.u32 1.1754944e-38, %v8333_v17  ;;  %vm8332_vm14 = vcmp.eq.f32.partialorder %v8331_v18, 8.507059e+37 }
 0x648   : > { %v8338_v50 = vadd.f32 %v8242_v47, %v7546_v30  ;;  %v8309_v36 = vsub.f32 1.0, %v8308_v48 }
 0x649   : > { %v8254_v49 = vpop.f32.mrf.mxu0 }
 0x64a   : > { %v12271_v51 = vmul.f32 -1.442695, %v8338_v50  ;;  %v8310_v54 = vmul.f32 %v13428_v46, %v8309_v36  ;;  %v8255_v6 = vadd.f32 %v8254_v49, %v7653_v53 }
 0x64b   : > { %v13430_v59 = vpop.eup %13429 }
 0x64c   : > { %v13432_v34 = vpop.eup %13431  ;;  %13433 = vpow2.f32 %v12271_v51  ;;  %v8311_v57 = vadd.f32 %v13428_v46, %v8310_v54  ;;  %v8323_v4 = vmul.f32 %v13430_v59, %v8306_v52  ;;  %vm8328_vm11 = vweird.f32 %v13430_v59 }
 0x64d   : > { %v8345_v5 = vadd.f32 1.0, %v13432_v34  ;;  %v8243_v8 = vpop.f32.mrf.mxu3  ;;  %vm8329_vm13 = vmor %vm8327_vm12, %vm8328_vm11 }
 0x64e   : > { %v8324_v7 = vsub.f32 1.0, %v8323_v4  ;;  %v8315_v61 = vsel %vm8314_vm9, %v13428_v46, %v8311_v57 }
 0x64f   : > { %13435 = vrcp.f32 %v8345_v5  ;;  %v8267_v20 = vpop.f32.mrf.mxu1  ;;  %v8280_v22 = vpop.f32.mrf.mxu2  ;;  %v8320_v16 = vsel %vm8317_vm10, %v8319_v21, %v8315_v61  ;;  %v8358_v43 = vand.u32 2147483648, %v8345_v5  ;;  %v8356_v38 = vand.u32 2147483647, %v8345_v5 }
 0x650   : > { %v8268_v26 = vadd.f32 %v8267_v20, %v8255_v6  ;;  %v8325_v0 = vmul.f32 %v13430_v59, %v8324_v7  ;;  %v8281_v24 = vadd.f32 %v8280_v22, %v7654_v10  ;;  %vm8352_vm1 = vweird.f32 %v8345_v5 }
 0x651   : > { %v8256_v15 = vpop.f32.mrf.mxu0  ;;  %v8359_v52 = vor.u32 1.1754944e-38, %v8358_v43  ;;  %vm8357_vm3 = vcmp.eq.f32.partialorder %v8356_v38, 8.507059e+37 }
 0x652   : > { %v13434_v29 = vpop.eup %13433  ;;  %v8326_v60 = vadd.f32 %v13430_v59, %v8325_v0  ;;  %v8377_v44 = vmul.f32 %v8320_v16, %v8268_v26 }
 0x653   : > { %v8346_v62 = vadd.f32 1.0, %v13434_v29 }
 0x654   : > { %v8330_v28 = vsel %vm8329_vm13, %v13430_v59, %v8326_v60  ;;  %v8379_v63 = vadd.f32 %v8377_v44, %v7547_v23 }
 0x655   : > { %v13436_v9 = vpop.eup %13435  ;;  %13437 = vrcp.f32 %v8346_v62  ;;  %v8293_v25 = vpop.f32.mrf.mxu3  ;;  %v8335_v41 = vsel %vm8332_vm14, %v8334_v1, %v8330_v28  ;;  %v8373_v55 = vand.u32 2147483648, %v8346_v62  ;;  %v8371_v58 = vand.u32 2147483647, %v8346_v62 }
 0x656   : > { %v8348_v19 = vmul.f32 %v13436_v9, %v8345_v5  ;;  %v8294_v2 = vadd.f32 %v8293_v25, %v8281_v24  ;;  %vm8353_vm15 = vweird.f32 %v13436_v9  ;;  %13439 = vtanh.f32 %v8379_v63 }
 0x657   : > { %v8269_v32 = vpop.f32.mrf.mxu1  ;;  %v8282_v33 = vpop.f32.mrf.mxu2  ;;  %vm8354_vm2 = vmor %vm8352_vm1, %vm8353_vm15  ;;  %vm8367_vm5 = vweird.f32 %v8346_v62  ;;  %v8374_v53 = vor.u32 1.1754944e-38, %v8373_v55  ;;  %vm8372_vm7 = vcmp.eq.f32.partialorder %v8371_v58, 8.507059e+37 }
 0x658   : > { %v8349_v35 = vsub.f32 1.0, %v8348_v19  ;;  %v8378_v45 = vmul.f32 %v8335_v41, %v8294_v2 }
 0x65a   : > { %v8350_v12 = vmul.f32 %v13436_v9, %v8349_v35  ;;  %v8380_v37 = vadd.f32 %v8378_v45, %v7548_v42 }
 0x65b   : > { %v13438_v31 = vpop.eup %13437 }
 0x65c   : > { %v8363_v40 = vmul.f32 %v13438_v31, %v8346_v62  ;;  %v8351_v14 = vadd.f32 %v13436_v9, %v8350_v12  ;;  %vm8368_vm4 = vweird.f32 %v13438_v31  ;;  %v13440_v50 = vpop.eup %13439  ;;  %13441 = vtanh.f32 %v8380_v37 }
 0x65d   : > { %v8295_v39 = vpop.f32.mrf.mxu3  ;;  %vm8369_vm6 = vmor %vm8367_vm5, %vm8368_vm4 }
 0x65e   : > { %v8364_v46 = vsub.f32 1.0, %v8363_v40  ;;  %v8355_v30 = vsel %vm8354_vm2, %v13436_v9, %v8351_v14 }
 0x65f   : > { %v8360_v47 = vsel %vm8357_vm3, %v8359_v52, %v8355_v30 }
 0x660   : > { %v8365_v48 = vmul.f32 %v13438_v31, %v8364_v46  ;;  %v8383_v56 = vsub.f32 1.0, %v8360_v47  ;;  %v8387_v49 = vmul.f32 %v8360_v47, %v15055_v11 }
 0x662   : > { %v8385_v36 = vmul.f32 %v13440_v50, %v8383_v56  ;;  %v8366_v51 = vadd.f32 %v13438_v31, %v8365_v48  ;;  %v13442_v11 = vpop.eup %13441 }
 0x664   : > { %v8389_v54 = vadd.f32 %v8387_v49, %v8385_v36  ;;  %v8370_v59 = vsel %vm8369_vm6, %v13438_v31, %v8366_v51 }
 0x665   : > { %v8375_v34 = vsel %vm8372_vm7, %v8374_v53, %v8370_v59 }
 0x666   : > { %12272 = vst [vmem:[%s14101_s29 + $0x70] sm:$0xff] %v8389_v54  ;;  %v8384_v57 = vsub.f32 1.0, %v8375_v34  ;;  %v8388_v4 = vmul.f32 %v8375_v34, %v15066_v27 }
 0x667   : > { %8394 = vst [vmem:[%s15177_s7] sm:$0xff] %v8389_v54 }
 0x668   : > { %v8386_v3 = vmul.f32 %v13442_v11, %v8384_v57 }
 0x66a   : > { %v8390_v5 = vadd.f32 %v8388_v4, %v8386_v3 }
 0x66c   : > { %12273 = vst [vmem:[%s14101_s29 + $0x78] sm:$0xff] %v8390_v5 }
 0x66d   : > { %13586 = shalt.err (!%p13583_p6)
}
 0x66e   : > { %s13676_s29 = smov 256   ;;  %s13677_s15 = smov 512   ;;  %8395 = vst [vmem:[%s15177_s7 + $0x8] sm:$0xff] %v8390_v5 }
 0x66f   : > { %s13678_s25 = smov 16   ;;  %s8402_s0 = scalar_lea.sflag [#allocation13], %s15393_s30 }
 0x670   : > { %13213 = dma.vmem_to_hbm [thread:$0]  (%p13773_p12), %s15173_s1, 2048, %s8417_s6, %s8397_s2, %s13676_s29, %s13677_s15, %s13678_s25  }
 0x671   : > { %s13601_s10 = sshra.s32 %s15185_s5, 4  ;;  %s13607_s21 = scalar_lea.hbm %s15395_s18, 32  ;;  %s13602_s10 = int_to_ptr.hbm [resolvable:$true] %s13601_s10 }
 0x672   : > { %s13603_s20 = scalar_lea.hbm %s13602_s10, 16  ;;  %p13608_p9 = scmp.lt.s32.totalorder %s13602_s10, %s15395_s18 }
 0x673   : > { %p13604_p13 = scmp.ne.s32.totalorder %s13602_s10, %s13603_s20  ;;  %p13609_p10 = scmp.lt.s32.totalorder %s13607_s21, %s13603_s20 }
 0x675   : > { %p13605_p2 = pnand %p13604_p13, %p13773_p12  ;;  %p13610_p11 = por %p13609_p10, %p13608_p9 }
 0x677   : > { %p13606_p8 = pneg %p13605_p2 }
 0x679   : > { %p13611_p0 = pnand %p13610_p11, %p13606_p8 }
 0x67b   : > { %13614 = shalt.err (!%p13611_p0)
}
 0x67c   : > { %13214 = dma.vmem_to_hbm [thread:$0]  (%p13773_p12), %s15183_s16, 256, %s15185_s5, %s8402_s0  }
 0x67d PF: > { %s15398_s30 = sld [smem:[#allocation20_spill]] }
 0x67e   : > { %s15400_s6 = sld [smem:[#allocation23_spill]] }
 0x683   : > { %s8446_s22 = sand.u32 1, %s15398_s30  }
 0x684   : > { %p15401_p3 = scmp.ge.s32.totalorder %s15400_s6, 2  ;;  %s8447_s14 = scalar_lea.sflag [#allocation7], %s8446_s22 }
 0x686   : > { %p13229_p5 = pnand %p15401_p3, %p13792_p7 }
 0x688   : > { %p13230_p1 = pneg %p13229_p5 }
 0x68a   : > { %13646 = dma.done.wait (%p13230_p1), %s8447_s14, 2048  }
 0x68b   : > { %13648 = vsyncadd (%p13230_p1), %s8447_s14, 4294965248  ;;  %s8457_s7 = scalar_lea.sflag [#allocation13], %s8446_s22 }
 0x68c   : > { %13650 = dma.done.wait (%p13230_p1), %s8457_s7, 256  }
 0x68d   : > { %13652 = vsyncadd (%p13230_p1), %s8457_s7, 4294967040  ;;  %s15402_s28 = sld [smem:[#allocation25_spill]] }
 0x68e   : > { %s15403_s25 = sld [smem:[#allocation21_spill]] }
 0x68f   : > { %s15404_s26 = sld [smem:[#allocation22_spill]] }
 0x690   : > { %s15405_s27 = sld [smem:[#allocation27_spill]] }
 0x693   : > { %p30_p12 = scmp.ge.s32.totalorder %s15402_s28, 4  }
 0x695   :  { %32 = sbr.rel (!%p30_p12) target bundleno = 17 (0x11), region = 239 }
 0x69a   :  { %8463 = vsyncpa [#allocation6], 1 }
 0x69b   :  { %8465 = vsyncpa [#allocation6 + $0x1], 1 }
 0x69c   :  { %8466 = vsyncpa [#allocation9], 1 }
 0x69d   :  { %8467 = vsyncpa [#allocation7], 1 }
 0x69e   :  { %8469 = vsyncpa [#allocation7 + $0x1], 1 }
 0x69f   :  { %8470 = vsyncpa [#allocation13], 1 }
 0x6a0   :  { %8472 = vsyncpa [#allocation13 + $0x1], 1 }

</bundles_post_ra>
